<compile_context>
chip_gen: v6e
topology: v6e:2x2x1
jax: 0.10.0
libtpu: 0.0.40
codegen_flags: <defaults>
</compile_context>

<pallas_src>
import functools

import numpy as np
import jax
import jax.numpy as jnp
from jax.experimental import pallas as pl
from jax.experimental.pallas import tpu as pltpu


# (cin, cout, k, conv_stride, effective_pad, input_dilation, activation)
# Decoder ConvTranspose2d(k, stride=2, padding=1) == stride-1 conv over the
# 2x zero-dilated input with padding k-1-p and spatially flipped weights;
# dec3 (stride=1) only needs the flip.
_LAYER_SPECS = (
    (1, 4, 3, 1, 1, 1, "lrelu"),
    (4, 8, 3, 2, 1, 1, "lrelu"),
    (8, 16, 3, 2, 1, 1, "lrelu"),
    (16, 32, 3, 2, 1, 1, None),
    (32, 16, 4, 1, 2, 2, "lrelu"),
    (16, 8, 4, 1, 2, 2, "lrelu"),
    (8, 4, 4, 1, 2, 2, "lrelu"),
    (4, 1, 3, 1, 1, 1, "sigmoid"),
)


def _make_plan(H, W):
    """Static per-layer geometry + 0/1 transition matrices (numpy, trace-time only)."""
    geoms = []
    hin, win = H, W
    for (cin, cout, k, s, p, d, act) in _LAYER_SPECS:
        HP = (hin - 1) * d + 1 + 2 * p          # padded (+dilated) input height
        WP = (win - 1) * d + 1 + 2 * p
        Ho = (HP - k) // s + 1
        Wo = (WP - k) // s + 1
        # length of the dense (stride-1) shifted-slice conv output over the
        # flattened (HP*WP) slab; rows that straddle image rows are garbage and
        # are simply never selected by the transition matrix below.
        F = (HP - k + 1) * WP - (k - 1)
        geoms.append(dict(cin=cin, cout=cout, k=k, s=s, p=p, d=d, act=act,
                          HP=HP, WP=WP, Ho=Ho, Wo=Wo, F=F))
        hin, win = Ho, Wo

    gmats = []
    for l, g in enumerate(geoms):
        if l + 1 < len(geoms):
            nxt = geoms[l + 1]
            WPn, pn, dn = nxt["WP"], nxt["p"], nxt["d"]
            lenn = nxt["HP"] * nxt["WP"]
        else:                                   # last layer -> dense (Ho, Wo) output
            WPn, pn, dn = g["Wo"], 0, 1
            lenn = g["Ho"] * g["Wo"]
        G = np.zeros((g["F"], lenn), dtype=np.float32)
        for ho in range(g["Ho"]):
            for wo in range(g["Wo"]):
                fsrc = ho * g["s"] * g["WP"] + wo * g["s"]      # stride-s selection
                fdst = (pn + dn * ho) * WPn + (pn + dn * wo)    # pad + dilation placement
                G[fsrc, fdst] = 1.0
        gmats.append(G)
    return geoms, gmats


# ----------------------------------------------------------------------------
# Fused Pallas kernel: whole autoencoder forward for one image per grid step
# ----------------------------------------------------------------------------
def _fused_kernel(x_ref, *refs, layer_cfg):
    nl = len(layer_cfg)
    w_refs = refs[:nl]                    # (k*k, Cout, Cin) each
    b_refs = refs[nl:2 * nl]              # (Cout, 1) each
    g_refs = refs[2 * nl:3 * nl]          # (F_l, Len_{l+1}) 0/1 transition matrices
    out_ref = refs[3 * nl]                # (1, Cout_last, Ho*Wo)
    bufs = refs[3 * nl + 1:]              # VMEM slabs B_l: (Cin_l, HP_l*WP_l)

    bufs[0][...] = x_ref[0]               # padded, flattened network input

    for l, (k, WP, F, act) in enumerate(layer_cfg):
        acc = None
        for ki in range(k):                           # in-kernel im2col:
            for kj in range(k):                       # kh*kw shifted-slice matmuls
                shift = ki * WP + kj
                xs = bufs[l][:, shift:shift + F]      # (Cin, F) contiguous lane slice
                wt = w_refs[l][ki * k + kj]           # (Cout, Cin)
                if wt.shape[1] == 1:                  # Cin == 1: cheaper as broadcast mul
                    term = wt * xs
                else:
                    term = jnp.dot(wt, xs, preferred_element_type=jnp.float32)
                acc = term if acc is None else acc + term
        acc = acc + b_refs[l][...]                    # (Cout, F) + (Cout, 1)
        if act == "lrelu":
            acc = jnp.where(acc >= 0.0, acc, 0.01 * acc)
        elif act == "sigmoid":
            acc = jax.nn.sigmoid(acc)

        # exact gather/scatter into the next layer's padded (+dilated) slab,
        # or into the dense output grid for the last layer (lane-dense store).
        nxt = jnp.dot(acc, g_refs[l][...], preferred_element_type=jnp.float32)
        if l + 1 < nl:
            bufs[l + 1][...] = nxt
        else:
            out_ref[0] = nxt


# ----------------------------------------------------------------------------
# Parameter re-arrangement (trace-time JAX, negligible)
# ----------------------------------------------------------------------------
def _prep_params(params):
    ws, bs = [], []
    for i in range(4):                                # Conv2d: (Cout, Cin, k, k)
        w, b = params[f"enc{i}"]
        k = w.shape[-1]
        wa = jnp.transpose(w, (2, 3, 0, 1)).reshape(k * k, w.shape[0], w.shape[1])
        ws.append(wa.astype(jnp.float32))
        bs.append(b.reshape(-1, 1).astype(jnp.float32))
    for i in range(4):                                # ConvTranspose2d: (Cin, Cout, k, k)
        w, b = params[f"dec{i}"]
        k = w.shape[-1]
        wf = jnp.flip(w, axis=(2, 3))                 # spatial flip
        wa = jnp.transpose(wf, (2, 3, 1, 0)).reshape(k * k, w.shape[1], w.shape[0])
        ws.append(wa.astype(jnp.float32))
        bs.append(b.reshape(-1, 1).astype(jnp.float32))
    return ws, bs


# ----------------------------------------------------------------------------
# Model_2 forward (public entry, NCHW in / NCHW out)
# ----------------------------------------------------------------------------
def model2_forward(x_nchw, params):
    x = x_nchw.astype(jnp.float32)
    N, Cin, H, W = x.shape
    geoms, gmats = _make_plan(H, W)

    ws, bs = _prep_params(params)
    gs = [jnp.asarray(G) for G in gmats]

    p0 = geoms[0]["p"]
    xpad = jnp.pad(x, ((0, 0), (0, 0), (p0, p0), (p0, p0)))
    xpad = xpad.reshape(N, Cin, geoms[0]["HP"] * geoms[0]["WP"])

    cout_last = geoms[-1]["cout"]
    Ho, Wo = geoms[-1]["Ho"], geoms[-1]["Wo"]

    layer_cfg = tuple((g["k"], g["WP"], g["F"], g["act"]) for g in geoms)
    kernel = functools.partial(_fused_kernel, layer_cfg=layer_cfg)

    def _const_spec(shape):
        nd = len(shape)
        return pl.BlockSpec(shape, lambda n, _nd=nd: (0,) * _nd)

    in_specs = [pl.BlockSpec((1, Cin, xpad.shape[-1]), lambda n: (n, 0, 0))]
    in_specs += [_const_spec(a.shape) for a in ws]
    in_specs += [_const_spec(a.shape) for a in bs]
    in_specs += [_const_spec(a.shape) for a in gs]

    out = pl.pallas_call(
        kernel,
        out_shape=jax.ShapeDtypeStruct((N, cout_last, Ho * Wo), jnp.float32),
        grid=(N,),                                     # one image per grid step
        in_specs=in_specs,
        out_specs=pl.BlockSpec((1, cout_last, Ho * Wo), lambda n: (n, 0, 0)),
        scratch_shapes=[pltpu.VMEM((g["cin"], g["HP"] * g["WP"]), jnp.float32)
                        for g in geoms],
        compiler_params=pltpu.CompilerParams(
            dimension_semantics=("parallel",)),        # v7x: batch across the 2 TCs
    )(xpad, *ws, *bs, *gs)

    return out.reshape(N, cout_last, Ho, Wo)


# ----------------------------------------------------------------------------
# Pure-JAX reference (for in-script correctness check)
# ----------------------------------------------------------------------------
def _reference_forward(x, params):
    dn = ("NCHW", "OIHW", "NCHW")
    prec = jax.lax.Precision.HIGHEST

    def conv(h, w, b, s, p):
        y = jax.lax.conv_general_dilated(h, w, (s, s), [(p, p), (p, p)],
                                         dimension_numbers=dn, precision=prec)
        return y + b.reshape(1, -1, 1, 1)

    def convT(h, w, b, s, p):
        k = w.shape[-1]
        w_eff = jnp.transpose(jnp.flip(w, axis=(2, 3)), (1, 0, 2, 3))
        y = jax.lax.conv_general_dilated(h, w_eff, (1, 1),
                                         [(k - 1 - p, k - 1 - p)] * 2,
                                         lhs_dilation=(s, s),
                                         dimension_numbers=dn, precision=prec)
        return y + b.reshape(1, -1, 1, 1)

    lrelu = lambda t: jnp.where(t >= 0.0, t, 0.01 * t)
    h = lrelu(conv(x, *params["enc0"], 1, 1))
    h = lrelu(conv(h, *params["enc1"], 2, 1))
    h = lrelu(conv(h, *params["enc2"], 2, 1))
    h = conv(h, *params["enc3"], 2, 1)
    h = lrelu(convT(h, *params["dec0"], 2, 1))
    h = lrelu(convT(h, *params["dec1"], 2, 1))
    h = lrelu(convT(h, *params["dec2"], 2, 1))
    h = jax.nn.sigmoid(convT(h, *params["dec3"], 1, 1))
    return h


# ----------------------------------------------------------------------------
# Deterministic parameter init (shapes follow nn.Conv2d / nn.ConvTranspose2d)
# ----------------------------------------------------------------------------
def init_params(key):
    def uniform(k, shape, fan_in):
        bound = 1.0 / jnp.sqrt(jnp.float32(fan_in))
        return jax.random.uniform(k, shape, jnp.float32, -bound, bound)

    params = {}
    enc_specs = [(1, 4, 3), (4, 8, 3), (8, 16, 3), (16, 32, 3)]        # (Cout,Cin,k,k)
    dec_specs = [(32, 16, 4), (16, 8, 4), (8, 4, 4), (4, 1, 3)]        # (Cin,Cout,k,k)

    keys = jax.random.split(key, 2 * (len(enc_specs) + len(dec_specs)))
    ki = 0
    for idx, (cin, cout, k) in enumerate(enc_specs):
        fan_in = cin * k * k
        w = uniform(keys[ki], (cout, cin, k, k), fan_in); ki += 1
        b = uniform(keys[ki], (cout,), fan_in); ki += 1
        params[f"enc{idx}"] = (w, b)
    for idx, (cin, cout, k) in enumerate(dec_specs):
        fan_in = cin * k * k
        w = uniform(keys[ki], (cin, cout, k, k), fan_in); ki += 1
        b = uniform(keys[ki], (cout,), fan_in); ki += 1
        params[f"dec{idx}"] = (w, b)
    return params


# ----------------------------------------------------------------------------
if __name__ == "__main__":
    key = jax.random.PRNGKey(0)
    pkey, xkey = jax.random.split(key)
    params = init_params(pkey)

    # Conv2d(1, ...) expects a single input channel; spatial 16x16, batch 2.
    x = jax.random.normal(xkey, (2, 1, 16, 16), dtype=jnp.float32)

    fwd = jax.jit(model2_forward)
    out = fwd(x, params)
    jax.block_until_ready(out)

    assert out.shape == (2, 1, 16, 16), out.shape
    assert bool(jnp.all((out >= 0.0) & (out <= 1.0))), "sigmoid output range violated"

    ref = _reference_forward(x, params)
    assert bool(jnp.allclose(out, ref, atol=2e-2, rtol=2e-2)), (
        "mismatch vs reference, max abs err = %f" % float(jnp.max(jnp.abs(out - ref))))

    print("KERNEL_OK")
</pallas_src>

<mosaic_0001>
module attributes {stable_mosaic.version = 11 : i64} {
  func.func @_fused_kernel(%arg0: i32, %arg1: memref<1x1x324xf32, #tpu.memory_space<vmem>>, %arg2: memref<9x4x1xf32, #tpu.memory_space<vmem>>, %arg3: memref<9x8x4xf32, #tpu.memory_space<vmem>>, %arg4: memref<9x16x8xf32, #tpu.memory_space<vmem>>, %arg5: memref<9x32x16xf32, #tpu.memory_space<vmem>>, %arg6: memref<16x16x32xf32, #tpu.memory_space<vmem>>, %arg7: memref<16x8x16xf32, #tpu.memory_space<vmem>>, %arg8: memref<16x4x8xf32, #tpu.memory_space<vmem>>, %arg9: memref<9x1x4xf32, #tpu.memory_space<vmem>>, %arg10: memref<4x1xf32, #tpu.memory_space<vmem>>, %arg11: memref<8x1xf32, #tpu.memory_space<vmem>>, %arg12: memref<16x1xf32, #tpu.memory_space<vmem>>, %arg13: memref<32x1xf32, #tpu.memory_space<vmem>>, %arg14: memref<16x1xf32, #tpu.memory_space<vmem>>, %arg15: memref<8x1xf32, #tpu.memory_space<vmem>>, %arg16: memref<4x1xf32, #tpu.memory_space<vmem>>, %arg17: memref<1x1xf32, #tpu.memory_space<vmem>>, %arg18: memref<286x324xf32, #tpu.memory_space<vmem>>, %arg19: memref<286x100xf32, #tpu.memory_space<vmem>>, %arg20: memref<78x36xf32, #tpu.memory_space<vmem>>, %arg21: memref<22x49xf32, #tpu.memory_space<vmem>>, %arg22: memref<25x121xf32, #tpu.memory_space<vmem>>, %arg23: memref<85x361xf32, #tpu.memory_space<vmem>>, %arg24: memref<301x324xf32, #tpu.memory_space<vmem>>, %arg25: memref<286x256xf32, #tpu.memory_space<vmem>>, %arg26: memref<1x1x256xf32, #tpu.memory_space<vmem>>, %arg27: memref<1x324xf32, #tpu.memory_space<vmem>>, %arg28: memref<4x324xf32, #tpu.memory_space<vmem>>, %arg29: memref<8x100xf32, #tpu.memory_space<vmem>>, %arg30: memref<16x36xf32, #tpu.memory_space<vmem>>, %arg31: memref<32x49xf32, #tpu.memory_space<vmem>>, %arg32: memref<16x121xf32, #tpu.memory_space<vmem>>, %arg33: memref<8x361xf32, #tpu.memory_space<vmem>>, %arg34: memref<4x324xf32, #tpu.memory_space<vmem>>) attributes {dimension_semantics = [#tpu.dimension_semantics<parallel>], iteration_bounds = array<i64: 2>, scalar_prefetch = 0 : i64, scratch_operands = 8 : i64, tpu.core_type = #tpu.core_type<tc>, window_params = [{transform_indices = @transform_0, window_bounds = array<i64: 1, 1, 324>}, {pipeline_mode = #tpu.pipeline_mode<synchronous>, transform_indices = @transform_1, window_bounds = array<i64: 9, 4, 1>}, {pipeline_mode = #tpu.pipeline_mode<synchronous>, transform_indices = @transform_2, window_bounds = array<i64: 9, 8, 4>}, {pipeline_mode = #tpu.pipeline_mode<synchronous>, transform_indices = @transform_3, window_bounds = array<i64: 9, 16, 8>}, {pipeline_mode = #tpu.pipeline_mode<synchronous>, transform_indices = @transform_4, window_bounds = array<i64: 9, 32, 16>}, {pipeline_mode = #tpu.pipeline_mode<synchronous>, transform_indices = @transform_5, window_bounds = array<i64: 16, 16, 32>}, {pipeline_mode = #tpu.pipeline_mode<synchronous>, transform_indices = @transform_6, window_bounds = array<i64: 16, 8, 16>}, {pipeline_mode = #tpu.pipeline_mode<synchronous>, transform_indices = @transform_7, window_bounds = array<i64: 16, 4, 8>}, {pipeline_mode = #tpu.pipeline_mode<synchronous>, transform_indices = @transform_8, window_bounds = array<i64: 9, 1, 4>}, {pipeline_mode = #tpu.pipeline_mode<synchronous>, transform_indices = @transform_9, window_bounds = array<i64: 4, 1>}, {pipeline_mode = #tpu.pipeline_mode<synchronous>, transform_indices = @transform_10, window_bounds = array<i64: 8, 1>}, {pipeline_mode = #tpu.pipeline_mode<synchronous>, transform_indices = @transform_11, window_bounds = array<i64: 16, 1>}, {pipeline_mode = #tpu.pipeline_mode<synchronous>, transform_indices = @transform_12, window_bounds = array<i64: 32, 1>}, {pipeline_mode = #tpu.pipeline_mode<synchronous>, transform_indices = @transform_13, window_bounds = array<i64: 16, 1>}, {pipeline_mode = #tpu.pipeline_mode<synchronous>, transform_indices = @transform_14, window_bounds = array<i64: 8, 1>}, {pipeline_mode = #tpu.pipeline_mode<synchronous>, transform_indices = @transform_15, window_bounds = array<i64: 4, 1>}, {pipeline_mode = #tpu.pipeline_mode<synchronous>, transform_indices = @transform_16, window_bounds = array<i64: 1, 1>}, {pipeline_mode = #tpu.pipeline_mode<synchronous>, transform_indices = @transform_17, window_bounds = array<i64: 286, 324>}, {pipeline_mode = #tpu.pipeline_mode<synchronous>, transform_indices = @transform_18, window_bounds = array<i64: 286, 100>}, {pipeline_mode = #tpu.pipeline_mode<synchronous>, transform_indices = @transform_19, window_bounds = array<i64: 78, 36>}, {pipeline_mode = #tpu.pipeline_mode<synchronous>, transform_indices = @transform_20, window_bounds = array<i64: 22, 49>}, {pipeline_mode = #tpu.pipeline_mode<synchronous>, transform_indices = @transform_21, window_bounds = array<i64: 25, 121>}, {pipeline_mode = #tpu.pipeline_mode<synchronous>, transform_indices = @transform_22, window_bounds = array<i64: 85, 361>}, {pipeline_mode = #tpu.pipeline_mode<synchronous>, transform_indices = @transform_23, window_bounds = array<i64: 301, 324>}, {pipeline_mode = #tpu.pipeline_mode<synchronous>, transform_indices = @transform_24, window_bounds = array<i64: 286, 256>}, {transform_indices = @transform_25, window_bounds = array<i64: 1, 1, 256>}]} {
    %c0 = arith.constant 0 : index
    %c0_0 = arith.constant 0 : index
    %c0_1 = arith.constant 0 : index
    %0 = vector.load %arg1[%c0, %c0_0, %c0_1] : memref<1x1x324xf32, #tpu.memory_space<vmem>>, vector<1x1x324xf32>
    %1 = vector.shape_cast %0 : vector<1x1x324xf32> to vector<1x324xf32>
    %c0_2 = arith.constant 0 : index
    %c0_3 = arith.constant 0 : index
    %2 = vector.load %arg27[%c0_2, %c0_3] : memref<1x324xf32, #tpu.memory_space<vmem>>, vector<1x324xf32>
    tpu.vector_store %arg27[%c0_2, %c0_3], %1 {strides = array<i32>} : memref<1x324xf32, #tpu.memory_space<vmem>>, vector<1x324xf32>,
    %c0_4 = arith.constant 0 : index
    %c0_5 = arith.constant 0 : index
    %3 = vector.load %arg27[%c0_4, %c0_5] : memref<1x324xf32, #tpu.memory_space<vmem>>, vector<1x286xf32>
    %c0_6 = arith.constant 0 : index
    %c0_7 = arith.constant 0 : index
    %c0_8 = arith.constant 0 : index
    %4 = vector.load %arg2[%c0_6, %c0_7, %c0_8] : memref<9x4x1xf32, #tpu.memory_space<vmem>>, vector<1x4x1xf32>
    %5 = vector.shape_cast %4 : vector<1x4x1xf32> to vector<4x1xf32>
    %6 = vector.broadcast %5 : vector<4x1xf32> to vector<4x286xf32>
    %7 = vector.broadcast %3 : vector<1x286xf32> to vector<4x286xf32>
    %8 = arith.mulf %6, %7 : vector<4x286xf32>
    %c0_9 = arith.constant 0 : index
    %c1 = arith.constant 1 : index
    %9 = vector.load %arg27[%c0_9, %c1] : memref<1x324xf32, #tpu.memory_space<vmem>>, vector<1x286xf32>
    %c1_10 = arith.constant 1 : index
    %c0_11 = arith.constant 0 : index
    %c0_12 = arith.constant 0 : index
    %10 = vector.load %arg2[%c1_10, %c0_11, %c0_12] : memref<9x4x1xf32, #tpu.memory_space<vmem>>, vector<1x4x1xf32>
    %11 = vector.shape_cast %10 : vector<1x4x1xf32> to vector<4x1xf32>
    %12 = vector.broadcast %11 : vector<4x1xf32> to vector<4x286xf32>
    %13 = vector.broadcast %9 : vector<1x286xf32> to vector<4x286xf32>
    %14 = arith.mulf %12, %13 : vector<4x286xf32>
    %15 = arith.addf %8, %14 : vector<4x286xf32>
    %c0_13 = arith.constant 0 : index
    %c2 = arith.constant 2 : index
    %16 = vector.load %arg27[%c0_13, %c2] : memref<1x324xf32, #tpu.memory_space<vmem>>, vector<1x286xf32>
    %c2_14 = arith.constant 2 : index
    %c0_15 = arith.constant 0 : index
    %c0_16 = arith.constant 0 : index
    %17 = vector.load %arg2[%c2_14, %c0_15, %c0_16] : memref<9x4x1xf32, #tpu.memory_space<vmem>>, vector<1x4x1xf32>
    %18 = vector.shape_cast %17 : vector<1x4x1xf32> to vector<4x1xf32>
    %19 = vector.broadcast %18 : vector<4x1xf32> to vector<4x286xf32>
    %20 = vector.broadcast %16 : vector<1x286xf32> to vector<4x286xf32>
    %21 = arith.mulf %19, %20 : vector<4x286xf32>
    %22 = arith.addf %15, %21 : vector<4x286xf32>
    %c0_17 = arith.constant 0 : index
    %c18 = arith.constant 18 : index
    %23 = vector.load %arg27[%c0_17, %c18] : memref<1x324xf32, #tpu.memory_space<vmem>>, vector<1x286xf32>
    %c3 = arith.constant 3 : index
    %c0_18 = arith.constant 0 : index
    %c0_19 = arith.constant 0 : index
    %24 = vector.load %arg2[%c3, %c0_18, %c0_19] : memref<9x4x1xf32, #tpu.memory_space<vmem>>, vector<1x4x1xf32>
    %25 = vector.shape_cast %24 : vector<1x4x1xf32> to vector<4x1xf32>
    %26 = vector.broadcast %25 : vector<4x1xf32> to vector<4x286xf32>
    %27 = vector.broadcast %23 : vector<1x286xf32> to vector<4x286xf32>
    %28 = arith.mulf %26, %27 : vector<4x286xf32>
    %29 = arith.addf %22, %28 : vector<4x286xf32>
    %c0_20 = arith.constant 0 : index
    %c19 = arith.constant 19 : index
    %30 = vector.load %arg27[%c0_20, %c19] : memref<1x324xf32, #tpu.memory_space<vmem>>, vector<1x286xf32>
    %c4 = arith.constant 4 : index
    %c0_21 = arith.constant 0 : index
    %c0_22 = arith.constant 0 : index
    %31 = vector.load %arg2[%c4, %c0_21, %c0_22] : memref<9x4x1xf32, #tpu.memory_space<vmem>>, vector<1x4x1xf32>
    %32 = vector.shape_cast %31 : vector<1x4x1xf32> to vector<4x1xf32>
    %33 = vector.broadcast %32 : vector<4x1xf32> to vector<4x286xf32>
    %34 = vector.broadcast %30 : vector<1x286xf32> to vector<4x286xf32>
    %35 = arith.mulf %33, %34 : vector<4x286xf32>
    %36 = arith.addf %29, %35 : vector<4x286xf32>
    %c0_23 = arith.constant 0 : index
    %c20 = arith.constant 20 : index
    %37 = vector.load %arg27[%c0_23, %c20] : memref<1x324xf32, #tpu.memory_space<vmem>>, vector<1x286xf32>
    %c5 = arith.constant 5 : index
    %c0_24 = arith.constant 0 : index
    %c0_25 = arith.constant 0 : index
    %38 = vector.load %arg2[%c5, %c0_24, %c0_25] : memref<9x4x1xf32, #tpu.memory_space<vmem>>, vector<1x4x1xf32>
    %39 = vector.shape_cast %38 : vector<1x4x1xf32> to vector<4x1xf32>
    %40 = vector.broadcast %39 : vector<4x1xf32> to vector<4x286xf32>
    %41 = vector.broadcast %37 : vector<1x286xf32> to vector<4x286xf32>
    %42 = arith.mulf %40, %41 : vector<4x286xf32>
    %43 = arith.addf %36, %42 : vector<4x286xf32>
    %c0_26 = arith.constant 0 : index
    %c36 = arith.constant 36 : index
    %44 = vector.load %arg27[%c0_26, %c36] : memref<1x324xf32, #tpu.memory_space<vmem>>, vector<1x286xf32>
    %c6 = arith.constant 6 : index
    %c0_27 = arith.constant 0 : index
    %c0_28 = arith.constant 0 : index
    %45 = vector.load %arg2[%c6, %c0_27, %c0_28] : memref<9x4x1xf32, #tpu.memory_space<vmem>>, vector<1x4x1xf32>
    %46 = vector.shape_cast %45 : vector<1x4x1xf32> to vector<4x1xf32>
    %47 = vector.broadcast %46 : vector<4x1xf32> to vector<4x286xf32>
    %48 = vector.broadcast %44 : vector<1x286xf32> to vector<4x286xf32>
    %49 = arith.mulf %47, %48 : vector<4x286xf32>
    %50 = arith.addf %43, %49 : vector<4x286xf32>
    %c0_29 = arith.constant 0 : index
    %c37 = arith.constant 37 : index
    %51 = vector.load %arg27[%c0_29, %c37] : memref<1x324xf32, #tpu.memory_space<vmem>>, vector<1x286xf32>
    %c7 = arith.constant 7 : index
    %c0_30 = arith.constant 0 : index
    %c0_31 = arith.constant 0 : index
    %52 = vector.load %arg2[%c7, %c0_30, %c0_31] : memref<9x4x1xf32, #tpu.memory_space<vmem>>, vector<1x4x1xf32>
    %53 = vector.shape_cast %52 : vector<1x4x1xf32> to vector<4x1xf32>
    %54 = vector.broadcast %53 : vector<4x1xf32> to vector<4x286xf32>
    %55 = vector.broadcast %51 : vector<1x286xf32> to vector<4x286xf32>
    %56 = arith.mulf %54, %55 : vector<4x286xf32>
    %57 = arith.addf %50, %56 : vector<4x286xf32>
    %c0_32 = arith.constant 0 : index
    %c38 = arith.constant 38 : index
    %58 = vector.load %arg27[%c0_32, %c38] : memref<1x324xf32, #tpu.memory_space<vmem>>, vector<1x286xf32>
    %c8 = arith.constant 8 : index
    %c0_33 = arith.constant 0 : index
    %c0_34 = arith.constant 0 : index
    %59 = vector.load %arg2[%c8, %c0_33, %c0_34] : memref<9x4x1xf32, #tpu.memory_space<vmem>>, vector<1x4x1xf32>
    %60 = vector.shape_cast %59 : vector<1x4x1xf32> to vector<4x1xf32>
    %61 = vector.broadcast %60 : vector<4x1xf32> to vector<4x286xf32>
    %62 = vector.broadcast %58 : vector<1x286xf32> to vector<4x286xf32>
    %63 = arith.mulf %61, %62 : vector<4x286xf32>
    %64 = arith.addf %57, %63 : vector<4x286xf32>
    %c0_35 = arith.constant 0 : index
    %c0_36 = arith.constant 0 : index
    %65 = vector.load %arg10[%c0_35, %c0_36] : memref<4x1xf32, #tpu.memory_space<vmem>>, vector<4x1xf32>
    %66 = vector.broadcast %65 : vector<4x1xf32> to vector<4x286xf32>
    %67 = arith.addf %64, %66 : vector<4x286xf32>
    %cst = arith.constant 0.000000e+00 : f32
    %68 = vector.broadcast %cst : f32 to vector<4x286xf32>
    %69 = arith.cmpf oge, %67, %68 : vector<4x286xf32>
    %cst_37 = arith.constant 0.00999999977 : f32
    %70 = vector.broadcast %cst_37 : f32 to vector<4x286xf32>
    %71 = arith.mulf %70, %67 : vector<4x286xf32>
    %72 = arith.select %69, %67, %71 : vector<4x286xi1>, vector<4x286xf32>
    %c0_38 = arith.constant 0 : index
    %c0_39 = arith.constant 0 : index
    %73 = vector.load %arg18[%c0_38, %c0_39] : memref<286x324xf32, #tpu.memory_space<vmem>>, vector<286x324xf32>
    %cst_40 = arith.constant dense<0.000000e+00> : vector<4x324xf32>
    %74 = tpu.matmul %72, %73, %cst_40 {dimension_numbers = #tpu.dot_dimension_numbers<[1], [0], [0], [1], [0, 0, 1, 1], [], []>} : vector<4x286xf32>, vector<286x324xf32>, vector<4x324xf32> -> vector<4x324xf32>
    %c0_41 = arith.constant 0 : index
    %c0_42 = arith.constant 0 : index
    %75 = vector.load %arg28[%c0_41, %c0_42] : memref<4x324xf32, #tpu.memory_space<vmem>>, vector<4x324xf32>
    tpu.vector_store %arg28[%c0_41, %c0_42], %74 {strides = array<i32>} : memref<4x324xf32, #tpu.memory_space<vmem>>, vector<4x324xf32>,
    %c0_43 = arith.constant 0 : index
    %c0_44 = arith.constant 0 : index
    %76 = vector.load %arg28[%c0_43, %c0_44] : memref<4x324xf32, #tpu.memory_space<vmem>>, vector<4x286xf32>
    %c0_45 = arith.constant 0 : index
    %c0_46 = arith.constant 0 : index
    %c0_47 = arith.constant 0 : index
    %77 = vector.load %arg3[%c0_45, %c0_46, %c0_47] : memref<9x8x4xf32, #tpu.memory_space<vmem>>, vector<1x8x4xf32>
    %78 = vector.shape_cast %77 : vector<1x8x4xf32> to vector<8x4xf32>
    %cst_48 = arith.constant dense<0.000000e+00> : vector<8x286xf32>
    %79 = tpu.matmul %78, %76, %cst_48 {dimension_numbers = #tpu.dot_dimension_numbers<[1], [0], [0], [1], [0, 0, 1, 1], [], []>} : vector<8x4xf32>, vector<4x286xf32>, vector<8x286xf32> -> vector<8x286xf32>
    %c0_49 = arith.constant 0 : index
    %c1_50 = arith.constant 1 : index
    %80 = vector.load %arg28[%c0_49, %c1_50] : memref<4x324xf32, #tpu.memory_space<vmem>>, vector<4x286xf32>
    %c1_51 = arith.constant 1 : index
    %c0_52 = arith.constant 0 : index
    %c0_53 = arith.constant 0 : index
    %81 = vector.load %arg3[%c1_51, %c0_52, %c0_53] : memref<9x8x4xf32, #tpu.memory_space<vmem>>, vector<1x8x4xf32>
    %82 = vector.shape_cast %81 : vector<1x8x4xf32> to vector<8x4xf32>
    %cst_54 = arith.constant dense<0.000000e+00> : vector<8x286xf32>
    %83 = tpu.matmul %82, %80, %cst_54 {dimension_numbers = #tpu.dot_dimension_numbers<[1], [0], [0], [1], [0, 0, 1, 1], [], []>} : vector<8x4xf32>, vector<4x286xf32>, vector<8x286xf32> -> vector<8x286xf32>
    %84 = arith.addf %79, %83 : vector<8x286xf32>
    %c0_55 = arith.constant 0 : index
    %c2_56 = arith.constant 2 : index
    %85 = vector.load %arg28[%c0_55, %c2_56] : memref<4x324xf32, #tpu.memory_space<vmem>>, vector<4x286xf32>
    %c2_57 = arith.constant 2 : index
    %c0_58 = arith.constant 0 : index
    %c0_59 = arith.constant 0 : index
    %86 = vector.load %arg3[%c2_57, %c0_58, %c0_59] : memref<9x8x4xf32, #tpu.memory_space<vmem>>, vector<1x8x4xf32>
    %87 = vector.shape_cast %86 : vector<1x8x4xf32> to vector<8x4xf32>
    %cst_60 = arith.constant dense<0.000000e+00> : vector<8x286xf32>
    %88 = tpu.matmul %87, %85, %cst_60 {dimension_numbers = #tpu.dot_dimension_numbers<[1], [0], [0], [1], [0, 0, 1, 1], [], []>} : vector<8x4xf32>, vector<4x286xf32>, vector<8x286xf32> -> vector<8x286xf32>
    %89 = arith.addf %84, %88 : vector<8x286xf32>
    %c0_61 = arith.constant 0 : index
    %c18_62 = arith.constant 18 : index
    %90 = vector.load %arg28[%c0_61, %c18_62] : memref<4x324xf32, #tpu.memory_space<vmem>>, vector<4x286xf32>
    %c3_63 = arith.constant 3 : index
    %c0_64 = arith.constant 0 : index
    %c0_65 = arith.constant 0 : index
    %91 = vector.load %arg3[%c3_63, %c0_64, %c0_65] : memref<9x8x4xf32, #tpu.memory_space<vmem>>, vector<1x8x4xf32>
    %92 = vector.shape_cast %91 : vector<1x8x4xf32> to vector<8x4xf32>
    %cst_66 = arith.constant dense<0.000000e+00> : vector<8x286xf32>
    %93 = tpu.matmul %92, %90, %cst_66 {dimension_numbers = #tpu.dot_dimension_numbers<[1], [0], [0], [1], [0, 0, 1, 1], [], []>} : vector<8x4xf32>, vector<4x286xf32>, vector<8x286xf32> -> vector<8x286xf32>
    %94 = arith.addf %89, %93 : vector<8x286xf32>
    %c0_67 = arith.constant 0 : index
    %c19_68 = arith.constant 19 : index
    %95 = vector.load %arg28[%c0_67, %c19_68] : memref<4x324xf32, #tpu.memory_space<vmem>>, vector<4x286xf32>
    %c4_69 = arith.constant 4 : index
    %c0_70 = arith.constant 0 : index
    %c0_71 = arith.constant 0 : index
    %96 = vector.load %arg3[%c4_69, %c0_70, %c0_71] : memref<9x8x4xf32, #tpu.memory_space<vmem>>, vector<1x8x4xf32>
    %97 = vector.shape_cast %96 : vector<1x8x4xf32> to vector<8x4xf32>
    %cst_72 = arith.constant dense<0.000000e+00> : vector<8x286xf32>
    %98 = tpu.matmul %97, %95, %cst_72 {dimension_numbers = #tpu.dot_dimension_numbers<[1], [0], [0], [1], [0, 0, 1, 1], [], []>} : vector<8x4xf32>, vector<4x286xf32>, vector<8x286xf32> -> vector<8x286xf32>
    %99 = arith.addf %94, %98 : vector<8x286xf32>
    %c0_73 = arith.constant 0 : index
    %c20_74 = arith.constant 20 : index
    %100 = vector.load %arg28[%c0_73, %c20_74] : memref<4x324xf32, #tpu.memory_space<vmem>>, vector<4x286xf32>
    %c5_75 = arith.constant 5 : index
    %c0_76 = arith.constant 0 : index
    %c0_77 = arith.constant 0 : index
    %101 = vector.load %arg3[%c5_75, %c0_76, %c0_77] : memref<9x8x4xf32, #tpu.memory_space<vmem>>, vector<1x8x4xf32>
    %102 = vector.shape_cast %101 : vector<1x8x4xf32> to vector<8x4xf32>
    %cst_78 = arith.constant dense<0.000000e+00> : vector<8x286xf32>
    %103 = tpu.matmul %102, %100, %cst_78 {dimension_numbers = #tpu.dot_dimension_numbers<[1], [0], [0], [1], [0, 0, 1, 1], [], []>} : vector<8x4xf32>, vector<4x286xf32>, vector<8x286xf32> -> vector<8x286xf32>
    %104 = arith.addf %99, %103 : vector<8x286xf32>
    %c0_79 = arith.constant 0 : index
    %c36_80 = arith.constant 36 : index
    %105 = vector.load %arg28[%c0_79, %c36_80] : memref<4x324xf32, #tpu.memory_space<vmem>>, vector<4x286xf32>
    %c6_81 = arith.constant 6 : index
    %c0_82 = arith.constant 0 : index
    %c0_83 = arith.constant 0 : index
    %106 = vector.load %arg3[%c6_81, %c0_82, %c0_83] : memref<9x8x4xf32, #tpu.memory_space<vmem>>, vector<1x8x4xf32>
    %107 = vector.shape_cast %106 : vector<1x8x4xf32> to vector<8x4xf32>
    %cst_84 = arith.constant dense<0.000000e+00> : vector<8x286xf32>
    %108 = tpu.matmul %107, %105, %cst_84 {dimension_numbers = #tpu.dot_dimension_numbers<[1], [0], [0], [1], [0, 0, 1, 1], [], []>} : vector<8x4xf32>, vector<4x286xf32>, vector<8x286xf32> -> vector<8x286xf32>
    %109 = arith.addf %104, %108 : vector<8x286xf32>
    %c0_85 = arith.constant 0 : index
    %c37_86 = arith.constant 37 : index
    %110 = vector.load %arg28[%c0_85, %c37_86] : memref<4x324xf32, #tpu.memory_space<vmem>>, vector<4x286xf32>
    %c7_87 = arith.constant 7 : index
    %c0_88 = arith.constant 0 : index
    %c0_89 = arith.constant 0 : index
    %111 = vector.load %arg3[%c7_87, %c0_88, %c0_89] : memref<9x8x4xf32, #tpu.memory_space<vmem>>, vector<1x8x4xf32>
    %112 = vector.shape_cast %111 : vector<1x8x4xf32> to vector<8x4xf32>
    %cst_90 = arith.constant dense<0.000000e+00> : vector<8x286xf32>
    %113 = tpu.matmul %112, %110, %cst_90 {dimension_numbers = #tpu.dot_dimension_numbers<[1], [0], [0], [1], [0, 0, 1, 1], [], []>} : vector<8x4xf32>, vector<4x286xf32>, vector<8x286xf32> -> vector<8x286xf32>
    %114 = arith.addf %109, %113 : vector<8x286xf32>
    %c0_91 = arith.constant 0 : index
    %c38_92 = arith.constant 38 : index
    %115 = vector.load %arg28[%c0_91, %c38_92] : memref<4x324xf32, #tpu.memory_space<vmem>>, vector<4x286xf32>
    %c8_93 = arith.constant 8 : index
    %c0_94 = arith.constant 0 : index
    %c0_95 = arith.constant 0 : index
    %116 = vector.load %arg3[%c8_93, %c0_94, %c0_95] : memref<9x8x4xf32, #tpu.memory_space<vmem>>, vector<1x8x4xf32>
    %117 = vector.shape_cast %116 : vector<1x8x4xf32> to vector<8x4xf32>
    %cst_96 = arith.constant dense<0.000000e+00> : vector<8x286xf32>
    %118 = tpu.matmul %117, %115, %cst_96 {dimension_numbers = #tpu.dot_dimension_numbers<[1], [0], [0], [1], [0, 0, 1, 1], [], []>} : vector<8x4xf32>, vector<4x286xf32>, vector<8x286xf32> -> vector<8x286xf32>
    %119 = arith.addf %114, %118 : vector<8x286xf32>
    %c0_97 = arith.constant 0 : index
    %c0_98 = arith.constant 0 : index
    %120 = vector.load %arg11[%c0_97, %c0_98] : memref<8x1xf32, #tpu.memory_space<vmem>>, vector<8x1xf32>
    %121 = vector.broadcast %120 : vector<8x1xf32> to vector<8x286xf32>
    %122 = arith.addf %119, %121 : vector<8x286xf32>
    %cst_99 = arith.constant 0.000000e+00 : f32
    %123 = vector.broadcast %cst_99 : f32 to vector<8x286xf32>
    %124 = arith.cmpf oge, %122, %123 : vector<8x286xf32>
    %cst_100 = arith.constant 0.00999999977 : f32
    %125 = vector.broadcast %cst_100 : f32 to vector<8x286xf32>
    %126 = arith.mulf %125, %122 : vector<8x286xf32>
    %127 = arith.select %124, %122, %126 : vector<8x286xi1>, vector<8x286xf32>
    %c0_101 = arith.constant 0 : index
    %c0_102 = arith.constant 0 : index
    %128 = vector.load %arg19[%c0_101, %c0_102] : memref<286x100xf32, #tpu.memory_space<vmem>>, vector<286x100xf32>
    %cst_103 = arith.constant dense<0.000000e+00> : vector<8x100xf32>
    %129 = tpu.matmul %127, %128, %cst_103 {dimension_numbers = #tpu.dot_dimension_numbers<[1], [0], [0], [1], [0, 0, 1, 1], [], []>} : vector<8x286xf32>, vector<286x100xf32>, vector<8x100xf32> -> vector<8x100xf32>
    %c0_104 = arith.constant 0 : index
    %c0_105 = arith.constant 0 : index
    %130 = vector.load %arg29[%c0_104, %c0_105] : memref<8x100xf32, #tpu.memory_space<vmem>>, vector<8x100xf32>
    tpu.vector_store %arg29[%c0_104, %c0_105], %129 {strides = array<i32>} : memref<8x100xf32, #tpu.memory_space<vmem>>, vector<8x100xf32>,
    %c0_106 = arith.constant 0 : index
    %c0_107 = arith.constant 0 : index
    %131 = vector.load %arg29[%c0_106, %c0_107] : memref<8x100xf32, #tpu.memory_space<vmem>>, vector<8x78xf32>
    %c0_108 = arith.constant 0 : index
    %c0_109 = arith.constant 0 : index
    %c0_110 = arith.constant 0 : index
    %132 = vector.load %arg4[%c0_108, %c0_109, %c0_110] : memref<9x16x8xf32, #tpu.memory_space<vmem>>, vector<1x16x8xf32>
    %133 = vector.shape_cast %132 : vector<1x16x8xf32> to vector<16x8xf32>
    %cst_111 = arith.constant dense<0.000000e+00> : vector<16x78xf32>
    %134 = tpu.matmul %133, %131, %cst_111 {dimension_numbers = #tpu.dot_dimension_numbers<[1], [0], [0], [1], [0, 0, 1, 1], [], []>} : vector<16x8xf32>, vector<8x78xf32>, vector<16x78xf32> -> vector<16x78xf32>
    %c0_112 = arith.constant 0 : index
    %c1_113 = arith.constant 1 : index
    %135 = vector.load %arg29[%c0_112, %c1_113] : memref<8x100xf32, #tpu.memory_space<vmem>>, vector<8x78xf32>
    %c1_114 = arith.constant 1 : index
    %c0_115 = arith.constant 0 : index
    %c0_116 = arith.constant 0 : index
    %136 = vector.load %arg4[%c1_114, %c0_115, %c0_116] : memref<9x16x8xf32, #tpu.memory_space<vmem>>, vector<1x16x8xf32>
    %137 = vector.shape_cast %136 : vector<1x16x8xf32> to vector<16x8xf32>
    %cst_117 = arith.constant dense<0.000000e+00> : vector<16x78xf32>
    %138 = tpu.matmul %137, %135, %cst_117 {dimension_numbers = #tpu.dot_dimension_numbers<[1], [0], [0], [1], [0, 0, 1, 1], [], []>} : vector<16x8xf32>, vector<8x78xf32>, vector<16x78xf32> -> vector<16x78xf32>
    %139 = arith.addf %134, %138 : vector<16x78xf32>
    %c0_118 = arith.constant 0 : index
    %c2_119 = arith.constant 2 : index
    %140 = vector.load %arg29[%c0_118, %c2_119] : memref<8x100xf32, #tpu.memory_space<vmem>>, vector<8x78xf32>
    %c2_120 = arith.constant 2 : index
    %c0_121 = arith.constant 0 : index
    %c0_122 = arith.constant 0 : index
    %141 = vector.load %arg4[%c2_120, %c0_121, %c0_122] : memref<9x16x8xf32, #tpu.memory_space<vmem>>, vector<1x16x8xf32>
    %142 = vector.shape_cast %141 : vector<1x16x8xf32> to vector<16x8xf32>
    %cst_123 = arith.constant dense<0.000000e+00> : vector<16x78xf32>
    %143 = tpu.matmul %142, %140, %cst_123 {dimension_numbers = #tpu.dot_dimension_numbers<[1], [0], [0], [1], [0, 0, 1, 1], [], []>} : vector<16x8xf32>, vector<8x78xf32>, vector<16x78xf32> -> vector<16x78xf32>
    %144 = arith.addf %139, %143 : vector<16x78xf32>
    %c0_124 = arith.constant 0 : index
    %c10 = arith.constant 10 : index
    %145 = vector.load %arg29[%c0_124, %c10] : memref<8x100xf32, #tpu.memory_space<vmem>>, vector<8x78xf32>
    %c3_125 = arith.constant 3 : index
    %c0_126 = arith.constant 0 : index
    %c0_127 = arith.constant 0 : index
    %146 = vector.load %arg4[%c3_125, %c0_126, %c0_127] : memref<9x16x8xf32, #tpu.memory_space<vmem>>, vector<1x16x8xf32>
    %147 = vector.shape_cast %146 : vector<1x16x8xf32> to vector<16x8xf32>
    %cst_128 = arith.constant dense<0.000000e+00> : vector<16x78xf32>
    %148 = tpu.matmul %147, %145, %cst_128 {dimension_numbers = #tpu.dot_dimension_numbers<[1], [0], [0], [1], [0, 0, 1, 1], [], []>} : vector<16x8xf32>, vector<8x78xf32>, vector<16x78xf32> -> vector<16x78xf32>
    %149 = arith.addf %144, %148 : vector<16x78xf32>
    %c0_129 = arith.constant 0 : index
    %c11 = arith.constant 11 : index
    %150 = vector.load %arg29[%c0_129, %c11] : memref<8x100xf32, #tpu.memory_space<vmem>>, vector<8x78xf32>
    %c4_130 = arith.constant 4 : index
    %c0_131 = arith.constant 0 : index
    %c0_132 = arith.constant 0 : index
    %151 = vector.load %arg4[%c4_130, %c0_131, %c0_132] : memref<9x16x8xf32, #tpu.memory_space<vmem>>, vector<1x16x8xf32>
    %152 = vector.shape_cast %151 : vector<1x16x8xf32> to vector<16x8xf32>
    %cst_133 = arith.constant dense<0.000000e+00> : vector<16x78xf32>
    %153 = tpu.matmul %152, %150, %cst_133 {dimension_numbers = #tpu.dot_dimension_numbers<[1], [0], [0], [1], [0, 0, 1, 1], [], []>} : vector<16x8xf32>, vector<8x78xf32>, vector<16x78xf32> -> vector<16x78xf32>
    %154 = arith.addf %149, %153 : vector<16x78xf32>
    %c0_134 = arith.constant 0 : index
    %c12 = arith.constant 12 : index
    %155 = vector.load %arg29[%c0_134, %c12] : memref<8x100xf32, #tpu.memory_space<vmem>>, vector<8x78xf32>
    %c5_135 = arith.constant 5 : index
    %c0_136 = arith.constant 0 : index
    %c0_137 = arith.constant 0 : index
    %156 = vector.load %arg4[%c5_135, %c0_136, %c0_137] : memref<9x16x8xf32, #tpu.memory_space<vmem>>, vector<1x16x8xf32>
    %157 = vector.shape_cast %156 : vector<1x16x8xf32> to vector<16x8xf32>
    %cst_138 = arith.constant dense<0.000000e+00> : vector<16x78xf32>
    %158 = tpu.matmul %157, %155, %cst_138 {dimension_numbers = #tpu.dot_dimension_numbers<[1], [0], [0], [1], [0, 0, 1, 1], [], []>} : vector<16x8xf32>, vector<8x78xf32>, vector<16x78xf32> -> vector<16x78xf32>
    %159 = arith.addf %154, %158 : vector<16x78xf32>
    %c0_139 = arith.constant 0 : index
    %c20_140 = arith.constant 20 : index
    %160 = vector.load %arg29[%c0_139, %c20_140] : memref<8x100xf32, #tpu.memory_space<vmem>>, vector<8x78xf32>
    %c6_141 = arith.constant 6 : index
    %c0_142 = arith.constant 0 : index
    %c0_143 = arith.constant 0 : index
    %161 = vector.load %arg4[%c6_141, %c0_142, %c0_143] : memref<9x16x8xf32, #tpu.memory_space<vmem>>, vector<1x16x8xf32>
    %162 = vector.shape_cast %161 : vector<1x16x8xf32> to vector<16x8xf32>
    %cst_144 = arith.constant dense<0.000000e+00> : vector<16x78xf32>
    %163 = tpu.matmul %162, %160, %cst_144 {dimension_numbers = #tpu.dot_dimension_numbers<[1], [0], [0], [1], [0, 0, 1, 1], [], []>} : vector<16x8xf32>, vector<8x78xf32>, vector<16x78xf32> -> vector<16x78xf32>
    %164 = arith.addf %159, %163 : vector<16x78xf32>
    %c0_145 = arith.constant 0 : index
    %c21 = arith.constant 21 : index
    %165 = vector.load %arg29[%c0_145, %c21] : memref<8x100xf32, #tpu.memory_space<vmem>>, vector<8x78xf32>
    %c7_146 = arith.constant 7 : index
    %c0_147 = arith.constant 0 : index
    %c0_148 = arith.constant 0 : index
    %166 = vector.load %arg4[%c7_146, %c0_147, %c0_148] : memref<9x16x8xf32, #tpu.memory_space<vmem>>, vector<1x16x8xf32>
    %167 = vector.shape_cast %166 : vector<1x16x8xf32> to vector<16x8xf32>
    %cst_149 = arith.constant dense<0.000000e+00> : vector<16x78xf32>
    %168 = tpu.matmul %167, %165, %cst_149 {dimension_numbers = #tpu.dot_dimension_numbers<[1], [0], [0], [1], [0, 0, 1, 1], [], []>} : vector<16x8xf32>, vector<8x78xf32>, vector<16x78xf32> -> vector<16x78xf32>
    %169 = arith.addf %164, %168 : vector<16x78xf32>
    %c0_150 = arith.constant 0 : index
    %c22 = arith.constant 22 : index
    %170 = vector.load %arg29[%c0_150, %c22] : memref<8x100xf32, #tpu.memory_space<vmem>>, vector<8x78xf32>
    %c8_151 = arith.constant 8 : index
    %c0_152 = arith.constant 0 : index
    %c0_153 = arith.constant 0 : index
    %171 = vector.load %arg4[%c8_151, %c0_152, %c0_153] : memref<9x16x8xf32, #tpu.memory_space<vmem>>, vector<1x16x8xf32>
    %172 = vector.shape_cast %171 : vector<1x16x8xf32> to vector<16x8xf32>
    %cst_154 = arith.constant dense<0.000000e+00> : vector<16x78xf32>
    %173 = tpu.matmul %172, %170, %cst_154 {dimension_numbers = #tpu.dot_dimension_numbers<[1], [0], [0], [1], [0, 0, 1, 1], [], []>} : vector<16x8xf32>, vector<8x78xf32>, vector<16x78xf32> -> vector<16x78xf32>
    %174 = arith.addf %169, %173 : vector<16x78xf32>
    %c0_155 = arith.constant 0 : index
    %c0_156 = arith.constant 0 : index
    %175 = vector.load %arg12[%c0_155, %c0_156] : memref<16x1xf32, #tpu.memory_space<vmem>>, vector<16x1xf32>
    %176 = vector.broadcast %175 : vector<16x1xf32> to vector<16x78xf32>
    %177 = arith.addf %174, %176 : vector<16x78xf32>
    %cst_157 = arith.constant 0.000000e+00 : f32
    %178 = vector.broadcast %cst_157 : f32 to vector<16x78xf32>
    %179 = arith.cmpf oge, %177, %178 : vector<16x78xf32>
    %cst_158 = arith.constant 0.00999999977 : f32
    %180 = vector.broadcast %cst_158 : f32 to vector<16x78xf32>
    %181 = arith.mulf %180, %177 : vector<16x78xf32>
    %182 = arith.select %179, %177, %181 : vector<16x78xi1>, vector<16x78xf32>
    %c0_159 = arith.constant 0 : index
    %c0_160 = arith.constant 0 : index
    %183 = vector.load %arg20[%c0_159, %c0_160] : memref<78x36xf32, #tpu.memory_space<vmem>>, vector<78x36xf32>
    %cst_161 = arith.constant dense<0.000000e+00> : vector<16x36xf32>
    %184 = tpu.matmul %182, %183, %cst_161 {dimension_numbers = #tpu.dot_dimension_numbers<[1], [0], [0], [1], [0, 0, 1, 1], [], []>} : vector<16x78xf32>, vector<78x36xf32>, vector<16x36xf32> -> vector<16x36xf32>
    %c0_162 = arith.constant 0 : index
    %c0_163 = arith.constant 0 : index
    %185 = vector.load %arg30[%c0_162, %c0_163] : memref<16x36xf32, #tpu.memory_space<vmem>>, vector<16x36xf32>
    tpu.vector_store %arg30[%c0_162, %c0_163], %184 {strides = array<i32>} : memref<16x36xf32, #tpu.memory_space<vmem>>, vector<16x36xf32>,
    %c0_164 = arith.constant 0 : index
    %c0_165 = arith.constant 0 : index
    %186 = vector.load %arg30[%c0_164, %c0_165] : memref<16x36xf32, #tpu.memory_space<vmem>>, vector<16x22xf32>
    %c0_166 = arith.constant 0 : index
    %c0_167 = arith.constant 0 : index
    %c0_168 = arith.constant 0 : index
    %187 = vector.load %arg5[%c0_166, %c0_167, %c0_168] : memref<9x32x16xf32, #tpu.memory_space<vmem>>, vector<1x32x16xf32>
    %188 = vector.shape_cast %187 : vector<1x32x16xf32> to vector<32x16xf32>
    %cst_169 = arith.constant dense<0.000000e+00> : vector<32x22xf32>
    %189 = tpu.matmul %188, %186, %cst_169 {dimension_numbers = #tpu.dot_dimension_numbers<[1], [0], [0], [1], [0, 0, 1, 1], [], []>} : vector<32x16xf32>, vector<16x22xf32>, vector<32x22xf32> -> vector<32x22xf32>
    %c0_170 = arith.constant 0 : index
    %c1_171 = arith.constant 1 : index
    %190 = vector.load %arg30[%c0_170, %c1_171] : memref<16x36xf32, #tpu.memory_space<vmem>>, vector<16x22xf32>
    %c1_172 = arith.constant 1 : index
    %c0_173 = arith.constant 0 : index
    %c0_174 = arith.constant 0 : index
    %191 = vector.load %arg5[%c1_172, %c0_173, %c0_174] : memref<9x32x16xf32, #tpu.memory_space<vmem>>, vector<1x32x16xf32>
    %192 = vector.shape_cast %191 : vector<1x32x16xf32> to vector<32x16xf32>
    %cst_175 = arith.constant dense<0.000000e+00> : vector<32x22xf32>
    %193 = tpu.matmul %192, %190, %cst_175 {dimension_numbers = #tpu.dot_dimension_numbers<[1], [0], [0], [1], [0, 0, 1, 1], [], []>} : vector<32x16xf32>, vector<16x22xf32>, vector<32x22xf32> -> vector<32x22xf32>
    %194 = arith.addf %189, %193 : vector<32x22xf32>
    %c0_176 = arith.constant 0 : index
    %c2_177 = arith.constant 2 : index
    %195 = vector.load %arg30[%c0_176, %c2_177] : memref<16x36xf32, #tpu.memory_space<vmem>>, vector<16x22xf32>
    %c2_178 = arith.constant 2 : index
    %c0_179 = arith.constant 0 : index
    %c0_180 = arith.constant 0 : index
    %196 = vector.load %arg5[%c2_178, %c0_179, %c0_180] : memref<9x32x16xf32, #tpu.memory_space<vmem>>, vector<1x32x16xf32>
    %197 = vector.shape_cast %196 : vector<1x32x16xf32> to vector<32x16xf32>
    %cst_181 = arith.constant dense<0.000000e+00> : vector<32x22xf32>
    %198 = tpu.matmul %197, %195, %cst_181 {dimension_numbers = #tpu.dot_dimension_numbers<[1], [0], [0], [1], [0, 0, 1, 1], [], []>} : vector<32x16xf32>, vector<16x22xf32>, vector<32x22xf32> -> vector<32x22xf32>
    %199 = arith.addf %194, %198 : vector<32x22xf32>
    %c0_182 = arith.constant 0 : index
    %c6_183 = arith.constant 6 : index
    %200 = vector.load %arg30[%c0_182, %c6_183] : memref<16x36xf32, #tpu.memory_space<vmem>>, vector<16x22xf32>
    %c3_184 = arith.constant 3 : index
    %c0_185 = arith.constant 0 : index
    %c0_186 = arith.constant 0 : index
    %201 = vector.load %arg5[%c3_184, %c0_185, %c0_186] : memref<9x32x16xf32, #tpu.memory_space<vmem>>, vector<1x32x16xf32>
    %202 = vector.shape_cast %201 : vector<1x32x16xf32> to vector<32x16xf32>
    %cst_187 = arith.constant dense<0.000000e+00> : vector<32x22xf32>
    %203 = tpu.matmul %202, %200, %cst_187 {dimension_numbers = #tpu.dot_dimension_numbers<[1], [0], [0], [1], [0, 0, 1, 1], [], []>} : vector<32x16xf32>, vector<16x22xf32>, vector<32x22xf32> -> vector<32x22xf32>
    %204 = arith.addf %199, %203 : vector<32x22xf32>
    %c0_188 = arith.constant 0 : index
    %c7_189 = arith.constant 7 : index
    %205 = vector.load %arg30[%c0_188, %c7_189] : memref<16x36xf32, #tpu.memory_space<vmem>>, vector<16x22xf32>
    %c4_190 = arith.constant 4 : index
    %c0_191 = arith.constant 0 : index
    %c0_192 = arith.constant 0 : index
    %206 = vector.load %arg5[%c4_190, %c0_191, %c0_192] : memref<9x32x16xf32, #tpu.memory_space<vmem>>, vector<1x32x16xf32>
    %207 = vector.shape_cast %206 : vector<1x32x16xf32> to vector<32x16xf32>
    %cst_193 = arith.constant dense<0.000000e+00> : vector<32x22xf32>
    %208 = tpu.matmul %207, %205, %cst_193 {dimension_numbers = #tpu.dot_dimension_numbers<[1], [0], [0], [1], [0, 0, 1, 1], [], []>} : vector<32x16xf32>, vector<16x22xf32>, vector<32x22xf32> -> vector<32x22xf32>
    %209 = arith.addf %204, %208 : vector<32x22xf32>
    %c0_194 = arith.constant 0 : index
    %c8_195 = arith.constant 8 : index
    %210 = vector.load %arg30[%c0_194, %c8_195] : memref<16x36xf32, #tpu.memory_space<vmem>>, vector<16x22xf32>
    %c5_196 = arith.constant 5 : index
    %c0_197 = arith.constant 0 : index
    %c0_198 = arith.constant 0 : index
    %211 = vector.load %arg5[%c5_196, %c0_197, %c0_198] : memref<9x32x16xf32, #tpu.memory_space<vmem>>, vector<1x32x16xf32>
    %212 = vector.shape_cast %211 : vector<1x32x16xf32> to vector<32x16xf32>
    %cst_199 = arith.constant dense<0.000000e+00> : vector<32x22xf32>
    %213 = tpu.matmul %212, %210, %cst_199 {dimension_numbers = #tpu.dot_dimension_numbers<[1], [0], [0], [1], [0, 0, 1, 1], [], []>} : vector<32x16xf32>, vector<16x22xf32>, vector<32x22xf32> -> vector<32x22xf32>
    %214 = arith.addf %209, %213 : vector<32x22xf32>
    %c0_200 = arith.constant 0 : index
    %c12_201 = arith.constant 12 : index
    %215 = vector.load %arg30[%c0_200, %c12_201] : memref<16x36xf32, #tpu.memory_space<vmem>>, vector<16x22xf32>
    %c6_202 = arith.constant 6 : index
    %c0_203 = arith.constant 0 : index
    %c0_204 = arith.constant 0 : index
    %216 = vector.load %arg5[%c6_202, %c0_203, %c0_204] : memref<9x32x16xf32, #tpu.memory_space<vmem>>, vector<1x32x16xf32>
    %217 = vector.shape_cast %216 : vector<1x32x16xf32> to vector<32x16xf32>
    %cst_205 = arith.constant dense<0.000000e+00> : vector<32x22xf32>
    %218 = tpu.matmul %217, %215, %cst_205 {dimension_numbers = #tpu.dot_dimension_numbers<[1], [0], [0], [1], [0, 0, 1, 1], [], []>} : vector<32x16xf32>, vector<16x22xf32>, vector<32x22xf32> -> vector<32x22xf32>
    %219 = arith.addf %214, %218 : vector<32x22xf32>
    %c0_206 = arith.constant 0 : index
    %c13 = arith.constant 13 : index
    %220 = vector.load %arg30[%c0_206, %c13] : memref<16x36xf32, #tpu.memory_space<vmem>>, vector<16x22xf32>
    %c7_207 = arith.constant 7 : index
    %c0_208 = arith.constant 0 : index
    %c0_209 = arith.constant 0 : index
    %221 = vector.load %arg5[%c7_207, %c0_208, %c0_209] : memref<9x32x16xf32, #tpu.memory_space<vmem>>, vector<1x32x16xf32>
    %222 = vector.shape_cast %221 : vector<1x32x16xf32> to vector<32x16xf32>
    %cst_210 = arith.constant dense<0.000000e+00> : vector<32x22xf32>
    %223 = tpu.matmul %222, %220, %cst_210 {dimension_numbers = #tpu.dot_dimension_numbers<[1], [0], [0], [1], [0, 0, 1, 1], [], []>} : vector<32x16xf32>, vector<16x22xf32>, vector<32x22xf32> -> vector<32x22xf32>
    %224 = arith.addf %219, %223 : vector<32x22xf32>
    %c0_211 = arith.constant 0 : index
    %c14 = arith.constant 14 : index
    %225 = vector.load %arg30[%c0_211, %c14] : memref<16x36xf32, #tpu.memory_space<vmem>>, vector<16x22xf32>
    %c8_212 = arith.constant 8 : index
    %c0_213 = arith.constant 0 : index
    %c0_214 = arith.constant 0 : index
    %226 = vector.load %arg5[%c8_212, %c0_213, %c0_214] : memref<9x32x16xf32, #tpu.memory_space<vmem>>, vector<1x32x16xf32>
    %227 = vector.shape_cast %226 : vector<1x32x16xf32> to vector<32x16xf32>
    %cst_215 = arith.constant dense<0.000000e+00> : vector<32x22xf32>
    %228 = tpu.matmul %227, %225, %cst_215 {dimension_numbers = #tpu.dot_dimension_numbers<[1], [0], [0], [1], [0, 0, 1, 1], [], []>} : vector<32x16xf32>, vector<16x22xf32>, vector<32x22xf32> -> vector<32x22xf32>
    %229 = arith.addf %224, %228 : vector<32x22xf32>
    %c0_216 = arith.constant 0 : index
    %c0_217 = arith.constant 0 : index
    %230 = vector.load %arg13[%c0_216, %c0_217] : memref<32x1xf32, #tpu.memory_space<vmem>>, vector<32x1xf32>
    %231 = vector.broadcast %230 : vector<32x1xf32> to vector<32x22xf32>
    %232 = arith.addf %229, %231 : vector<32x22xf32>
    %c0_218 = arith.constant 0 : index
    %c0_219 = arith.constant 0 : index
    %233 = vector.load %arg21[%c0_218, %c0_219] : memref<22x49xf32, #tpu.memory_space<vmem>>, vector<22x49xf32>
    %cst_220 = arith.constant dense<0.000000e+00> : vector<32x49xf32>
    %234 = tpu.matmul %232, %233, %cst_220 {dimension_numbers = #tpu.dot_dimension_numbers<[1], [0], [0], [1], [0, 0, 1, 1], [], []>} : vector<32x22xf32>, vector<22x49xf32>, vector<32x49xf32> -> vector<32x49xf32>
    %c0_221 = arith.constant 0 : index
    %c0_222 = arith.constant 0 : index
    %235 = vector.load %arg31[%c0_221, %c0_222] : memref<32x49xf32, #tpu.memory_space<vmem>>, vector<32x49xf32>
    tpu.vector_store %arg31[%c0_221, %c0_222], %234 {strides = array<i32>} : memref<32x49xf32, #tpu.memory_space<vmem>>, vector<32x49xf32>,
    %c0_223 = arith.constant 0 : index
    %c0_224 = arith.constant 0 : index
    %236 = vector.load %arg31[%c0_223, %c0_224] : memref<32x49xf32, #tpu.memory_space<vmem>>, vector<32x25xf32>
    %c0_225 = arith.constant 0 : index
    %c0_226 = arith.constant 0 : index
    %c0_227 = arith.constant 0 : index
    %237 = vector.load %arg6[%c0_225, %c0_226, %c0_227] : memref<16x16x32xf32, #tpu.memory_space<vmem>>, vector<1x16x32xf32>
    %238 = vector.shape_cast %237 : vector<1x16x32xf32> to vector<16x32xf32>
    %cst_228 = arith.constant dense<0.000000e+00> : vector<16x25xf32>
    %239 = tpu.matmul %238, %236, %cst_228 {dimension_numbers = #tpu.dot_dimension_numbers<[1], [0], [0], [1], [0, 0, 1, 1], [], []>} : vector<16x32xf32>, vector<32x25xf32>, vector<16x25xf32> -> vector<16x25xf32>
    %c0_229 = arith.constant 0 : index
    %c1_230 = arith.constant 1 : index
    %240 = vector.load %arg31[%c0_229, %c1_230] : memref<32x49xf32, #tpu.memory_space<vmem>>, vector<32x25xf32>
    %c1_231 = arith.constant 1 : index
    %c0_232 = arith.constant 0 : index
    %c0_233 = arith.constant 0 : index
    %241 = vector.load %arg6[%c1_231, %c0_232, %c0_233] : memref<16x16x32xf32, #tpu.memory_space<vmem>>, vector<1x16x32xf32>
    %242 = vector.shape_cast %241 : vector<1x16x32xf32> to vector<16x32xf32>
    %cst_234 = arith.constant dense<0.000000e+00> : vector<16x25xf32>
    %243 = tpu.matmul %242, %240, %cst_234 {dimension_numbers = #tpu.dot_dimension_numbers<[1], [0], [0], [1], [0, 0, 1, 1], [], []>} : vector<16x32xf32>, vector<32x25xf32>, vector<16x25xf32> -> vector<16x25xf32>
    %244 = arith.addf %239, %243 : vector<16x25xf32>
    %c0_235 = arith.constant 0 : index
    %c2_236 = arith.constant 2 : index
    %245 = vector.load %arg31[%c0_235, %c2_236] : memref<32x49xf32, #tpu.memory_space<vmem>>, vector<32x25xf32>
    %c2_237 = arith.constant 2 : index
    %c0_238 = arith.constant 0 : index
    %c0_239 = arith.constant 0 : index
    %246 = vector.load %arg6[%c2_237, %c0_238, %c0_239] : memref<16x16x32xf32, #tpu.memory_space<vmem>>, vector<1x16x32xf32>
    %247 = vector.shape_cast %246 : vector<1x16x32xf32> to vector<16x32xf32>
    %cst_240 = arith.constant dense<0.000000e+00> : vector<16x25xf32>
    %248 = tpu.matmul %247, %245, %cst_240 {dimension_numbers = #tpu.dot_dimension_numbers<[1], [0], [0], [1], [0, 0, 1, 1], [], []>} : vector<16x32xf32>, vector<32x25xf32>, vector<16x25xf32> -> vector<16x25xf32>
    %249 = arith.addf %244, %248 : vector<16x25xf32>
    %c0_241 = arith.constant 0 : index
    %c3_242 = arith.constant 3 : index
    %250 = vector.load %arg31[%c0_241, %c3_242] : memref<32x49xf32, #tpu.memory_space<vmem>>, vector<32x25xf32>
    %c3_243 = arith.constant 3 : index
    %c0_244 = arith.constant 0 : index
    %c0_245 = arith.constant 0 : index
    %251 = vector.load %arg6[%c3_243, %c0_244, %c0_245] : memref<16x16x32xf32, #tpu.memory_space<vmem>>, vector<1x16x32xf32>
    %252 = vector.shape_cast %251 : vector<1x16x32xf32> to vector<16x32xf32>
    %cst_246 = arith.constant dense<0.000000e+00> : vector<16x25xf32>
    %253 = tpu.matmul %252, %250, %cst_246 {dimension_numbers = #tpu.dot_dimension_numbers<[1], [0], [0], [1], [0, 0, 1, 1], [], []>} : vector<16x32xf32>, vector<32x25xf32>, vector<16x25xf32> -> vector<16x25xf32>
    %254 = arith.addf %249, %253 : vector<16x25xf32>
    %c0_247 = arith.constant 0 : index
    %c7_248 = arith.constant 7 : index
    %255 = vector.load %arg31[%c0_247, %c7_248] : memref<32x49xf32, #tpu.memory_space<vmem>>, vector<32x25xf32>
    %c4_249 = arith.constant 4 : index
    %c0_250 = arith.constant 0 : index
    %c0_251 = arith.constant 0 : index
    %256 = vector.load %arg6[%c4_249, %c0_250, %c0_251] : memref<16x16x32xf32, #tpu.memory_space<vmem>>, vector<1x16x32xf32>
    %257 = vector.shape_cast %256 : vector<1x16x32xf32> to vector<16x32xf32>
    %cst_252 = arith.constant dense<0.000000e+00> : vector<16x25xf32>
    %258 = tpu.matmul %257, %255, %cst_252 {dimension_numbers = #tpu.dot_dimension_numbers<[1], [0], [0], [1], [0, 0, 1, 1], [], []>} : vector<16x32xf32>, vector<32x25xf32>, vector<16x25xf32> -> vector<16x25xf32>
    %259 = arith.addf %254, %258 : vector<16x25xf32>
    %c0_253 = arith.constant 0 : index
    %c8_254 = arith.constant 8 : index
    %260 = vector.load %arg31[%c0_253, %c8_254] : memref<32x49xf32, #tpu.memory_space<vmem>>, vector<32x25xf32>
    %c5_255 = arith.constant 5 : index
    %c0_256 = arith.constant 0 : index
    %c0_257 = arith.constant 0 : index
    %261 = vector.load %arg6[%c5_255, %c0_256, %c0_257] : memref<16x16x32xf32, #tpu.memory_space<vmem>>, vector<1x16x32xf32>
    %262 = vector.shape_cast %261 : vector<1x16x32xf32> to vector<16x32xf32>
    %cst_258 = arith.constant dense<0.000000e+00> : vector<16x25xf32>
    %263 = tpu.matmul %262, %260, %cst_258 {dimension_numbers = #tpu.dot_dimension_numbers<[1], [0], [0], [1], [0, 0, 1, 1], [], []>} : vector<16x32xf32>, vector<32x25xf32>, vector<16x25xf32> -> vector<16x25xf32>
    %264 = arith.addf %259, %263 : vector<16x25xf32>
    %c0_259 = arith.constant 0 : index
    %c9 = arith.constant 9 : index
    %265 = vector.load %arg31[%c0_259, %c9] : memref<32x49xf32, #tpu.memory_space<vmem>>, vector<32x25xf32>
    %c6_260 = arith.constant 6 : index
    %c0_261 = arith.constant 0 : index
    %c0_262 = arith.constant 0 : index
    %266 = vector.load %arg6[%c6_260, %c0_261, %c0_262] : memref<16x16x32xf32, #tpu.memory_space<vmem>>, vector<1x16x32xf32>
    %267 = vector.shape_cast %266 : vector<1x16x32xf32> to vector<16x32xf32>
    %cst_263 = arith.constant dense<0.000000e+00> : vector<16x25xf32>
    %268 = tpu.matmul %267, %265, %cst_263 {dimension_numbers = #tpu.dot_dimension_numbers<[1], [0], [0], [1], [0, 0, 1, 1], [], []>} : vector<16x32xf32>, vector<32x25xf32>, vector<16x25xf32> -> vector<16x25xf32>
    %269 = arith.addf %264, %268 : vector<16x25xf32>
    %c0_264 = arith.constant 0 : index
    %c10_265 = arith.constant 10 : index
    %270 = vector.load %arg31[%c0_264, %c10_265] : memref<32x49xf32, #tpu.memory_space<vmem>>, vector<32x25xf32>
    %c7_266 = arith.constant 7 : index
    %c0_267 = arith.constant 0 : index
    %c0_268 = arith.constant 0 : index
    %271 = vector.load %arg6[%c7_266, %c0_267, %c0_268] : memref<16x16x32xf32, #tpu.memory_space<vmem>>, vector<1x16x32xf32>
    %272 = vector.shape_cast %271 : vector<1x16x32xf32> to vector<16x32xf32>
    %cst_269 = arith.constant dense<0.000000e+00> : vector<16x25xf32>
    %273 = tpu.matmul %272, %270, %cst_269 {dimension_numbers = #tpu.dot_dimension_numbers<[1], [0], [0], [1], [0, 0, 1, 1], [], []>} : vector<16x32xf32>, vector<32x25xf32>, vector<16x25xf32> -> vector<16x25xf32>
    %274 = arith.addf %269, %273 : vector<16x25xf32>
    %c0_270 = arith.constant 0 : index
    %c14_271 = arith.constant 14 : index
    %275 = vector.load %arg31[%c0_270, %c14_271] : memref<32x49xf32, #tpu.memory_space<vmem>>, vector<32x25xf32>
    %c8_272 = arith.constant 8 : index
    %c0_273 = arith.constant 0 : index
    %c0_274 = arith.constant 0 : index
    %276 = vector.load %arg6[%c8_272, %c0_273, %c0_274] : memref<16x16x32xf32, #tpu.memory_space<vmem>>, vector<1x16x32xf32>
    %277 = vector.shape_cast %276 : vector<1x16x32xf32> to vector<16x32xf32>
    %cst_275 = arith.constant dense<0.000000e+00> : vector<16x25xf32>
    %278 = tpu.matmul %277, %275, %cst_275 {dimension_numbers = #tpu.dot_dimension_numbers<[1], [0], [0], [1], [0, 0, 1, 1], [], []>} : vector<16x32xf32>, vector<32x25xf32>, vector<16x25xf32> -> vector<16x25xf32>
    %279 = arith.addf %274, %278 : vector<16x25xf32>
    %c0_276 = arith.constant 0 : index
    %c15 = arith.constant 15 : index
    %280 = vector.load %arg31[%c0_276, %c15] : memref<32x49xf32, #tpu.memory_space<vmem>>, vector<32x25xf32>
    %c9_277 = arith.constant 9 : index
    %c0_278 = arith.constant 0 : index
    %c0_279 = arith.constant 0 : index
    %281 = vector.load %arg6[%c9_277, %c0_278, %c0_279] : memref<16x16x32xf32, #tpu.memory_space<vmem>>, vector<1x16x32xf32>
    %282 = vector.shape_cast %281 : vector<1x16x32xf32> to vector<16x32xf32>
    %cst_280 = arith.constant dense<0.000000e+00> : vector<16x25xf32>
    %283 = tpu.matmul %282, %280, %cst_280 {dimension_numbers = #tpu.dot_dimension_numbers<[1], [0], [0], [1], [0, 0, 1, 1], [], []>} : vector<16x32xf32>, vector<32x25xf32>, vector<16x25xf32> -> vector<16x25xf32>
    %284 = arith.addf %279, %283 : vector<16x25xf32>
    %c0_281 = arith.constant 0 : index
    %c16 = arith.constant 16 : index
    %285 = vector.load %arg31[%c0_281, %c16] : memref<32x49xf32, #tpu.memory_space<vmem>>, vector<32x25xf32>
    %c10_282 = arith.constant 10 : index
    %c0_283 = arith.constant 0 : index
    %c0_284 = arith.constant 0 : index
    %286 = vector.load %arg6[%c10_282, %c0_283, %c0_284] : memref<16x16x32xf32, #tpu.memory_space<vmem>>, vector<1x16x32xf32>
    %287 = vector.shape_cast %286 : vector<1x16x32xf32> to vector<16x32xf32>
    %cst_285 = arith.constant dense<0.000000e+00> : vector<16x25xf32>
    %288 = tpu.matmul %287, %285, %cst_285 {dimension_numbers = #tpu.dot_dimension_numbers<[1], [0], [0], [1], [0, 0, 1, 1], [], []>} : vector<16x32xf32>, vector<32x25xf32>, vector<16x25xf32> -> vector<16x25xf32>
    %289 = arith.addf %284, %288 : vector<16x25xf32>
    %c0_286 = arith.constant 0 : index
    %c17 = arith.constant 17 : index
    %290 = vector.load %arg31[%c0_286, %c17] : memref<32x49xf32, #tpu.memory_space<vmem>>, vector<32x25xf32>
    %c11_287 = arith.constant 11 : index
    %c0_288 = arith.constant 0 : index
    %c0_289 = arith.constant 0 : index
    %291 = vector.load %arg6[%c11_287, %c0_288, %c0_289] : memref<16x16x32xf32, #tpu.memory_space<vmem>>, vector<1x16x32xf32>
    %292 = vector.shape_cast %291 : vector<1x16x32xf32> to vector<16x32xf32>
    %cst_290 = arith.constant dense<0.000000e+00> : vector<16x25xf32>
    %293 = tpu.matmul %292, %290, %cst_290 {dimension_numbers = #tpu.dot_dimension_numbers<[1], [0], [0], [1], [0, 0, 1, 1], [], []>} : vector<16x32xf32>, vector<32x25xf32>, vector<16x25xf32> -> vector<16x25xf32>
    %294 = arith.addf %289, %293 : vector<16x25xf32>
    %c0_291 = arith.constant 0 : index
    %c21_292 = arith.constant 21 : index
    %295 = vector.load %arg31[%c0_291, %c21_292] : memref<32x49xf32, #tpu.memory_space<vmem>>, vector<32x25xf32>
    %c12_293 = arith.constant 12 : index
    %c0_294 = arith.constant 0 : index
    %c0_295 = arith.constant 0 : index
    %296 = vector.load %arg6[%c12_293, %c0_294, %c0_295] : memref<16x16x32xf32, #tpu.memory_space<vmem>>, vector<1x16x32xf32>
    %297 = vector.shape_cast %296 : vector<1x16x32xf32> to vector<16x32xf32>
    %cst_296 = arith.constant dense<0.000000e+00> : vector<16x25xf32>
    %298 = tpu.matmul %297, %295, %cst_296 {dimension_numbers = #tpu.dot_dimension_numbers<[1], [0], [0], [1], [0, 0, 1, 1], [], []>} : vector<16x32xf32>, vector<32x25xf32>, vector<16x25xf32> -> vector<16x25xf32>
    %299 = arith.addf %294, %298 : vector<16x25xf32>
    %c0_297 = arith.constant 0 : index
    %c22_298 = arith.constant 22 : index
    %300 = vector.load %arg31[%c0_297, %c22_298] : memref<32x49xf32, #tpu.memory_space<vmem>>, vector<32x25xf32>
    %c13_299 = arith.constant 13 : index
    %c0_300 = arith.constant 0 : index
    %c0_301 = arith.constant 0 : index
    %301 = vector.load %arg6[%c13_299, %c0_300, %c0_301] : memref<16x16x32xf32, #tpu.memory_space<vmem>>, vector<1x16x32xf32>
    %302 = vector.shape_cast %301 : vector<1x16x32xf32> to vector<16x32xf32>
    %cst_302 = arith.constant dense<0.000000e+00> : vector<16x25xf32>
    %303 = tpu.matmul %302, %300, %cst_302 {dimension_numbers = #tpu.dot_dimension_numbers<[1], [0], [0], [1], [0, 0, 1, 1], [], []>} : vector<16x32xf32>, vector<32x25xf32>, vector<16x25xf32> -> vector<16x25xf32>
    %304 = arith.addf %299, %303 : vector<16x25xf32>
    %c0_303 = arith.constant 0 : index
    %c23 = arith.constant 23 : index
    %305 = vector.load %arg31[%c0_303, %c23] : memref<32x49xf32, #tpu.memory_space<vmem>>, vector<32x25xf32>
    %c14_304 = arith.constant 14 : index
    %c0_305 = arith.constant 0 : index
    %c0_306 = arith.constant 0 : index
    %306 = vector.load %arg6[%c14_304, %c0_305, %c0_306] : memref<16x16x32xf32, #tpu.memory_space<vmem>>, vector<1x16x32xf32>
    %307 = vector.shape_cast %306 : vector<1x16x32xf32> to vector<16x32xf32>
    %cst_307 = arith.constant dense<0.000000e+00> : vector<16x25xf32>
    %308 = tpu.matmul %307, %305, %cst_307 {dimension_numbers = #tpu.dot_dimension_numbers<[1], [0], [0], [1], [0, 0, 1, 1], [], []>} : vector<16x32xf32>, vector<32x25xf32>, vector<16x25xf32> -> vector<16x25xf32>
    %309 = arith.addf %304, %308 : vector<16x25xf32>
    %c0_308 = arith.constant 0 : index
    %c24 = arith.constant 24 : index
    %310 = vector.load %arg31[%c0_308, %c24] : memref<32x49xf32, #tpu.memory_space<vmem>>, vector<32x25xf32>
    %c15_309 = arith.constant 15 : index
    %c0_310 = arith.constant 0 : index
    %c0_311 = arith.constant 0 : index
    %311 = vector.load %arg6[%c15_309, %c0_310, %c0_311] : memref<16x16x32xf32, #tpu.memory_space<vmem>>, vector<1x16x32xf32>
    %312 = vector.shape_cast %311 : vector<1x16x32xf32> to vector<16x32xf32>
    %cst_312 = arith.constant dense<0.000000e+00> : vector<16x25xf32>
    %313 = tpu.matmul %312, %310, %cst_312 {dimension_numbers = #tpu.dot_dimension_numbers<[1], [0], [0], [1], [0, 0, 1, 1], [], []>} : vector<16x32xf32>, vector<32x25xf32>, vector<16x25xf32> -> vector<16x25xf32>
    %314 = arith.addf %309, %313 : vector<16x25xf32>
    %c0_313 = arith.constant 0 : index
    %c0_314 = arith.constant 0 : index
    %315 = vector.load %arg14[%c0_313, %c0_314] : memref<16x1xf32, #tpu.memory_space<vmem>>, vector<16x1xf32>
    %316 = vector.broadcast %315 : vector<16x1xf32> to vector<16x25xf32>
    %317 = arith.addf %314, %316 : vector<16x25xf32>
    %cst_315 = arith.constant 0.000000e+00 : f32
    %318 = vector.broadcast %cst_315 : f32 to vector<16x25xf32>
    %319 = arith.cmpf oge, %317, %318 : vector<16x25xf32>
    %cst_316 = arith.constant 0.00999999977 : f32
    %320 = vector.broadcast %cst_316 : f32 to vector<16x25xf32>
    %321 = arith.mulf %320, %317 : vector<16x25xf32>
    %322 = arith.select %319, %317, %321 : vector<16x25xi1>, vector<16x25xf32>
    %c0_317 = arith.constant 0 : index
    %c0_318 = arith.constant 0 : index
    %323 = vector.load %arg22[%c0_317, %c0_318] : memref<25x121xf32, #tpu.memory_space<vmem>>, vector<25x121xf32>
    %cst_319 = arith.constant dense<0.000000e+00> : vector<16x121xf32>
    %324 = tpu.matmul %322, %323, %cst_319 {dimension_numbers = #tpu.dot_dimension_numbers<[1], [0], [0], [1], [0, 0, 1, 1], [], []>} : vector<16x25xf32>, vector<25x121xf32>, vector<16x121xf32> -> vector<16x121xf32>
    %c0_320 = arith.constant 0 : index
    %c0_321 = arith.constant 0 : index
    %325 = vector.load %arg32[%c0_320, %c0_321] : memref<16x121xf32, #tpu.memory_space<vmem>>, vector<16x121xf32>
    tpu.vector_store %arg32[%c0_320, %c0_321], %324 {strides = array<i32>} : memref<16x121xf32, #tpu.memory_space<vmem>>, vector<16x121xf32>,
    %c0_322 = arith.constant 0 : index
    %c0_323 = arith.constant 0 : index
    %326 = vector.load %arg32[%c0_322, %c0_323] : memref<16x121xf32, #tpu.memory_space<vmem>>, vector<16x85xf32>
    %c0_324 = arith.constant 0 : index
    %c0_325 = arith.constant 0 : index
    %c0_326 = arith.constant 0 : index
    %327 = vector.load %arg7[%c0_324, %c0_325, %c0_326] : memref<16x8x16xf32, #tpu.memory_space<vmem>>, vector<1x8x16xf32>
    %328 = vector.shape_cast %327 : vector<1x8x16xf32> to vector<8x16xf32>
    %cst_327 = arith.constant dense<0.000000e+00> : vector<8x85xf32>
    %329 = tpu.matmul %328, %326, %cst_327 {dimension_numbers = #tpu.dot_dimension_numbers<[1], [0], [0], [1], [0, 0, 1, 1], [], []>} : vector<8x16xf32>, vector<16x85xf32>, vector<8x85xf32> -> vector<8x85xf32>
    %c0_328 = arith.constant 0 : index
    %c1_329 = arith.constant 1 : index
    %330 = vector.load %arg32[%c0_328, %c1_329] : memref<16x121xf32, #tpu.memory_space<vmem>>, vector<16x85xf32>
    %c1_330 = arith.constant 1 : index
    %c0_331 = arith.constant 0 : index
    %c0_332 = arith.constant 0 : index
    %331 = vector.load %arg7[%c1_330, %c0_331, %c0_332] : memref<16x8x16xf32, #tpu.memory_space<vmem>>, vector<1x8x16xf32>
    %332 = vector.shape_cast %331 : vector<1x8x16xf32> to vector<8x16xf32>
    %cst_333 = arith.constant dense<0.000000e+00> : vector<8x85xf32>
    %333 = tpu.matmul %332, %330, %cst_333 {dimension_numbers = #tpu.dot_dimension_numbers<[1], [0], [0], [1], [0, 0, 1, 1], [], []>} : vector<8x16xf32>, vector<16x85xf32>, vector<8x85xf32> -> vector<8x85xf32>
    %334 = arith.addf %329, %333 : vector<8x85xf32>
    %c0_334 = arith.constant 0 : index
    %c2_335 = arith.constant 2 : index
    %335 = vector.load %arg32[%c0_334, %c2_335] : memref<16x121xf32, #tpu.memory_space<vmem>>, vector<16x85xf32>
    %c2_336 = arith.constant 2 : index
    %c0_337 = arith.constant 0 : index
    %c0_338 = arith.constant 0 : index
    %336 = vector.load %arg7[%c2_336, %c0_337, %c0_338] : memref<16x8x16xf32, #tpu.memory_space<vmem>>, vector<1x8x16xf32>
    %337 = vector.shape_cast %336 : vector<1x8x16xf32> to vector<8x16xf32>
    %cst_339 = arith.constant dense<0.000000e+00> : vector<8x85xf32>
    %338 = tpu.matmul %337, %335, %cst_339 {dimension_numbers = #tpu.dot_dimension_numbers<[1], [0], [0], [1], [0, 0, 1, 1], [], []>} : vector<8x16xf32>, vector<16x85xf32>, vector<8x85xf32> -> vector<8x85xf32>
    %339 = arith.addf %334, %338 : vector<8x85xf32>
    %c0_340 = arith.constant 0 : index
    %c3_341 = arith.constant 3 : index
    %340 = vector.load %arg32[%c0_340, %c3_341] : memref<16x121xf32, #tpu.memory_space<vmem>>, vector<16x85xf32>
    %c3_342 = arith.constant 3 : index
    %c0_343 = arith.constant 0 : index
    %c0_344 = arith.constant 0 : index
    %341 = vector.load %arg7[%c3_342, %c0_343, %c0_344] : memref<16x8x16xf32, #tpu.memory_space<vmem>>, vector<1x8x16xf32>
    %342 = vector.shape_cast %341 : vector<1x8x16xf32> to vector<8x16xf32>
    %cst_345 = arith.constant dense<0.000000e+00> : vector<8x85xf32>
    %343 = tpu.matmul %342, %340, %cst_345 {dimension_numbers = #tpu.dot_dimension_numbers<[1], [0], [0], [1], [0, 0, 1, 1], [], []>} : vector<8x16xf32>, vector<16x85xf32>, vector<8x85xf32> -> vector<8x85xf32>
    %344 = arith.addf %339, %343 : vector<8x85xf32>
    %c0_346 = arith.constant 0 : index
    %c11_347 = arith.constant 11 : index
    %345 = vector.load %arg32[%c0_346, %c11_347] : memref<16x121xf32, #tpu.memory_space<vmem>>, vector<16x85xf32>
    %c4_348 = arith.constant 4 : index
    %c0_349 = arith.constant 0 : index
    %c0_350 = arith.constant 0 : index
    %346 = vector.load %arg7[%c4_348, %c0_349, %c0_350] : memref<16x8x16xf32, #tpu.memory_space<vmem>>, vector<1x8x16xf32>
    %347 = vector.shape_cast %346 : vector<1x8x16xf32> to vector<8x16xf32>
    %cst_351 = arith.constant dense<0.000000e+00> : vector<8x85xf32>
    %348 = tpu.matmul %347, %345, %cst_351 {dimension_numbers = #tpu.dot_dimension_numbers<[1], [0], [0], [1], [0, 0, 1, 1], [], []>} : vector<8x16xf32>, vector<16x85xf32>, vector<8x85xf32> -> vector<8x85xf32>
    %349 = arith.addf %344, %348 : vector<8x85xf32>
    %c0_352 = arith.constant 0 : index
    %c12_353 = arith.constant 12 : index
    %350 = vector.load %arg32[%c0_352, %c12_353] : memref<16x121xf32, #tpu.memory_space<vmem>>, vector<16x85xf32>
    %c5_354 = arith.constant 5 : index
    %c0_355 = arith.constant 0 : index
    %c0_356 = arith.constant 0 : index
    %351 = vector.load %arg7[%c5_354, %c0_355, %c0_356] : memref<16x8x16xf32, #tpu.memory_space<vmem>>, vector<1x8x16xf32>
    %352 = vector.shape_cast %351 : vector<1x8x16xf32> to vector<8x16xf32>
    %cst_357 = arith.constant dense<0.000000e+00> : vector<8x85xf32>
    %353 = tpu.matmul %352, %350, %cst_357 {dimension_numbers = #tpu.dot_dimension_numbers<[1], [0], [0], [1], [0, 0, 1, 1], [], []>} : vector<8x16xf32>, vector<16x85xf32>, vector<8x85xf32> -> vector<8x85xf32>
    %354 = arith.addf %349, %353 : vector<8x85xf32>
    %c0_358 = arith.constant 0 : index
    %c13_359 = arith.constant 13 : index
    %355 = vector.load %arg32[%c0_358, %c13_359] : memref<16x121xf32, #tpu.memory_space<vmem>>, vector<16x85xf32>
    %c6_360 = arith.constant 6 : index
    %c0_361 = arith.constant 0 : index
    %c0_362 = arith.constant 0 : index
    %356 = vector.load %arg7[%c6_360, %c0_361, %c0_362] : memref<16x8x16xf32, #tpu.memory_space<vmem>>, vector<1x8x16xf32>
    %357 = vector.shape_cast %356 : vector<1x8x16xf32> to vector<8x16xf32>
    %cst_363 = arith.constant dense<0.000000e+00> : vector<8x85xf32>
    %358 = tpu.matmul %357, %355, %cst_363 {dimension_numbers = #tpu.dot_dimension_numbers<[1], [0], [0], [1], [0, 0, 1, 1], [], []>} : vector<8x16xf32>, vector<16x85xf32>, vector<8x85xf32> -> vector<8x85xf32>
    %359 = arith.addf %354, %358 : vector<8x85xf32>
    %c0_364 = arith.constant 0 : index
    %c14_365 = arith.constant 14 : index
    %360 = vector.load %arg32[%c0_364, %c14_365] : memref<16x121xf32, #tpu.memory_space<vmem>>, vector<16x85xf32>
    %c7_366 = arith.constant 7 : index
    %c0_367 = arith.constant 0 : index
    %c0_368 = arith.constant 0 : index
    %361 = vector.load %arg7[%c7_366, %c0_367, %c0_368] : memref<16x8x16xf32, #tpu.memory_space<vmem>>, vector<1x8x16xf32>
    %362 = vector.shape_cast %361 : vector<1x8x16xf32> to vector<8x16xf32>
    %cst_369 = arith.constant dense<0.000000e+00> : vector<8x85xf32>
    %363 = tpu.matmul %362, %360, %cst_369 {dimension_numbers = #tpu.dot_dimension_numbers<[1], [0], [0], [1], [0, 0, 1, 1], [], []>} : vector<8x16xf32>, vector<16x85xf32>, vector<8x85xf32> -> vector<8x85xf32>
    %364 = arith.addf %359, %363 : vector<8x85xf32>
    %c0_370 = arith.constant 0 : index
    %c22_371 = arith.constant 22 : index
    %365 = vector.load %arg32[%c0_370, %c22_371] : memref<16x121xf32, #tpu.memory_space<vmem>>, vector<16x85xf32>
    %c8_372 = arith.constant 8 : index
    %c0_373 = arith.constant 0 : index
    %c0_374 = arith.constant 0 : index
    %366 = vector.load %arg7[%c8_372, %c0_373, %c0_374] : memref<16x8x16xf32, #tpu.memory_space<vmem>>, vector<1x8x16xf32>
    %367 = vector.shape_cast %366 : vector<1x8x16xf32> to vector<8x16xf32>
    %cst_375 = arith.constant dense<0.000000e+00> : vector<8x85xf32>
    %368 = tpu.matmul %367, %365, %cst_375 {dimension_numbers = #tpu.dot_dimension_numbers<[1], [0], [0], [1], [0, 0, 1, 1], [], []>} : vector<8x16xf32>, vector<16x85xf32>, vector<8x85xf32> -> vector<8x85xf32>
    %369 = arith.addf %364, %368 : vector<8x85xf32>
    %c0_376 = arith.constant 0 : index
    %c23_377 = arith.constant 23 : index
    %370 = vector.load %arg32[%c0_376, %c23_377] : memref<16x121xf32, #tpu.memory_space<vmem>>, vector<16x85xf32>
    %c9_378 = arith.constant 9 : index
    %c0_379 = arith.constant 0 : index
    %c0_380 = arith.constant 0 : index
    %371 = vector.load %arg7[%c9_378, %c0_379, %c0_380] : memref<16x8x16xf32, #tpu.memory_space<vmem>>, vector<1x8x16xf32>
    %372 = vector.shape_cast %371 : vector<1x8x16xf32> to vector<8x16xf32>
    %cst_381 = arith.constant dense<0.000000e+00> : vector<8x85xf32>
    %373 = tpu.matmul %372, %370, %cst_381 {dimension_numbers = #tpu.dot_dimension_numbers<[1], [0], [0], [1], [0, 0, 1, 1], [], []>} : vector<8x16xf32>, vector<16x85xf32>, vector<8x85xf32> -> vector<8x85xf32>
    %374 = arith.addf %369, %373 : vector<8x85xf32>
    %c0_382 = arith.constant 0 : index
    %c24_383 = arith.constant 24 : index
    %375 = vector.load %arg32[%c0_382, %c24_383] : memref<16x121xf32, #tpu.memory_space<vmem>>, vector<16x85xf32>
    %c10_384 = arith.constant 10 : index
    %c0_385 = arith.constant 0 : index
    %c0_386 = arith.constant 0 : index
    %376 = vector.load %arg7[%c10_384, %c0_385, %c0_386] : memref<16x8x16xf32, #tpu.memory_space<vmem>>, vector<1x8x16xf32>
    %377 = vector.shape_cast %376 : vector<1x8x16xf32> to vector<8x16xf32>
    %cst_387 = arith.constant dense<0.000000e+00> : vector<8x85xf32>
    %378 = tpu.matmul %377, %375, %cst_387 {dimension_numbers = #tpu.dot_dimension_numbers<[1], [0], [0], [1], [0, 0, 1, 1], [], []>} : vector<8x16xf32>, vector<16x85xf32>, vector<8x85xf32> -> vector<8x85xf32>
    %379 = arith.addf %374, %378 : vector<8x85xf32>
    %c0_388 = arith.constant 0 : index
    %c25 = arith.constant 25 : index
    %380 = vector.load %arg32[%c0_388, %c25] : memref<16x121xf32, #tpu.memory_space<vmem>>, vector<16x85xf32>
    %c11_389 = arith.constant 11 : index
    %c0_390 = arith.constant 0 : index
    %c0_391 = arith.constant 0 : index
    %381 = vector.load %arg7[%c11_389, %c0_390, %c0_391] : memref<16x8x16xf32, #tpu.memory_space<vmem>>, vector<1x8x16xf32>
    %382 = vector.shape_cast %381 : vector<1x8x16xf32> to vector<8x16xf32>
    %cst_392 = arith.constant dense<0.000000e+00> : vector<8x85xf32>
    %383 = tpu.matmul %382, %380, %cst_392 {dimension_numbers = #tpu.dot_dimension_numbers<[1], [0], [0], [1], [0, 0, 1, 1], [], []>} : vector<8x16xf32>, vector<16x85xf32>, vector<8x85xf32> -> vector<8x85xf32>
    %384 = arith.addf %379, %383 : vector<8x85xf32>
    %c0_393 = arith.constant 0 : index
    %c33 = arith.constant 33 : index
    %385 = vector.load %arg32[%c0_393, %c33] : memref<16x121xf32, #tpu.memory_space<vmem>>, vector<16x85xf32>
    %c12_394 = arith.constant 12 : index
    %c0_395 = arith.constant 0 : index
    %c0_396 = arith.constant 0 : index
    %386 = vector.load %arg7[%c12_394, %c0_395, %c0_396] : memref<16x8x16xf32, #tpu.memory_space<vmem>>, vector<1x8x16xf32>
    %387 = vector.shape_cast %386 : vector<1x8x16xf32> to vector<8x16xf32>
    %cst_397 = arith.constant dense<0.000000e+00> : vector<8x85xf32>
    %388 = tpu.matmul %387, %385, %cst_397 {dimension_numbers = #tpu.dot_dimension_numbers<[1], [0], [0], [1], [0, 0, 1, 1], [], []>} : vector<8x16xf32>, vector<16x85xf32>, vector<8x85xf32> -> vector<8x85xf32>
    %389 = arith.addf %384, %388 : vector<8x85xf32>
    %c0_398 = arith.constant 0 : index
    %c34 = arith.constant 34 : index
    %390 = vector.load %arg32[%c0_398, %c34] : memref<16x121xf32, #tpu.memory_space<vmem>>, vector<16x85xf32>
    %c13_399 = arith.constant 13 : index
    %c0_400 = arith.constant 0 : index
    %c0_401 = arith.constant 0 : index
    %391 = vector.load %arg7[%c13_399, %c0_400, %c0_401] : memref<16x8x16xf32, #tpu.memory_space<vmem>>, vector<1x8x16xf32>
    %392 = vector.shape_cast %391 : vector<1x8x16xf32> to vector<8x16xf32>
    %cst_402 = arith.constant dense<0.000000e+00> : vector<8x85xf32>
    %393 = tpu.matmul %392, %390, %cst_402 {dimension_numbers = #tpu.dot_dimension_numbers<[1], [0], [0], [1], [0, 0, 1, 1], [], []>} : vector<8x16xf32>, vector<16x85xf32>, vector<8x85xf32> -> vector<8x85xf32>
    %394 = arith.addf %389, %393 : vector<8x85xf32>
    %c0_403 = arith.constant 0 : index
    %c35 = arith.constant 35 : index
    %395 = vector.load %arg32[%c0_403, %c35] : memref<16x121xf32, #tpu.memory_space<vmem>>, vector<16x85xf32>
    %c14_404 = arith.constant 14 : index
    %c0_405 = arith.constant 0 : index
    %c0_406 = arith.constant 0 : index
    %396 = vector.load %arg7[%c14_404, %c0_405, %c0_406] : memref<16x8x16xf32, #tpu.memory_space<vmem>>, vector<1x8x16xf32>
    %397 = vector.shape_cast %396 : vector<1x8x16xf32> to vector<8x16xf32>
    %cst_407 = arith.constant dense<0.000000e+00> : vector<8x85xf32>
    %398 = tpu.matmul %397, %395, %cst_407 {dimension_numbers = #tpu.dot_dimension_numbers<[1], [0], [0], [1], [0, 0, 1, 1], [], []>} : vector<8x16xf32>, vector<16x85xf32>, vector<8x85xf32> -> vector<8x85xf32>
    %399 = arith.addf %394, %398 : vector<8x85xf32>
    %c0_408 = arith.constant 0 : index
    %c36_409 = arith.constant 36 : index
    %400 = vector.load %arg32[%c0_408, %c36_409] : memref<16x121xf32, #tpu.memory_space<vmem>>, vector<16x85xf32>
    %c15_410 = arith.constant 15 : index
    %c0_411 = arith.constant 0 : index
    %c0_412 = arith.constant 0 : index
    %401 = vector.load %arg7[%c15_410, %c0_411, %c0_412] : memref<16x8x16xf32, #tpu.memory_space<vmem>>, vector<1x8x16xf32>
    %402 = vector.shape_cast %401 : vector<1x8x16xf32> to vector<8x16xf32>
    %cst_413 = arith.constant dense<0.000000e+00> : vector<8x85xf32>
    %403 = tpu.matmul %402, %400, %cst_413 {dimension_numbers = #tpu.dot_dimension_numbers<[1], [0], [0], [1], [0, 0, 1, 1], [], []>} : vector<8x16xf32>, vector<16x85xf32>, vector<8x85xf32> -> vector<8x85xf32>
    %404 = arith.addf %399, %403 : vector<8x85xf32>
    %c0_414 = arith.constant 0 : index
    %c0_415 = arith.constant 0 : index
    %405 = vector.load %arg15[%c0_414, %c0_415] : memref<8x1xf32, #tpu.memory_space<vmem>>, vector<8x1xf32>
    %406 = vector.broadcast %405 : vector<8x1xf32> to vector<8x85xf32>
    %407 = arith.addf %404, %406 : vector<8x85xf32>
    %cst_416 = arith.constant 0.000000e+00 : f32
    %408 = vector.broadcast %cst_416 : f32 to vector<8x85xf32>
    %409 = arith.cmpf oge, %407, %408 : vector<8x85xf32>
    %cst_417 = arith.constant 0.00999999977 : f32
    %410 = vector.broadcast %cst_417 : f32 to vector<8x85xf32>
    %411 = arith.mulf %410, %407 : vector<8x85xf32>
    %412 = arith.select %409, %407, %411 : vector<8x85xi1>, vector<8x85xf32>
    %c0_418 = arith.constant 0 : index
    %c0_419 = arith.constant 0 : index
    %413 = vector.load %arg23[%c0_418, %c0_419] : memref<85x361xf32, #tpu.memory_space<vmem>>, vector<85x361xf32>
    %cst_420 = arith.constant dense<0.000000e+00> : vector<8x361xf32>
    %414 = tpu.matmul %412, %413, %cst_420 {dimension_numbers = #tpu.dot_dimension_numbers<[1], [0], [0], [1], [0, 0, 1, 1], [], []>} : vector<8x85xf32>, vector<85x361xf32>, vector<8x361xf32> -> vector<8x361xf32>
    %c0_421 = arith.constant 0 : index
    %c0_422 = arith.constant 0 : index
    %415 = vector.load %arg33[%c0_421, %c0_422] : memref<8x361xf32, #tpu.memory_space<vmem>>, vector<8x361xf32>
    tpu.vector_store %arg33[%c0_421, %c0_422], %414 {strides = array<i32>} : memref<8x361xf32, #tpu.memory_space<vmem>>, vector<8x361xf32>,
    %c0_423 = arith.constant 0 : index
    %c0_424 = arith.constant 0 : index
    %416 = vector.load %arg33[%c0_423, %c0_424] : memref<8x361xf32, #tpu.memory_space<vmem>>, vector<8x301xf32>
    %c0_425 = arith.constant 0 : index
    %c0_426 = arith.constant 0 : index
    %c0_427 = arith.constant 0 : index
    %417 = vector.load %arg8[%c0_425, %c0_426, %c0_427] : memref<16x4x8xf32, #tpu.memory_space<vmem>>, vector<1x4x8xf32>
    %418 = vector.shape_cast %417 : vector<1x4x8xf32> to vector<4x8xf32>
    %cst_428 = arith.constant dense<0.000000e+00> : vector<4x301xf32>
    %419 = tpu.matmul %418, %416, %cst_428 {dimension_numbers = #tpu.dot_dimension_numbers<[1], [0], [0], [1], [0, 0, 1, 1], [], []>} : vector<4x8xf32>, vector<8x301xf32>, vector<4x301xf32> -> vector<4x301xf32>
    %c0_429 = arith.constant 0 : index
    %c1_430 = arith.constant 1 : index
    %420 = vector.load %arg33[%c0_429, %c1_430] : memref<8x361xf32, #tpu.memory_space<vmem>>, vector<8x301xf32>
    %c1_431 = arith.constant 1 : index
    %c0_432 = arith.constant 0 : index
    %c0_433 = arith.constant 0 : index
    %421 = vector.load %arg8[%c1_431, %c0_432, %c0_433] : memref<16x4x8xf32, #tpu.memory_space<vmem>>, vector<1x4x8xf32>
    %422 = vector.shape_cast %421 : vector<1x4x8xf32> to vector<4x8xf32>
    %cst_434 = arith.constant dense<0.000000e+00> : vector<4x301xf32>
    %423 = tpu.matmul %422, %420, %cst_434 {dimension_numbers = #tpu.dot_dimension_numbers<[1], [0], [0], [1], [0, 0, 1, 1], [], []>} : vector<4x8xf32>, vector<8x301xf32>, vector<4x301xf32> -> vector<4x301xf32>
    %424 = arith.addf %419, %423 : vector<4x301xf32>
    %c0_435 = arith.constant 0 : index
    %c2_436 = arith.constant 2 : index
    %425 = vector.load %arg33[%c0_435, %c2_436] : memref<8x361xf32, #tpu.memory_space<vmem>>, vector<8x301xf32>
    %c2_437 = arith.constant 2 : index
    %c0_438 = arith.constant 0 : index
    %c0_439 = arith.constant 0 : index
    %426 = vector.load %arg8[%c2_437, %c0_438, %c0_439] : memref<16x4x8xf32, #tpu.memory_space<vmem>>, vector<1x4x8xf32>
    %427 = vector.shape_cast %426 : vector<1x4x8xf32> to vector<4x8xf32>
    %cst_440 = arith.constant dense<0.000000e+00> : vector<4x301xf32>
    %428 = tpu.matmul %427, %425, %cst_440 {dimension_numbers = #tpu.dot_dimension_numbers<[1], [0], [0], [1], [0, 0, 1, 1], [], []>} : vector<4x8xf32>, vector<8x301xf32>, vector<4x301xf32> -> vector<4x301xf32>
    %429 = arith.addf %424, %428 : vector<4x301xf32>
    %c0_441 = arith.constant 0 : index
    %c3_442 = arith.constant 3 : index
    %430 = vector.load %arg33[%c0_441, %c3_442] : memref<8x361xf32, #tpu.memory_space<vmem>>, vector<8x301xf32>
    %c3_443 = arith.constant 3 : index
    %c0_444 = arith.constant 0 : index
    %c0_445 = arith.constant 0 : index
    %431 = vector.load %arg8[%c3_443, %c0_444, %c0_445] : memref<16x4x8xf32, #tpu.memory_space<vmem>>, vector<1x4x8xf32>
    %432 = vector.shape_cast %431 : vector<1x4x8xf32> to vector<4x8xf32>
    %cst_446 = arith.constant dense<0.000000e+00> : vector<4x301xf32>
    %433 = tpu.matmul %432, %430, %cst_446 {dimension_numbers = #tpu.dot_dimension_numbers<[1], [0], [0], [1], [0, 0, 1, 1], [], []>} : vector<4x8xf32>, vector<8x301xf32>, vector<4x301xf32> -> vector<4x301xf32>
    %434 = arith.addf %429, %433 : vector<4x301xf32>
    %c0_447 = arith.constant 0 : index
    %c19_448 = arith.constant 19 : index
    %435 = vector.load %arg33[%c0_447, %c19_448] : memref<8x361xf32, #tpu.memory_space<vmem>>, vector<8x301xf32>
    %c4_449 = arith.constant 4 : index
    %c0_450 = arith.constant 0 : index
    %c0_451 = arith.constant 0 : index
    %436 = vector.load %arg8[%c4_449, %c0_450, %c0_451] : memref<16x4x8xf32, #tpu.memory_space<vmem>>, vector<1x4x8xf32>
    %437 = vector.shape_cast %436 : vector<1x4x8xf32> to vector<4x8xf32>
    %cst_452 = arith.constant dense<0.000000e+00> : vector<4x301xf32>
    %438 = tpu.matmul %437, %435, %cst_452 {dimension_numbers = #tpu.dot_dimension_numbers<[1], [0], [0], [1], [0, 0, 1, 1], [], []>} : vector<4x8xf32>, vector<8x301xf32>, vector<4x301xf32> -> vector<4x301xf32>
    %439 = arith.addf %434, %438 : vector<4x301xf32>
    %c0_453 = arith.constant 0 : index
    %c20_454 = arith.constant 20 : index
    %440 = vector.load %arg33[%c0_453, %c20_454] : memref<8x361xf32, #tpu.memory_space<vmem>>, vector<8x301xf32>
    %c5_455 = arith.constant 5 : index
    %c0_456 = arith.constant 0 : index
    %c0_457 = arith.constant 0 : index
    %441 = vector.load %arg8[%c5_455, %c0_456, %c0_457] : memref<16x4x8xf32, #tpu.memory_space<vmem>>, vector<1x4x8xf32>
    %442 = vector.shape_cast %441 : vector<1x4x8xf32> to vector<4x8xf32>
    %cst_458 = arith.constant dense<0.000000e+00> : vector<4x301xf32>
    %443 = tpu.matmul %442, %440, %cst_458 {dimension_numbers = #tpu.dot_dimension_numbers<[1], [0], [0], [1], [0, 0, 1, 1], [], []>} : vector<4x8xf32>, vector<8x301xf32>, vector<4x301xf32> -> vector<4x301xf32>
    %444 = arith.addf %439, %443 : vector<4x301xf32>
    %c0_459 = arith.constant 0 : index
    %c21_460 = arith.constant 21 : index
    %445 = vector.load %arg33[%c0_459, %c21_460] : memref<8x361xf32, #tpu.memory_space<vmem>>, vector<8x301xf32>
    %c6_461 = arith.constant 6 : index
    %c0_462 = arith.constant 0 : index
    %c0_463 = arith.constant 0 : index
    %446 = vector.load %arg8[%c6_461, %c0_462, %c0_463] : memref<16x4x8xf32, #tpu.memory_space<vmem>>, vector<1x4x8xf32>
    %447 = vector.shape_cast %446 : vector<1x4x8xf32> to vector<4x8xf32>
    %cst_464 = arith.constant dense<0.000000e+00> : vector<4x301xf32>
    %448 = tpu.matmul %447, %445, %cst_464 {dimension_numbers = #tpu.dot_dimension_numbers<[1], [0], [0], [1], [0, 0, 1, 1], [], []>} : vector<4x8xf32>, vector<8x301xf32>, vector<4x301xf32> -> vector<4x301xf32>
    %449 = arith.addf %444, %448 : vector<4x301xf32>
    %c0_465 = arith.constant 0 : index
    %c22_466 = arith.constant 22 : index
    %450 = vector.load %arg33[%c0_465, %c22_466] : memref<8x361xf32, #tpu.memory_space<vmem>>, vector<8x301xf32>
    %c7_467 = arith.constant 7 : index
    %c0_468 = arith.constant 0 : index
    %c0_469 = arith.constant 0 : index
    %451 = vector.load %arg8[%c7_467, %c0_468, %c0_469] : memref<16x4x8xf32, #tpu.memory_space<vmem>>, vector<1x4x8xf32>
    %452 = vector.shape_cast %451 : vector<1x4x8xf32> to vector<4x8xf32>
    %cst_470 = arith.constant dense<0.000000e+00> : vector<4x301xf32>
    %453 = tpu.matmul %452, %450, %cst_470 {dimension_numbers = #tpu.dot_dimension_numbers<[1], [0], [0], [1], [0, 0, 1, 1], [], []>} : vector<4x8xf32>, vector<8x301xf32>, vector<4x301xf32> -> vector<4x301xf32>
    %454 = arith.addf %449, %453 : vector<4x301xf32>
    %c0_471 = arith.constant 0 : index
    %c38_472 = arith.constant 38 : index
    %455 = vector.load %arg33[%c0_471, %c38_472] : memref<8x361xf32, #tpu.memory_space<vmem>>, vector<8x301xf32>
    %c8_473 = arith.constant 8 : index
    %c0_474 = arith.constant 0 : index
    %c0_475 = arith.constant 0 : index
    %456 = vector.load %arg8[%c8_473, %c0_474, %c0_475] : memref<16x4x8xf32, #tpu.memory_space<vmem>>, vector<1x4x8xf32>
    %457 = vector.shape_cast %456 : vector<1x4x8xf32> to vector<4x8xf32>
    %cst_476 = arith.constant dense<0.000000e+00> : vector<4x301xf32>
    %458 = tpu.matmul %457, %455, %cst_476 {dimension_numbers = #tpu.dot_dimension_numbers<[1], [0], [0], [1], [0, 0, 1, 1], [], []>} : vector<4x8xf32>, vector<8x301xf32>, vector<4x301xf32> -> vector<4x301xf32>
    %459 = arith.addf %454, %458 : vector<4x301xf32>
    %c0_477 = arith.constant 0 : index
    %c39 = arith.constant 39 : index
    %460 = vector.load %arg33[%c0_477, %c39] : memref<8x361xf32, #tpu.memory_space<vmem>>, vector<8x301xf32>
    %c9_478 = arith.constant 9 : index
    %c0_479 = arith.constant 0 : index
    %c0_480 = arith.constant 0 : index
    %461 = vector.load %arg8[%c9_478, %c0_479, %c0_480] : memref<16x4x8xf32, #tpu.memory_space<vmem>>, vector<1x4x8xf32>
    %462 = vector.shape_cast %461 : vector<1x4x8xf32> to vector<4x8xf32>
    %cst_481 = arith.constant dense<0.000000e+00> : vector<4x301xf32>
    %463 = tpu.matmul %462, %460, %cst_481 {dimension_numbers = #tpu.dot_dimension_numbers<[1], [0], [0], [1], [0, 0, 1, 1], [], []>} : vector<4x8xf32>, vector<8x301xf32>, vector<4x301xf32> -> vector<4x301xf32>
    %464 = arith.addf %459, %463 : vector<4x301xf32>
    %c0_482 = arith.constant 0 : index
    %c40 = arith.constant 40 : index
    %465 = vector.load %arg33[%c0_482, %c40] : memref<8x361xf32, #tpu.memory_space<vmem>>, vector<8x301xf32>
    %c10_483 = arith.constant 10 : index
    %c0_484 = arith.constant 0 : index
    %c0_485 = arith.constant 0 : index
    %466 = vector.load %arg8[%c10_483, %c0_484, %c0_485] : memref<16x4x8xf32, #tpu.memory_space<vmem>>, vector<1x4x8xf32>
    %467 = vector.shape_cast %466 : vector<1x4x8xf32> to vector<4x8xf32>
    %cst_486 = arith.constant dense<0.000000e+00> : vector<4x301xf32>
    %468 = tpu.matmul %467, %465, %cst_486 {dimension_numbers = #tpu.dot_dimension_numbers<[1], [0], [0], [1], [0, 0, 1, 1], [], []>} : vector<4x8xf32>, vector<8x301xf32>, vector<4x301xf32> -> vector<4x301xf32>
    %469 = arith.addf %464, %468 : vector<4x301xf32>
    %c0_487 = arith.constant 0 : index
    %c41 = arith.constant 41 : index
    %470 = vector.load %arg33[%c0_487, %c41] : memref<8x361xf32, #tpu.memory_space<vmem>>, vector<8x301xf32>
    %c11_488 = arith.constant 11 : index
    %c0_489 = arith.constant 0 : index
    %c0_490 = arith.constant 0 : index
    %471 = vector.load %arg8[%c11_488, %c0_489, %c0_490] : memref<16x4x8xf32, #tpu.memory_space<vmem>>, vector<1x4x8xf32>
    %472 = vector.shape_cast %471 : vector<1x4x8xf32> to vector<4x8xf32>
    %cst_491 = arith.constant dense<0.000000e+00> : vector<4x301xf32>
    %473 = tpu.matmul %472, %470, %cst_491 {dimension_numbers = #tpu.dot_dimension_numbers<[1], [0], [0], [1], [0, 0, 1, 1], [], []>} : vector<4x8xf32>, vector<8x301xf32>, vector<4x301xf32> -> vector<4x301xf32>
    %474 = arith.addf %469, %473 : vector<4x301xf32>
    %c0_492 = arith.constant 0 : index
    %c57 = arith.constant 57 : index
    %475 = vector.load %arg33[%c0_492, %c57] : memref<8x361xf32, #tpu.memory_space<vmem>>, vector<8x301xf32>
    %c12_493 = arith.constant 12 : index
    %c0_494 = arith.constant 0 : index
    %c0_495 = arith.constant 0 : index
    %476 = vector.load %arg8[%c12_493, %c0_494, %c0_495] : memref<16x4x8xf32, #tpu.memory_space<vmem>>, vector<1x4x8xf32>
    %477 = vector.shape_cast %476 : vector<1x4x8xf32> to vector<4x8xf32>
    %cst_496 = arith.constant dense<0.000000e+00> : vector<4x301xf32>
    %478 = tpu.matmul %477, %475, %cst_496 {dimension_numbers = #tpu.dot_dimension_numbers<[1], [0], [0], [1], [0, 0, 1, 1], [], []>} : vector<4x8xf32>, vector<8x301xf32>, vector<4x301xf32> -> vector<4x301xf32>
    %479 = arith.addf %474, %478 : vector<4x301xf32>
    %c0_497 = arith.constant 0 : index
    %c58 = arith.constant 58 : index
    %480 = vector.load %arg33[%c0_497, %c58] : memref<8x361xf32, #tpu.memory_space<vmem>>, vector<8x301xf32>
    %c13_498 = arith.constant 13 : index
    %c0_499 = arith.constant 0 : index
    %c0_500 = arith.constant 0 : index
    %481 = vector.load %arg8[%c13_498, %c0_499, %c0_500] : memref<16x4x8xf32, #tpu.memory_space<vmem>>, vector<1x4x8xf32>
    %482 = vector.shape_cast %481 : vector<1x4x8xf32> to vector<4x8xf32>
    %cst_501 = arith.constant dense<0.000000e+00> : vector<4x301xf32>
    %483 = tpu.matmul %482, %480, %cst_501 {dimension_numbers = #tpu.dot_dimension_numbers<[1], [0], [0], [1], [0, 0, 1, 1], [], []>} : vector<4x8xf32>, vector<8x301xf32>, vector<4x301xf32> -> vector<4x301xf32>
    %484 = arith.addf %479, %483 : vector<4x301xf32>
    %c0_502 = arith.constant 0 : index
    %c59 = arith.constant 59 : index
    %485 = vector.load %arg33[%c0_502, %c59] : memref<8x361xf32, #tpu.memory_space<vmem>>, vector<8x301xf32>
    %c14_503 = arith.constant 14 : index
    %c0_504 = arith.constant 0 : index
    %c0_505 = arith.constant 0 : index
    %486 = vector.load %arg8[%c14_503, %c0_504, %c0_505] : memref<16x4x8xf32, #tpu.memory_space<vmem>>, vector<1x4x8xf32>
    %487 = vector.shape_cast %486 : vector<1x4x8xf32> to vector<4x8xf32>
    %cst_506 = arith.constant dense<0.000000e+00> : vector<4x301xf32>
    %488 = tpu.matmul %487, %485, %cst_506 {dimension_numbers = #tpu.dot_dimension_numbers<[1], [0], [0], [1], [0, 0, 1, 1], [], []>} : vector<4x8xf32>, vector<8x301xf32>, vector<4x301xf32> -> vector<4x301xf32>
    %489 = arith.addf %484, %488 : vector<4x301xf32>
    %c0_507 = arith.constant 0 : index
    %c60 = arith.constant 60 : index
    %490 = vector.load %arg33[%c0_507, %c60] : memref<8x361xf32, #tpu.memory_space<vmem>>, vector<8x301xf32>
    %c15_508 = arith.constant 15 : index
    %c0_509 = arith.constant 0 : index
    %c0_510 = arith.constant 0 : index
    %491 = vector.load %arg8[%c15_508, %c0_509, %c0_510] : memref<16x4x8xf32, #tpu.memory_space<vmem>>, vector<1x4x8xf32>
    %492 = vector.shape_cast %491 : vector<1x4x8xf32> to vector<4x8xf32>
    %cst_511 = arith.constant dense<0.000000e+00> : vector<4x301xf32>
    %493 = tpu.matmul %492, %490, %cst_511 {dimension_numbers = #tpu.dot_dimension_numbers<[1], [0], [0], [1], [0, 0, 1, 1], [], []>} : vector<4x8xf32>, vector<8x301xf32>, vector<4x301xf32> -> vector<4x301xf32>
    %494 = arith.addf %489, %493 : vector<4x301xf32>
    %c0_512 = arith.constant 0 : index
    %c0_513 = arith.constant 0 : index
    %495 = vector.load %arg16[%c0_512, %c0_513] : memref<4x1xf32, #tpu.memory_space<vmem>>, vector<4x1xf32>
    %496 = vector.broadcast %495 : vector<4x1xf32> to vector<4x301xf32>
    %497 = arith.addf %494, %496 : vector<4x301xf32>
    %cst_514 = arith.constant 0.000000e+00 : f32
    %498 = vector.broadcast %cst_514 : f32 to vector<4x301xf32>
    %499 = arith.cmpf oge, %497, %498 : vector<4x301xf32>
    %cst_515 = arith.constant 0.00999999977 : f32
    %500 = vector.broadcast %cst_515 : f32 to vector<4x301xf32>
    %501 = arith.mulf %500, %497 : vector<4x301xf32>
    %502 = arith.select %499, %497, %501 : vector<4x301xi1>, vector<4x301xf32>
    %c0_516 = arith.constant 0 : index
    %c0_517 = arith.constant 0 : index
    %503 = vector.load %arg24[%c0_516, %c0_517] : memref<301x324xf32, #tpu.memory_space<vmem>>, vector<301x324xf32>
    %cst_518 = arith.constant dense<0.000000e+00> : vector<4x324xf32>
    %504 = tpu.matmul %502, %503, %cst_518 {dimension_numbers = #tpu.dot_dimension_numbers<[1], [0], [0], [1], [0, 0, 1, 1], [], []>} : vector<4x301xf32>, vector<301x324xf32>, vector<4x324xf32> -> vector<4x324xf32>
    %c0_519 = arith.constant 0 : index
    %c0_520 = arith.constant 0 : index
    %505 = vector.load %arg34[%c0_519, %c0_520] : memref<4x324xf32, #tpu.memory_space<vmem>>, vector<4x324xf32>
    tpu.vector_store %arg34[%c0_519, %c0_520], %504 {strides = array<i32>} : memref<4x324xf32, #tpu.memory_space<vmem>>, vector<4x324xf32>,
    %c0_521 = arith.constant 0 : index
    %c0_522 = arith.constant 0 : index
    %506 = vector.load %arg34[%c0_521, %c0_522] : memref<4x324xf32, #tpu.memory_space<vmem>>, vector<4x286xf32>
    %c0_523 = arith.constant 0 : index
    %c0_524 = arith.constant 0 : index
    %c0_525 = arith.constant 0 : index
    %507 = vector.load %arg9[%c0_523, %c0_524, %c0_525] : memref<9x1x4xf32, #tpu.memory_space<vmem>>, vector<1x1x4xf32>
    %508 = vector.shape_cast %507 : vector<1x1x4xf32> to vector<1x4xf32>
    %cst_526 = arith.constant dense<0.000000e+00> : vector<1x286xf32>
    %509 = tpu.matmul %508, %506, %cst_526 {dimension_numbers = #tpu.dot_dimension_numbers<[1], [0], [0], [1], [0, 0, 1, 1], [], []>} : vector<1x4xf32>, vector<4x286xf32>, vector<1x286xf32> -> vector<1x286xf32>
    %c0_527 = arith.constant 0 : index
    %c1_528 = arith.constant 1 : index
    %510 = vector.load %arg34[%c0_527, %c1_528] : memref<4x324xf32, #tpu.memory_space<vmem>>, vector<4x286xf32>
    %c1_529 = arith.constant 1 : index
    %c0_530 = arith.constant 0 : index
    %c0_531 = arith.constant 0 : index
    %511 = vector.load %arg9[%c1_529, %c0_530, %c0_531] : memref<9x1x4xf32, #tpu.memory_space<vmem>>, vector<1x1x4xf32>
    %512 = vector.shape_cast %511 : vector<1x1x4xf32> to vector<1x4xf32>
    %cst_532 = arith.constant dense<0.000000e+00> : vector<1x286xf32>
    %513 = tpu.matmul %512, %510, %cst_532 {dimension_numbers = #tpu.dot_dimension_numbers<[1], [0], [0], [1], [0, 0, 1, 1], [], []>} : vector<1x4xf32>, vector<4x286xf32>, vector<1x286xf32> -> vector<1x286xf32>
    %514 = arith.addf %509, %513 : vector<1x286xf32>
    %c0_533 = arith.constant 0 : index
    %c2_534 = arith.constant 2 : index
    %515 = vector.load %arg34[%c0_533, %c2_534] : memref<4x324xf32, #tpu.memory_space<vmem>>, vector<4x286xf32>
    %c2_535 = arith.constant 2 : index
    %c0_536 = arith.constant 0 : index
    %c0_537 = arith.constant 0 : index
    %516 = vector.load %arg9[%c2_535, %c0_536, %c0_537] : memref<9x1x4xf32, #tpu.memory_space<vmem>>, vector<1x1x4xf32>
    %517 = vector.shape_cast %516 : vector<1x1x4xf32> to vector<1x4xf32>
    %cst_538 = arith.constant dense<0.000000e+00> : vector<1x286xf32>
    %518 = tpu.matmul %517, %515, %cst_538 {dimension_numbers = #tpu.dot_dimension_numbers<[1], [0], [0], [1], [0, 0, 1, 1], [], []>} : vector<1x4xf32>, vector<4x286xf32>, vector<1x286xf32> -> vector<1x286xf32>
    %519 = arith.addf %514, %518 : vector<1x286xf32>
    %c0_539 = arith.constant 0 : index
    %c18_540 = arith.constant 18 : index
    %520 = vector.load %arg34[%c0_539, %c18_540] : memref<4x324xf32, #tpu.memory_space<vmem>>, vector<4x286xf32>
    %c3_541 = arith.constant 3 : index
    %c0_542 = arith.constant 0 : index
    %c0_543 = arith.constant 0 : index
    %521 = vector.load %arg9[%c3_541, %c0_542, %c0_543] : memref<9x1x4xf32, #tpu.memory_space<vmem>>, vector<1x1x4xf32>
    %522 = vector.shape_cast %521 : vector<1x1x4xf32> to vector<1x4xf32>
    %cst_544 = arith.constant dense<0.000000e+00> : vector<1x286xf32>
    %523 = tpu.matmul %522, %520, %cst_544 {dimension_numbers = #tpu.dot_dimension_numbers<[1], [0], [0], [1], [0, 0, 1, 1], [], []>} : vector<1x4xf32>, vector<4x286xf32>, vector<1x286xf32> -> vector<1x286xf32>
    %524 = arith.addf %519, %523 : vector<1x286xf32>
    %c0_545 = arith.constant 0 : index
    %c19_546 = arith.constant 19 : index
    %525 = vector.load %arg34[%c0_545, %c19_546] : memref<4x324xf32, #tpu.memory_space<vmem>>, vector<4x286xf32>
    %c4_547 = arith.constant 4 : index
    %c0_548 = arith.constant 0 : index
    %c0_549 = arith.constant 0 : index
    %526 = vector.load %arg9[%c4_547, %c0_548, %c0_549] : memref<9x1x4xf32, #tpu.memory_space<vmem>>, vector<1x1x4xf32>
    %527 = vector.shape_cast %526 : vector<1x1x4xf32> to vector<1x4xf32>
    %cst_550 = arith.constant dense<0.000000e+00> : vector<1x286xf32>
    %528 = tpu.matmul %527, %525, %cst_550 {dimension_numbers = #tpu.dot_dimension_numbers<[1], [0], [0], [1], [0, 0, 1, 1], [], []>} : vector<1x4xf32>, vector<4x286xf32>, vector<1x286xf32> -> vector<1x286xf32>
    %529 = arith.addf %524, %528 : vector<1x286xf32>
    %c0_551 = arith.constant 0 : index
    %c20_552 = arith.constant 20 : index
    %530 = vector.load %arg34[%c0_551, %c20_552] : memref<4x324xf32, #tpu.memory_space<vmem>>, vector<4x286xf32>
    %c5_553 = arith.constant 5 : index
    %c0_554 = arith.constant 0 : index
    %c0_555 = arith.constant 0 : index
    %531 = vector.load %arg9[%c5_553, %c0_554, %c0_555] : memref<9x1x4xf32, #tpu.memory_space<vmem>>, vector<1x1x4xf32>
    %532 = vector.shape_cast %531 : vector<1x1x4xf32> to vector<1x4xf32>
    %cst_556 = arith.constant dense<0.000000e+00> : vector<1x286xf32>
    %533 = tpu.matmul %532, %530, %cst_556 {dimension_numbers = #tpu.dot_dimension_numbers<[1], [0], [0], [1], [0, 0, 1, 1], [], []>} : vector<1x4xf32>, vector<4x286xf32>, vector<1x286xf32> -> vector<1x286xf32>
    %534 = arith.addf %529, %533 : vector<1x286xf32>
    %c0_557 = arith.constant 0 : index
    %c36_558 = arith.constant 36 : index
    %535 = vector.load %arg34[%c0_557, %c36_558] : memref<4x324xf32, #tpu.memory_space<vmem>>, vector<4x286xf32>
    %c6_559 = arith.constant 6 : index
    %c0_560 = arith.constant 0 : index
    %c0_561 = arith.constant 0 : index
    %536 = vector.load %arg9[%c6_559, %c0_560, %c0_561] : memref<9x1x4xf32, #tpu.memory_space<vmem>>, vector<1x1x4xf32>
    %537 = vector.shape_cast %536 : vector<1x1x4xf32> to vector<1x4xf32>
    %cst_562 = arith.constant dense<0.000000e+00> : vector<1x286xf32>
    %538 = tpu.matmul %537, %535, %cst_562 {dimension_numbers = #tpu.dot_dimension_numbers<[1], [0], [0], [1], [0, 0, 1, 1], [], []>} : vector<1x4xf32>, vector<4x286xf32>, vector<1x286xf32> -> vector<1x286xf32>
    %539 = arith.addf %534, %538 : vector<1x286xf32>
    %c0_563 = arith.constant 0 : index
    %c37_564 = arith.constant 37 : index
    %540 = vector.load %arg34[%c0_563, %c37_564] : memref<4x324xf32, #tpu.memory_space<vmem>>, vector<4x286xf32>
    %c7_565 = arith.constant 7 : index
    %c0_566 = arith.constant 0 : index
    %c0_567 = arith.constant 0 : index
    %541 = vector.load %arg9[%c7_565, %c0_566, %c0_567] : memref<9x1x4xf32, #tpu.memory_space<vmem>>, vector<1x1x4xf32>
    %542 = vector.shape_cast %541 : vector<1x1x4xf32> to vector<1x4xf32>
    %cst_568 = arith.constant dense<0.000000e+00> : vector<1x286xf32>
    %543 = tpu.matmul %542, %540, %cst_568 {dimension_numbers = #tpu.dot_dimension_numbers<[1], [0], [0], [1], [0, 0, 1, 1], [], []>} : vector<1x4xf32>, vector<4x286xf32>, vector<1x286xf32> -> vector<1x286xf32>
    %544 = arith.addf %539, %543 : vector<1x286xf32>
    %c0_569 = arith.constant 0 : index
    %c38_570 = arith.constant 38 : index
    %545 = vector.load %arg34[%c0_569, %c38_570] : memref<4x324xf32, #tpu.memory_space<vmem>>, vector<4x286xf32>
    %c8_571 = arith.constant 8 : index
    %c0_572 = arith.constant 0 : index
    %c0_573 = arith.constant 0 : index
    %546 = vector.load %arg9[%c8_571, %c0_572, %c0_573] : memref<9x1x4xf32, #tpu.memory_space<vmem>>, vector<1x1x4xf32>
    %547 = vector.shape_cast %546 : vector<1x1x4xf32> to vector<1x4xf32>
    %cst_574 = arith.constant dense<0.000000e+00> : vector<1x286xf32>
    %548 = tpu.matmul %547, %545, %cst_574 {dimension_numbers = #tpu.dot_dimension_numbers<[1], [0], [0], [1], [0, 0, 1, 1], [], []>} : vector<1x4xf32>, vector<4x286xf32>, vector<1x286xf32> -> vector<1x286xf32>
    %549 = arith.addf %544, %548 : vector<1x286xf32>
    %c0_575 = arith.constant 0 : index
    %c0_576 = arith.constant 0 : index
    %550 = vector.load %arg17[%c0_575, %c0_576] : memref<1x1xf32, #tpu.memory_space<vmem>>, vector<1x1xf32>
    %551 = vector.broadcast %550 : vector<1x1xf32> to vector<1x286xf32>
    %552 = arith.addf %549, %551 : vector<1x286xf32>
    %553 = arith.negf %552 : vector<1x286xf32>
    %554 = math.exp %553 : vector<1x286xf32>
    %cst_577 = arith.constant 1.000000e+00 : f32
    %555 = vector.broadcast %cst_577 : f32 to vector<1x286xf32>
    %556 = arith.addf %555, %554 : vector<1x286xf32>
    %557 = arith.divf %555, %556 : vector<1x286xf32>
    %c0_578 = arith.constant 0 : index
    %c0_579 = arith.constant 0 : index
    %558 = vector.load %arg25[%c0_578, %c0_579] : memref<286x256xf32, #tpu.memory_space<vmem>>, vector<286x256xf32>
    %cst_580 = arith.constant dense<0.000000e+00> : vector<1x256xf32>
    %559 = tpu.matmul %557, %558, %cst_580 {dimension_numbers = #tpu.dot_dimension_numbers<[1], [0], [0], [1], [0, 0, 1, 1], [], []>} : vector<1x286xf32>, vector<286x256xf32>, vector<1x256xf32> -> vector<1x256xf32>
    %c0_581 = arith.constant 0 : index
    %c0_582 = arith.constant 0 : index
    %c0_583 = arith.constant 0 : index
    %560 = vector.load %arg26[%c0_581, %c0_582, %c0_583] : memref<1x1x256xf32, #tpu.memory_space<vmem>>, vector<1x1x256xf32>
    %561 = vector.shape_cast %560 : vector<1x1x256xf32> to vector<1x256xf32>
    %562 = vector.shape_cast %559 : vector<1x256xf32> to vector<1x1x256xf32>
    tpu.vector_store %arg26[%c0_581, %c0_582, %c0_583], %562 {strides = array<i32>} : memref<1x1x256xf32, #tpu.memory_space<vmem>>, vector<1x1x256xf32>,
    return
  }
  func.func @transform_0(%arg0: i32) -> (i32, i32, i32) {
    %c0_i32 = arith.constant 0 : i32
    %c0_i32_0 = arith.constant 0 : i32
    %c0_i32_1 = arith.constant 0 : i32
    return %arg0, %c0_i32, %c0_i32_0 : i32, i32, i32
  }
  func.func @transform_1(%arg0: i32) -> (i32, i32, i32) {
    %c0_i32 = arith.constant 0 : i32
    %c0_i32_0 = arith.constant 0 : i32
    %c0_i32_1 = arith.constant 0 : i32
    %c0_i32_2 = arith.constant 0 : i32
    return %c0_i32, %c0_i32_0, %c0_i32_1 : i32, i32, i32
  }
  func.func @transform_2(%arg0: i32) -> (i32, i32, i32) {
    %c0_i32 = arith.constant 0 : i32
    %c0_i32_0 = arith.constant 0 : i32
    %c0_i32_1 = arith.constant 0 : i32
    %c0_i32_2 = arith.constant 0 : i32
    return %c0_i32, %c0_i32_0, %c0_i32_1 : i32, i32, i32
  }
  func.func @transform_3(%arg0: i32) -> (i32, i32, i32) {
    %c0_i32 = arith.constant 0 : i32
    %c0_i32_0 = arith.constant 0 : i32
    %c0_i32_1 = arith.constant 0 : i32
    %c0_i32_2 = arith.constant 0 : i32
    return %c0_i32, %c0_i32_0, %c0_i32_1 : i32, i32, i32
  }
  func.func @transform_4(%arg0: i32) -> (i32, i32, i32) {
    %c0_i32 = arith.constant 0 : i32
    %c0_i32_0 = arith.constant 0 : i32
    %c0_i32_1 = arith.constant 0 : i32
    %c0_i32_2 = arith.constant 0 : i32
    return %c0_i32, %c0_i32_0, %c0_i32_1 : i32, i32, i32
  }
  func.func @transform_5(%arg0: i32) -> (i32, i32, i32) {
    %c0_i32 = arith.constant 0 : i32
    %c0_i32_0 = arith.constant 0 : i32
    %c0_i32_1 = arith.constant 0 : i32
    %c0_i32_2 = arith.constant 0 : i32
    return %c0_i32, %c0_i32_0, %c0_i32_1 : i32, i32, i32
  }
  func.func @transform_6(%arg0: i32) -> (i32, i32, i32) {
    %c0_i32 = arith.constant 0 : i32
    %c0_i32_0 = arith.constant 0 : i32
    %c0_i32_1 = arith.constant 0 : i32
    %c0_i32_2 = arith.constant 0 : i32
    return %c0_i32, %c0_i32_0, %c0_i32_1 : i32, i32, i32
  }
  func.func @transform_7(%arg0: i32) -> (i32, i32, i32) {
    %c0_i32 = arith.constant 0 : i32
    %c0_i32_0 = arith.constant 0 : i32
    %c0_i32_1 = arith.constant 0 : i32
    %c0_i32_2 = arith.constant 0 : i32
    return %c0_i32, %c0_i32_0, %c0_i32_1 : i32, i32, i32
  }
  func.func @transform_8(%arg0: i32) -> (i32, i32, i32) {
    %c0_i32 = arith.constant 0 : i32
    %c0_i32_0 = arith.constant 0 : i32
    %c0_i32_1 = arith.constant 0 : i32
    %c0_i32_2 = arith.constant 0 : i32
    return %c0_i32, %c0_i32_0, %c0_i32_1 : i32, i32, i32
  }
  func.func @transform_9(%arg0: i32) -> (i32, i32) {
    %c0_i32 = arith.constant 0 : i32
    %c0_i32_0 = arith.constant 0 : i32
    %c0_i32_1 = arith.constant 0 : i32
    return %c0_i32, %c0_i32_0 : i32, i32
  }
  func.func @transform_10(%arg0: i32) -> (i32, i32) {
    %c0_i32 = arith.constant 0 : i32
    %c0_i32_0 = arith.constant 0 : i32
    %c0_i32_1 = arith.constant 0 : i32
    return %c0_i32, %c0_i32_0 : i32, i32
  }
  func.func @transform_11(%arg0: i32) -> (i32, i32) {
    %c0_i32 = arith.constant 0 : i32
    %c0_i32_0 = arith.constant 0 : i32
    %c0_i32_1 = arith.constant 0 : i32
    return %c0_i32, %c0_i32_0 : i32, i32
  }
  func.func @transform_12(%arg0: i32) -> (i32, i32) {
    %c0_i32 = arith.constant 0 : i32
    %c0_i32_0 = arith.constant 0 : i32
    %c0_i32_1 = arith.constant 0 : i32
    return %c0_i32, %c0_i32_0 : i32, i32
  }
  func.func @transform_13(%arg0: i32) -> (i32, i32) {
    %c0_i32 = arith.constant 0 : i32
    %c0_i32_0 = arith.constant 0 : i32
    %c0_i32_1 = arith.constant 0 : i32
    return %c0_i32, %c0_i32_0 : i32, i32
  }
  func.func @transform_14(%arg0: i32) -> (i32, i32) {
    %c0_i32 = arith.constant 0 : i32
    %c0_i32_0 = arith.constant 0 : i32
    %c0_i32_1 = arith.constant 0 : i32
    return %c0_i32, %c0_i32_0 : i32, i32
  }
  func.func @transform_15(%arg0: i32) -> (i32, i32) {
    %c0_i32 = arith.constant 0 : i32
    %c0_i32_0 = arith.constant 0 : i32
    %c0_i32_1 = arith.constant 0 : i32
    return %c0_i32, %c0_i32_0 : i32, i32
  }
  func.func @transform_16(%arg0: i32) -> (i32, i32) {
    %c0_i32 = arith.constant 0 : i32
    %c0_i32_0 = arith.constant 0 : i32
    %c0_i32_1 = arith.constant 0 : i32
    return %c0_i32, %c0_i32_0 : i32, i32
  }
  func.func @transform_17(%arg0: i32) -> (i32, i32) {
    %c0_i32 = arith.constant 0 : i32
    %c0_i32_0 = arith.constant 0 : i32
    %c0_i32_1 = arith.constant 0 : i32
    return %c0_i32, %c0_i32_0 : i32, i32
  }
  func.func @transform_18(%arg0: i32) -> (i32, i32) {
    %c0_i32 = arith.constant 0 : i32
    %c0_i32_0 = arith.constant 0 : i32
    %c0_i32_1 = arith.constant 0 : i32
    return %c0_i32, %c0_i32_0 : i32, i32
  }
  func.func @transform_19(%arg0: i32) -> (i32, i32) {
    %c0_i32 = arith.constant 0 : i32
    %c0_i32_0 = arith.constant 0 : i32
    %c0_i32_1 = arith.constant 0 : i32
    return %c0_i32, %c0_i32_0 : i32, i32
  }
  func.func @transform_20(%arg0: i32) -> (i32, i32) {
    %c0_i32 = arith.constant 0 : i32
    %c0_i32_0 = arith.constant 0 : i32
    %c0_i32_1 = arith.constant 0 : i32
    return %c0_i32, %c0_i32_0 : i32, i32
  }
  func.func @transform_21(%arg0: i32) -> (i32, i32) {
    %c0_i32 = arith.constant 0 : i32
    %c0_i32_0 = arith.constant 0 : i32
    %c0_i32_1 = arith.constant 0 : i32
    return %c0_i32, %c0_i32_0 : i32, i32
  }
  func.func @transform_22(%arg0: i32) -> (i32, i32) {
    %c0_i32 = arith.constant 0 : i32
    %c0_i32_0 = arith.constant 0 : i32
    %c0_i32_1 = arith.constant 0 : i32
    return %c0_i32, %c0_i32_0 : i32, i32
  }
  func.func @transform_23(%arg0: i32) -> (i32, i32) {
    %c0_i32 = arith.constant 0 : i32
    %c0_i32_0 = arith.constant 0 : i32
    %c0_i32_1 = arith.constant 0 : i32
    return %c0_i32, %c0_i32_0 : i32, i32
  }
  func.func @transform_24(%arg0: i32) -> (i32, i32) {
    %c0_i32 = arith.constant 0 : i32
    %c0_i32_0 = arith.constant 0 : i32
    %c0_i32_1 = arith.constant 0 : i32
    return %c0_i32, %c0_i32_0 : i32, i32
  }
  func.func @transform_25(%arg0: i32) -> (i32, i32, i32) {
    %c0_i32 = arith.constant 0 : i32
    %c0_i32_0 = arith.constant 0 : i32
    %c0_i32_1 = arith.constant 0 : i32
    return %arg0, %c0_i32, %c0_i32_0 : i32, i32, i32
  }
}

</mosaic_0001>

<bundles_post_ra>
// kernel: model2_forward.1
= control target key start
LH: loop header
LB: loop body
LE: loop exit
PB: predicated region body
PF: predicated region fallthrough
CT: control target
= control target key end

     0   :  { %s18038_s0 = inlined_call_operand.vmem [shape: f32[2,1,324], index: 0, kind: input, shape index: {}]   ;;  %s18039_s1 = inlined_call_operand.vmem [shape: f32[9,4,1], index: 1, kind: input, shape index: {}]   ;;  %s18040_s2 = inlined_call_operand.vmem [shape: f32[9,8,4], index: 2, kind: input, shape index: {}]   ;;  %s18041_s3 = inlined_call_operand.vmem [shape: f32[9,16,8], index: 3, kind: input, shape index: {}]   ;;  %s18042_s4 = inlined_call_operand.vmem [shape: f32[9,32,16], index: 4, kind: input, shape index: {}]   ;;  %s18043_s5 = inlined_call_operand.vmem [shape: f32[16,16,32], index: 5, kind: input, shape index: {}]   ;;  %s18044_s6 = inlined_call_operand.vmem [shape: f32[16,8,16], index: 6, kind: input, shape index: {}]   ;;  %s18045_s7 = inlined_call_operand.vmem [shape: f32[16,4,8], index: 7, kind: input, shape index: {}]   ;;  %s18046_s8 = inlined_call_operand.vmem [shape: f32[9,1,4], index: 8, kind: input, shape index: {}]   ;;  %s18047_s9 = inlined_call_operand.vmem [shape: f32[4,1], index: 9, kind: input, shape index: {}]   ;;  %s18048_s10 = inlined_call_operand.vmem [shape: f32[8,1], index: 10, kind: input, shape index: {}]   ;;  %s18049_s11 = inlined_call_operand.vmem [shape: f32[16,1], index: 11, kind: input, shape index: {}]   ;;  %s18050_s12 = inlined_call_operand.vmem [shape: f32[32,1], index: 12, kind: input, shape index: {}]   ;;  %s18051_s13 = inlined_call_operand.vmem [shape: f32[16,1], index: 13, kind: input, shape index: {}]   ;;  %s18052_s14 = inlined_call_operand.vmem [shape: f32[8,1], index: 14, kind: input, shape index: {}]   ;;  %s18053_s15 = inlined_call_operand.vmem [shape: f32[4,1], index: 15, kind: input, shape index: {}]   ;;  %s18054_s16 = inlined_call_operand.<no memory space> [shape: f32[1,1], index: 16, kind: input, shape index: {}]   ;;  %s18055_s17 = inlined_call_operand.vmem [shape: f32[286,324], index: 17, kind: input, shape index: {}]   ;;  %s18056_s18 = inlined_call_operand.vmem [shape: f32[286,100], index: 18, kind: input, shape index: {}]   ;;  %s18057_s19 = inlined_call_operand.hbm [shape: f32[78,36], index: 19, kind: input, shape index: {}]   ;;  %s18058_s20 = inlined_call_operand.hbm [shape: f32[22,49], index: 20, kind: input, shape index: {}]   ;;  %s18059_s21 = inlined_call_operand.hbm [shape: f32[25,121], index: 21, kind: input, shape index: {}]   ;;  %s18060_s22 = inlined_call_operand.vmem [shape: f32[85,361], index: 22, kind: input, shape index: {}]   ;;  %s18061_s23 = inlined_call_operand.vmem [shape: f32[301,324], index: 23, kind: input, shape index: {}]   ;;  %s18062_s24 = inlined_call_operand.vmem [shape: f32[286,256], index: 24, kind: input, shape index: {}]   ;;  %s18063_s25 = inlined_call_operand.vmem [shape: f32[2,1,256], index: 25, kind: output, shape index: {}]  }
   0x1   :  { %18122 = sst [smem:[#allocation18_spill]] %s18038_s0  ;;  %v30_v0 = vstv %s18054_s16 }
   0x2   :  { %18123 = sst [smem:[#allocation19_spill]] %s18039_s1  ;;  %31 = vst [vmem:[#allocation10] sm:$0x1] %v30_v0 }
   0x3   :  { %18124 = sst [smem:[#allocation20_spill]] %s18040_s2 }
   0x4   :  { %18125 = sst [smem:[#allocation21_spill]] %s18041_s3 }
   0x5   :  { %18126 = sst [smem:[#allocation22_spill]] %s18042_s4 }
   0x6   :  { %18127 = sst [smem:[#allocation23_spill]] %s18043_s5 }
   0x7   :  { %18128 = sst [smem:[#allocation24_spill]] %s18044_s6 }
   0x8   :  { %18129 = sst [smem:[#allocation25_spill]] %s18045_s7 }
   0x9   :  { %18130 = sst [smem:[#allocation26_spill]] %s18046_s8 }
   0xa   :  { %18131 = sst [smem:[#allocation27_spill]] %s18047_s9 }
   0xb   :  { %18132 = sst [smem:[#allocation28_spill]] %s18048_s10 }
   0xc   :  { %18133 = sst [smem:[#allocation29_spill]] %s18049_s11 }
   0xd   :  { %18134 = sst [smem:[#allocation30_spill]] %s18050_s12 }
   0xe   :  { %18135 = sst [smem:[#allocation31_spill]] %s18051_s13 }
   0xf   :  { %18136 = sst [smem:[#allocation32_spill]] %s18052_s14 }
  0x10   :  { %18137 = sst [smem:[#allocation33_spill]] %s18055_s17 }
  0x11   :  { %18138 = sst [smem:[#allocation34_spill]] %s18056_s18 }
  0x12   :  { %18139 = sst [smem:[#allocation35_spill]] %s18057_s19 }
  0x13   :  { %18140 = sst [smem:[#allocation36_spill]] %s18058_s20 }
  0x14   :  { %32 = vsyncpa [#allocation12], 0 }
  0x15   :  { %33 = vsyncpa [#allocation14], 0  ;;  %s15187_s6 = smov 0  }
  0x16 LB: > { %s15193_s30 = sadd.s32 4294967295, %s15007_s6   ;;  %p13262_p0 = scmp.ge.s32.totalorder %s15007_s6, 1  ;;  %s15007_s6 = sphi %s15187_s6, %s39_s6  }
  0x17   : > { %p600_p1 = scmp.lt.s32.totalorder %s15007_s6, 3  ;;  %p14840_p2 = scmp.eq.s32.totalorder %s15193_s30, 0 }
  0x18   : > { %s15009_s7 = smov [#allocation13]   ;;  %s15010_s26 = smov [#allocation11]  }
  0x19   : > { %p15198_p3 = pnand %p13262_p0, %p600_p1  ;;  %s679_s3 = sshll.u32 %s15009_s7, 4  ;;  %s680_s3 = int_to_ptr.vmem [resolvable:$true] %s679_s3 }
  0x1a   : > { %s666_s1 = sshll.u32 %s15010_s26, 4  ;;  %s15011_s27 = smov [#allocation15]   ;;  %s667_s1 = int_to_ptr.vmem [resolvable:$true] %s666_s1 }
  0x1b   : > { %p14830_p4 = pneg %p15198_p3  ;;  %s692_s4 = sshll.u32 %s15011_s27, 4  ;;  %s15210_s4 = int_to_ptr.vmem [resolvable:$true] %s692_s4 }
  0x1c   : > { %s14926_s28 = scalar_lea.vmem %s680_s3, 384  ;;  %p14934_p10 = scmp.lt.s32.totalorder %s680_s3, %s680_s3 }
  0x1d   : > { %p15206_p5 = pnand %p14840_p2, %p14830_p4  ;;  %p14927_p7 = scmp.ne.s32.totalorder %s680_s3, %s14926_s28 }
  0x1e   : > { %p14935_p11 = scmp.lt.s32.totalorder %s14926_s28, %s14926_s28 }
  0x1f   : > { %p14917_p6 = pneg %p15206_p5 }
  0x20   : > { %p14936_p12 = por %p14935_p11, %p14934_p10 }
  0x21   : > { %p14929_p8 = pnand %p14927_p7, %p14917_p6 }
  0x23   : > { %p14930_p9 = pneg %p14929_p8 }
  0x25   : > { %p14937_p13 = pnand %p14936_p12, %p14930_p9 }
  0x27   : > { %14940 = shalt.err (!%p14937_p13)
}
  0x28   : > { %s15012_s9 = smov 128   ;;  %s15013_s5 = smov 8  }
  0x29   : > { %s18143_s20 = sld [smem:[#allocation36_spill]]  ;;  %s14952_s2 = scalar_lea.vmem %s667_s1, 1280 }
  0x2a   : > { %p14953_p0 = scmp.ne.s32.totalorder %s667_s1, %s14952_s2  ;;  %p14960_p7 = scmp.lt.s32.totalorder %s667_s1, %s667_s1 }
  0x2b   : > { %p14961_p8 = scmp.lt.s32.totalorder %s14952_s2, %s14952_s2 }
  0x2c   : > { %p14955_p1 = pnand %p14953_p0, %p14917_p6 }
  0x2d   : > { %p14962_p10 = por %p14961_p8, %p14960_p7 }
  0x2e   : > { %p14956_p4 = pneg %p14955_p1 }
  0x2f   : > { %14836 = dma.hbm_to_vmem [thread:$0]  (!%p15206_p5), %s18143_s20, 384, %s680_s3, [#allocation14], %s15012_s9, %s15012_s9, %s15013_s5  }
  0x30   : > { %p14963_p9 = pnand %p14962_p10, %p14956_p4 }
  0x32   : > { %14966 = shalt.err (!%p14963_p9)
}
  0x33   : > { %s18144_s19 = sld [smem:[#allocation35_spill]]  ;;  %s14978_s3 = scalar_lea.vmem %s15210_s4, 512 }
  0x34   : > { %p14979_p11 = scmp.ne.s32.totalorder %s15210_s4, %s14978_s3  ;;  %p14986_p0 = scmp.lt.s32.totalorder %s15210_s4, %s15210_s4 }
  0x35   : > { %p14987_p1 = scmp.lt.s32.totalorder %s14978_s3, %s14978_s3 }
  0x36   : > { %p14981_p12 = pnand %p14979_p11, %p14917_p6 }
  0x37   : > { %p14988_p4 = por %p14987_p1, %p14986_p0 }
  0x38   : > { %p14982_p13 = pneg %p14981_p12 }
  0x39   : > { %14833 = dma.hbm_to_vmem [thread:$0]  (!%p15206_p5), %s18144_s19, 1280, %s667_s1, [#allocation12], %s15012_s9, %s15012_s9, %s15013_s5  }
  0x3a   : > { %p14989_p7 = pnand %p14988_p4, %p14982_p13 }
  0x3c   : > { %14992 = shalt.err (!%p14989_p7)
}
  0x3d   : > { %14839 = dma.hbm_to_vmem [thread:$0]  (!%p15206_p5), %s18059_s21, 512, %s15210_s4, [#allocation14], %s15012_s9, %s15012_s9, %s15013_s5  }
  0x3e   : > { %724 = sbr.rel (%p15198_p3) target bundleno = 4702 (0x125e), region = 120 }
  0x43   : > { %14998 = dma.done.wait (%p14840_p2), [#allocation12], 1280  }
  0x44   : > { %15000 = vsyncadd (%p14840_p2), [#allocation12], 4294966016 }
  0x45   : > { %15002 = dma.done.wait (%p14840_p2), [#allocation14], 896  }
  0x46   : > { %15004 = vsyncadd (%p14840_p2), [#allocation14], 4294966400  ;;  %p798_p6 = scmp.lt.s32.totalorder %s15193_s30, 1  ;;  %v15014_v1 = vmov 0   ;;  %v807_v2 = vlaneseq  ;;  %s18145_s4 = sld [smem:[#allocation19_spill]]  ;;  %vm1192_vm1 = vcmask 1045504  }
  0x47   : > { %14900 = vset.pattern.permute.xlu1 %v15014_v1  ;;  %14899 = vset.pattern.permute.xlu0 %v15014_v1  ;;  %s18146_s2 = sld [smem:[#allocation18_spill]]  ;;  %s18082_s28 = smov 127   ;;  %vm857_vm2 = vcmask 1039360   ;;  %vm18099_vm4 = vcmask 244736   ;;  %vm885_vm5 = vcmask 1031168   ;;  %vm18101_vm6 = vcmask 900096  }
  0x48   : > { %s18191_s30 = smov (!%p798_p6, %s15193_s30), 1  ;;  %vm809_vm0 = vcmp.lt.s32.totalorder %v807_v2, 324  ;;  %v15290_v13 = vshrl.u32 %v807_v2, 7  ;;  %s18147_s17 = sld [smem:[#allocation33_spill]]  ;;  %vm941_vm7 = vcmask 891904   ;;  %vm969_vm8 = vcmask 883712  }
  0x49   : > { %s14817_s16 = smul.u32 3, %s18191_s30  ;;  %s18086_s29 = smov 126   ;;  %vm18100_vm9 = vcmask 752640   ;;  %vm18090_vm10 = vcmask 744448   ;;  %vm1053_vm11 = vcmask 736256   ;;  %vm15024_vm14 = vmmov 0  }
  0x4a   : > { %v830_v17 = vsub.s32 2, %v15290_v13  ;;  %s18076_s9 = smov 108   ;;  %v826_v50 = vsub.s32 1, %v15290_v13  ;;  %v822_v52 = vsub.s32 0, %v15290_v13  ;;  %s18074_s0 = smov 92   ;;  %vm1489_vm15 = vcmask 551936  }
  0x4b   : > { %s18084_s8 = smov 90   ;;  %s18154_s5 = smov 109  }
  0x4c   : > { %v13274_v3 = vld [vmem:[%s18145_s4 + $0xc] sm:$0xf]  ;;  %v13272_v4 = vld [vmem:[%s18145_s4 + $0x4] sm:$0xf]  ;;  %v13275_v5 = vld [vmem:[%s18145_s4 + $0x10] sm:$0xf] }
  0x4d   : > { %s801_s7 = scalar_lea.vmem %s18146_s2, %s14817_s16  ;;  %898 = vperm.xlu1 %14900, %v13274_v3   ;;  %842 = vperm.xlu0 %14899, %v13272_v4   ;;  %v13273_v6 = vld [vmem:[%s18145_s4 + $0x8] sm:$0xf]  ;;  %v13277_v8 = vld [vmem:[%s18145_s4 + $0x18] sm:$0xf]  ;;  %v13276_v9 = vld [vmem:[%s18145_s4 + $0x14] sm:$0xf] }
  0x4e   : > { %v806_v7 = vld [vmem:[%s801_s7] sm:$0x7]  ;;  %v13278_v11 = vld [vmem:[%s18145_s4 + $0x1c] sm:$0xf]  ;;  %v1126_v14 = vld [vmem:[%s18147_s17 + $0x170] sm:$0xff]  ;;  %s18072_s2 = smov 110  }
  0x4f   : > { %811 = vst.msk [vmem:[#allocation2] sm:$0x7] %vm809_vm0, %v806_v7  ;;  %v13279_v10 = vld [vmem:[%s18145_s4 + $0x20] sm:$0xf]  ;;  %v1125_v15 = vld [vmem:[%s18147_s17 + $0x168] sm:$0xff]  ;;  %v1123_v16 = vld [vmem:[%s18147_s17 + $0x158] sm:$0xff]  ;;  %1202 = vmatprep.subr.mxu0 %v1126_v14 }
  0x50   : > { %v813_v12 = vld [vmem:[%s18145_s4] sm:$0xf]  ;;  %1203 = vmatpush1.msra.mxu0 %v1125_v15  ;;  %v1122_v19 = vld [vmem:[%s18147_s17 + $0x150] sm:$0xff]  ;;  %v1119_v21 = vld [vmem:[%s18147_s17 + $0x138] sm:$0xff]  ;;  %s18078_s16 = smov 109   ;;  %s18149_s7 = smov 110  }
  0x51   : > { %926 = vperm.xlu1 %14900, %v13275_v5   ;;  %870 = vperm.xlu0 %14899, %v13273_v6   ;;  %v1120_v20 = vld [vmem:[%s18147_s17 + $0x140] sm:$0xff]  ;;  %v1117_v22 = vld [vmem:[%s18147_s17 + $0x128] sm:$0xff]  ;;  %v1114_v25 = vld [vmem:[%s18147_s17 + $0x110] sm:$0xff]  ;;  %s18155_s26 = smov 91   ;;  %s18157_s10 = sld [smem:[#allocation28_spill]]  ;;  %vm1511_vm0 = vcmask 1043456  }
  0x52   : > { %1204 = vmatprep.subr.mxu0 %v1123_v16  ;;  %v1116_v24 = vld [vmem:[%s18147_s17 + $0x120] sm:$0xff]  ;;  %v1113_v28 = vld [vmem:[%s18147_s17 + $0x108] sm:$0xff]  ;;  %v1111_v29 = vld [vmem:[%s18147_s17 + $0xf8] sm:$0xff]  ;;  %s18158_s1 = sld [smem:[#allocation20_spill]]  ;;  %s18093_s19 = smov 118  }
  0x53   : > { %1205 = vmatpush1.msra.mxu0 %v1122_v19  ;;  %v1110_v31 = vld [vmem:[%s18147_s17 + $0xf0] sm:$0xff]  ;;  %v1108_v32 = vld [vmem:[%s18147_s17 + $0xe0] sm:$0xff]  ;;  %v1107_v33 = vld [vmem:[%s18147_s17 + $0xd8] sm:$0xff]  ;;  %s18159_s18 = sld [smem:[#allocation34_spill]]  ;;  %s18097_s20 = smov 116  }
  0x54   : > { %1206 = vmatprep.subr.mxu0 %v1120_v20  ;;  %v1105_v35 = vld [vmem:[%s18147_s17 + $0xc8] sm:$0xff]  ;;  %v1104_v39 = vld [vmem:[%s18147_s17 + $0xc0] sm:$0xff]  ;;  %v1102_v40 = vld [vmem:[%s18147_s17 + $0xb0] sm:$0xff]  ;;  %v15023_v20 = vmov 0.0   ;;  %s18160_s4 = sld [smem:[#allocation21_spill]]  ;;  %s18102_s3 = smov 107  }
  0x55   : > { %982 = vperm.xlu1 %14900, %v13277_v8   ;;  %954 = vperm.xlu0 %14899, %v13276_v9   ;;  %v1101_v41 = vld [vmem:[%s18147_s17 + $0xa8] sm:$0xff]  ;;  %v1099_v46 = vld [vmem:[%s18147_s17 + $0x98] sm:$0xff]  ;;  %v1098_v47 = vld [vmem:[%s18147_s17 + $0x90] sm:$0xff]  ;;  %s18161_s11 = sld [smem:[#allocation29_spill]]  ;;  %s18167_s27 = smov 118  }
  0x56   : > { %v15302_v18 = vld [vmem:[#allocation2] sm:$0x7]  ;;  %1207 = vmatpush1.msra.mxu0 %v1119_v21  ;;  %v1095_v53 = vld [vmem:[%s18147_s17 + $0x78] sm:$0xff]  ;;  %v1093_v56 = vld [vmem:[%s18147_s17 + $0x68] sm:$0xff]  ;;  %1337 = vmatprep.mubr.f32.mxu1 %v15023_v20  ;;  %s18164_s12 = sld [smem:[#allocation30_spill]] }
  0x57   : > { %v15317_v23 = vrot.slane %v15302_v18, %v830_v17  ;;  %1208 = vmatprep.subr.mxu0 %v1117_v22  ;;  %v1096_v48 = vld [vmem:[%s18147_s17 + $0x80] sm:$0xff]  ;;  %v1186_v57 = vld [vmem:[%s18147_s17 + $0x350] sm:$0x3f]  ;;  %v1185_v59 = vld [vmem:[%s18147_s17 + $0x348] sm:$0x3f]  ;;  %v15416_v60 = vrot.slane %v15302_v18, %v826_v50  ;;  %v15429_v0 = vrot.slane %v15302_v18, %v822_v52  ;;  %s18174_s13 = sld [smem:[#allocation31_spill]] }
  0x58   : > { %1209 = vmatpush1.msra.mxu0 %v1116_v24  ;;  %v1092_v58 = vld [vmem:[%s18147_s17 + $0x60] sm:$0xff]  ;;  %13280 = vmatprep.subr.msk.mxu1 %vm1192_vm1, %v1186_v57  ;;  %v1183_v61 = vld [vmem:[%s18147_s17 + $0x338] sm:$0xff]  ;;  %v1090_v1 = vld [vmem:[%s18147_s17 + $0x50] sm:$0xff]  ;;  %s18179_s14 = sld [smem:[#allocation32_spill]] }
  0x59   : > { %1038 = vperm.xlu1 %14900, %v13279_v10   ;;  %1010 = vperm.xlu0 %14899, %v13278_v11   ;;  %v1182_v3 = vld [vmem:[%s18147_s17 + $0x330] sm:$0xff]  ;;  %v1089_v4 = vld [vmem:[%s18147_s17 + $0x48] sm:$0xff]  ;;  %v1180_v5 = vld [vmem:[%s18147_s17 + $0x320] sm:$0xff] }
  0x5a   : > { %1210 = vmatprep.subr.mxu0 %v1114_v25  ;;  %13281 = vmatpush1.msk.msra.mxu1 %vm1192_vm1, %v1185_v59  ;;  %v1087_v6 = vld [vmem:[%s18147_s17 + $0x38] sm:$0xff]  ;;  %v1086_v10 = vld [vmem:[%s18147_s17 + $0x30] sm:$0xff]  ;;  %v1177_v11 = vld [vmem:[%s18147_s17 + $0x308] sm:$0xff] }
  0x5b   : > { %1211 = vmatpush1.msra.mxu0 %v1113_v28  ;;  %1299 = vmatprep.subr.mxu1 %v1183_v61  ;;  %v1179_v7 = vld [vmem:[%s18147_s17 + $0x318] sm:$0xff]  ;;  %v1176_v14 = vld [vmem:[%s18147_s17 + $0x300] sm:$0xff]  ;;  %v1081_v18 = vld [vmem:[%s18147_s17 + $0x8] sm:$0xff] }
  0x5c   : > { %1212 = vmatprep.subr.mxu0 %v1111_v29  ;;  %1300 = vmatpush1.msra.mxu1 %v1182_v3  ;;  %v1083_v15 = vld [vmem:[%s18147_s17 + $0x18] sm:$0xff]  ;;  %v1080_v21 = vld [vmem:[%s18147_s17] sm:$0xff]  ;;  %v1174_v22 = vld [vmem:[%s18147_s17 + $0x2f0] sm:$0xff] }
  0x5d   : > { %816 = vperm.xlu0 %14899, %v813_v12   ;;  %1213 = vmatpush1.msra.mxu0 %v1110_v31  ;;  %v1084_v12 = vld [vmem:[%s18147_s17 + $0x20] sm:$0xff]  ;;  %v1175_v19 = vld [vmem:[%s18147_s17 + $0x2f8] sm:$0xff]  ;;  %v1170_v29 = vld [vmem:[%s18147_s17 + $0x2d0] sm:$0xff] }
  0x5e   : > { %1214 = vmatprep.subr.mxu0 %v1108_v32  ;;  %1301 = vmatprep.subr.mxu1 %v1180_v5  ;;  %v1171_v28 = vld [vmem:[%s18147_s17 + $0x2d8] sm:$0xff]  ;;  %v1168_v31 = vld [vmem:[%s18147_s17 + $0x2c0] sm:$0xff]  ;;  %v1138_v61 = vld [vmem:[%s18147_s17 + $0x1d0] sm:$0xff] }
  0x5f   : > { %1215 = vmatpush1.msra.mxu0 %v1107_v33  ;;  %1302 = vmatpush1.msra.mxu1 %v1179_v7  ;;  %v1167_v32 = vld [vmem:[%s18147_s17 + $0x2b8] sm:$0xff]  ;;  %v1165_v33 = vld [vmem:[%s18147_s17 + $0x2a8] sm:$0xff]  ;;  %v1140_v59 = vld [vmem:[%s18147_s17 + $0x1e0] sm:$0xff] }
  0x60   : > { %1216 = vmatprep.subr.mxu0 %v1105_v35  ;;  %1303 = vmatprep.subr.mxu1 %v1177_v11  ;;  %v1143_v57 = vld [vmem:[%s18147_s17 + $0x1f8] sm:$0xff]  ;;  %v1132_v3 = vld [vmem:[%s18147_s17 + $0x1a0] sm:$0xff]  ;;  %v1129_v5 = vld [vmem:[%s18147_s17 + $0x188] sm:$0xff] }
  0x61   : > { %1217 = vmatpush1.msra.mxu0 %v1104_v39  ;;  %1304 = vmatpush1.msra.mxu1 %v1176_v14 }
  0x62   : > { %1218 = vmatprep.subr.mxu0 %v1102_v40  ;;  %13664 = vmatprep.subr.mxu1 %v1175_v19 }
  0x63   : > { %1219 = vmatpush1.msra.mxu0 %v1101_v41  ;;  %v1159_v41 = vld [vmem:[%s18147_s17 + $0x278] sm:$0xff] }
  0x64   : > { %1220 = vmatprep.subr.mxu0 %v1099_v46  ;;  %v1155_v46 = vld [vmem:[%s18147_s17 + $0x258] sm:$0xff] }
  0x65   : > { %1221 = vmatpush1.msra.mxu0 %v1098_v47  ;;  %v1153_v47 = vld [vmem:[%s18147_s17 + $0x248] sm:$0xff] }
  0x66   : > { %1222 = vmatprep.subr.mxu0 %v1096_v48  ;;  %v1152_v48 = vld [vmem:[%s18147_s17 + $0x240] sm:$0xff] }
  0x67   : > { %1223 = vmatpush1.msra.mxu0 %v1095_v53  ;;  %v1149_v53 = vld [vmem:[%s18147_s17 + $0x228] sm:$0xff] }
  0x68   : > { %1224 = vmatprep.subr.mxu0 %v1093_v56  ;;  %v1144_v56 = vld [vmem:[%s18147_s17 + $0x200] sm:$0xff] }
  0x69   : > { %1225 = vmatpush1.msra.mxu0 %v1092_v58  ;;  %v1141_v58 = vld [vmem:[%s18147_s17 + $0x1e8] sm:$0xff] }
  0x6a   : > { %1226 = vmatprep.subr.mxu0 %v1090_v1  ;;  %v1134_v1 = vld [vmem:[%s18147_s17 + $0x1b0] sm:$0xff] }
  0x6b   : > { %1227 = vmatpush1.msra.mxu0 %v1089_v4  ;;  %v1131_v4 = vld [vmem:[%s18147_s17 + $0x198] sm:$0xff] }
  0x6c   : > { %1228 = vmatprep.subr.mxu0 %v1087_v6  ;;  %v1128_v6 = vld [vmem:[%s18147_s17 + $0x180] sm:$0xff] }
  0x6d   : > { %1229 = vmatpush1.msra.mxu0 %v1086_v10 }
  0x6e   : > { %1230 = vmatprep.subr.mxu0 %v1084_v12 }
  0x6f   : > { %1231 = vmatpush1.msra.mxu0 %v1083_v15 }
  0x70   : > { %1232 = vmatprep.subr.mxu0 %v1081_v18 }
  0x71   : > { %1233 = vmatpush1.msra.mxu0 %v1080_v21 }
  0x72   : > { %1234 = vmatprep.subr.mxu0 %v1174_v22 }
  0xc8   : > { %v15325_v26 = vpop.permute.xlu1 %898  ;;  %v15327_v27 = vpop.permute.xlu0 %842 }
  0xc9   : > { %v847_v30 = vmul.f32 %v15327_v27, %v15317_v23  ;;  %v903_v34 = vmul.f32 %v15325_v26, %v15317_v23  ;;  %v846_v8 = vmul.f32 %v15327_v27, %v15416_v60  ;;  %v845_v9 = vmul.f32 %v15327_v27, %v15429_v0  ;;  %v1173_v27 = vld [vmem:[%s18147_s17 + $0x2e8] sm:$0xff] }
  0xca   : > { %v902_v24 = vmul.f32 %v15325_v26, %v15416_v60  ;;  %v901_v25 = vmul.f32 %v15325_v26, %v15429_v0  ;;  %1235 = vmatpush2.msra.mxu0 %v1173_v27 }
  0xcb   : > { %855 = vrot.lane.b32.xlu1 %v847_v30, %s18082_s28  ;;  %1236 = vmatprep.subr.mxu0 %v1171_v28 }
  0xcc   : > { %v15352_v36 = vpop.permute.xlu1 %926  ;;  %v15354_v37 = vpop.permute.xlu0 %870  ;;  %1237 = vmatpush2.msra.mxu0 %v1170_v29 }
  0xcd   : > { %v875_v38 = vmul.f32 %v15354_v37, %v15317_v23  ;;  %v931_v44 = vmul.f32 %v15352_v36, %v15317_v23  ;;  %v874_v16 = vmul.f32 %v15354_v37, %v15416_v60  ;;  %v873_v17 = vmul.f32 %v15354_v37, %v15429_v0  ;;  %1238 = vmatprep.subr.mxu0 %v1168_v31  ;;  %v1162_v37 = vld [vmem:[%s18147_s17 + $0x290] sm:$0xff] }
  0xce   : > { %v930_v26 = vmul.f32 %v15352_v36, %v15416_v60  ;;  %v929_v30 = vmul.f32 %v15352_v36, %v15429_v0  ;;  %1239 = vmatpush2.msra.mxu0 %v1167_v32  ;;  %v1164_v36 = vld [vmem:[%s18147_s17 + $0x2a0] sm:$0xff] }
  0xcf   : > { %883 = vrot.lane.b32.xlu0 %v875_v38, %s18086_s29  ;;  %911 = vrot.lane.b32.xlu1 %v903_v34, %s18072_s2  ;;  %s18148_s2 = sld [smem:[#allocation27_spill]]  ;;  %v1161_v38 = vld [vmem:[%s18147_s17 + $0x288] sm:$0xff] }
  0xd0   : > { %v15369_v42 = vpop.permute.xlu1 %982  ;;  %v15371_v43 = vpop.permute.xlu0 %954  ;;  %1240 = vmatprep.subr.mxu0 %v1165_v33 }
  0xd1   : > { %v959_v45 = vmul.f32 %v15371_v43, %v15317_v23  ;;  %v987_v51 = vmul.f32 %v15369_v42, %v15317_v23  ;;  %v958_v34 = vmul.f32 %v15371_v43, %v15416_v60  ;;  %v957_v35 = vmul.f32 %v15371_v43, %v15429_v0  ;;  %1241 = vmatpush2.msra.mxu0 %v1164_v36  ;;  %v1158_v43 = vld [vmem:[%s18147_s17 + $0x270] sm:$0xff] }
  0xd2   : > { %v986_v39 = vmul.f32 %v15369_v42, %v15416_v60  ;;  %v985_v40 = vmul.f32 %v15369_v42, %v15429_v0  ;;  %1242 = vmatprep.subr.mxu0 %v1162_v37  ;;  %v1172_v37 = vld [vmem:[%s18147_s17 + $0x2e0] sm:$0xff] }
  0xd3   : > { %939 = vrot.lane.b32.xlu0 %v931_v44, %s18078_s16  ;;  %967 = vrot.lane.b32.xlu1 %v959_v45, %s18076_s9  ;;  %v1156_v44 = vld [vmem:[%s18147_s17 + $0x260] sm:$0xff]  ;;  %s15030_s9 = smov 122  }
  0xd4   : > { %v15398_v54 = vpop.permute.xlu1 %1038  ;;  %v15400_v55 = vpop.permute.xlu0 %1010  ;;  %1243 = vmatpush2.msra.mxu0 %v1161_v38 }
  0xd5   : > { %v1062_v49 = vld [vmem:[%s18148_s2] sm:$0xf]  ;;  %v1015_v62 = vmul.f32 %v15400_v55, %v15317_v23  ;;  %v1043_v63 = vmul.f32 %v15398_v54, %v15317_v23  ;;  %s18150_s2 = smov 108   ;;  %1244 = vmatprep.subr.mxu0 %v1159_v41  ;;  %v1014_v42 = vmul.f32 %v15400_v55, %v15416_v60  ;;  %v1013_v45 = vmul.f32 %v15400_v55, %v15429_v0  ;;  %v1147_v55 = vld [vmem:[%s18147_s17 + $0x218] sm:$0xff] }
  0xd6   : > { %1245 = vmatpush2.msra.mxu0 %v1158_v43  ;;  %v1041_v50 = vmul.f32 %v15398_v54, %v15429_v0  ;;  %v1169_v43 = vld [vmem:[%s18147_s17 + $0x2c8] sm:$0xff] }
  0xd7   : > { %995 = vrot.lane.b32.xlu0 %v987_v51, %s18074_s0  ;;  %1065 = vperm.xlu1 %14900, %v1062_v49   ;;  %s18080_s0 = smov 91   ;;  %v1042_v49 = vmul.f32 %v15398_v54, %v15416_v60  ;;  %v1150_v51 = vld [vmem:[%s18147_s17 + $0x230] sm:$0xff] }
  0xd8   : > { %1246 = vmatprep.subr.mxu0 %v1156_v44  ;;  %v1146_v54 = vld [vmem:[%s18147_s17 + $0x210] sm:$0xff]  ;;  %v15621_v7 = vpop.permute.xlu0 %816 }
  0xd9   : > { %1247 = vmatpush2.msra.mxu0 %v1155_v46  ;;  %v836_v41 = vmul.f32 %v15416_v60, %v15621_v7  ;;  %v1166_v60 = vld [vmem:[%s18147_s17 + $0x2b0] sm:$0xff] }
  0xda   : > { %1248 = vmatprep.subr.mxu0 %v1153_v47 }
  0xdb   : > { %1023 = vrot.lane.b32.xlu0 %v1015_v62, %s18080_s0  ;;  %1051 = vrot.lane.b32.xlu1 %v1043_v63, %s18084_s8  ;;  %v1137_v62 = vld [vmem:[%s18147_s17 + $0x1c8] sm:$0xff]  ;;  %v1135_v63 = vld [vmem:[%s18147_s17 + $0x1b8] sm:$0xff] }
  0xdc   : > { %1249 = vmatpush2.msra.mxu0 %v1152_v48 }
  0xdd   : > { %1250 = vmatprep.subr.mxu0 %v1150_v51  ;;  %v1163_v51 = vld [vmem:[%s18147_s17 + $0x298] sm:$0xff] }
  0xde   : > { %1251 = vmatpush2.msra.mxu0 %v1149_v53 }
  0xdf   : > { %853 = vrot.lane.b32.xlu0 %v846_v8, %s18082_s28  ;;  %851 = vrot.lane.b32.xlu1 %v845_v9, %s18082_s28  ;;  %v837_v9 = vmul.f32 %v15317_v23, %v15621_v7  ;;  %s18156_s28 = smov 90  }
  0xe0   : > { %1252 = vmatprep.subr.mxu0 %v1147_v55  ;;  %v1115_v55 = vld [vmem:[%s18147_s17 + $0x118] sm:$0xff] }
  0xe1   : > { %1253 = vmatpush2.msra.mxu0 %v1146_v54 }
  0xe2   : > { %1254 = vmatprep.subr.mxu0 %v1144_v56 }
  0xe3   : > { %881 = vrot.lane.b32.xlu0 %v874_v16, %s18086_s29  ;;  %879 = vrot.lane.b32.xlu1 %v873_v17, %s18086_s29  ;;  %s18152_s29 = smov 126  }
  0xe4   : > { %1255 = vmatpush2.msra.mxu0 %v1143_v57  ;;  %v1160_v57 = vld [vmem:[%s18147_s17 + $0x280] sm:$0xff] }
  0xe5   : > { %1256 = vmatprep.subr.mxu0 %v1141_v58 }
  0xe6   : > { %1257 = vmatpush2.msra.mxu0 %v1140_v59 }
  0xe7   : > { %909 = vrot.lane.b32.xlu0 %v902_v24, %s18149_s7  ;;  %907 = vrot.lane.b32.xlu1 %v901_v25, %s18149_s7 }
  0xe8   : > { %1258 = vmatprep.subr.mxu0 %v1138_v61  ;;  %v1112_v61 = vld [vmem:[%s18147_s17 + $0x100] sm:$0xff] }
  0xe9   : > { %1259 = vmatpush2.msra.mxu0 %v1137_v62 }
  0xea   : > { %1260 = vmatprep.subr.mxu0 %v1135_v63 }
  0xeb   : > { %937 = vrot.lane.b32.xlu0 %v930_v26, %s18078_s16  ;;  %935 = vrot.lane.b32.xlu1 %v929_v30, %s18078_s16  ;;  %s18151_s16 = smov 92  }
  0xec   : > { %1261 = vmatpush2.msra.mxu0 %v1134_v1  ;;  %v1157_v1 = vld [vmem:[%s18147_s17 + $0x268] sm:$0xff] }
  0xed   : > { %1262 = vmatprep.subr.mxu0 %v1132_v3  ;;  %v835_v3 = vmul.f32 %v15429_v0, %v15621_v7 }
  0xee   : > { %1263 = vmatpush2.msra.mxu0 %v1131_v4 }
  0xef   : > { %965 = vrot.lane.b32.xlu0 %v958_v34, %s18150_s2  ;;  %963 = vrot.lane.b32.xlu1 %v957_v35, %s18150_s2  ;;  %v1127_v34 = vld [vmem:[%s18147_s17 + $0x178] sm:$0xff] }
  0xf0   : > { %1264 = vmatprep.subr.mxu0 %v1129_v5  ;;  %v1109_v5 = vld [vmem:[%s18147_s17 + $0xe8] sm:$0xff] }
  0xf1   : > { %1265 = vmatpush2.msra.mxu0 %v1128_v6 }
  0xf3   : > { %993 = vrot.lane.b32.xlu0 %v986_v39, %s18151_s16  ;;  %991 = vrot.lane.b32.xlu1 %v985_v40, %s18151_s16  ;;  %v1124_v40 = vld [vmem:[%s18147_s17 + $0x160] sm:$0xff] }
  0xf7   : > { %1021 = vrot.lane.b32.xlu0 %v1014_v42, %s18080_s0  ;;  %1019 = vrot.lane.b32.xlu1 %v1013_v45, %s18080_s0  ;;  %v1121_v42 = vld [vmem:[%s18147_s17 + $0x148] sm:$0xff]  ;;  %s18095_s0 = smov 106  }
  0xfb   : > { %1049 = vrot.lane.b32.xlu0 %v1042_v49, %s18084_s8  ;;  %1047 = vrot.lane.b32.xlu1 %v1041_v50, %s18084_s8  ;;  %v1118_v49 = vld [vmem:[%s18147_s17 + $0x130] sm:$0xff]  ;;  %s18153_s8 = smov 127  }
 0x13d   : > { %v856_v8 = vpop.permute.xlu1 %855 }
 0x13e   : > { %v865_v10 = vadd.f32 %v856_v8, %v837_v9 }
 0x141   : > { %v884_v11 = vpop.permute.xlu0 %883  ;;  %v912_v15 = vpop.permute.xlu1 %911 }
 0x142   : > { %v893_v12 = vadd.f32 %v884_v11, %v865_v10  ;;  %v1154_v10 = vld [vmem:[%s18147_s17 + $0x250] sm:$0xff] }
 0x144   : > { %v921_v16 = vadd.f32 %v912_v15, %v893_v12  ;;  %v1106_v12 = vld [vmem:[%s18147_s17 + $0xd0] sm:$0xff] }
 0x145   : > { %v940_v14 = vpop.permute.xlu0 %939  ;;  %v968_v21 = vpop.permute.xlu1 %967 }
 0x146   : > { %v949_v18 = vadd.f32 %v940_v14, %v921_v16  ;;  %v1151_v16 = vld [vmem:[%s18147_s17 + $0x238] sm:$0xff] }
 0x148   : > { %v977_v22 = vadd.f32 %v968_v21, %v949_v18  ;;  %v1103_v18 = vld [vmem:[%s18147_s17 + $0xb8] sm:$0xff] }
 0x149   : > { %v15625_v17 = vpop.permute.xlu0 %995 }
 0x14a   : > { %v1005_v27 = vadd.f32 %v15625_v17, %v977_v22 }
 0x14d   : > { %v15627_v19 = vpop.permute.xlu0 %1023 }
 0x14e   : > { %v1033_v23 = vadd.f32 %v15627_v19, %v1005_v27 }
 0x151   : > { %v854_v24 = vpop.permute.xlu0 %853 }
 0x152   : > { %v15629_v25 = vpop.permute.xlu1 %1065  ;;  %v859_v38 = vsel %vm857_vm2, %v854_v24, %v856_v8 }
 0x153   : > { %v864_v45 = vadd.f32 %v859_v38, %v836_v41 }
 0x155   : > { %v882_v28 = vpop.permute.xlu0 %881 }
 0x156   : > { %v15633_v29 = vpop.permute.xlu1 %1051  ;;  %v887_v44 = vsel %vm885_vm5, %v882_v28, %v884_v11 }
 0x157   : > { %v1061_v26 = vadd.f32 %v15633_v29, %v1033_v23  ;;  %v892_v50 = vadd.f32 %v887_v44, %v864_v45  ;;  %v1139_v44 = vld [vmem:[%s18147_s17 + $0x1d8] sm:$0xff] }
 0x158   : > { %v1091_v45 = vld [vmem:[%s18147_s17 + $0x58] sm:$0xff] }
 0x159   : > { %v1070_v30 = vadd.f32 %v15629_v25, %v1061_v26  ;;  %v15637_v31 = vpop.permute.xlu0 %909  ;;  %v1100_v26 = vld [vmem:[%s18147_s17 + $0xa0] sm:$0xff] }
 0x15a   : > { %v852_v32 = vpop.permute.xlu1 %851  ;;  %v915_v47 = vsel %vm18101_vm6, %v15637_v31, %v912_v15 }
 0x15b   : > { %vm1073_vm3 = vcmp.ge.f32.partialorder %v1070_v30, 0.0  ;;  %v1076_v33 = vmul.f32 0.01, %v1070_v30  ;;  %v920_v54 = vadd.f32 %v915_v47, %v892_v50  ;;  %v858_v62 = vsel %vm857_vm2, %v852_v32, %v854_v24  ;;  %v1148_v24 = vld [vmem:[%s18147_s17 + $0x220] sm:$0xff]  ;;  %v1145_v32 = vld [vmem:[%s18147_s17 + $0x208] sm:$0xff] }
 0x15c   : > { %v863_v11 = vadd.f32 %v858_v62, %v835_v3  ;;  %v1181_v62 = vld [vmem:[%s18147_s17 + $0x328] sm:$0xff] }
 0x15d   : > { %v15642_v35 = vpop.permute.xlu0 %937  ;;  %v15644_v36 = vsel %vm1073_vm3, %v1070_v30, %v1076_v33  ;;  %vm1507_vm3 = vcmask 31744  }
 0x15e   : > { %13282 = vmatmul.mubr.msk.f32.vlgmr.msra.gmra.mxu1 %vm18099_vm4, %v15644_v36  ;;  %v880_v39 = vpop.permute.xlu1 %879  ;;  %v943_v53 = vsel %vm941_vm7, %v15642_v35, %v940_v14 }
 0x15f   : > { %13665 = vmatpush3.msra.mxu1 %v1127_v34  ;;  %v948_v63 = vadd.f32 %v943_v53, %v920_v54  ;;  %v886_v6 = vsel %vm885_vm5, %v880_v39, %v882_v28  ;;  %v1130_v54 = vld [vmem:[%s18147_s17 + $0x190] sm:$0xff] }
 0x160   : > { %13666 = vmatprep.subr.mxu1 %v1172_v37 }
 0x161   : > { %13667 = vmatpush3.msra.mxu1 %v1124_v40  ;;  %v966_v46 = vpop.permute.xlu0 %965  ;;  %v1094_v40 = vld [vmem:[%s18147_s17 + $0x70] sm:$0xff] }
 0x162   : > { %13668 = vmatprep.subr.mxu1 %v1169_v43  ;;  %v908_v48 = vpop.permute.xlu1 %907  ;;  %v971_v58 = vsel %vm969_vm8, %v966_v46, %v968_v21 }
 0x163   : > { %13669 = vmatpush3.msra.mxu1 %v1121_v42  ;;  %v976_v8 = vadd.f32 %v971_v58, %v948_v63  ;;  %v914_v14 = vsel %vm18101_vm6, %v908_v48, %v15637_v31  ;;  %v1178_v63 = vld [vmem:[%s18147_s17 + $0x310] sm:$0xff] }
 0x164   : > { %13670 = vmatprep.subr.mxu1 %v1166_v60  ;;  %v1136_v60 = vld [vmem:[%s18147_s17 + $0x1c0] sm:$0xff] }
 0x165   : > { %13671 = vmatpush3.msra.mxu1 %v1118_v49  ;;  %v994_v56 = vpop.permute.xlu0 %993  ;;  %v1088_v49 = vld [vmem:[%s18147_s17 + $0x40] sm:$0xff] }
 0x166   : > { %13672 = vmatprep.subr.mxu1 %v1163_v51  ;;  %v936_v59 = vpop.permute.xlu1 %935  ;;  %v999_v4 = vsel %vm18100_vm9, %v994_v56, %v15625_v17  ;;  %v891_v17 = vadd.f32 %v886_v6, %v863_v11  ;;  %v1133_v51 = vld [vmem:[%s18147_s17 + $0x1a8] sm:$0xff] }
 0x167   : > { %13673 = vmatpush3.msra.mxu1 %v1115_v55  ;;  %v1004_v15 = vadd.f32 %v999_v4, %v976_v8  ;;  %v1085_v55 = vld [vmem:[%s18147_s17 + $0x28] sm:$0xff] }
 0x168   : > { %13674 = vmatprep.subr.mxu1 %v1160_v57  ;;  %v919_v27 = vadd.f32 %v914_v14, %v891_v17  ;;  %v1082_v57 = vld [vmem:[%s18147_s17 + $0x10] sm:$0xff] }
 0x169   : > { %13675 = vmatpush3.msra.mxu1 %v1112_v61  ;;  %v1022_v9 = vpop.permute.xlu0 %1021 }
 0x16a   : > { %v1027_v0 = vsel %vm18090_vm10, %v1022_v9, %v15627_v19  ;;  %13676 = vmatprep.subr.mxu1 %v1157_v1  ;;  %v964_v7 = vpop.permute.xlu1 %963  ;;  %v942_v19 = vsel %vm941_vm7, %v936_v59, %v15642_v35  ;;  %v1142_v35 = vld [vmem:[%s18147_s17 + $0x1f0] sm:$0xff]  ;;  %v1187_v59 = vld [vmem:[%s18147_s17 + $0x358] sm:$0x3f] }
 0x16b   : > { %13677 = vmatpush3.msra.mxu1 %v1109_v5  ;;  %v1032_v21 = vadd.f32 %v1027_v0, %v1004_v15  ;;  %v970_v30 = vsel %vm969_vm8, %v964_v7, %v966_v46  ;;  %v947_v33 = vadd.f32 %v942_v19, %v919_v27  ;;  %v2985_v27 = vld [vmem:[%s18157_s10] sm:$0xff]  ;;  %s18116_s10 = smov 114  }
 0x16c   : > { %13678 = vmatprep.subr.mxu1 %v1154_v10 }
 0x16d   : > { %13679 = vmatpush3.msra.mxu1 %v1106_v12  ;;  %v1050_v22 = vpop.permute.xlu0 %1049  ;;  %v975_v38 = vadd.f32 %v970_v30, %v947_v33  ;;  %v13285_v33 = vld [vmem:[%s18158_s1 + $0x8] sm:$0xff] }
 0x16e   : > { %v1055_v23 = vsel %vm1053_vm11, %v1050_v22, %v15633_v29  ;;  %13680 = vmatprep.subr.mxu1 %v1151_v16  ;;  %v992_v28 = vpop.permute.xlu1 %991  ;;  %v1097_v29 = vld [vmem:[%s18147_s17 + $0x88] sm:$0xff] }
 0x16f   : > { %v1060_v31 = vadd.f32 %v1055_v23, %v1032_v21  ;;  %13681 = vmatpush3.msra.mxu1 %v1103_v18  ;;  %v998_v34 = vsel %vm18100_vm9, %v992_v28, %v994_v56 }
 0x170   : > { %13682 = vmatprep.subr.mxu1 %v1148_v24  ;;  %v1003_v42 = vadd.f32 %v998_v34, %v975_v38  ;;  %v1493_v38 = vld [vmem:[%s18158_s1] sm:$0xff] }
 0x171   : > { %13683 = vmatpush3.msra.mxu1 %v1100_v26  ;;  %v1069_v37 = vadd.f32 %v15629_v25, %v1060_v31 }
 0x172   : > { %13684 = vmatprep.subr.mxu1 %v1145_v32  ;;  %v1020_v39 = vpop.permute.xlu1 %1019 }
 0x173   : > { %v1026_v41 = vsel %vm18090_vm10, %v1020_v39, %v1022_v9  ;;  %13685 = vmatpush3.msra.mxu1 %v1097_v29  ;;  %vm1072_vm12 = vcmp.ge.f32.partialorder %v1069_v37, 0.0  ;;  %v1075_v43 = vmul.f32 0.01, %v1069_v37 }
 0x174   : > { %13686 = vmatprep.subr.mxu1 %v1142_v35  ;;  %v1031_v47 = vadd.f32 %v1026_v41, %v1003_v42  ;;  %v13296_v42 = vld [vmem:[%s18158_s1 + $0x10] sm:$0xff] }
 0x175   : > { %13687 = vmatpush3.msra.mxu1 %v1094_v40  ;;  %v1078_v46 = vsel %vm1072_vm12, %v1069_v37, %v1075_v43 }
 0x176   : > { %1266 = vmatprep.mubr.f32.mxu0 %v1078_v46  ;;  %13688 = vmatprep.subr.mxu1 %v1139_v44  ;;  %v1048_v48 = vpop.permute.xlu1 %1047 }
 0x177   : > { %1408 = vmatprep.mubr.f32.mxu1 %v1078_v46  ;;  %v1054_v50 = vsel %vm1053_vm11, %v1048_v48, %v1050_v22  ;;  %13689 = vmatpush3.msra.mxu1 %v1091_v45 }
 0x178   : > { %v1059_v53 = vadd.f32 %v1054_v50, %v1031_v47  ;;  %13690 = vmatprep.subr.mxu1 %v1136_v60 }
 0x179   : > { %13691 = vmatpush3.msra.mxu1 %v1088_v49  ;;  %v13302_v49 = vld [vmem:[%s18158_s1 + $0x18] sm:$0xff] }
 0x17a   : > { %v1068_v56 = vadd.f32 %v15629_v25, %v1059_v53  ;;  %13692 = vmatprep.subr.mxu1 %v1133_v51  ;;  %v1184_v25 = vld [vmem:[%s18147_s17 + $0x340] sm:$0xff]  ;;  %s18091_s17 = smov 117  }
 0x17b   : > { %13693 = vmatpush3.msra.mxu1 %v1085_v55  ;;  %v13308_v55 = vld [vmem:[%s18158_s1 + $0x20] sm:$0xff] }
 0x17c   : > { %13694 = vmatprep.subr.mxu1 %v1130_v54  ;;  %vm1071_vm13 = vcmp.ge.f32.partialorder %v1068_v56, 0.0  ;;  %v1074_v58 = vmul.f32 0.01, %v1068_v56 }
 0x17d   : > { %13695 = vmatpush3.msra.mxu1 %v1082_v57 }
 0x17e   : > { %14116 = vmatprep.subr.mxu1 %v15023_v20  ;;  %v1077_v61 = vsel %vm1071_vm13, %v1068_v56, %v1074_v58 }
 0x17f   : > { %1267 = vmatmul.mubr.f32.vlgmr.msra.gmra.mxu0 %v1077_v61  ;;  %1409 = vmatmul.mubr.f32.vlgmr.msra.gmra.mxu1 %v1077_v61  ;;  %v13314_v61 = vld [vmem:[%s18158_s1 + $0x28] sm:$0xff] }
 0x180   : > { %14117 = vmatpush3.msk.msra.mxu1 %vm1192_vm1, %v1187_v59  ;;  %14124 = vmatprep.mubr.msk.f32.mxu1 %vm15024_vm14, %v15023_v20 }
 0x181   : > { %14118 = vmatprep.subr.mxu1 %v15023_v20  ;;  %1582 = vmatprep.mubr.f32.mxu0 %v15023_v20 }
 0x182   : > { %14119 = vmatpush3.msra.mxu1 %v1184_v25 }
 0x183   : > { %14120 = vmatprep.subr.mxu1 %v15023_v20 }
 0x184   : > { %14121 = vmatpush3.msra.mxu1 %v1181_v62 }
 0x185   : > { %14122 = vmatprep.subr.mxu1 %v15023_v20 }
 0x186   : > { %14123 = vmatpush3.msra.mxu1 %v1178_v63 }
 0x187   : > { %14125 = vmatmul.mubr.msk.f32.vlgmr.msra.gmra.mxu1 %vm18099_vm4, %v15644_v36  ;;  %14127 = vmatprep.subr.mxu1 %v15023_v20 }
 0x188   : > { %14129 = vmatprep.mubr.msk.f32.mxu1 %vm15024_vm14, %v15023_v20 }
 0x21e   : > { %v1339_v1 = vpop.f32.mrf.mxu1 }
 0x220   : > { %v1341_v3 = vpop.f32.mrf.mxu1 }
 0x23f   : > { %v1268_v4 = vpop.f32.mrf.mxu0  ;;  %v13696_v5 = vpop.f32.mrf.mxu1 }
 0x240   : > { %v1340_v8 = vadd.f32 %v1339_v1, %v1268_v4  ;;  %v13320_v1 = vld [vmem:[%s18158_s1 + $0x30] sm:$0xff] }
 0x241   : > { %v1270_v6 = vpop.f32.mrf.mxu0  ;;  %v13697_v10 = vpop.f32.mrf.mxu1 }
 0x242   : > { %v1342_v9 = vadd.f32 %v1341_v3, %v1270_v6  ;;  %v13698_v0 = vadd.f32 %v13697_v10, %v13696_v5 }
 0x244   : > { %v1486_v11 = vcombine.low %v1340_v8, %v1342_v9  ;;  %v14913_v12 = vcombine.low %v1342_v9, %v1342_v9  ;;  %v13326_v9 = vld [vmem:[%s18158_s1 + $0x38] sm:$0xff] }
 0x246   : > { %1816 = vrot.lane.b32.xlu1 %v1486_v11, %s18152_s29  ;;  %1499 = vrot.lane.b32.xlu0 %v1486_v11, %s18153_s8 }
 0x247   : > { %v1480_v36 = vpop.f32.mrf.mxu1 }
 0x248   : > { %v1481_v7 = vadd.f32 %v13698_v0, %v1480_v36 }
 0x249   : > { %v14126_v14 = vpop.f32.mrf.mxu1 }
 0x24a   : > { %1490 = vst.msk [vmem:[#allocation3 + $0x8] sm:$0xf] %vm1489_vm15, %v1481_v7  ;;  %1818 = vrot.lane.b32.xlu1 %v14913_v12, %s18152_s29  ;;  %1984 = vrot.lane.b32.xlu0 %v1486_v11, %s18149_s7  ;;  %v13332_v7 = vld [vmem:[%s18158_s1 + $0x40] sm:$0xff]  ;;  %v3018_v14 = vld [vmem:[%s18159_s18 + $0x78] sm:$0xff]  ;;  %s18162_s1 = sld [smem:[#allocation22_spill]] }
 0x24e   : > { %2154 = vrot.lane.b32.xlu1 %v14913_v12, %s18154_s5  ;;  %1501 = vrot.lane.b32.xlu0 %v14913_v12, %s18153_s8 }
 0x251   : > { %v1492_v15 = vld [vmem:[#allocation3 + $0x8] sm:$0xf] }
 0x252   : > { %1503 = vrot.lane.b32.xlu1 %v1492_v15, %s18153_s8  ;;  %1986 = vrot.lane.b32.xlu0 %v14913_v12, %s18149_s7  ;;  %v1978_v16 = vld [vmem:[#allocation3 + $0x8] sm:$0xf] }
 0x253   : > { %v1810_v17 = vld [vmem:[#allocation3 + $0x8] sm:$0xf] }
 0x254   : > { %v2314_v18 = vld [vmem:[#allocation3 + $0x8] sm:$0xf] }
 0x255   : > { %v2146_v19 = vld [vmem:[#allocation3 + $0x8] sm:$0xf] }
 0x256   : > { %2152 = vrot.lane.b32.xlu1 %v1486_v11, %s18154_s5  ;;  %2322 = vrot.lane.b32.xlu0 %v14913_v12, %s18150_s2  ;;  %v2650_v21 = vld [vmem:[#allocation3 + $0x8] sm:$0xf] }
 0x257   : > { %v2482_v22 = vld [vmem:[#allocation3 + $0x8] sm:$0xf] }
 0x258   : > { %v2818_v24 = vld [vmem:[#allocation3 + $0x8] sm:$0xf] }
 0x25a   : > { %1988 = vrot.lane.b32.xlu1 %v1978_v16, %s18149_s7  ;;  %1820 = vrot.lane.b32.xlu0 %v1810_v17, %s18152_s29  ;;  %v3017_v16 = vld [vmem:[%s18159_s18 + $0x70] sm:$0xff]  ;;  %v3032_v17 = vld [vmem:[%s18159_s18 + $0xe8] sm:$0xff] }
 0x25e   : > { %2490 = vrot.lane.b32.xlu1 %v14913_v12, %s18151_s16  ;;  %2320 = vrot.lane.b32.xlu0 %v1486_v11, %s18150_s2 }
 0x262   : > { %2324 = vrot.lane.b32.xlu1 %v2314_v18, %s18150_s2  ;;  %2156 = vrot.lane.b32.xlu0 %v2146_v19, %s18154_s5  ;;  %v3016_v18 = vld [vmem:[%s18159_s18 + $0x68] sm:$0xff]  ;;  %v3031_v19 = vld [vmem:[%s18159_s18 + $0xe0] sm:$0xff] }
 0x266   : > { %2488 = vrot.lane.b32.xlu1 %v1486_v11, %s18151_s16  ;;  %2658 = vrot.lane.b32.xlu0 %v14913_v12, %s18155_s26 }
 0x26a   : > { %2660 = vrot.lane.b32.xlu1 %v2650_v21, %s18155_s26  ;;  %2492 = vrot.lane.b32.xlu0 %v2482_v22, %s18151_s16  ;;  %v3015_v21 = vld [vmem:[%s18159_s18 + $0x60] sm:$0xff]  ;;  %v3030_v22 = vld [vmem:[%s18159_s18 + $0xd8] sm:$0xff] }
 0x26e   : > { %2826 = vrot.lane.b32.xlu1 %v14913_v12, %s18156_s28  ;;  %2656 = vrot.lane.b32.xlu0 %v1486_v11, %s18155_s26 }
 0x272   : > { %2824 = vrot.lane.b32.xlu1 %v1486_v11, %s18156_s28  ;;  %2828 = vrot.lane.b32.xlu0 %v2818_v24, %s18156_s28  ;;  %v3014_v24 = vld [vmem:[%s18159_s18 + $0x58] sm:$0xff] }
 0x276   : > { %2988 = vperm.xlu0 %14899, %v2985_v27   ;;  %v3029_v27 = vld [vmem:[%s18159_s18 + $0xd0] sm:$0xff] }
 0x2b8   : > { %v1817_v23 = vpop.permute.xlu1 %1816  ;;  %v1500_v28 = vpop.permute.xlu0 %1499 }
 0x2bc   : > { %v1819_v26 = vpop.permute.xlu1 %1818  ;;  %v1985_v30 = vpop.permute.xlu0 %1984 }
 0x2bd   : > { %v1822_v45 = vsel %vm885_vm5, %v1817_v23, %v1819_v26  ;;  %v3013_v23 = vld [vmem:[%s18159_s18 + $0x50] sm:$0xff] }
 0x2c0   : > { %v2155_v31 = vpop.permute.xlu1 %2154  ;;  %v1502_v32 = vpop.permute.xlu0 %1501 }
 0x2c1   : > { %v1505_v37 = vsel %vm857_vm2, %v1500_v28, %v1502_v32  ;;  %v3028_v28 = vld [vmem:[%s18159_s18 + $0xc8] sm:$0xff] }
 0x2c4   : > { %v1504_v29 = vpop.permute.xlu1 %1503  ;;  %v1987_v34 = vpop.permute.xlu0 %1986 }
 0x2c5   : > { %14128 = vmatpush3.msk.msra.mxu1 %vm1511_vm0, %v1504_v29  ;;  %v1506_v35 = vsel %vm857_vm2, %v1502_v32, %v1504_v29  ;;  %v1990_v60 = vsel %vm18101_vm6, %v1985_v30, %v1987_v34  ;;  %v3027_v30 = vld [vmem:[%s18159_s18 + $0xc0] sm:$0xff]  ;;  %v3026_v32 = vld [vmem:[%s18159_s18 + $0xb8] sm:$0xff]  ;;  %v3025_v29 = vld [vmem:[%s18159_s18 + $0xb0] sm:$0xff] }
 0x2c6   : > { %13286 = vmatprep.subr.msk.mxu0 %vm1511_vm0, %v1506_v35  ;;  %14130 = vmatmul.mubr.msk.f32.vlgmr.msra.gmra.mxu1 %vm1507_vm3, %v13285_v33  ;;  %v3024_v35 = vld [vmem:[%s18159_s18 + $0xa8] sm:$0xff] }
 0x2c7   : > { %13291 = vmatprep.subr.msk.mxu1 %vm1511_vm0, %v14913_v12  ;;  %13287 = vmatpush1.msk.msra.mxu0 %vm1511_vm0, %v1505_v37  ;;  %v3034_v12 = vld [vmem:[%s18159_s18 + $0xf8] sm:$0xff]  ;;  %v3008_v37 = vld [vmem:[%s18159_s18 + $0x28] sm:$0xff] }
 0x2c8   : > { %13292 = vmatpush1.msk.msra.mxu1 %vm1511_vm0, %v1486_v11  ;;  %v2153_v39 = vpop.permute.xlu1 %2152  ;;  %v2323_v40 = vpop.permute.xlu0 %2322  ;;  %1732 = vmatprep.mubr.f32.mxu1 %v15023_v20 }
 0x2c9   : > { %14132 = vmatprep.subr.mxu1 %v15023_v20  ;;  %13288 = vmatmul.mubr.msk.f32.vlgmr.msra.gmra.mxu0 %vm1507_vm3, %v13285_v33  ;;  %v2158_v54 = vsel %vm941_vm7, %v2153_v39, %v2155_v31  ;;  %v3010_v33 = vld [vmem:[%s18159_s18 + $0x38] sm:$0xff]  ;;  %v3007_v39 = vld [vmem:[%s18159_s18 + $0x20] sm:$0xff] }
 0x2ca   : > { %13293 = vmatmul.mubr.msk.f32.vlgmr.msra.gmra.mxu1 %vm1507_vm3, %v1493_v38  ;;  %1897 = vmatprep.mubr.f32.mxu0 %v15023_v20 }
 0x2cb   : > { %14133 = vmatpush3.msk.msra.mxu1 %vm1511_vm0, %v1492_v15  ;;  %14134 = vmatprep.mubr.msk.f32.mxu1 %vm15024_vm14, %v15023_v20  ;;  %v3033_v15 = vld [vmem:[%s18159_s18 + $0xf0] sm:$0xff] }
 0x2cc   : > { %v1989_v41 = vpop.permute.xlu1 %1988  ;;  %v1821_v43 = vpop.permute.xlu0 %1820  ;;  %14137 = vmatprep.subr.mxu1 %v15023_v20 }
 0x2cd   : > { %v1823_v44 = vsel %vm885_vm5, %v1819_v26, %v1821_v43  ;;  %v1991_v46 = vsel %vm18101_vm6, %v1987_v34, %v1989_v41  ;;  %v3012_v26 = vld [vmem:[%s18159_s18 + $0x48] sm:$0xff]  ;;  %v3009_v34 = vld [vmem:[%s18159_s18 + $0x30] sm:$0xff]  ;;  %vm4120_vm6 = vcmask 130048  }
 0x2ce   : > { %14135 = vmatmul.mubr.msk.f32.vlgmr.msra.gmra.mxu1 %vm1507_vm3, %v1493_v38  ;;  %13297 = vmatprep.subr.msk.mxu0 %vm1511_vm0, %v1823_v44  ;;  %v3023_v38 = vld [vmem:[%s18159_s18 + $0xa0] sm:$0xff]  ;;  %v3005_v44 = vld [vmem:[%s18159_s18 + $0x10] sm:$0xff] }
 0x2cf   : > { %14138 = vmatpush3.msk.msra.mxu1 %vm1511_vm0, %v1821_v43  ;;  %13298 = vmatpush1.msk.msra.mxu0 %vm1511_vm0, %v1822_v45  ;;  %v3021_v43 = vld [vmem:[%s18159_s18 + $0x90] sm:$0xff]  ;;  %v3004_v45 = vld [vmem:[%s18159_s18 + $0x8] sm:$0xff] }
 0x2d0   : > { %v2491_v47 = vpop.permute.xlu1 %2490  ;;  %13299 = vmatmul.mubr.msk.f32.vlgmr.msra.gmra.mxu0 %vm1507_vm3, %v13296_v42  ;;  %13303 = vmatprep.subr.msk.mxu0 %vm1511_vm0, %v1991_v46  ;;  %v2321_v48 = vpop.permute.xlu0 %2320  ;;  %v3019_v46 = vld [vmem:[%s18159_s18 + $0x80] sm:$0xff] }
 0x2d1   : > { %14139 = vmatprep.mubr.msk.f32.mxu1 %vm15024_vm14, %v15023_v20  ;;  %13304 = vmatpush1.msk.msra.mxu0 %vm1511_vm0, %v1990_v60  ;;  %v2326_v57 = vsel %vm969_vm8, %v2321_v48, %v2323_v40  ;;  %v3003_v60 = vld [vmem:[%s18159_s18] sm:$0xff] }
 0x2d2   : > { %14142 = vmatprep.subr.mxu1 %v15023_v20  ;;  %14140 = vmatmul.mubr.msk.f32.vlgmr.msra.gmra.mxu1 %vm1507_vm3, %v13296_v42  ;;  %v3020_v42 = vld [vmem:[%s18159_s18 + $0x88] sm:$0xff] }
 0x2d3   : > { %14143 = vmatpush3.msk.msra.mxu1 %vm1511_vm0, %v1989_v41  ;;  %2065 = vmatprep.mubr.f32.mxu0 %v15023_v20  ;;  %v3006_v41 = vld [vmem:[%s18159_s18 + $0x18] sm:$0xff] }
 0x2d4   : > { %v2325_v50 = vpop.permute.xlu1 %2324  ;;  %13305 = vmatmul.mubr.msk.f32.vlgmr.msra.gmra.mxu0 %vm1507_vm3, %v13302_v49  ;;  %v2157_v51 = vpop.permute.xlu0 %2156  ;;  %14144 = vmatprep.mubr.msk.f32.mxu1 %vm15024_vm14, %v15023_v20 }
 0x2d5   : > { %14147 = vmatprep.subr.mxu1 %v15023_v20  ;;  %v2159_v53 = vsel %vm941_vm7, %v2155_v31, %v2157_v51  ;;  %2233 = vmatprep.mubr.f32.mxu0 %v15023_v20  ;;  %v2327_v56 = vsel %vm969_vm8, %v2323_v40, %v2325_v50  ;;  %v3011_v31 = vld [vmem:[%s18159_s18 + $0x40] sm:$0xff]  ;;  %v3022_v40 = vld [vmem:[%s18159_s18 + $0x98] sm:$0xff] }
 0x2d6   : > { %14145 = vmatmul.mubr.msk.f32.vlgmr.msra.gmra.mxu1 %vm1507_vm3, %v13302_v49  ;;  %13309 = vmatprep.subr.msk.mxu0 %vm1511_vm0, %v2159_v53 }
 0x2d7   : > { %14148 = vmatpush3.msk.msra.mxu1 %vm1511_vm0, %v2157_v51  ;;  %13310 = vmatpush1.msk.msra.mxu0 %vm1511_vm0, %v2158_v54 }
 0x2d8   : > { %v2489_v58 = vpop.permute.xlu1 %2488  ;;  %13311 = vmatmul.mubr.msk.f32.vlgmr.msra.gmra.mxu0 %vm1507_vm3, %v13308_v55  ;;  %13315 = vmatprep.subr.msk.mxu0 %vm1511_vm0, %v2327_v56  ;;  %v2659_v59 = vpop.permute.xlu0 %2658 }
 0x2d9   : > { %14149 = vmatprep.mubr.msk.f32.mxu1 %vm15024_vm14, %v15023_v20  ;;  %13316 = vmatpush1.msk.msra.mxu0 %vm1511_vm0, %v2326_v57  ;;  %v2494_v3 = vsel %vm18100_vm9, %v2489_v58, %v2491_v47 }
 0x2da   : > { %14152 = vmatprep.subr.mxu1 %v15023_v20  ;;  %14150 = vmatmul.mubr.msk.f32.vlgmr.msra.gmra.mxu1 %vm1507_vm3, %v13308_v55 }
 0x2db   : > { %14153 = vmatpush3.msk.msra.mxu1 %vm1511_vm0, %v2325_v50  ;;  %2401 = vmatprep.mubr.f32.mxu0 %v15023_v20 }
 0x2dc   : > { %v2661_v25 = vpop.permute.xlu1 %2660  ;;  %13317 = vmatmul.mubr.msk.f32.vlgmr.msra.gmra.mxu0 %vm1507_vm3, %v13314_v61  ;;  %v2493_v62 = vpop.permute.xlu0 %2492  ;;  %14154 = vmatprep.mubr.msk.f32.mxu1 %vm15024_vm14, %v15023_v20 }
 0x2dd   : > { %14157 = vmatprep.subr.mxu1 %v15023_v20  ;;  %v2495_v63 = vsel %vm18100_vm9, %v2491_v47, %v2493_v62  ;;  %2569 = vmatprep.mubr.f32.mxu0 %v15023_v20  ;;  %v2663_v4 = vsel %vm18090_vm10, %v2659_v59, %v2661_v25  ;;  %vm4098_vm9 = vcmask 293888  }
 0x2de   : > { %14155 = vmatmul.mubr.msk.f32.vlgmr.msra.gmra.mxu1 %vm1507_vm3, %v13314_v61  ;;  %13321 = vmatprep.subr.msk.mxu0 %vm1511_vm0, %v2495_v63 }
 0x2df   : > { %14158 = vmatpush3.msk.msra.mxu1 %vm1511_vm0, %v2493_v62  ;;  %13322 = vmatpush1.msk.msra.mxu0 %vm1511_vm0, %v2494_v3 }
 0x2e0   : > { %v2827_v5 = vpop.permute.xlu1 %2826  ;;  %13323 = vmatmul.mubr.msk.f32.vlgmr.msra.gmra.mxu0 %vm1507_vm3, %v13320_v1  ;;  %13327 = vmatprep.subr.msk.mxu0 %vm1511_vm0, %v2663_v4  ;;  %v2657_v6 = vpop.permute.xlu0 %2656 }
 0x2e1   : > { %v2662_v8 = vsel %vm18090_vm10, %v2657_v6, %v2659_v59  ;;  %14159 = vmatprep.mubr.msk.f32.mxu1 %vm15024_vm14, %v15023_v20  ;;  %14162 = vmatprep.subr.mxu1 %v15023_v20  ;;  %vm3185_vm10 = vcmask 818176  }
 0x2e2   : > { %14160 = vmatmul.mubr.msk.f32.vlgmr.msra.gmra.mxu1 %vm1507_vm3, %v13320_v1  ;;  %13328 = vmatpush1.msk.msra.mxu0 %vm1511_vm0, %v2662_v8 }
 0x2e3   : > { %14163 = vmatpush3.msk.msra.mxu1 %vm1511_vm0, %v2661_v25  ;;  %2737 = vmatprep.mubr.f32.mxu0 %v15023_v20 }
 0x2e4   : > { %v2825_v10 = vpop.permute.xlu1 %2824  ;;  %13329 = vmatmul.mubr.msk.f32.vlgmr.msra.gmra.mxu0 %vm1507_vm3, %v13326_v9  ;;  %v2829_v11 = vpop.permute.xlu0 %2828  ;;  %14164 = vmatprep.mubr.msk.f32.mxu1 %vm15024_vm14, %v15023_v20 }
 0x2e5   : > { %v2830_v0 = vsel %vm1053_vm11, %v2825_v10, %v2827_v5  ;;  %14167 = vmatprep.subr.mxu1 %v15023_v20  ;;  %v2831_v36 = vsel %vm1053_vm11, %v2827_v5, %v2829_v11  ;;  %2905 = vmatprep.mubr.f32.mxu0 %v15023_v20 }
 0x2e6   : > { %14165 = vmatmul.mubr.msk.f32.vlgmr.msra.gmra.mxu1 %vm1507_vm3, %v13326_v9  ;;  %13333 = vmatprep.subr.msk.mxu0 %vm1511_vm0, %v2831_v36 }
 0x2e7   : > { %14168 = vmatpush3.msk.msra.mxu1 %vm1511_vm0, %v2829_v11  ;;  %13334 = vmatpush1.msk.msra.mxu0 %vm1511_vm0, %v2830_v0 }
 0x2e8   : > { %13335 = vmatmul.mubr.msk.f32.vlgmr.msra.gmra.mxu0 %vm1507_vm3, %v13332_v7  ;;  %14169 = vmatprep.mubr.msk.f32.mxu1 %vm15024_vm14, %v15023_v20 }
 0x2e9   : > { %13722 = vmatprep.subr.mxu1 %v3034_v12 }
 0x2ea   : > { %14170 = vmatmul.mubr.msk.f32.vlgmr.msra.gmra.mxu1 %vm1507_vm3, %v13332_v7 }
 0x2eb   : > { %13723 = vmatpush3.msra.mxu1 %v3018_v14 }
 0x2ec   : > { %13724 = vmatprep.subr.mxu1 %v3033_v15 }
 0x2ed   : > { %13725 = vmatpush3.msra.mxu1 %v3017_v16 }
 0x2ee   : > { %13726 = vmatprep.subr.mxu1 %v3032_v17 }
 0x2ef   : > { %13727 = vmatpush3.msra.mxu1 %v3016_v18 }
 0x2f0   : > { %13728 = vmatprep.subr.mxu1 %v3031_v19 }
 0x2f1   : > { %13729 = vmatpush3.msra.mxu1 %v3015_v21 }
 0x2f2   : > { %13730 = vmatprep.subr.mxu1 %v3030_v22 }
 0x2f3   : > { %13731 = vmatpush3.msra.mxu1 %v3014_v24 }
 0x2f4   : > { %13732 = vmatprep.subr.mxu1 %v3029_v27 }
 0x2f5   : > { %13733 = vmatpush3.msra.mxu1 %v3013_v23 }
 0x2f6   : > { %13734 = vmatprep.subr.mxu1 %v3028_v28 }
 0x2f7   : > { %13735 = vmatpush3.msra.mxu1 %v3012_v26 }
 0x2f8   : > { %13736 = vmatprep.subr.mxu1 %v3027_v30 }
 0x2f9   : > { %13737 = vmatpush3.msra.mxu1 %v3011_v31 }
 0x2fa   : > { %13738 = vmatprep.subr.mxu1 %v3026_v32 }
 0x2fb   : > { %13739 = vmatpush3.msra.mxu1 %v3010_v33 }
 0x2fc   : > { %13740 = vmatprep.subr.mxu1 %v3025_v29 }
 0x2fd   : > { %13741 = vmatpush3.msra.mxu1 %v3009_v34 }
 0x2fe   : > { %13742 = vmatprep.subr.mxu1 %v3024_v35 }
 0x2ff   : > { %13743 = vmatpush3.msra.mxu1 %v3008_v37 }
 0x300   : > { %13744 = vmatprep.subr.mxu1 %v3023_v38 }
 0x301   : > { %13745 = vmatpush3.msra.mxu1 %v3007_v39  ;;  %v2989_v39 = vpop.permute.xlu0 %2988 }
 0x302   : > { %13746 = vmatprep.subr.mxu1 %v3022_v40 }
 0x303   : > { %13747 = vmatpush3.msra.mxu1 %v3006_v41 }
 0x304   : > { %13748 = vmatprep.subr.mxu1 %v3021_v43 }
 0x305   : > { %13749 = vmatpush3.msra.mxu1 %v3005_v44 }
 0x306   : > { %13750 = vmatprep.subr.mxu1 %v3020_v42 }
 0x307   : > { %13751 = vmatpush3.msra.mxu1 %v3004_v45 }
 0x308   : > { %13752 = vmatprep.subr.mxu1 %v3019_v46 }
 0x309   : > { %13753 = vmatpush3.msra.mxu1 %v3003_v60 }
 0x30a   : > { %14172 = vmatprep.subr.mxu1 %v15023_v20 }
 0x386   : > { %v1655_v47 = vpop.f32.mrf.mxu1 }
 0x388   : > { %v14131_v48 = vpop.f32.mrf.mxu1 }
 0x389   : > { %v1584_v49 = vpop.f32.mrf.mxu0 }
 0x38a   : > { %v1734_v50 = vpop.f32.mrf.mxu1 }
 0x38b   : > { %v1586_v53 = vpop.f32.mrf.mxu0  ;;  %v1735_v5 = vadd.f32 %v1734_v50, %v1584_v49 }
 0x38c   : > { %v1736_v51 = vpop.f32.mrf.mxu1 }
 0x38d   : > { %v1737_v9 = vadd.f32 %v1736_v51, %v1586_v53 }
 0x38e   : > { %v1805_v55 = vpop.f32.mrf.mxu1 }
 0x38f   : > { %v1806_v12 = vadd.f32 %v1805_v55, %v1655_v47  ;;  %v3038_v55 = vld [vmem:[%s18159_s18 + $0x118] sm:$0x3f] }
 0x390   : > { %v14136_v54 = vpop.f32.mrf.mxu1  ;;  %v1899_v56 = vpop.f32.mrf.mxu0 }
 0x391   : > { %v1974_v10 = vadd.f32 %v1899_v56, %v1735_v5 }
 0x392   : > { %v1901_v57 = vpop.f32.mrf.mxu0  ;;  %v1970_v58 = vpop.f32.mrf.mxu1 }
 0x393   : > { %v1975_v36 = vadd.f32 %v1901_v57, %v1737_v9  ;;  %v1976_v18 = vadd.f32 %v1970_v58, %v1806_v12  ;;  %v3037_v57 = vld [vmem:[%s18159_s18 + $0x110] sm:$0xff]  ;;  %v3036_v58 = vld [vmem:[%s18159_s18 + $0x108] sm:$0xff]  ;;  %v13362_v9 = vld [vmem:[%s18160_s4 + $0x60] sm:$0xff] }
 0x394   : > { %v14141_v59 = vpop.f32.mrf.mxu1  ;;  %v2067_v61 = vpop.f32.mrf.mxu0  ;;  %v3188_v12 = vld [vmem:[%s18160_s4] sm:$0xff] }
 0x395   : > { %v2142_v7 = vadd.f32 %v2067_v61, %v1974_v10  ;;  %v3035_v61 = vld [vmem:[%s18159_s18 + $0x100] sm:$0xff]  ;;  %v3984_v10 = vld [vmem:[%s18161_s11 + $0x8] sm:$0xff]  ;;  %s18181_s18 = sld [smem:[#allocation25_spill]] }
 0x396   : > { %v2069_v25 = vpop.f32.mrf.mxu0  ;;  %v2138_v62 = vpop.f32.mrf.mxu1 }
 0x397   : > { %v2143_v16 = vadd.f32 %v2069_v25, %v1975_v36  ;;  %v2144_v27 = vadd.f32 %v2138_v62, %v1976_v18 }
 0x398   : > { %v14146_v63 = vpop.f32.mrf.mxu1  ;;  %v2235_v1 = vpop.f32.mrf.mxu0 }
 0x399   : > { %v2310_v17 = vadd.f32 %v2235_v1, %v2142_v7  ;;  %v13341_v7 = vld [vmem:[%s18160_s4 + $0x18] sm:$0xff] }
 0x39a   : > { %v2237_v3 = vpop.f32.mrf.mxu0  ;;  %v2306_v4 = vpop.f32.mrf.mxu1 }
 0x39b   : > { %v2311_v22 = vadd.f32 %v2237_v3, %v2143_v16  ;;  %v2312_v31 = vadd.f32 %v2306_v4, %v2144_v27  ;;  %v13340_v3 = vld [vmem:[%s18160_s4 + $0x10] sm:$0xff]  ;;  %v13346_v16 = vld [vmem:[%s18160_s4 + $0x20] sm:$0xff] }
 0x39c   : > { %v14151_v6 = vpop.f32.mrf.mxu1  ;;  %v2403_v8 = vpop.f32.mrf.mxu0 }
 0x39d   : > { %v2478_v24 = vadd.f32 %v2403_v8, %v2310_v17 }
 0x39e   : > { %v2405_v11 = vpop.f32.mrf.mxu0  ;;  %v2474_v0 = vpop.f32.mrf.mxu1 }
 0x39f   : > { %v2479_v26 = vadd.f32 %v2405_v11, %v2311_v22  ;;  %v2480_v35 = vadd.f32 %v2474_v0, %v2312_v31  ;;  %v3983_v11 = vld [vmem:[%s18161_s11] sm:$0xff]  ;;  %v13350_v22 = vld [vmem:[%s18160_s4 + $0x30] sm:$0xff]  ;;  %v13355_v31 = vld [vmem:[%s18160_s4 + $0x48] sm:$0xff]  ;;  %s18165_s11 = smov 121  }
 0x3a0   : > { %v14156_v14 = vpop.f32.mrf.mxu1  ;;  %v2571_v15 = vpop.f32.mrf.mxu0 }
 0x3a1   : > { %v2646_v30 = vadd.f32 %v2571_v15, %v2478_v24  ;;  %v3189_v15 = vld [vmem:[%s18160_s4 + $0x8] sm:$0xff]  ;;  %v13370_v24 = vld [vmem:[%s18160_s4 + $0x80] sm:$0xff] }
 0x3a2   : > { %v2573_v19 = vpop.f32.mrf.mxu0  ;;  %v2642_v21 = vpop.f32.mrf.mxu1 }
 0x3a3   : > { %v2647_v29 = vadd.f32 %v2573_v19, %v2479_v26  ;;  %v2648_v43 = vadd.f32 %v2642_v21, %v2480_v35  ;;  %v13347_v19 = vld [vmem:[%s18160_s4 + $0x28] sm:$0xff]  ;;  %v13354_v26 = vld [vmem:[%s18160_s4 + $0x40] sm:$0xff]  ;;  %v13367_v35 = vld [vmem:[%s18160_s4 + $0x78] sm:$0xff] }
 0x3a4   : > { %v14161_v23 = vpop.f32.mrf.mxu1  ;;  %v2739_v28 = vpop.f32.mrf.mxu0  ;;  %v13363_v21 = vld [vmem:[%s18160_s4 + $0x68] sm:$0xff] }
 0x3a5   : > { %v2814_v34 = vadd.f32 %v2739_v28, %v2646_v30  ;;  %v13351_v23 = vld [vmem:[%s18160_s4 + $0x38] sm:$0xff]  ;;  %v13371_v28 = vld [vmem:[%s18160_s4 + $0x88] sm:$0xff] }
 0x3a6   : > { %v2741_v32 = vpop.f32.mrf.mxu0  ;;  %v2810_v33 = vpop.f32.mrf.mxu1 }
 0x3a7   : > { %v2815_v40 = vadd.f32 %v2741_v32, %v2647_v29  ;;  %v2816_v60 = vadd.f32 %v2810_v33, %v2648_v43  ;;  %v13358_v32 = vld [vmem:[%s18160_s4 + $0x50] sm:$0xff]  ;;  %v13359_v29 = vld [vmem:[%s18160_s4 + $0x58] sm:$0xff] }
 0x3a8   : > { %v14166_v37 = vpop.f32.mrf.mxu1  ;;  %v2907_v38 = vpop.f32.mrf.mxu0  ;;  %v4007_v43 = vld [vmem:[#allocation11 + $0x20] sm:$0xff] }
 0x3a9   : > { %v2982_v41 = vadd.f32 %v2907_v38, %v2814_v34  ;;  %v13366_v34 = vld [vmem:[%s18160_s4 + $0x70] sm:$0xff]  ;;  %v4012_v37 = vld [vmem:[#allocation11 + $0x48] sm:$0x3f]  ;;  %v4011_v38 = vld [vmem:[#allocation11 + $0x40] sm:$0xff]  ;;  %s18113_s4 = smov 125  }
 0x3aa   : > { %v2909_v44 = vpop.f32.mrf.mxu0  ;;  %v2978_v42 = vpop.f32.mrf.mxu1 }
 0x3ab   : > { %v2991_v45 = vadd.f32 %v2989_v39, %v2982_v41  ;;  %v2983_v46 = vadd.f32 %v2909_v44, %v2815_v40  ;;  %v2984_v50 = vadd.f32 %v2978_v42, %v2816_v60  ;;  %v4009_v40 = vld [vmem:[#allocation11 + $0x30] sm:$0xff]  ;;  %v4008_v41 = vld [vmem:[#allocation11 + $0x28] sm:$0xff]  ;;  %v4006_v44 = vld [vmem:[#allocation11 + $0x18] sm:$0xff] }
 0x3ac   : > { %v14171_v47 = vpop.f32.mrf.mxu1  ;;  %v4005_v42 = vld [vmem:[#allocation11 + $0x10] sm:$0xff] }
 0x3ad   : > { %v2992_v48 = vadd.f32 %v2989_v39, %v2983_v46  ;;  %v2997_v49 = vmul.f32 0.01, %v2991_v45  ;;  %vm2994_vm13 = vcmp.ge.f32.partialorder %v2991_v45, 0.0  ;;  %v2993_v54 = vadd.f32 %v2989_v39, %v2984_v50  ;;  %v4010_v39 = vld [vmem:[#allocation11 + $0x38] sm:$0xff]  ;;  %v4003_v46 = vld [vmem:[#allocation11] sm:$0xff] }
 0x3af   : > { %vm2995_vm12 = vcmp.ge.f32.partialorder %v2992_v48, 0.0  ;;  %v2998_v51 = vmul.f32 0.01, %v2992_v48  ;;  %v3000_v56 = vsel %vm2994_vm13, %v2991_v45, %v2997_v49  ;;  %v2999_v59 = vmul.f32 0.01, %v2993_v54  ;;  %v4004_v45 = vld [vmem:[#allocation11 + $0x8] sm:$0xff] }
 0x3b0   : > { %vm3197_vm13 = vcmask 64512  }
 0x3b1   : > { %v3001_v53 = vsel %vm2995_vm12, %v2992_v48, %v2998_v51  ;;  %vm2996_vm12 = vcmp.ge.f32.partialorder %v2993_v54, 0.0  ;;  %14215 = vmatprep.mubr.msk.f32.mxu0 %vm3197_vm13, %v13362_v9 }
 0x3b2   : > { %3109 = vmatprep.mubr.f32.mxu1 %v3001_v53  ;;  %v3002_v25 = vsel %vm2996_vm12, %v2993_v54, %v2999_v59 }
 0x3b3   : > { %3110 = vmatmul.mubr.f32.vlgmr.msra.gmra.mxu1 %v3000_v56 }
 0x3b4   : > { %14173 = vmatpush3.msk.msra.mxu1 %vm1192_vm1, %v3038_v55  ;;  %14180 = vmatprep.mubr.msk.f32.mxu1 %vm15024_vm14, %v15023_v20 }
 0x3b5   : > { %14174 = vmatprep.subr.mxu1 %v15023_v20 }
 0x3b6   : > { %14175 = vmatpush3.msra.mxu1 %v3037_v57 }
 0x3b7   : > { %14176 = vmatprep.subr.mxu1 %v15023_v20 }
 0x3b8   : > { %14177 = vmatpush3.msra.mxu1 %v3036_v58 }
 0x3b9   : > { %14178 = vmatprep.subr.mxu1 %v15023_v20 }
 0x3ba   : > { %14179 = vmatpush3.msra.mxu1 %v3035_v61 }
 0x3bb   : > { %14181 = vmatmul.mubr.msk.f32.vlgmr.msra.gmra.mxu1 %vm18099_vm4, %v3002_v25  ;;  %vm4013_vm4 = vcmask 637952  }
 0x3bc   : > { %14185 = vmatprep.mubr.msk.f32.mxu1 %vm3197_vm13, %v13340_v3 }
 0x473   : > { %v13754_v62 = vpop.f32.mrf.mxu1 }
 0x475   : > { %v13755_v63 = vpop.f32.mrf.mxu1 }
 0x476   : > { %v13756_v1 = vadd.f32 %v13755_v63, %v13754_v62 }
 0x47b   : > { %v3181_v4 = vpop.f32.mrf.mxu1 }
 0x47c   : > { %v3182_v5 = vadd.f32 %v13756_v1, %v3181_v4 }
 0x47d   : > { %v14182_v6 = vpop.f32.mrf.mxu1 }
 0x47e   : > { %3186 = vst.msk [vmem:[#allocation4] sm:$0xff] %vm3185_vm10, %v3182_v5 }
 0x485   : > { %v3187_v8 = vld [vmem:[#allocation4] sm:$0xff] }
 0x486   : > { %3363 = vrot.lane.b32.xlu0 %v3187_v8, %s18152_s29  ;;  %3194 = vrot.lane.b32.xlu1 %v3187_v8, %s18153_s8 }
 0x48a   : > { %3541 = vrot.lane.b32.xlu0 %v3187_v8, %s18091_s17  ;;  %3452 = vrot.lane.b32.xlu1 %v3187_v8, %s18093_s19  ;;  %s18106_s17 = smov 121   ;;  %s18104_s19 = smov 120  }
 0x48e   : > { %3719 = vrot.lane.b32.xlu0 %v3187_v8, %s18150_s2  ;;  %3630 = vrot.lane.b32.xlu1 %v3187_v8, %s18097_s20  ;;  %s18163_s20 = smov 116  }
 0x492   : > { %3897 = vrot.lane.b32.xlu0 %v3187_v8, %s18095_s0  ;;  %3808 = vrot.lane.b32.xlu1 %v3187_v8, %s18102_s3  ;;  %s18109_s0 = smov 115   ;;  %s18173_s3 = smov 106  }
 0x496   : > { %3992 = vperm.xlu0 %14899, %v3984_v10   ;;  %3987 = vperm.xlu1 %14900, %v3983_v11  }
 0x4f8   : > { %v3364_v0 = vpop.permute.xlu0 %3363  ;;  %v3195_v36 = vpop.permute.xlu1 %3194 }
 0x4f9   : > { %14183 = vmatprep.subr.mxu1 %v3195_v36 }
 0x4fa   : > { %14184 = vmatpush3.msra.mxu1 %v3195_v36 }
 0x4fb   : > { %14186 = vmatmul.mubr.msk.f32.vlgmr.msra.gmra.mxu1 %vm3197_vm13, %v13341_v7  ;;  %14188 = vmatprep.subr.mxu1 %v3187_v8 }
 0x4fc   : > { %v3542_v14 = vpop.permute.xlu0 %3541  ;;  %14189 = vmatpush3.msra.mxu1 %v3187_v8  ;;  %14190 = vmatprep.mubr.msk.f32.mxu1 %vm3197_vm13, %v3188_v12  ;;  %v3453_v17 = vpop.permute.xlu1 %3452 }
 0x4fd   : > { %14193 = vmatprep.subr.mxu1 %v3364_v0 }
 0x4ff   : > { %14191 = vmatmul.mubr.msk.f32.vlgmr.msra.gmra.mxu1 %vm3197_vm13, %v3189_v15 }
 0x500   : > { %14194 = vmatpush3.msra.mxu1 %v3364_v0  ;;  %v3720_v18 = vpop.permute.xlu0 %3719  ;;  %14195 = vmatprep.mubr.msk.f32.mxu1 %vm3197_vm13, %v13346_v16  ;;  %v3631_v30 = vpop.permute.xlu1 %3630 }
 0x501   : > { %14198 = vmatprep.subr.mxu1 %v3453_v17  ;;  %14213 = vmatprep.subr.mxu0 %v3720_v18 }
 0x502   : > { %14214 = vmatpush3.msra.mxu0 %v3720_v18 }
 0x503   : > { %14196 = vmatmul.mubr.msk.f32.vlgmr.msra.gmra.mxu1 %vm3197_vm13, %v13347_v19  ;;  %14216 = vmatmul.mubr.msk.f32.vlgmr.msra.gmra.mxu0 %vm3197_vm13, %v13363_v21 }
 0x504   : > { %14199 = vmatpush3.msra.mxu1 %v3453_v17  ;;  %v3898_v27 = vpop.permute.xlu0 %3897  ;;  %14200 = vmatprep.mubr.msk.f32.mxu1 %vm3197_vm13, %v13350_v22  ;;  %v3809_v33 = vpop.permute.xlu1 %3808 }
 0x505   : > { %14203 = vmatprep.subr.mxu1 %v3542_v14  ;;  %14223 = vmatprep.subr.mxu0 %v3898_v27 }
 0x506   : > { %14224 = vmatpush3.msra.mxu0 %v3898_v27  ;;  %14225 = vmatprep.mubr.msk.f32.mxu0 %vm3197_vm13, %v13370_v24 }
 0x507   : > { %14201 = vmatmul.mubr.msk.f32.vlgmr.msra.gmra.mxu1 %vm3197_vm13, %v13351_v23  ;;  %14226 = vmatmul.mubr.msk.f32.vlgmr.msra.gmra.mxu0 %vm3197_vm13, %v13371_v28 }
 0x508   : > { %14204 = vmatpush3.msra.mxu1 %v3542_v14  ;;  %14205 = vmatprep.mubr.msk.f32.mxu1 %vm3197_vm13, %v13354_v26  ;;  %v13377_v26 = vld [vmem:[%s18162_s1 + $0x20] sm:$0xff] }
 0x509   : > { %14208 = vmatprep.subr.mxu1 %v3631_v30  ;;  %14255 = vmatprep.mubr.msk.f32.mxu0 %vm4120_vm6, %v13377_v26  ;;  %v5129_v26 = vld [vmem:[#allocation13 + $0x10] sm:$0x3f] }
 0x50b   : > { %14206 = vmatmul.mubr.msk.f32.vlgmr.msra.gmra.mxu1 %vm3197_vm13, %v13355_v31 }
 0x50c   : > { %14209 = vmatpush3.msra.mxu1 %v3631_v30  ;;  %14210 = vmatprep.mubr.msk.f32.mxu1 %vm3197_vm13, %v13358_v32 }
 0x50d   : > { %14218 = vmatprep.subr.mxu1 %v3809_v33 }
 0x50f   : > { %14211 = vmatmul.mubr.msk.f32.vlgmr.msra.gmra.mxu1 %vm3197_vm13, %v13359_v29  ;;  %v13397_v29 = vld [vmem:[%s18162_s1 + $0x60] sm:$0xff] }
 0x510   : > { %14219 = vmatpush3.msra.mxu1 %v3809_v33  ;;  %14220 = vmatprep.mubr.msk.f32.mxu1 %vm3197_vm13, %v13366_v34  ;;  %v5099_v34 = vld [vmem:[%s18164_s12] sm:$0xff] }
 0x511   : > { %14228 = vmatprep.subr.msk.mxu1 %vm1192_vm1, %v4012_v37  ;;  %v3993_v16 = vpop.permute.xlu0 %3992  ;;  %v3988_v21 = vpop.permute.xlu1 %3987 }
 0x513   : > { %14221 = vmatmul.mubr.msk.f32.vlgmr.msra.gmra.mxu1 %vm3197_vm13, %v13367_v35  ;;  %v5100_v35 = vld [vmem:[%s18164_s12 + $0x8] sm:$0xff] }
 0x514   : > { %14229 = vmatpush3.msk.msra.mxu1 %vm1192_vm1, %v4012_v37  ;;  %v5101_v37 = vld [vmem:[%s18164_s12 + $0x10] sm:$0xff] }
 0x515   : > { %14230 = vmatprep.subr.mxu1 %v4011_v38 }
 0x516   : > { %14231 = vmatpush3.msra.mxu1 %v4011_v38  ;;  %v5102_v38 = vld [vmem:[%s18164_s12 + $0x18] sm:$0xff]  ;;  %s15038_s12 = smov 112  }
 0x517   : > { %14232 = vmatprep.subr.mxu1 %v4010_v39 }
 0x518   : > { %14233 = vmatpush3.msra.mxu1 %v4010_v39 }
 0x519   : > { %14234 = vmatprep.subr.mxu1 %v4009_v40 }
 0x51a   : > { %14235 = vmatpush3.msra.mxu1 %v4009_v40 }
 0x51b   : > { %14236 = vmatprep.subr.mxu1 %v4008_v41 }
 0x51c   : > { %14237 = vmatpush3.msra.mxu1 %v4008_v41  ;;  %v13378_v41 = vld [vmem:[%s18162_s1 + $0x28] sm:$0xff] }
 0x51d   : > { %14238 = vmatprep.subr.mxu1 %v4007_v43 }
 0x51e   : > { %14239 = vmatpush3.msra.mxu1 %v4007_v43  ;;  %v13379_v43 = vld [vmem:[%s18162_s1 + $0x30] sm:$0xff] }
 0x51f   : > { %14240 = vmatprep.subr.mxu1 %v4006_v44 }
 0x520   : > { %14241 = vmatpush3.msra.mxu1 %v4006_v44 }
 0x521   : > { %14242 = vmatprep.subr.mxu1 %v4005_v42 }
 0x522   : > { %14243 = vmatpush3.msra.mxu1 %v4005_v42 }
 0x523   : > { %14244 = vmatprep.subr.mxu1 %v4004_v45 }
 0x524   : > { %14245 = vmatpush3.msra.mxu1 %v4004_v45  ;;  %v13380_v45 = vld [vmem:[%s18162_s1 + $0x38] sm:$0xff] }
 0x525   : > { %14246 = vmatprep.subr.mxu1 %v4003_v46 }
 0x526   : > { %14247 = vmatpush3.msra.mxu1 %v4003_v46  ;;  %v4103_v46 = vld [vmem:[%s18162_s1] sm:$0xff] }
 0x5bb   : > { %v14187_v60 = vpop.f32.mrf.mxu1 }
 0x5bd   : > { %v3270_v47 = vpop.f32.mrf.mxu1 }
 0x5bf   : > { %v14192_v48 = vpop.f32.mrf.mxu1 }
 0x5c0   : > { %v3357_v55 = vadd.f32 %v14192_v48, %v14187_v60  ;;  %v4104_v48 = vld [vmem:[%s18162_s1 + $0x8] sm:$0xff] }
 0x5c1   : > { %v3351_v49 = vpop.f32.mrf.mxu1 }
 0x5c2   : > { %v3352_v56 = vadd.f32 %v3351_v49, %v3270_v47  ;;  %v4105_v49 = vld [vmem:[%s18162_s1 + $0x10] sm:$0xff] }
 0x5c3   : > { %v14197_v50 = vpop.f32.mrf.mxu1  ;;  %v14217_v59 = vpop.f32.mrf.mxu0 }
 0x5c4   : > { %v3448_v57 = vadd.f32 %v14197_v50, %v3357_v55 }
 0x5c5   : > { %v3438_v51 = vpop.f32.mrf.mxu1  ;;  %v3794_v4 = vpop.f32.mrf.mxu0 }
 0x5c6   : > { %v3447_v61 = vadd.f32 %v3438_v51, %v3352_v56  ;;  %v13398_v51 = vld [vmem:[%s18162_s1 + $0x68] sm:$0xff]  ;;  %v13389_v56 = vld [vmem:[%s18162_s1 + $0x40] sm:$0xff] }
 0x5c7   : > { %v14202_v53 = vpop.f32.mrf.mxu1  ;;  %v14227_v0 = vpop.f32.mrf.mxu0 }
 0x5c8   : > { %v3537_v25 = vadd.f32 %v14202_v53, %v3448_v57  ;;  %v13399_v53 = vld [vmem:[%s18162_s1 + $0x70] sm:$0xff] }
 0x5c9   : > { %v3527_v54 = vpop.f32.mrf.mxu1  ;;  %v3972_v17 = vpop.f32.mrf.mxu0 }
 0x5ca   : > { %v3536_v63 = vadd.f32 %v3527_v54, %v3447_v61  ;;  %v4106_v54 = vld [vmem:[%s18162_s1 + $0x18] sm:$0xff]  ;;  %v13390_v61 = vld [vmem:[%s18162_s1 + $0x48] sm:$0xff] }
 0x5cb   : > { %v14207_v58 = vpop.f32.mrf.mxu1 }
 0x5cc   : > { %v3626_v1 = vadd.f32 %v14207_v58, %v3537_v25  ;;  %v13400_v58 = vld [vmem:[%s18162_s1 + $0x78] sm:$0xff]  ;;  %v13391_v25 = vld [vmem:[%s18162_s1 + $0x50] sm:$0xff] }
 0x5cd   : > { %v3616_v62 = vpop.f32.mrf.mxu1 }
 0x5ce   : > { %v3625_v5 = vadd.f32 %v3616_v62, %v3536_v63  ;;  %v13413_v63 = vld [vmem:[%s18162_s1 + $0xa0] sm:$0xff] }
 0x5cf   : > { %v14212_v3 = vpop.f32.mrf.mxu1 }
 0x5d0   : > { %v3715_v6 = vadd.f32 %v14212_v3, %v3626_v1  ;;  %v13414_v1 = vld [vmem:[%s18162_s1 + $0xa8] sm:$0xff] }
 0x5d1   : > { %v3705_v8 = vpop.f32.mrf.mxu1 }
 0x5d2   : > { %v3804_v9 = vadd.f32 %v14217_v59, %v3715_v6  ;;  %v3714_v10 = vadd.f32 %v3705_v8, %v3625_v5  ;;  %v13405_v5 = vld [vmem:[%s18162_s1 + $0x80] sm:$0xff]  ;;  %v13415_v8 = vld [vmem:[%s18162_s1 + $0xb0] sm:$0xff] }
 0x5d3   : > { %v14222_v11 = vpop.f32.mrf.mxu1 }
 0x5d4   : > { %v3803_v36 = vadd.f32 %v3794_v4, %v3714_v10  ;;  %v3893_v7 = vadd.f32 %v14222_v11, %v3804_v9  ;;  %v13392_v4 = vld [vmem:[%s18162_s1 + $0x58] sm:$0xff]  ;;  %v13406_v11 = vld [vmem:[%s18162_s1 + $0x88] sm:$0xff] }
 0x5d5   : > { %v3883_v12 = vpop.f32.mrf.mxu1  ;;  %v13416_v9 = vld [vmem:[%s18162_s1 + $0xb8] sm:$0xff] }
 0x5d6   : > { %v3982_v14 = vadd.f32 %v14227_v0, %v3893_v7  ;;  %v3892_v15 = vadd.f32 %v3883_v12, %v3803_v36  ;;  %v13407_v0 = vld [vmem:[%s18162_s1 + $0x90] sm:$0xff]  ;;  %v13429_v36 = vld [vmem:[%s18162_s1 + $0xe0] sm:$0xff]  ;;  %v13430_v7 = vld [vmem:[%s18162_s1 + $0xe8] sm:$0xff] }
 0x5d7   : > { %v13408_v12 = vld [vmem:[%s18162_s1 + $0x98] sm:$0xff] }
 0x5d8   : > { %v3996_v18 = vadd.f32 %v3993_v16, %v3982_v14  ;;  %v3981_v19 = vadd.f32 %v3972_v17, %v3892_v15  ;;  %v13421_v14 = vld [vmem:[%s18162_s1 + $0xc0] sm:$0xff]  ;;  %v13431_v15 = vld [vmem:[%s18162_s1 + $0xf0] sm:$0xff]  ;;  %v13432_v17 = vld [vmem:[%s18162_s1 + $0xf8] sm:$0xff] }
 0x5da   : > { %v3995_v22 = vadd.f32 %v3988_v21, %v3981_v19  ;;  %v4000_v24 = vmul.f32 0.01, %v3996_v18  ;;  %vm3998_vm10 = vcmp.ge.f32.partialorder %v3996_v18, 0.0  ;;  %v13423_v19 = vld [vmem:[%s18162_s1 + $0xd0] sm:$0xff] }
 0x5dc   : > { %v3999_v27 = vmul.f32 0.01, %v3995_v22  ;;  %vm3997_vm12 = vcmp.ge.f32.partialorder %v3995_v22, 0.0  ;;  %v4002_v28 = vsel %vm3998_vm10, %v3996_v18, %v4000_v24  ;;  %v13422_v18 = vld [vmem:[%s18162_s1 + $0xc8] sm:$0xff]  ;;  %v13437_v24 = vld [vmem:[%s18162_s1 + $0x100] sm:$0xff]  ;;  %vm5261_vm10 = vcmask 261120  }
 0x5de   : > { %v4001_v23 = vsel %vm3997_vm12, %v3995_v22, %v3999_v27  ;;  %v13424_v22 = vld [vmem:[%s18162_s1 + $0xd8] sm:$0xff]  ;;  %v13438_v27 = vld [vmem:[%s18162_s1 + $0x108] sm:$0xff]  ;;  %vm6827_vm12 = vcmask 1040384  }
 0x5df   : > { %14248 = vmatprep.mubr.msk.f32.mxu1 %vm4013_vm4, %v4001_v23  ;;  %v13439_v23 = vld [vmem:[%s18162_s1 + $0x110] sm:$0xff] }
 0x5e0   : > { %14249 = vmatmul.mubr.msk.f32.vlgmr.msra.gmra.mxu1 %vm4013_vm4, %v4002_v28  ;;  %v13440_v28 = vld [vmem:[%s18162_s1 + $0x118] sm:$0xff]  ;;  %vm5130_vm4 = vcmask 179200   ;;  %s15037_s1 = smov 113  }
 0x5e1   : > { %14285 = vmatprep.mubr.msk.f32.mxu1 %vm4120_vm6, %v13397_v29 }
 0x6a0   : > { %v14250_v30 = vpop.f32.mrf.mxu1 }
 0x6a1   : > { %4100 = vst.msk [vmem:[#allocation5 + $0x8] sm:$0xff] %vm4098_vm9, %v14250_v30  ;;  %v5128_v30 = vld [vmem:[#allocation13 + $0x8] sm:$0xff] }
 0x6a2   : > { %v4089_v31 = vpop.f32.mrf.mxu1 }
 0x6a3   : > { %4099 = vst.msk [vmem:[#allocation5] sm:$0xff] %vm4098_vm9, %v4089_v31  ;;  %v5127_v31 = vld [vmem:[#allocation13] sm:$0xff]  ;;  %vm5231_vm9 = vcmask 400384  }
 0x6a8   : > { %v4102_v32 = vld [vmem:[#allocation5 + $0x8] sm:$0xff] }
 0x6a9   : > { %4116 = vrot.lane.b32.xlu1 %v4102_v32, %s18153_s8 }
 0x6aa   : > { %v4101_v33 = vld [vmem:[#allocation5] sm:$0xff] }
 0x6ab   : > { %4114 = vrot.lane.b32.xlu0 %v4101_v33, %s18153_s8 }
 0x6ad   : > { %4322 = vrot.lane.b32.xlu1 %v4102_v32, %s18152_s29 }
 0x6af   : > { %4320 = vrot.lane.b32.xlu0 %v4101_v33, %s18152_s29 }
 0x6b1   : > { %4434 = vrot.lane.b32.xlu1 %v4102_v32, %s15030_s9 }
 0x6b3   : > { %4432 = vrot.lane.b32.xlu0 %v4101_v33, %s15030_s9  ;;  %s18169_s9 = smov 125  }
 0x6b5   : > { %4546 = vrot.lane.b32.xlu1 %v4102_v32, %s18106_s17 }
 0x6b7   : > { %4544 = vrot.lane.b32.xlu0 %v4101_v33, %s18106_s17  ;;  %s18111_s17 = smov 119  }
 0x6b9   : > { %4658 = vrot.lane.b32.xlu1 %v4102_v32, %s18104_s19 }
 0x6bb   : > { %4656 = vrot.lane.b32.xlu0 %v4101_v33, %s18104_s19  ;;  %s18168_s19 = sld [smem:[#allocation23_spill]] }
 0x6bd   : > { %4770 = vrot.lane.b32.xlu1 %v4102_v32, %s18163_s20 }
 0x6bf   : > { %4768 = vrot.lane.b32.xlu0 %v4101_v33, %s18163_s20 }
 0x6c1   : > { %4882 = vrot.lane.b32.xlu1 %v4102_v32, %s18109_s0 }
 0x6c3   : > { %4880 = vrot.lane.b32.xlu0 %v4101_v33, %s18109_s0  ;;  %s18166_s0 = smov 120  }
 0x6c5   : > { %4994 = vrot.lane.b32.xlu1 %v4102_v32, %s18116_s10 }
 0x6c7   : > { %4992 = vrot.lane.b32.xlu0 %v4101_v33, %s18116_s10 }
 0x6c9   : > { %5105 = vperm.xlu1 %14900, %v5099_v34  }
 0x6cb   : > { %5110 = vperm.xlu0 %14899, %v5100_v35  }
 0x6cd   : > { %5115 = vperm.xlu1 %14900, %v5101_v37  }
 0x6cf   : > { %5120 = vperm.xlu0 %14899, %v5102_v38  }
 0x71b   : > { %v4117_v39 = vpop.permute.xlu1 %4116 }
 0x71c   : > { %14251 = vmatprep.subr.mxu0 %v4117_v39 }
 0x71d   : > { %14252 = vmatpush3.msra.mxu0 %v4117_v39  ;;  %v4115_v40 = vpop.permute.xlu0 %4114 }
 0x71e   : > { %14253 = vmatprep.subr.mxu0 %v4115_v40 }
 0x71f   : > { %v4323_v44 = vpop.permute.xlu1 %4322  ;;  %14254 = vmatpush3.msra.mxu0 %v4115_v40 }
 0x720   : > { %14256 = vmatmul.mubr.msk.f32.vlgmr.msra.gmra.mxu0 %vm4120_vm6, %v13378_v41  ;;  %14261 = vmatprep.subr.mxu0 %v4102_v32 }
 0x721   : > { %14262 = vmatpush3.msra.mxu0 %v4102_v32  ;;  %v4321_v42 = vpop.permute.xlu0 %4320  ;;  %14258 = vmatprep.mubr.msk.f32.mxu0 %vm4120_vm6, %v13379_v43 }
 0x722   : > { %14263 = vmatprep.subr.mxu0 %v4101_v33 }
 0x723   : > { %v4435_v60 = vpop.permute.xlu1 %4434  ;;  %14264 = vmatpush3.msra.mxu0 %v4101_v33 }
 0x724   : > { %14259 = vmatmul.mubr.msk.f32.gmra.mxu0 %vm4120_vm6, %v13380_v45  ;;  %14271 = vmatprep.subr.mxu0 %v4323_v44 }
 0x725   : > { %14281 = vmatprep.subr.mxu1 %v4435_v60  ;;  %v4433_v47 = vpop.permute.xlu0 %4432  ;;  %14265 = vmatprep.mubr.msk.f32.mxu0 %vm4120_vm6, %v4103_v46 }
 0x726   : > { %14282 = vmatpush3.msra.mxu1 %v4435_v60 }
 0x727   : > { %14283 = vmatprep.subr.mxu1 %v4433_v47  ;;  %v4547_v50 = vpop.permute.xlu1 %4546 }
 0x728   : > { %14284 = vmatpush3.msra.mxu1 %v4433_v47  ;;  %14266 = vmatmul.mubr.msk.f32.vlgmr.msra.gmra.mxu0 %vm4120_vm6, %v4104_v48 }
 0x729   : > { %14272 = vmatpush3.msra.mxu0 %v4323_v44  ;;  %v4545_v55 = vpop.permute.xlu0 %4544  ;;  %14268 = vmatprep.mubr.msk.f32.mxu0 %vm4120_vm6, %v4105_v49 }
 0x72a   : > { %14273 = vmatprep.subr.mxu0 %v4321_v42  ;;  %14286 = vmatmul.mubr.msk.f32.vlgmr.msra.gmra.mxu1 %vm4120_vm6, %v13398_v51 }
 0x72b   : > { %14274 = vmatpush3.msra.mxu0 %v4321_v42  ;;  %v4659_v57 = vpop.permute.xlu1 %4658  ;;  %14288 = vmatprep.mubr.msk.f32.mxu1 %vm4120_vm6, %v13399_v53 }
 0x72c   : > { %14291 = vmatprep.subr.mxu0 %v4547_v50  ;;  %14269 = vmatmul.mubr.msk.f32.gmra.mxu0 %vm4120_vm6, %v4106_v54 }
 0x72d   : > { %14301 = vmatprep.subr.mxu1 %v4659_v57  ;;  %v4657_v59 = vpop.permute.xlu0 %4656  ;;  %14275 = vmatprep.mubr.msk.f32.mxu0 %vm4120_vm6, %v13389_v56 }
 0x72e   : > { %14302 = vmatpush3.msra.mxu1 %v4659_v57 }
 0x72f   : > { %14303 = vmatprep.subr.mxu1 %v4657_v59  ;;  %v4771_v62 = vpop.permute.xlu1 %4770  ;;  %14289 = vmatmul.mubr.msk.f32.gmra.mxu1 %vm4120_vm6, %v13400_v58 }
 0x730   : > { %14304 = vmatpush3.msra.mxu1 %v4657_v59  ;;  %14276 = vmatmul.mubr.msk.f32.vlgmr.msra.gmra.mxu0 %vm4120_vm6, %v13390_v61 }
 0x731   : > { %14292 = vmatpush3.msra.mxu0 %v4547_v50  ;;  %v4769_v3 = vpop.permute.xlu0 %4768  ;;  %14278 = vmatprep.mubr.msk.f32.mxu0 %vm4120_vm6, %v13391_v25 }
 0x732   : > { %14293 = vmatprep.subr.mxu0 %v4545_v55  ;;  %14305 = vmatprep.mubr.msk.f32.mxu1 %vm4120_vm6, %v13413_v63 }
 0x733   : > { %14294 = vmatpush3.msra.mxu0 %v4545_v55  ;;  %v4883_v6 = vpop.permute.xlu1 %4882  ;;  %14306 = vmatmul.mubr.msk.f32.vlgmr.msra.gmra.mxu1 %vm4120_vm6, %v13414_v1 }
 0x734   : > { %14311 = vmatprep.subr.mxu0 %v4771_v62  ;;  %14279 = vmatmul.mubr.msk.f32.gmra.mxu0 %vm4120_vm6, %v13392_v4 }
 0x735   : > { %14321 = vmatprep.subr.mxu1 %v4883_v6  ;;  %v4881_v10 = vpop.permute.xlu0 %4880  ;;  %14295 = vmatprep.mubr.msk.f32.mxu0 %vm4120_vm6, %v13405_v5 }
 0x736   : > { %14322 = vmatpush3.msra.mxu1 %v4883_v6  ;;  %14308 = vmatprep.mubr.msk.f32.mxu1 %vm4120_vm6, %v13415_v8 }
 0x737   : > { %14323 = vmatprep.subr.mxu1 %v4881_v10  ;;  %14309 = vmatmul.mubr.msk.f32.gmra.mxu1 %vm4120_vm6, %v13416_v9  ;;  %v4995_v16 = vpop.permute.xlu1 %4994 }
 0x738   : > { %14324 = vmatpush3.msra.mxu1 %v4881_v10  ;;  %14296 = vmatmul.mubr.msk.f32.vlgmr.msra.gmra.mxu0 %vm4120_vm6, %v13406_v11 }
 0x739   : > { %14312 = vmatpush3.msra.mxu0 %v4771_v62  ;;  %14298 = vmatprep.mubr.msk.f32.mxu0 %vm4120_vm6, %v13407_v0  ;;  %v4993_v21 = vpop.permute.xlu0 %4992 }
 0x73a   : > { %14313 = vmatprep.subr.mxu0 %v4769_v3  ;;  %14325 = vmatprep.mubr.msk.f32.mxu1 %vm4120_vm6, %v13429_v36 }
 0x73b   : > { %14314 = vmatpush3.msra.mxu0 %v4769_v3  ;;  %14326 = vmatmul.mubr.msk.f32.vlgmr.msra.gmra.mxu1 %vm4120_vm6, %v13430_v7 }
 0x73c   : > { %14331 = vmatprep.subr.mxu0 %v4995_v16  ;;  %14299 = vmatmul.mubr.msk.f32.gmra.mxu0 %vm4120_vm6, %v13408_v12 }
 0x73d   : > { %14315 = vmatprep.mubr.msk.f32.mxu0 %vm4120_vm6, %v13421_v14  ;;  %14328 = vmatprep.mubr.msk.f32.mxu1 %vm4120_vm6, %v13431_v15 }
 0x73e   : > { %14341 = vmatprep.subr.msk.mxu1 %vm1192_vm1, %v5129_v26 }
 0x73f   : > { %14329 = vmatmul.mubr.msk.f32.gmra.mxu1 %vm4120_vm6, %v13432_v17 }
 0x740   : > { %14316 = vmatmul.mubr.msk.f32.vlgmr.msra.gmra.mxu0 %vm4120_vm6, %v13422_v18  ;;  %14342 = vmatpush3.msk.msra.mxu1 %vm1192_vm1, %v5129_v26 }
 0x741   : > { %14332 = vmatpush3.msra.mxu0 %v4995_v16  ;;  %14318 = vmatprep.mubr.msk.f32.mxu0 %vm4120_vm6, %v13423_v19 }
 0x742   : > { %14333 = vmatprep.subr.mxu0 %v4993_v21  ;;  %14343 = vmatprep.subr.mxu1 %v5128_v30 }
 0x743   : > { %14334 = vmatpush3.msra.mxu0 %v4993_v21  ;;  %14344 = vmatpush3.msra.mxu1 %v5128_v30 }
 0x744   : > { %14319 = vmatmul.mubr.msk.f32.gmra.mxu0 %vm4120_vm6, %v13424_v22  ;;  %14345 = vmatprep.subr.mxu1 %v5127_v31 }
 0x745   : > { %14335 = vmatprep.mubr.msk.f32.mxu0 %vm4120_vm6, %v13437_v24  ;;  %14346 = vmatpush3.msra.mxu1 %v5127_v31 }
 0x748   : > { %14336 = vmatmul.mubr.msk.f32.vlgmr.msra.gmra.mxu0 %vm4120_vm6, %v13438_v27 }
 0x749   : > { %14338 = vmatprep.mubr.msk.f32.mxu0 %vm4120_vm6, %v13439_v23 }
 0x74c   : > { %14339 = vmatmul.mubr.msk.f32.gmra.mxu0 %vm4120_vm6, %v13440_v28  ;;  %v5106_v28 = vpop.permute.xlu1 %5105 }
 0x7e0   : > { %v14257_v32 = vpop.f32.mrf.mxu0 }
 0x7e2   : > { %v4199_v33 = vpop.f32.mrf.mxu0 }
 0x7e4   : > { %v14260_v29 = vpop.f32.mrf.mxu0 }
 0x7e6   : > { %v4209_v34 = vpop.f32.mrf.mxu0 }
 0x7e8   : > { %v14267_v35 = vpop.f32.mrf.mxu0 }
 0x7e9   : > { %v4302_v48 = vadd.f32 %v14267_v35, %v14257_v32 }
 0x7ea   : > { %v4296_v37 = vpop.f32.mrf.mxu0  ;;  %v14287_v38 = vpop.f32.mrf.mxu1 }
 0x7eb   : > { %v4297_v50 = vadd.f32 %v4296_v37, %v4199_v33 }
 0x7ec   : > { %v14270_v39 = vpop.f32.mrf.mxu0  ;;  %v4516_v40 = vpop.f32.mrf.mxu1 }
 0x7ed   : > { %v4312_v56 = vadd.f32 %v14270_v39, %v14260_v29  ;;  %v5111_v29 = vpop.permute.xlu0 %5110 }
 0x7ee   : > { %v4306_v41 = vpop.f32.mrf.mxu0 }
 0x7ef   : > { %v14290_v43 = vpop.f32.mrf.mxu1  ;;  %v4307_v59 = vadd.f32 %v4306_v41, %v4209_v34 }
 0x7f0   : > { %v14277_v44 = vpop.f32.mrf.mxu0 }
 0x7f1   : > { %v4526_v42 = vpop.f32.mrf.mxu1  ;;  %v4424_v53 = vadd.f32 %v14277_v44, %v4302_v48 }
 0x7f2   : > { %v4404_v45 = vpop.f32.mrf.mxu0 }
 0x7f3   : > { %v14307_v46 = vpop.f32.mrf.mxu1  ;;  %v4423_v54 = vadd.f32 %v4404_v45, %v4297_v50  ;;  %v4536_v61 = vadd.f32 %v14287_v38, %v4424_v53  ;;  %v5121_v45 = vpop.permute.xlu0 %5120 }
 0x7f4   : > { %v14280_v60 = vpop.f32.mrf.mxu0 }
 0x7f5   : > { %v4740_v47 = vpop.f32.mrf.mxu1  ;;  %v4426_v25 = vadd.f32 %v14280_v60, %v4312_v56  ;;  %v4535_v63 = vadd.f32 %v4516_v40, %v4423_v54  ;;  %v5240_v56 = vld [vmem:[%s18168_s19] sm:$0xff] }
 0x7f6   : > { %v4414_v49 = vpop.f32.mrf.mxu0 }
 0x7f7   : > { %v14310_v51 = vpop.f32.mrf.mxu1  ;;  %v4425_v1 = vadd.f32 %v4414_v49, %v4307_v59  ;;  %v4538_v8 = vadd.f32 %v14290_v43, %v4426_v25  ;;  %v13460_v59 = vld [vmem:[%s18168_s19 + $0x30] sm:$0xff] }
 0x7f8   : > { %v14297_v55 = vpop.f32.mrf.mxu0 }
 0x7f9   : > { %v4750_v58 = vpop.f32.mrf.mxu1  ;;  %v4648_v3 = vadd.f32 %v14297_v55, %v4536_v61  ;;  %v4537_v10 = vadd.f32 %v4526_v42, %v4425_v1  ;;  %v5116_v42 = vpop.permute.xlu1 %5115 }
 0x7fa   : > { %v4628_v57 = vpop.f32.mrf.mxu0 }
 0x7fb   : > { %v14327_v5 = vpop.f32.mrf.mxu1  ;;  %v4647_v6 = vadd.f32 %v4628_v57, %v4535_v63  ;;  %v4760_v11 = vadd.f32 %v14307_v46, %v4648_v3  ;;  %v5241_v57 = vld [vmem:[%s18168_s19 + $0x8] sm:$0xff]  ;;  %v6796_v3 = vld [vmem:[%s18174_s13] sm:$0xff] }
 0x7fc   : > { %v14300_v62 = vpop.f32.mrf.mxu0 }
 0x7fd   : > { %v4650_v0 = vadd.f32 %v14300_v62, %v4538_v8  ;;  %v4964_v7 = vpop.f32.mrf.mxu1  ;;  %v4759_v12 = vadd.f32 %v4740_v47, %v4647_v6  ;;  %v6797_v62 = vld [vmem:[%s18174_s13 + $0x8] sm:$0xff]  ;;  %s15047_s13 = smov 88  }
 0x7fe   : > { %v4638_v4 = vpop.f32.mrf.mxu0 }
 0x7ff   : > { %v4649_v14 = vadd.f32 %v4638_v4, %v4537_v10  ;;  %v4762_v18 = vadd.f32 %v14310_v51, %v4650_v0  ;;  %v14330_v21 = vpop.f32.mrf.mxu1 }
 0x800   : > { %v14317_v9 = vpop.f32.mrf.mxu0 }
 0x801   : > { %v4872_v15 = vadd.f32 %v14317_v9, %v4760_v11  ;;  %v4761_v22 = vadd.f32 %v4750_v58, %v4649_v14  ;;  %v4974_v31 = vpop.f32.mrf.mxu1  ;;  %v13450_v58 = vld [vmem:[%s18168_s19 + $0x10] sm:$0xff] }
 0x802   : > { %v4852_v36 = vpop.f32.mrf.mxu0  ;;  %14361 = vmatprep.mubr.msk.f32.mxu0 %vm5261_vm10, %v13450_v58  ;;  %v13477_v58 = vld [vmem:[%s18168_s19 + $0x78] sm:$0xff] }
 0x803   : > { %v4871_v17 = vadd.f32 %v4852_v36, %v4759_v12  ;;  %v4984_v24 = vadd.f32 %v14327_v5, %v4872_v15 }
 0x804   : > { %v14320_v16 = vpop.f32.mrf.mxu0 }
 0x805   : > { %v4874_v27 = vadd.f32 %v14320_v16, %v4762_v18  ;;  %v4983_v26 = vadd.f32 %v4964_v7, %v4871_v17 }
 0x806   : > { %v4862_v19 = vpop.f32.mrf.mxu0 }
 0x807   : > { %v4873_v30 = vadd.f32 %v4862_v19, %v4761_v22  ;;  %v4986_v35 = vadd.f32 %v14330_v21, %v4874_v27 }
 0x808   : > { %v14337_v23 = vpop.f32.mrf.mxu0 }
 0x809   : > { %v5096_v32 = vadd.f32 %v14337_v23, %v4984_v24  ;;  %v4985_v38 = vadd.f32 %v4974_v31, %v4873_v30  ;;  %v13451_v31 = vld [vmem:[%s18168_s19 + $0x18] sm:$0xff] }
 0x80a   : > { %v5076_v33 = vpop.f32.mrf.mxu0 }
 0x80b   : > { %v5095_v34 = vadd.f32 %v5076_v33, %v4983_v26  ;;  %v5124_v40 = vadd.f32 %v5111_v29, %v5096_v32  ;;  %v13456_v33 = vld [vmem:[%s18168_s19 + $0x20] sm:$0xff] }
 0x80c   : > { %v14340_v37 = vpop.f32.mrf.mxu0 }
 0x80d   : > { %v5123_v39 = vadd.f32 %v5106_v28, %v5095_v34  ;;  %v5098_v41 = vadd.f32 %v14340_v37, %v4986_v35  ;;  %v13457_v37 = vld [vmem:[%s18168_s19 + $0x28] sm:$0xff] }
 0x80e   : > { %v5086_v43 = vpop.f32.mrf.mxu0 }
 0x80f   : > { %v5097_v44 = vadd.f32 %v5086_v43, %v4985_v38  ;;  %14347 = vmatprep.mubr.msk.f32.mxu1 %vm5130_vm4, %v5123_v39  ;;  %v5126_v60 = vadd.f32 %v5121_v45, %v5098_v41  ;;  %v13461_v41 = vld [vmem:[%s18168_s19 + $0x38] sm:$0xff]  ;;  %v13465_v45 = vld [vmem:[%s18168_s19 + $0x48] sm:$0xff] }
 0x810   : > { %14348 = vmatmul.mubr.msk.f32.vlgmr.msra.gmra.mxu1 %vm5130_vm4, %v5124_v40 }
 0x811   : > { %v5125_v46 = vadd.f32 %v5116_v42, %v5097_v44  ;;  %v13464_v42 = vld [vmem:[%s18168_s19 + $0x40] sm:$0xff] }
 0x813   : > { %14350 = vmatprep.mubr.msk.f32.mxu1 %vm5130_vm4, %v5125_v46 }
 0x814   : > { %14351 = vmatmul.mubr.msk.f32.gmra.mxu1 %vm5130_vm4, %v5126_v60 }
 0x815   : > { %14372 = vmatprep.mubr.msk.f32.mxu1 %vm5261_vm10, %v5240_v56  ;;  %v13476_v56 = vld [vmem:[%s18168_s19 + $0x70] sm:$0xff] }
 0x8d0   : > { %v14349_v47 = vpop.f32.mrf.mxu1 }
 0x8d1   : > { %5233 = vst.msk [vmem:[#allocation6 + $0x8] sm:$0xff] %vm5231_vm9, %v14349_v47  ;;  %v13468_v47 = vld [vmem:[%s18168_s19 + $0x50] sm:$0xff] }
 0x8d2   : > { %v5212_v48 = vpop.f32.mrf.mxu1 }
 0x8d3   : > { %5232 = vst.msk [vmem:[#allocation6] sm:$0xff] %vm5231_vm9, %v5212_v48  ;;  %v13469_v48 = vld [vmem:[%s18168_s19 + $0x58] sm:$0xff] }
 0x8d4   : > { %v14352_v49 = vpop.f32.mrf.mxu1 }
 0x8d5   : > { %5235 = vst.msk [vmem:[#allocation6 + $0x18] sm:$0xff] %vm5231_vm9, %v14352_v49 }
 0x8d6   : > { %v5222_v50 = vpop.f32.mrf.mxu1 }
 0x8d7   : > { %5234 = vst.msk [vmem:[#allocation6 + $0x10] sm:$0xff] %vm5231_vm9, %v5222_v50 }
 0x8d8   : > { %v16316_v51 = vld [vmem:[#allocation6 + $0x8] sm:$0xff] }
 0x8d9   : > { %5429 = vrot.lane.b32.xlu0 %v16316_v51, %s18152_s29  ;;  %5251 = vrot.lane.b32.xlu1 %v16316_v51, %s18153_s8 }
 0x8da   : > { %v16339_v54 = vld [vmem:[#allocation6] sm:$0xff] }
 0x8dc   : > { %v16322_v53 = vld [vmem:[#allocation6 + $0x18] sm:$0xff] }
 0x8dd   : > { %5625 = vrot.lane.b32.xlu0 %v16316_v51, %s18165_s11  ;;  %5527 = vrot.lane.b32.xlu1 %v16316_v51, %s18113_s4  ;;  %s18170_s4 = smov 119  }
 0x8de   : > { %v16328_v55 = vld [vmem:[#allocation6 + $0x10] sm:$0xff]  ;;  %14364 = vmatprep.subr.mxu1 %v16322_v53 }
 0x8df   : > { %14365 = vmatpush3.msra.mxu1 %v16322_v53 }
 0x8e0   : > { %14366 = vmatprep.subr.mxu1 %v16328_v55 }
 0x8e1   : > { %14367 = vmatpush3.msra.mxu1 %v16328_v55  ;;  %5821 = vrot.lane.b32.xlu0 %v16316_v51, %s18111_s17  ;;  %s18171_s17 = smov 107  }
 0x8e2   : > { %5723 = vrot.lane.b32.xlu1 %v16316_v51, %s18166_s0  ;;  %14368 = vmatprep.subr.mxu1 %v16316_v51 }
 0x8e3   : > { %14369 = vmatpush3.msra.mxu1 %v16316_v51 }
 0x8e4   : > { %14370 = vmatprep.subr.mxu1 %v16339_v54 }
 0x8e5   : > { %14371 = vmatpush3.msra.mxu1 %v16339_v54  ;;  %6017 = vrot.lane.b32.xlu0 %v16316_v51, %s18116_s10 }
 0x8e6   : > { %5919 = vrot.lane.b32.xlu1 %v16316_v51, %s18167_s27  ;;  %14373 = vmatmul.mubr.msk.f32.vlgmr.msra.gmra.mxu1 %vm5261_vm10, %v5241_v57 }
 0x8e7   : > { %14394 = vmatprep.mubr.msk.f32.mxu1 %vm5261_vm10, %v13460_v59 }
 0x8e9   : > { %5249 = vrot.lane.b32.xlu0 %v16339_v54, %s18153_s8 }
 0x8ea   : > { %6115 = vrot.lane.b32.xlu1 %v16316_v51, %s15037_s1 }
 0x8ed   : > { %5427 = vrot.lane.b32.xlu0 %v16339_v54, %s18152_s29 }
 0x8ee   : > { %5255 = vrot.lane.b32.xlu1 %v16322_v53, %s18153_s8 }
 0x8f1   : > { %5525 = vrot.lane.b32.xlu0 %v16339_v54, %s18169_s9 }
 0x8f2   : > { %5433 = vrot.lane.b32.xlu1 %v16322_v53, %s18152_s29 }
 0x8f5   : > { %5623 = vrot.lane.b32.xlu0 %v16339_v54, %s18165_s11 }
 0x8f6   : > { %5531 = vrot.lane.b32.xlu1 %v16322_v53, %s18169_s9 }
 0x8f9   : > { %5721 = vrot.lane.b32.xlu0 %v16339_v54, %s18166_s0 }
 0x8fa   : > { %5629 = vrot.lane.b32.xlu1 %v16322_v53, %s18165_s11 }
 0x8fd   : > { %5819 = vrot.lane.b32.xlu0 %v16339_v54, %s18170_s4 }
 0x8fe   : > { %5727 = vrot.lane.b32.xlu1 %v16322_v53, %s18166_s0 }
 0x901   : > { %5917 = vrot.lane.b32.xlu0 %v16339_v54, %s18167_s27 }
 0x902   : > { %5825 = vrot.lane.b32.xlu1 %v16322_v53, %s18170_s4 }
 0x905   : > { %6015 = vrot.lane.b32.xlu0 %v16339_v54, %s18116_s10 }
 0x906   : > { %5923 = vrot.lane.b32.xlu1 %v16322_v53, %s18167_s27 }
 0x909   : > { %6113 = vrot.lane.b32.xlu0 %v16339_v54, %s15037_s1 }
 0x90a   : > { %6021 = vrot.lane.b32.xlu1 %v16322_v53, %s18116_s10  ;;  %s15039_s10 = smov 111  }
 0x90d   : > { %5253 = vrot.lane.b32.xlu0 %v16328_v55, %s18153_s8 }
 0x90e   : > { %6119 = vrot.lane.b32.xlu1 %v16322_v53, %s15037_s1 }
 0x911   : > { %6213 = vrot.lane.b32.xlu0 %v16316_v51, %s15038_s12 }
 0x912   : > { %6217 = vrot.lane.b32.xlu1 %v16322_v53, %s15038_s12 }
 0x915   : > { %5431 = vrot.lane.b32.xlu0 %v16328_v55, %s18152_s29 }
 0x916   : > { %6315 = vrot.lane.b32.xlu1 %v16322_v53, %s15039_s10 }
 0x919   : > { %6211 = vrot.lane.b32.xlu0 %v16339_v54, %s15038_s12 }
 0x91a   : > { %5529 = vrot.lane.b32.xlu1 %v16328_v55, %s18169_s9 }
 0x91d   : > { %5627 = vrot.lane.b32.xlu0 %v16328_v55, %s18165_s11  ;;  %s18172_s11 = smov 114  }
 0x91e   : > { %6311 = vrot.lane.b32.xlu1 %v16316_v51, %s15039_s10 }
 0x921   : > { %6309 = vrot.lane.b32.xlu0 %v16339_v54, %s15039_s10 }
 0x922   : > { %5725 = vrot.lane.b32.xlu1 %v16328_v55, %s18166_s0  ;;  %s18120_s0 = smov 105  }
 0x925   : > { %5823 = vrot.lane.b32.xlu0 %v16328_v55, %s18170_s4  ;;  %s18178_s4 = smov 104  }
 0x926   : > { %6413 = vrot.lane.b32.xlu1 %v16322_v53, %s18171_s17 }
 0x929   : > { %6409 = vrot.lane.b32.xlu0 %v16316_v51, %s18171_s17 }
 0x92a   : > { %5921 = vrot.lane.b32.xlu1 %v16328_v55, %s18167_s27  ;;  %s18177_s27 = smov 105  }
 0x92d   : > { %6019 = vrot.lane.b32.xlu0 %v16328_v55, %s18172_s11 }
 0x92e   : > { %6511 = vrot.lane.b32.xlu1 %v16322_v53, %s18173_s3 }
 0x931   : > { %6407 = vrot.lane.b32.xlu0 %v16339_v54, %s18171_s17 }
 0x932   : > { %6117 = vrot.lane.b32.xlu1 %v16328_v55, %s15037_s1  ;;  %s15043_s1 = smov 95  }
 0x935   : > { %6215 = vrot.lane.b32.xlu0 %v16328_v55, %s15038_s12  ;;  %s18118_s12 = smov 104  }
 0x936   : > { %6507 = vrot.lane.b32.xlu1 %v16316_v51, %s18173_s3 }
 0x939   : > { %6505 = vrot.lane.b32.xlu0 %v16339_v54, %s18173_s3 }
 0x93a   : > { %6313 = vrot.lane.b32.xlu1 %v16328_v55, %s15039_s10  ;;  %s18176_s10 = smov 115  }
 0x93d   : > { %6411 = vrot.lane.b32.xlu0 %v16328_v55, %s18171_s17 }
 0x93e   : > { %6609 = vrot.lane.b32.xlu1 %v16322_v53, %s18120_s0 }
 0x941   : > { %6605 = vrot.lane.b32.xlu0 %v16316_v51, %s18120_s0 }
 0x942   : > { %6509 = vrot.lane.b32.xlu1 %v16328_v55, %s18173_s3 }
 0x945   : > { %6607 = vrot.lane.b32.xlu0 %v16328_v55, %s18120_s0 }
 0x946   : > { %6707 = vrot.lane.b32.xlu1 %v16322_v53, %s18118_s12  ;;  %v13473_v53 = vld [vmem:[%s18168_s19 + $0x68] sm:$0xff] }
 0x949   : > { %6603 = vrot.lane.b32.xlu0 %v16339_v54, %s18120_s0  ;;  %s18175_s0 = smov 117  }
 0x94a   : > { %6705 = vrot.lane.b32.xlu1 %v16328_v55, %s18118_s12 }
 0x94b   : > { %v5252_v61 = vpop.permute.xlu1 %5251  ;;  %v5430_v25 = vpop.permute.xlu0 %5429 }
 0x94d   : > { %6701 = vrot.lane.b32.xlu0 %v16339_v54, %s18118_s12 }
 0x94e   : > { %6703 = vrot.lane.b32.xlu1 %v16316_v51, %s18118_s12  ;;  %v13472_v51 = vld [vmem:[%s18168_s19 + $0x60] sm:$0xff]  ;;  %s15044_s12 = smov 94  }
 0x94f   : > { %v16463_v63 = vpop.permute.xlu1 %5527  ;;  %v16465_v1 = vpop.permute.xlu0 %5625 }
 0x951   : > { %6805 = vperm.xlu0 %14899, %v6797_v62  }
 0x952   : > { %6800 = vperm.xlu1 %14900, %v6796_v3  }
 0x953   : > { %v16470_v4 = vpop.permute.xlu0 %5821 }
 0x954   : > { %v16472_v5 = vpop.permute.xlu1 %5723 }
 0x957   : > { %v16474_v6 = vpop.permute.xlu0 %6017 }
 0x958   : > { %v16476_v8 = vpop.permute.xlu1 %5919 }
 0x95b   : > { %v5250_v9 = vpop.permute.xlu0 %5249 }
 0x95c   : > { %v16478_v10 = vpop.permute.xlu1 %6115 }
 0x95f   : > { %v5428_v11 = vpop.permute.xlu0 %5427 }
 0x960   : > { %v5256_v0 = vpop.permute.xlu1 %5255 }
 0x961   : > { %14353 = vmatprep.subr.mxu0 %v5256_v0 }
 0x962   : > { %14354 = vmatpush3.msra.mxu0 %v5256_v0  ;;  %v13492_v0 = vld [vmem:[%s18168_s19 + $0xb0] sm:$0xff] }
 0x963   : > { %v5526_v36 = vpop.permute.xlu0 %5525 }
 0x964   : > { %v5434_v7 = vpop.permute.xlu1 %5433 }
 0x967   : > { %v16480_v12 = vpop.permute.xlu0 %5623 }
 0x968   : > { %v5532_v14 = vpop.permute.xlu1 %5531 }
 0x969   : > { %14386 = vmatprep.subr.mxu1 %v5532_v14 }
 0x96a   : > { %14387 = vmatpush3.msra.mxu1 %v5532_v14  ;;  %v13496_v14 = vld [vmem:[%s18168_s19 + $0xc0] sm:$0xff] }
 0x96b   : > { %v16482_v15 = vpop.permute.xlu0 %5721 }
 0x96c   : > { %v5630_v16 = vpop.permute.xlu1 %5629 }
 0x96f   : > { %v16484_v17 = vpop.permute.xlu0 %5819 }
 0x970   : > { %v5728_v18 = vpop.permute.xlu1 %5727 }
 0x973   : > { %v16486_v19 = vpop.permute.xlu0 %5917 }
 0x974   : > { %v16488_v21 = vpop.permute.xlu1 %5825 }
 0x977   : > { %v16490_v22 = vpop.permute.xlu0 %6015 }
 0x978   : > { %v16492_v24 = vpop.permute.xlu1 %5923 }
 0x97b   : > { %v16494_v27 = vpop.permute.xlu0 %6113 }
 0x97c   : > { %v16496_v23 = vpop.permute.xlu1 %6021 }
 0x97f   : > { %v5254_v28 = vpop.permute.xlu0 %5253 }
 0x980   : > { %v16498_v26 = vpop.permute.xlu1 %6119  ;;  %14355 = vmatprep.subr.mxu0 %v5254_v28 }
 0x981   : > { %14356 = vmatpush3.msra.mxu0 %v5254_v28 }
 0x982   : > { %14357 = vmatprep.subr.mxu0 %v5252_v61 }
 0x983   : > { %14358 = vmatpush3.msra.mxu0 %v5252_v61  ;;  %v16500_v30 = vpop.permute.xlu0 %6213 }
 0x984   : > { %v16505_v32 = vpop.permute.xlu1 %6217  ;;  %14359 = vmatprep.subr.mxu0 %v5250_v9 }
 0x985   : > { %14360 = vmatpush3.msra.mxu0 %v5250_v9 }
 0x986   : > { %14375 = vmatprep.subr.mxu0 %v5434_v7  ;;  %14362 = vmatmul.mubr.msk.f32.vlgmr.msra.gmra.mxu0 %vm5261_vm10, %v13451_v31  ;;  %v6818_v31 = vld [vmem:[#allocation15 + $0x10] sm:$0xff] }
 0x987   : > { %14376 = vmatpush3.msra.mxu0 %v5434_v7  ;;  %v5432_v29 = vpop.permute.xlu0 %5431  ;;  %14383 = vmatprep.mubr.msk.f32.mxu0 %vm5261_vm10, %v13456_v33  ;;  %v6816_v33 = vld [vmem:[#allocation15] sm:$0xff] }
 0x988   : > { %v16512_v34 = vpop.permute.xlu1 %6315  ;;  %14377 = vmatprep.subr.mxu0 %v5432_v29 }
 0x989   : > { %14378 = vmatpush3.msra.mxu0 %v5432_v29 }
 0x98a   : > { %14379 = vmatprep.subr.mxu0 %v5430_v25 }
 0x98b   : > { %14380 = vmatpush3.msra.mxu0 %v5430_v25  ;;  %v16514_v35 = vpop.permute.xlu0 %6211  ;;  %v13480_v25 = vld [vmem:[%s18168_s19 + $0x80] sm:$0xff] }
 0x98c   : > { %v5530_v38 = vpop.permute.xlu1 %5529  ;;  %14381 = vmatprep.subr.mxu0 %v5428_v11 }
 0x98d   : > { %14388 = vmatprep.subr.mxu1 %v5530_v38  ;;  %14382 = vmatpush3.msra.mxu0 %v5428_v11 }
 0x98e   : > { %14389 = vmatpush3.msra.mxu1 %v5530_v38  ;;  %14384 = vmatmul.mubr.msk.f32.vlgmr.msra.gmra.mxu0 %vm5261_vm10, %v13457_v37 }
 0x98f   : > { %14390 = vmatprep.subr.mxu1 %v16463_v63  ;;  %14397 = vmatprep.subr.mxu0 %v5630_v16  ;;  %v5628_v39 = vpop.permute.xlu0 %5627 }
 0x990   : > { %v16521_v40 = vpop.permute.xlu1 %6311  ;;  %14391 = vmatpush3.msra.mxu1 %v16463_v63  ;;  %14398 = vmatpush3.msra.mxu0 %v5630_v16  ;;  %v13481_v63 = vld [vmem:[%s18168_s19 + $0x88] sm:$0xff] }
 0x991   : > { %14392 = vmatprep.subr.mxu1 %v5526_v36  ;;  %14399 = vmatprep.subr.mxu0 %v5628_v39 }
 0x992   : > { %14393 = vmatpush3.msra.mxu1 %v5526_v36  ;;  %14400 = vmatpush3.msra.mxu0 %v5628_v39  ;;  %v13493_v36 = vld [vmem:[%s18168_s19 + $0xb8] sm:$0xff] }
 0x993   : > { %14395 = vmatmul.mubr.msk.f32.vlgmr.msra.gmra.mxu1 %vm5261_vm10, %v13461_v41  ;;  %14401 = vmatprep.subr.mxu0 %v16465_v1  ;;  %v16529_v43 = vpop.permute.xlu0 %6309 }
 0x994   : > { %14408 = vmatprep.subr.mxu1 %v5728_v18  ;;  %v5726_v44 = vpop.permute.xlu1 %5725  ;;  %14402 = vmatpush3.msra.mxu0 %v16465_v1 }
 0x995   : > { %14409 = vmatpush3.msra.mxu1 %v5728_v18  ;;  %14403 = vmatprep.subr.mxu0 %v16480_v12 }
 0x996   : > { %14410 = vmatprep.subr.mxu1 %v5726_v44  ;;  %14404 = vmatpush3.msra.mxu0 %v16480_v12 }
 0x997   : > { %14405 = vmatprep.mubr.msk.f32.mxu0 %vm5261_vm10, %v13464_v42  ;;  %14411 = vmatpush3.msra.mxu1 %v5726_v44  ;;  %v5824_v46 = vpop.permute.xlu0 %5823 }
 0x998   : > { %14406 = vmatmul.mubr.msk.f32.vlgmr.msra.gmra.mxu0 %vm5261_vm10, %v13465_v45  ;;  %14412 = vmatprep.subr.mxu1 %v16472_v5  ;;  %v16543_v60 = vpop.permute.xlu1 %6413 }
 0x999   : > { %14419 = vmatprep.subr.mxu0 %v16488_v21  ;;  %14413 = vmatpush3.msra.mxu1 %v16472_v5  ;;  %v13485_v5 = vld [vmem:[%s18168_s19 + $0x98] sm:$0xff] }
 0x99a   : > { %14420 = vmatpush3.msra.mxu0 %v16488_v21  ;;  %14414 = vmatprep.subr.mxu1 %v16482_v15 }
 0x99b   : > { %14421 = vmatprep.subr.mxu0 %v5824_v46  ;;  %14415 = vmatpush3.msra.mxu1 %v16482_v15  ;;  %v16556_v49 = vpop.permute.xlu0 %6409  ;;  %v13497_v15 = vld [vmem:[%s18168_s19 + $0xc8] sm:$0xff] }
 0x99c   : > { %14416 = vmatprep.mubr.msk.f32.mxu1 %vm5261_vm10, %v13468_v47  ;;  %14422 = vmatpush3.msra.mxu0 %v5824_v46  ;;  %v5922_v50 = vpop.permute.xlu1 %5921 }
 0x99d   : > { %14417 = vmatmul.mubr.msk.f32.vlgmr.msra.gmra.mxu1 %vm5261_vm10, %v13469_v48  ;;  %14423 = vmatprep.subr.mxu0 %v16470_v4 }
 0x99e   : > { %14430 = vmatprep.subr.mxu1 %v16492_v24  ;;  %14424 = vmatpush3.msra.mxu0 %v16470_v4  ;;  %v13484_v4 = vld [vmem:[%s18168_s19 + $0x90] sm:$0xff] }
 0x99f   : > { %14431 = vmatpush3.msra.mxu1 %v16492_v24  ;;  %14425 = vmatprep.subr.mxu0 %v16484_v17  ;;  %v6020_v55 = vpop.permute.xlu0 %6019  ;;  %v13505_v24 = vld [vmem:[%s18168_s19 + $0xe8] sm:$0xff] }
 0x9a0   : > { %14432 = vmatprep.subr.mxu1 %v5922_v50  ;;  %14426 = vmatpush3.msra.mxu0 %v16484_v17  ;;  %v16572_v54 = vpop.permute.xlu1 %6511  ;;  %v13500_v17 = vld [vmem:[%s18168_s19 + $0xd0] sm:$0xff] }
 0x9a1   : > { %14427 = vmatprep.mubr.msk.f32.mxu0 %vm5261_vm10, %v13472_v51  ;;  %14433 = vmatpush3.msra.mxu1 %v5922_v50 }
 0x9a2   : > { %14428 = vmatmul.mubr.msk.f32.vlgmr.msra.gmra.mxu0 %vm5261_vm10, %v13473_v53  ;;  %14434 = vmatprep.subr.mxu1 %v16476_v8 }
 0x9a3   : > { %14441 = vmatprep.subr.mxu0 %v16496_v23  ;;  %14435 = vmatpush3.msra.mxu1 %v16476_v8  ;;  %v16582_v57 = vpop.permute.xlu0 %6407  ;;  %v13488_v8 = vld [vmem:[%s18168_s19 + $0xa0] sm:$0xff] }
 0x9a4   : > { %14442 = vmatpush3.msra.mxu0 %v16496_v23  ;;  %14436 = vmatprep.subr.mxu1 %v16486_v19  ;;  %v6118_v59 = vpop.permute.xlu1 %6117  ;;  %v13508_v23 = vld [vmem:[%s18168_s19 + $0xf0] sm:$0xff] }
 0x9a5   : > { %14443 = vmatprep.subr.mxu0 %v6020_v55  ;;  %14437 = vmatpush3.msra.mxu1 %v16486_v19  ;;  %v13501_v19 = vld [vmem:[%s18168_s19 + $0xd8] sm:$0xff] }
 0x9a6   : > { %14438 = vmatprep.mubr.msk.f32.mxu1 %vm5261_vm10, %v13476_v56  ;;  %14444 = vmatpush3.msra.mxu0 %v6020_v55 }
 0x9a7   : > { %14439 = vmatmul.mubr.msk.f32.vlgmr.msra.gmra.mxu1 %vm5261_vm10, %v13477_v58  ;;  %14445 = vmatprep.subr.mxu0 %v16474_v6  ;;  %v6216_v61 = vpop.permute.xlu0 %6215 }
 0x9a8   : > { %14452 = vmatprep.subr.mxu1 %v16498_v26  ;;  %14446 = vmatpush3.msra.mxu0 %v16474_v6  ;;  %v16598_v62 = vpop.permute.xlu1 %6507 }
 0x9a9   : > { %14453 = vmatpush3.msra.mxu1 %v16498_v26  ;;  %14447 = vmatprep.subr.mxu0 %v16490_v22  ;;  %v13509_v26 = vld [vmem:[%s18168_s19 + $0xf8] sm:$0xff] }
 0x9aa   : > { %14454 = vmatprep.subr.mxu1 %v6118_v59  ;;  %14448 = vmatpush3.msra.mxu0 %v16490_v22  ;;  %v13504_v22 = vld [vmem:[%s18168_s19 + $0xe0] sm:$0xff] }
 0x9ab   : > { %14449 = vmatprep.mubr.msk.f32.mxu0 %vm5261_vm10, %v13480_v25  ;;  %14455 = vmatpush3.msra.mxu1 %v6118_v59  ;;  %v6506_v3 = vpop.permute.xlu0 %6505 }
 0x9ac   : > { %14450 = vmatmul.mubr.msk.f32.vlgmr.msra.gmra.mxu0 %vm5261_vm10, %v13481_v63  ;;  %14456 = vmatprep.subr.mxu1 %v16478_v10  ;;  %v6314_v1 = vpop.permute.xlu1 %6313 }
 0x9ad   : > { %14463 = vmatprep.subr.mxu0 %v16505_v32  ;;  %14457 = vmatpush3.msra.mxu1 %v16478_v10  ;;  %v13489_v10 = vld [vmem:[%s18168_s19 + $0xa8] sm:$0xff] }
 0x9ae   : > { %14464 = vmatpush3.msra.mxu0 %v16505_v32  ;;  %14458 = vmatprep.subr.mxu1 %v16494_v27  ;;  %v6817_v32 = vld [vmem:[#allocation15 + $0x8] sm:$0xff] }
 0x9af   : > { %14465 = vmatprep.subr.mxu0 %v6216_v61  ;;  %14459 = vmatpush3.msra.mxu1 %v16494_v27  ;;  %v6412_v9 = vpop.permute.xlu0 %6411 }
 0x9b0   : > { %14460 = vmatprep.mubr.msk.f32.mxu1 %vm5261_vm10, %v13484_v4  ;;  %14466 = vmatpush3.msra.mxu0 %v6216_v61  ;;  %v6610_v6 = vpop.permute.xlu1 %6609 }
 0x9b1   : > { %14461 = vmatmul.mubr.msk.f32.vlgmr.msra.gmra.mxu1 %vm5261_vm10, %v13485_v5  ;;  %14467 = vmatprep.subr.mxu0 %v16500_v30 }
 0x9b2   : > { %14474 = vmatprep.subr.mxu1 %v16512_v34  ;;  %14468 = vmatpush3.msra.mxu0 %v16500_v30  ;;  %v6819_v30 = vld [vmem:[#allocation15 + $0x18] sm:$0x1] }
 0x9b3   : > { %14475 = vmatpush3.msra.mxu1 %v16512_v34  ;;  %14469 = vmatprep.subr.mxu0 %v16514_v35  ;;  %v6606_v7 = vpop.permute.xlu0 %6605  ;;  %v14374_v34 = vpop.f32.mrf.mxu1 }
 0x9b4   : > { %14476 = vmatprep.subr.mxu1 %v6314_v1  ;;  %14470 = vmatpush3.msra.mxu0 %v16514_v35  ;;  %v6510_v11 = vpop.permute.xlu1 %6509 }
 0x9b5   : > { %14471 = vmatprep.mubr.msk.f32.mxu0 %vm5261_vm10, %v13488_v8  ;;  %14477 = vmatpush3.msra.mxu1 %v6314_v1  ;;  %v5415_v37 = vpop.f32.mrf.mxu1 }
 0x9b6   : > { %14472 = vmatmul.mubr.msk.f32.vlgmr.msra.gmra.mxu0 %vm5261_vm10, %v13489_v10  ;;  %14478 = vmatprep.subr.mxu1 %v16521_v40 }
 0x9b7   : > { %14485 = vmatprep.subr.mxu0 %v16543_v60  ;;  %14479 = vmatpush3.msra.mxu1 %v16521_v40  ;;  %v6608_v16 = vpop.permute.xlu0 %6607 }
 0x9b8   : > { %14486 = vmatpush3.msra.mxu0 %v16543_v60  ;;  %14480 = vmatprep.subr.mxu1 %v16529_v43  ;;  %v6708_v12 = vpop.permute.xlu1 %6707 }
 0x9b9   : > { %14487 = vmatprep.subr.mxu0 %v6412_v9  ;;  %14481 = vmatpush3.msra.mxu1 %v16529_v43 }
 0x9ba   : > { %14482 = vmatprep.mubr.msk.f32.mxu1 %vm5261_vm10, %v13492_v0  ;;  %14488 = vmatpush3.msra.mxu0 %v6412_v9 }
 0x9bb   : > { %14483 = vmatmul.mubr.msk.f32.vlgmr.msra.gmra.mxu1 %vm5261_vm10, %v13493_v36  ;;  %14489 = vmatprep.subr.mxu0 %v16556_v49  ;;  %v6604_v21 = vpop.permute.xlu0 %6603 }
 0x9bc   : > { %14496 = vmatprep.subr.mxu1 %v16572_v54  ;;  %14490 = vmatpush3.msra.mxu0 %v16556_v49  ;;  %v6706_v18 = vpop.permute.xlu1 %6705 }
 0x9bd   : > { %14497 = vmatpush3.msra.mxu1 %v16572_v54  ;;  %14491 = vmatprep.subr.mxu0 %v16582_v57 }
 0x9be   : > { %14498 = vmatprep.subr.mxu1 %v6510_v11  ;;  %14492 = vmatpush3.msra.mxu0 %v16582_v57 }
 0x9bf   : > { %14493 = vmatprep.mubr.msk.f32.mxu0 %vm5261_vm10, %v13496_v14  ;;  %14499 = vmatpush3.msra.mxu1 %v6510_v11  ;;  %v6702_v28 = vpop.permute.xlu0 %6701 }
 0x9c0   : > { %14494 = vmatmul.mubr.msk.f32.vlgmr.msra.gmra.mxu0 %vm5261_vm10, %v13497_v15  ;;  %14500 = vmatprep.subr.mxu1 %v16598_v62  ;;  %v6704_v27 = vpop.permute.xlu1 %6703 }
 0x9c1   : > { %14507 = vmatprep.subr.mxu0 %v6610_v6  ;;  %14501 = vmatpush3.msra.mxu1 %v16598_v62 }
 0x9c2   : > { %14508 = vmatpush3.msra.mxu0 %v6610_v6  ;;  %14502 = vmatprep.subr.mxu1 %v6506_v3 }
 0x9c3   : > { %14509 = vmatprep.subr.mxu0 %v6608_v16  ;;  %14503 = vmatpush3.msra.mxu1 %v6506_v3 }
 0x9c4   : > { %14504 = vmatprep.mubr.msk.f32.mxu1 %vm5261_vm10, %v13500_v17  ;;  %14510 = vmatpush3.msra.mxu0 %v6608_v16 }
 0x9c5   : > { %14505 = vmatmul.mubr.msk.f32.vlgmr.msra.gmra.mxu1 %vm5261_vm10, %v13501_v19  ;;  %14511 = vmatprep.subr.mxu0 %v6606_v7 }
 0x9c6   : > { %14518 = vmatprep.subr.mxu1 %v6708_v12  ;;  %14512 = vmatpush3.msra.mxu0 %v6606_v7 }
 0x9c7   : > { %14519 = vmatpush3.msra.mxu1 %v6708_v12  ;;  %14513 = vmatprep.subr.mxu0 %v6604_v21 }
 0x9c8   : > { %14520 = vmatprep.subr.mxu1 %v6706_v18  ;;  %14514 = vmatpush3.msra.mxu0 %v6604_v21 }
 0x9c9   : > { %14515 = vmatprep.mubr.msk.f32.mxu0 %vm5261_vm10, %v13504_v22  ;;  %14521 = vmatpush3.msra.mxu1 %v6706_v18 }
 0x9ca   : > { %14516 = vmatmul.mubr.msk.f32.vlgmr.msra.gmra.mxu0 %vm5261_vm10, %v13505_v24  ;;  %14522 = vmatprep.subr.mxu1 %v6704_v27 }
 0x9cb   : > { %14523 = vmatpush3.msra.mxu1 %v6704_v27  ;;  %14526 = vmatprep.mubr.msk.f32.mxu1 %vm5261_vm10, %v13508_v23 }
 0x9cc   : > { %14524 = vmatprep.subr.mxu1 %v6702_v28  ;;  %14529 = vmatprep.subr.msk.mxu0 %vm6827_vm12, %v6819_v30 }
 0x9cd   : > { %14525 = vmatpush3.msra.mxu1 %v6702_v28  ;;  %14530 = vmatpush3.msk.msra.mxu0 %vm6827_vm12, %v6819_v30  ;;  %vm6906_vm12 = vcmask 990208  }
 0x9ce   : > { %14527 = vmatmul.mubr.msk.f32.vlgmr.msra.gmra.mxu1 %vm5261_vm10, %v13509_v26  ;;  %14540 = vmatprep.subr.mxu1 %v15023_v20  ;;  %vm6820_vm10 = vcmask 203776  }
 0x9cf   : > { %14544 = vmatprep.mubr.msk.f32.mxu1 %vm15024_vm14, %v15023_v20  ;;  %14531 = vmatprep.subr.mxu0 %v6818_v31 }
 0x9d0   : > { %14532 = vmatpush3.msra.mxu0 %v6818_v31 }
 0x9d1   : > { %14533 = vmatprep.subr.mxu0 %v6817_v32 }
 0x9d2   : > { %14534 = vmatpush3.msra.mxu0 %v6817_v32 }
 0x9d3   : > { %14535 = vmatprep.subr.mxu0 %v6816_v33 }
 0x9d4   : > { %14536 = vmatpush3.msra.mxu0 %v6816_v33 }
 0x9d5   : > { %14554 = vmatprep.subr.mxu0 %v15023_v20 }
 0xa46   : > { %v14363_v29 = vpop.f32.mrf.mxu0 }
 0xa47   : > { %v5421_v45 = vadd.f32 %v14374_v34, %v14363_v29  ;;  %v6806_v29 = vpop.permute.xlu0 %6805 }
 0xa48   : > { %v5334_v35 = vpop.f32.mrf.mxu0 }
 0xa49   : > { %v5416_v48 = vadd.f32 %v5415_v37, %v5334_v35 }
 0xa4e   : > { %v14385_v38 = vpop.f32.mrf.mxu0 }
 0xa4f   : > { %v5521_v49 = vadd.f32 %v14385_v38, %v5421_v45  ;;  %v6801_v38 = vpop.permute.xlu1 %6800 }
 0xa50   : > { %v5511_v40 = vpop.f32.mrf.mxu0 }
 0xa51   : > { %v5520_v51 = vadd.f32 %v5511_v40, %v5416_v48 }
 0xa53   : > { %v14396_v39 = vpop.f32.mrf.mxu1 }
 0xa54   : > { %v5619_v53 = vadd.f32 %v14396_v39, %v5521_v49 }
 0xa55   : > { %v5609_v41 = vpop.f32.mrf.mxu1 }
 0xa56   : > { %v5618_v56 = vadd.f32 %v5609_v41, %v5520_v51 }
 0xa58   : > { %v14407_v43 = vpop.f32.mrf.mxu0 }
 0xa59   : > { %v5717_v57 = vadd.f32 %v14407_v43, %v5619_v53 }
 0xa5a   : > { %v5707_v42 = vpop.f32.mrf.mxu0 }
 0xa5b   : > { %v5716_v59 = vadd.f32 %v5707_v42, %v5618_v56 }
 0xa5d   : > { %v14418_v44 = vpop.f32.mrf.mxu1 }
 0xa5e   : > { %v5815_v61 = vadd.f32 %v14418_v44, %v5717_v57 }
 0xa5f   : > { %v5805_v46 = vpop.f32.mrf.mxu1 }
 0xa60   : > { %v5814_v62 = vadd.f32 %v5805_v46, %v5716_v59 }
 0xa62   : > { %v14429_v60 = vpop.f32.mrf.mxu0 }
 0xa63   : > { %v5913_v63 = vadd.f32 %v14429_v60, %v5815_v61 }
 0xa64   : > { %v5903_v50 = vpop.f32.mrf.mxu0 }
 0xa65   : > { %v5912_v4 = vadd.f32 %v5903_v50, %v5814_v62 }
 0xa67   : > { %v14440_v47 = vpop.f32.mrf.mxu1 }
 0xa68   : > { %v6011_v5 = vadd.f32 %v14440_v47, %v5913_v63  ;;  %v8216_v47 = vld [vmem:[%s18179_s14] sm:$0xff] }
 0xa69   : > { %v6001_v55 = vpop.f32.mrf.mxu1 }
 0xa6a   : > { %v6010_v8 = vadd.f32 %v6001_v55, %v5912_v4 }
 0xa6c   : > { %v14451_v54 = vpop.f32.mrf.mxu0 }
 0xa6d   : > { %v6109_v9 = vadd.f32 %v14451_v54, %v6011_v5 }
 0xa6e   : > { %v6099_v25 = vpop.f32.mrf.mxu0 }
 0xa6f   : > { %v6108_v11 = vadd.f32 %v6099_v25, %v6010_v8 }
 0xa71   : > { %v14462_v58 = vpop.f32.mrf.mxu1 }
 0xa72   : > { %v6207_v0 = vadd.f32 %v14462_v58, %v6109_v9 }
 0xa73   : > { %v6197_v1 = vpop.f32.mrf.mxu1 }
 0xa74   : > { %v6206_v12 = vadd.f32 %v6197_v1, %v6108_v11 }
 0xa76   : > { %v14473_v3 = vpop.f32.mrf.mxu0 }
 0xa77   : > { %v6305_v14 = vadd.f32 %v14473_v3, %v6207_v0 }
 0xa78   : > { %v6295_v10 = vpop.f32.mrf.mxu0 }
 0xa79   : > { %v6304_v16 = vadd.f32 %v6295_v10, %v6206_v12 }
 0xa7b   : > { %v14484_v6 = vpop.f32.mrf.mxu1 }
 0xa7c   : > { %v6403_v17 = vadd.f32 %v14484_v6, %v6305_v14 }
 0xa7d   : > { %v6393_v36 = vpop.f32.mrf.mxu1 }
 0xa7e   : > { %v6402_v19 = vadd.f32 %v6393_v36, %v6304_v16 }
 0xa80   : > { %v14495_v7 = vpop.f32.mrf.mxu0 }
 0xa81   : > { %v6501_v21 = vadd.f32 %v14495_v7, %v6403_v17 }
 0xa82   : > { %v6491_v18 = vpop.f32.mrf.mxu0 }
 0xa83   : > { %v6500_v27 = vadd.f32 %v6491_v18, %v6402_v19 }
 0xa85   : > { %v14506_v15 = vpop.f32.mrf.mxu1 }
 0xa86   : > { %v6599_v23 = vadd.f32 %v14506_v15, %v6501_v21 }
 0xa87   : > { %v6589_v22 = vpop.f32.mrf.mxu1 }
 0xa88   : > { %v6598_v26 = vadd.f32 %v6589_v22, %v6500_v27 }
 0xa8a   : > { %v14517_v24 = vpop.f32.mrf.mxu0 }
 0xa8b   : > { %v6697_v30 = vadd.f32 %v14517_v24, %v6599_v23 }
 0xa8c   : > { %v6687_v28 = vpop.f32.mrf.mxu0 }
 0xa8d   : > { %v6696_v32 = vadd.f32 %v6687_v28, %v6598_v26 }
 0xa8e   : > { %v14528_v31 = vpop.f32.mrf.mxu1 }
 0xa8f   : > { %v6795_v33 = vadd.f32 %v14528_v31, %v6697_v30 }
 0xa90   : > { %v6785_v34 = vpop.f32.mrf.mxu1 }
 0xa91   : > { %v6809_v35 = vadd.f32 %v6806_v29, %v6795_v33  ;;  %v6794_v37 = vadd.f32 %v6785_v34, %v6696_v32  ;;  %v8257_v34 = vld [vmem:[%s18060_s22 + $0xf8] sm:$0x1f] }
 0xa93   : > { %v6808_v39 = vadd.f32 %v6801_v38, %v6794_v37  ;;  %v6813_v40 = vmul.f32 0.01, %v6809_v35  ;;  %vm6811_vm4 = vcmp.ge.f32.partialorder %v6809_v35, 0.0  ;;  %v8258_v37 = vld [vmem:[%s18060_s22 + $0x100] sm:$0x1f] }
 0xa94   : > { %v8254_v38 = vld [vmem:[%s18060_s22 + $0xe0] sm:$0xff] }
 0xa95   : > { %v6812_v41 = vmul.f32 0.01, %v6808_v39  ;;  %vm6810_vm9 = vcmp.ge.f32.partialorder %v6808_v39, 0.0  ;;  %v6815_v44 = vsel %vm6811_vm4, %v6809_v35, %v6813_v40  ;;  %vm8263_vm4 = vcmask 1044480   ;;  %v8256_v35 = vld [vmem:[%s18060_s22 + $0xf0] sm:$0x1f] }
 0xa96   : > { %v8255_v40 = vld [vmem:[%s18060_s22 + $0xe8] sm:$0xff] }
 0xa97   : > { %v6814_v43 = vsel %vm6810_vm9, %v6808_v39, %v6812_v41  ;;  %v8253_v39 = vld [vmem:[%s18060_s22 + $0xd8] sm:$0xff]  ;;  %v8251_v41 = vld [vmem:[%s18060_s22 + $0xc8] sm:$0xff]  ;;  %vm8259_vm9 = vcmask 695296  }
 0xa98   : > { %14537 = vmatprep.mubr.msk.f32.mxu0 %vm6820_vm10, %v6814_v43  ;;  %v8250_v43 = vld [vmem:[%s18060_s22 + $0xc0] sm:$0xff] }
 0xa99   : > { %14538 = vmatmul.mubr.msk.f32.vlgmr.msra.gmra.mxu0 %vm6820_vm10, %v6815_v44  ;;  %v8252_v44 = vld [vmem:[%s18060_s22 + $0xd0] sm:$0xff]  ;;  %vm8416_vm10 = vcmask 859136  }
 0xa9a   : > { %14558 = vmatprep.mubr.msk.f32.mxu0 %vm15024_vm14, %v15023_v20 }
 0xb59   : > { %v14539_v42 = vpop.f32.mrf.mxu0 }
 0xb5a   : > { %6908 = vst.msk [vmem:[#allocation7 + $0x8] sm:$0xff] %vm6906_vm12, %v14539_v42  ;;  %v8248_v42 = vld [vmem:[%s18060_s22 + $0xb0] sm:$0xff] }
 0xb5b   : > { %v6897_v45 = vpop.f32.mrf.mxu0 }
 0xb5c   : > { %6907 = vst.msk [vmem:[#allocation7] sm:$0xff] %vm6906_vm12, %v6897_v45  ;;  %v8247_v45 = vld [vmem:[%s18060_s22 + $0xa8] sm:$0xff]  ;;  %vm8894_vm12 = vcmask 1022976  }
 0xb61   : > { %v6910_v46 = vld [vmem:[#allocation7 + $0x8] sm:$0xff] }
 0xb62   : > { %6918 = vrot.lane.b32.xlu1 %v6910_v46, %s18153_s8 }
 0xb63   : > { %v6909_v60 = vld [vmem:[#allocation7] sm:$0xff] }
 0xb64   : > { %6916 = vrot.lane.b32.xlu0 %v6909_v60, %s18153_s8 }
 0xb66   : > { %7072 = vrot.lane.b32.xlu1 %v6910_v46, %s18152_s29 }
 0xb68   : > { %7070 = vrot.lane.b32.xlu0 %v6909_v60, %s18152_s29 }
 0xb6a   : > { %7154 = vrot.lane.b32.xlu1 %v6910_v46, %s18169_s9 }
 0xb6c   : > { %7152 = vrot.lane.b32.xlu0 %v6909_v60, %s18169_s9 }
 0xb6e   : > { %7236 = vrot.lane.b32.xlu1 %v6910_v46, %s18175_s0 }
 0xb70   : > { %7234 = vrot.lane.b32.xlu0 %v6909_v60, %s18175_s0  ;;  %s15048_s0 = smov 87  }
 0xb72   : > { %7318 = vrot.lane.b32.xlu1 %v6910_v46, %s18163_s20 }
 0xb74   : > { %7316 = vrot.lane.b32.xlu0 %v6909_v60, %s18163_s20  ;;  %s15042_s20 = smov 103  }
 0xb76   : > { %7400 = vrot.lane.b32.xlu1 %v6910_v46, %s18176_s10 }
 0xb78   : > { %7398 = vrot.lane.b32.xlu0 %v6909_v60, %s18176_s10  ;;  %s15049_s10 = smov 71  }
 0xb7a   : > { %7482 = vrot.lane.b32.xlu1 %v6910_v46, %s18172_s11 }
 0xb7c   : > { %7480 = vrot.lane.b32.xlu0 %v6909_v60, %s18172_s11  ;;  %s15045_s11 = smov 93  }
 0xb7e   : > { %7564 = vrot.lane.b32.xlu1 %v6910_v46, %s18173_s3 }
 0xb80   : > { %7562 = vrot.lane.b32.xlu0 %v6909_v60, %s18173_s3 }
 0xb82   : > { %7646 = vrot.lane.b32.xlu1 %v6910_v46, %s18177_s27 }
 0xb84   : > { %7644 = vrot.lane.b32.xlu0 %v6909_v60, %s18177_s27  ;;  %s15050_s27 = smov 70  }
 0xb86   : > { %7728 = vrot.lane.b32.xlu1 %v6910_v46, %s18178_s4 }
 0xb88   : > { %7726 = vrot.lane.b32.xlu0 %v6909_v60, %s18178_s4  ;;  %s15051_s4 = smov 69  }
 0xb8a   : > { %7810 = vrot.lane.b32.xlu1 %v6910_v46, %s15042_s20 }
 0xb8c   : > { %7808 = vrot.lane.b32.xlu0 %v6909_v60, %s15042_s20  ;;  %s18180_s20 = sld [smem:[#allocation24_spill]] }
 0xb8e   : > { %7892 = vrot.lane.b32.xlu1 %v6910_v46, %s15043_s1 }
 0xb90   : > { %7890 = vrot.lane.b32.xlu0 %v6909_v60, %s15043_s1 }
 0xb92   : > { %7974 = vrot.lane.b32.xlu1 %v6910_v46, %s15044_s12  ;;  %v13515_v49 = vld [vmem:[%s18180_s20 + $0x8] sm:$0xff]  ;;  %v6911_v55 = vld [vmem:[%s18180_s20] sm:$0xff]  ;;  %v13518_v54 = vld [vmem:[%s18180_s20 + $0x10] sm:$0xff] }
 0xb93   : > { %v13520_v58 = vld [vmem:[%s18180_s20 + $0x18] sm:$0xff]  ;;  %v13522_v61 = vld [vmem:[%s18180_s20 + $0x20] sm:$0xff]  ;;  %v13524_v63 = vld [vmem:[%s18180_s20 + $0x28] sm:$0xff] }
 0xb94   : > { %7972 = vrot.lane.b32.xlu0 %v6909_v60, %s15044_s12  ;;  %v13526_v4 = vld [vmem:[%s18180_s20 + $0x30] sm:$0xff]  ;;  %v13528_v8 = vld [vmem:[%s18180_s20 + $0x38] sm:$0xff]  ;;  %v13530_v11 = vld [vmem:[%s18180_s20 + $0x40] sm:$0xff] }
 0xb95   : > { %v13532_v7 = vld [vmem:[%s18180_s20 + $0x48] sm:$0xff]  ;;  %v13534_v15 = vld [vmem:[%s18180_s20 + $0x50] sm:$0xff]  ;;  %v13536_v18 = vld [vmem:[%s18180_s20 + $0x58] sm:$0xff] }
 0xb96   : > { %8056 = vrot.lane.b32.xlu1 %v6910_v46, %s15045_s11  ;;  %v13538_v22 = vld [vmem:[%s18180_s20 + $0x60] sm:$0xff]  ;;  %v13540_v23 = vld [vmem:[%s18180_s20 + $0x68] sm:$0xff]  ;;  %v13542_v30 = vld [vmem:[%s18180_s20 + $0x70] sm:$0xff] }
 0xb97   : > { %v13544_v33 = vld [vmem:[%s18180_s20 + $0x78] sm:$0xff] }
 0xb98   : > { %8054 = vrot.lane.b32.xlu0 %v6909_v60, %s15045_s11  ;;  %s15046_s11 = smov 89  }
 0xb9a   : > { %8138 = vrot.lane.b32.xlu1 %v6910_v46, %s18151_s16 }
 0xb9c   : > { %8136 = vrot.lane.b32.xlu0 %v6909_v60, %s18151_s16 }
 0xb9e   : > { %8219 = vperm.xlu1 %14900, %v8216_v47   ;;  %v8244_v47 = vld [vmem:[%s18060_s22 + $0x90] sm:$0xff] }
 0xbd4   : > { %v6919_v48 = vpop.permute.xlu1 %6918 }
 0xbd5   : > { %14541 = vmatpush3.msra.mxu1 %v6919_v48  ;;  %v8246_v48 = vld [vmem:[%s18060_s22 + $0xa0] sm:$0xff] }
 0xbd6   : > { %14542 = vmatprep.subr.mxu1 %v15023_v20  ;;  %v6917_v50 = vpop.permute.xlu0 %6916 }
 0xbd7   : > { %14543 = vmatpush3.msra.mxu1 %v6917_v50  ;;  %v8241_v50 = vld [vmem:[%s18060_s22 + $0x78] sm:$0xff] }
 0xbd8   : > { %v7073_v51 = vpop.permute.xlu1 %7072  ;;  %14547 = vmatprep.subr.mxu1 %v15023_v20  ;;  %14545 = vmatmul.mubr.msk.f32.vlgmr.msra.gmra.mxu1 %vm4120_vm6, %v13515_v49  ;;  %v8242_v49 = vld [vmem:[%s18060_s22 + $0x80] sm:$0xff] }
 0xbd9   : > { %14548 = vmatpush3.msra.mxu1 %v6910_v46  ;;  %14555 = vmatpush3.msra.mxu0 %v7073_v51  ;;  %v8249_v46 = vld [vmem:[%s18060_s22 + $0xb8] sm:$0xff]  ;;  %v8243_v51 = vld [vmem:[%s18060_s22 + $0x88] sm:$0xff] }
 0xbda   : > { %14549 = vmatprep.subr.mxu1 %v15023_v20  ;;  %14556 = vmatprep.subr.mxu0 %v15023_v20  ;;  %v7071_v53 = vpop.permute.xlu0 %7070 }
 0xbdb   : > { %14550 = vmatpush3.msra.mxu1 %v6909_v60  ;;  %14557 = vmatpush3.msra.mxu0 %v7071_v53  ;;  %v8245_v60 = vld [vmem:[%s18060_s22 + $0x98] sm:$0xff]  ;;  %v8239_v53 = vld [vmem:[%s18060_s22 + $0x68] sm:$0xff] }
 0xbdc   : > { %v7155_v56 = vpop.permute.xlu1 %7154  ;;  %14551 = vmatprep.mubr.msk.f32.mxu1 %vm15024_vm14, %v15023_v20  ;;  %14561 = vmatprep.subr.mxu1 %v15023_v20 }
 0xbdd   : > { %14552 = vmatmul.mubr.msk.f32.vlgmr.msra.gmra.mxu1 %vm4120_vm6, %v6911_v55  ;;  %14568 = vmatprep.subr.mxu0 %v15023_v20  ;;  %v8238_v55 = vld [vmem:[%s18060_s22 + $0x60] sm:$0xff] }
 0xbde   : > { %14562 = vmatpush3.msra.mxu1 %v7155_v56  ;;  %v7153_v57 = vpop.permute.xlu0 %7152  ;;  %14559 = vmatmul.mubr.msk.f32.vlgmr.msra.gmra.mxu0 %vm4120_vm6, %v13518_v54  ;;  %v8240_v54 = vld [vmem:[%s18060_s22 + $0x70] sm:$0xff] }
 0xbdf   : > { %14563 = vmatprep.subr.mxu1 %v15023_v20  ;;  %14565 = vmatprep.mubr.msk.f32.mxu1 %vm15024_vm14, %v15023_v20  ;;  %v8236_v56 = vld [vmem:[%s18060_s22 + $0x50] sm:$0xff] }
 0xbe0   : > { %14564 = vmatpush3.msra.mxu1 %v7153_v57  ;;  %v7237_v59 = vpop.permute.xlu1 %7236  ;;  %14572 = vmatprep.mubr.msk.f32.mxu0 %vm15024_vm14, %v15023_v20  ;;  %v8235_v57 = vld [vmem:[%s18060_s22 + $0x48] sm:$0xff] }
 0xbe1   : > { %14569 = vmatpush3.msra.mxu0 %v7237_v59  ;;  %14575 = vmatprep.subr.mxu1 %v15023_v20  ;;  %v8233_v59 = vld [vmem:[%s18060_s22 + $0x38] sm:$0xff] }
 0xbe2   : > { %14570 = vmatprep.subr.mxu0 %v15023_v20  ;;  %v7235_v25 = vpop.permute.xlu0 %7234  ;;  %14566 = vmatmul.mubr.msk.f32.vlgmr.msra.gmra.mxu1 %vm4120_vm6, %v13520_v58  ;;  %v8237_v58 = vld [vmem:[%s18060_s22 + $0x58] sm:$0xff] }
 0xbe3   : > { %14571 = vmatpush3.msra.mxu0 %v7235_v25  ;;  %14579 = vmatprep.mubr.msk.f32.mxu1 %vm15024_vm14, %v15023_v20  ;;  %v8234_v25 = vld [vmem:[%s18060_s22 + $0x40] sm:$0xff] }
 0xbe4   : > { %v7319_v62 = vpop.permute.xlu1 %7318  ;;  %14582 = vmatprep.subr.mxu0 %v15023_v20  ;;  %14573 = vmatmul.mubr.msk.f32.vlgmr.msra.gmra.mxu0 %vm4120_vm6, %v13522_v61  ;;  %v8232_v61 = vld [vmem:[%s18060_s22 + $0x30] sm:$0xff] }
 0xbe5   : > { %14576 = vmatpush3.msra.mxu1 %v7319_v62  ;;  %14586 = vmatprep.mubr.msk.f32.mxu0 %vm15024_vm14, %v15023_v20  ;;  %v8230_v62 = vld [vmem:[%s18060_s22 + $0x20] sm:$0xff] }
 0xbe6   : > { %14577 = vmatprep.subr.mxu1 %v15023_v20  ;;  %v7317_v1 = vpop.permute.xlu0 %7316 }
 0xbe7   : > { %14578 = vmatpush3.msra.mxu1 %v7317_v1  ;;  %v8231_v1 = vld [vmem:[%s18060_s22 + $0x28] sm:$0xff] }
 0xbe8   : > { %v7401_v3 = vpop.permute.xlu1 %7400  ;;  %14589 = vmatprep.subr.mxu1 %v15023_v20  ;;  %14580 = vmatmul.mubr.msk.f32.vlgmr.msra.gmra.mxu1 %vm4120_vm6, %v13524_v63  ;;  %v8229_v63 = vld [vmem:[%s18060_s22 + $0x18] sm:$0xff] }
 0xbe9   : > { %14583 = vmatpush3.msra.mxu0 %v7401_v3  ;;  %14593 = vmatprep.mubr.msk.f32.mxu1 %vm15024_vm14, %v15023_v20  ;;  %v8227_v3 = vld [vmem:[%s18060_s22 + $0x8] sm:$0xff] }
 0xbea   : > { %14584 = vmatprep.subr.mxu0 %v15023_v20  ;;  %v7399_v5 = vpop.permute.xlu0 %7398 }
 0xbeb   : > { %14585 = vmatpush3.msra.mxu0 %v7399_v5  ;;  %v8228_v5 = vld [vmem:[%s18060_s22 + $0x10] sm:$0xff] }
 0xbec   : > { %v7483_v6 = vpop.permute.xlu1 %7482  ;;  %14596 = vmatprep.subr.mxu0 %v15023_v20  ;;  %14587 = vmatmul.mubr.msk.f32.vlgmr.msra.gmra.mxu0 %vm4120_vm6, %v13526_v4  ;;  %v8226_v4 = vld [vmem:[%s18060_s22] sm:$0xff] }
 0xbed   : > { %14590 = vmatpush3.msra.mxu1 %v7483_v6  ;;  %14600 = vmatprep.mubr.msk.f32.mxu0 %vm15024_vm14, %v15023_v20 }
 0xbee   : > { %14591 = vmatprep.subr.mxu1 %v15023_v20  ;;  %v7481_v9 = vpop.permute.xlu0 %7480 }
 0xbef   : > { %14592 = vmatpush3.msra.mxu1 %v7481_v9 }
 0xbf0   : > { %v7565_v10 = vpop.permute.xlu1 %7564  ;;  %14603 = vmatprep.subr.mxu1 %v15023_v20  ;;  %14594 = vmatmul.mubr.msk.f32.vlgmr.msra.gmra.mxu1 %vm4120_vm6, %v13528_v8 }
 0xbf1   : > { %14597 = vmatpush3.msra.mxu0 %v7565_v10  ;;  %14607 = vmatprep.mubr.msk.f32.mxu1 %vm15024_vm14, %v15023_v20 }
 0xbf2   : > { %14598 = vmatprep.subr.mxu0 %v15023_v20  ;;  %v7563_v0 = vpop.permute.xlu0 %7562 }
 0xbf3   : > { %14599 = vmatpush3.msra.mxu0 %v7563_v0 }
 0xbf4   : > { %v7647_v36 = vpop.permute.xlu1 %7646  ;;  %14610 = vmatprep.subr.mxu0 %v15023_v20  ;;  %14601 = vmatmul.mubr.msk.f32.vlgmr.msra.gmra.mxu0 %vm4120_vm6, %v13530_v11 }
 0xbf5   : > { %14604 = vmatpush3.msra.mxu1 %v7647_v36  ;;  %14614 = vmatprep.mubr.msk.f32.mxu0 %vm15024_vm14, %v15023_v20 }
 0xbf6   : > { %14605 = vmatprep.subr.mxu1 %v15023_v20  ;;  %v7645_v12 = vpop.permute.xlu0 %7644 }
 0xbf7   : > { %14606 = vmatpush3.msra.mxu1 %v7645_v12 }
 0xbf8   : > { %v7729_v14 = vpop.permute.xlu1 %7728  ;;  %14617 = vmatprep.subr.mxu1 %v15023_v20  ;;  %14608 = vmatmul.mubr.msk.f32.vlgmr.msra.gmra.mxu1 %vm4120_vm6, %v13532_v7 }
 0xbf9   : > { %14611 = vmatpush3.msra.mxu0 %v7729_v14  ;;  %14621 = vmatprep.mubr.msk.f32.mxu1 %vm15024_vm14, %v15023_v20 }
 0xbfa   : > { %14612 = vmatprep.subr.mxu0 %v15023_v20  ;;  %v7727_v16 = vpop.permute.xlu0 %7726 }
 0xbfb   : > { %14613 = vmatpush3.msra.mxu0 %v7727_v16 }
 0xbfc   : > { %v7811_v17 = vpop.permute.xlu1 %7810  ;;  %14624 = vmatprep.subr.mxu0 %v15023_v20  ;;  %14615 = vmatmul.mubr.msk.f32.vlgmr.msra.gmra.mxu0 %vm4120_vm6, %v13534_v15 }
 0xbfd   : > { %14618 = vmatpush3.msra.mxu1 %v7811_v17  ;;  %14628 = vmatprep.mubr.msk.f32.mxu0 %vm15024_vm14, %v15023_v20 }
 0xbfe   : > { %14619 = vmatprep.subr.mxu1 %v15023_v20  ;;  %v7809_v19 = vpop.permute.xlu0 %7808 }
 0xbff   : > { %14620 = vmatpush3.msra.mxu1 %v7809_v19 }
 0xc00   : > { %v7893_v21 = vpop.permute.xlu1 %7892  ;;  %14622 = vmatmul.mubr.msk.f32.vlgmr.msra.gmra.mxu1 %vm4120_vm6, %v13536_v18  ;;  %14631 = vmatprep.subr.mxu1 %v15023_v20 }
 0xc01   : > { %14625 = vmatpush3.msra.mxu0 %v7893_v21  ;;  %14635 = vmatprep.mubr.msk.f32.mxu1 %vm15024_vm14, %v15023_v20 }
 0xc02   : > { %14626 = vmatprep.subr.mxu0 %v15023_v20  ;;  %v7891_v24 = vpop.permute.xlu0 %7890 }
 0xc03   : > { %14627 = vmatpush3.msra.mxu0 %v7891_v24 }
 0xc04   : > { %v7975_v27 = vpop.permute.xlu1 %7974  ;;  %14629 = vmatmul.mubr.msk.f32.vlgmr.msra.gmra.mxu0 %vm4120_vm6, %v13538_v22  ;;  %14638 = vmatprep.subr.mxu0 %v15023_v20 }
 0xc05   : > { %14632 = vmatpush3.msra.mxu1 %v7975_v27  ;;  %14642 = vmatprep.mubr.msk.f32.mxu0 %vm15024_vm14, %v15023_v20 }
 0xc06   : > { %14633 = vmatprep.subr.mxu1 %v15023_v20  ;;  %v7973_v28 = vpop.permute.xlu0 %7972 }
 0xc07   : > { %14634 = vmatpush3.msra.mxu1 %v7973_v28 }
 0xc08   : > { %v8057_v26 = vpop.permute.xlu1 %8056  ;;  %14636 = vmatmul.mubr.msk.f32.vlgmr.msra.gmra.mxu1 %vm4120_vm6, %v13540_v23  ;;  %14645 = vmatprep.subr.mxu1 %v15023_v20 }
 0xc09   : > { %14639 = vmatpush3.msra.mxu0 %v8057_v26  ;;  %14649 = vmatprep.mubr.msk.f32.mxu1 %vm15024_vm14, %v15023_v20 }
 0xc0a   : > { %14640 = vmatprep.subr.mxu0 %v15023_v20  ;;  %v8055_v31 = vpop.permute.xlu0 %8054 }
 0xc0b   : > { %14641 = vmatpush3.msra.mxu0 %v8055_v31 }
 0xc0c   : > { %v8139_v32 = vpop.permute.xlu1 %8138  ;;  %14643 = vmatmul.mubr.msk.f32.vlgmr.msra.gmra.mxu0 %vm4120_vm6, %v13542_v30  ;;  %13546 = vmatprep.subr.msk.mxu0 %vm8263_vm4, %v8257_v34 }
 0xc0d   : > { %14646 = vmatpush3.msra.mxu1 %v8139_v32  ;;  %8337 = vmatprep.mubr.f32.mxu0 %v15023_v20 }
 0xc0e   : > { %14647 = vmatprep.subr.mxu1 %v15023_v20  ;;  %v8137_v29 = vpop.permute.xlu0 %8136  ;;  %13547 = vmatpush1.msk.msra.mxu0 %vm8263_vm4, %v8256_v35 }
 0xc0f   : > { %14648 = vmatpush3.msra.mxu1 %v8137_v29  ;;  %8285 = vmatprep.subr.mxu0 %v8254_v38 }
 0xc10   : > { %14650 = vmatmul.mubr.msk.f32.vlgmr.msra.gmra.mxu1 %vm4120_vm6, %v13544_v33  ;;  %14652 = vmatprep.subr.mxu1 %v15023_v20 }
 0xc11   : > { %14674 = vmatprep.mubr.msk.f32.mxu1 %vm15024_vm14, %v15023_v20  ;;  %14653 = vmatpush3.msk.msra.mxu1 %vm8263_vm4, %v8258_v37 }
 0xc12   : > { %14654 = vmatprep.subr.mxu1 %v15023_v20  ;;  %8286 = vmatpush1.msra.mxu0 %v8253_v39 }
 0xc13   : > { %14655 = vmatpush3.msra.mxu1 %v8255_v40  ;;  %8287 = vmatprep.subr.mxu0 %v8251_v41 }
 0xc14   : > { %14656 = vmatprep.subr.mxu1 %v15023_v20  ;;  %8288 = vmatpush1.msra.mxu0 %v8250_v43 }
 0xc15   : > { %14657 = vmatpush3.msra.mxu1 %v8252_v44  ;;  %8289 = vmatprep.subr.mxu0 %v8248_v42 }
 0xc16   : > { %14658 = vmatprep.subr.mxu1 %v15023_v20  ;;  %8290 = vmatpush1.msra.mxu0 %v8247_v45 }
 0xc17   : > { %14659 = vmatpush3.msra.mxu1 %v8249_v46  ;;  %8291 = vmatprep.subr.mxu0 %v8245_v60 }
 0xc18   : > { %14660 = vmatprep.subr.mxu1 %v15023_v20  ;;  %8292 = vmatpush1.msra.mxu0 %v8244_v47 }
 0xc19   : > { %14661 = vmatpush3.msra.mxu1 %v8246_v48  ;;  %8293 = vmatprep.subr.mxu0 %v8242_v49 }
 0xc1a   : > { %14662 = vmatprep.subr.mxu1 %v15023_v20  ;;  %8294 = vmatpush1.msra.mxu0 %v8241_v50 }
 0xc1b   : > { %14663 = vmatpush3.msra.mxu1 %v8243_v51  ;;  %8295 = vmatprep.subr.mxu0 %v8239_v53 }
 0xc1c   : > { %14664 = vmatprep.subr.mxu1 %v15023_v20  ;;  %8296 = vmatpush1.msra.mxu0 %v8238_v55  ;;  %v8220_v55 = vpop.permute.xlu1 %8219 }
 0xc1d   : > { %14665 = vmatpush3.msra.mxu1 %v8240_v54  ;;  %8297 = vmatprep.subr.mxu0 %v8236_v56 }
 0xc1e   : > { %14666 = vmatprep.subr.mxu1 %v15023_v20  ;;  %8298 = vmatpush1.msra.mxu0 %v8235_v57 }
 0xc1f   : > { %14667 = vmatpush3.msra.mxu1 %v8237_v58  ;;  %8299 = vmatprep.subr.mxu0 %v8233_v59 }
 0xc20   : > { %14668 = vmatprep.subr.mxu1 %v15023_v20  ;;  %8300 = vmatpush1.msra.mxu0 %v8232_v61 }
 0xc21   : > { %14669 = vmatpush3.msra.mxu1 %v8234_v25  ;;  %8301 = vmatprep.subr.mxu0 %v8230_v62 }
 0xc22   : > { %14670 = vmatprep.subr.mxu1 %v15023_v20  ;;  %8302 = vmatpush1.msra.mxu0 %v8229_v63 }
 0xc23   : > { %14671 = vmatpush3.msra.mxu1 %v8231_v1  ;;  %8303 = vmatprep.subr.mxu0 %v8227_v3  ;;  %v10976_v1 = vld [vmem:[%s18053_s15] sm:$0xf]  ;;  %v13551_v3 = vld [vmem:[%s18181_s18 + $0x4] sm:$0xf] }
 0xc24   : > { %14672 = vmatprep.subr.mxu1 %v15023_v20  ;;  %8304 = vmatpush1.msra.mxu0 %v8226_v4 }
 0xc25   : > { %14673 = vmatpush3.msra.mxu1 %v8228_v5 }
 0xc26   : > { %14677 = vmatprep.subr.mxu1 %v15023_v20 }
 0xc98   : > { %v6991_v6 = vpop.f32.mrf.mxu1 }
 0xc9a   : > { %v14546_v8 = vpop.f32.mrf.mxu1 }
 0xc9d   : > { %v7064_v9 = vpop.f32.mrf.mxu1 }
 0xc9e   : > { %v7065_v10 = vadd.f32 %v7064_v9, %v6991_v6  ;;  %v7145_v11 = vpop.f32.mrf.mxu0  ;;  %v8421_v6 = vld [vmem:[%s18181_s18] sm:$0xf] }
 0xc9f   : > { %v14553_v0 = vpop.f32.mrf.mxu1 }
 0xca0   : > { %v14560_v36 = vpop.f32.mrf.mxu0  ;;  %v7149_v7 = vadd.f32 %v7145_v11, %v7065_v10  ;;  %v17051_v10 = vld [vmem:[%s18181_s18 + $0x8] sm:$0xf] }
 0xca1   : > { %v17066_v36 = vld [vmem:[%s18181_s18 + $0xc] sm:$0xf] }
 0xca2   : > { %v7227_v12 = vpop.f32.mrf.mxu1 }
 0xca3   : > { %v7231_v16 = vadd.f32 %v7227_v12, %v7149_v7 }
 0xca4   : > { %v14567_v14 = vpop.f32.mrf.mxu1  ;;  %v7309_v15 = vpop.f32.mrf.mxu0 }
 0xca5   : > { %v7313_v19 = vadd.f32 %v7309_v15, %v7231_v16  ;;  %v17079_v14 = vld [vmem:[%s18181_s18 + $0x10] sm:$0xf] }
 0xca6   : > { %v14574_v17 = vpop.f32.mrf.mxu0 }
 0xca7   : > { %v17094_v17 = vld [vmem:[%s18181_s18 + $0x14] sm:$0xf] }
 0xca8   : > { %v7391_v18 = vpop.f32.mrf.mxu1 }
 0xca9   : > { %v7395_v24 = vadd.f32 %v7391_v18, %v7313_v19 }
 0xcaa   : > { %v14581_v21 = vpop.f32.mrf.mxu1 }
 0xcab   : > { %v17105_v21 = vld [vmem:[%s18181_s18 + $0x18] sm:$0xf] }
 0xcac   : > { %v7473_v22 = vpop.f32.mrf.mxu0 }
 0xcad   : > { %v7477_v28 = vadd.f32 %v7473_v22, %v7395_v24 }
 0xcae   : > { %v14588_v27 = vpop.f32.mrf.mxu0 }
 0xcb0   : > { %v7555_v23 = vpop.f32.mrf.mxu1 }
 0xcb1   : > { %v7559_v31 = vadd.f32 %v7555_v23, %v7477_v28  ;;  %v17118_v28 = vld [vmem:[%s18181_s18 + $0x1c] sm:$0xf] }
 0xcb2   : > { %v14595_v26 = vpop.f32.mrf.mxu1 }
 0xcb4   : > { %v7637_v30 = vpop.f32.mrf.mxu0 }
 0xcb5   : > { %v7641_v29 = vadd.f32 %v7637_v30, %v7559_v31  ;;  %v17135_v31 = vld [vmem:[%s18181_s18 + $0x20] sm:$0xf] }
 0xcb6   : > { %v14602_v32 = vpop.f32.mrf.mxu0 }
 0xcb8   : > { %v7719_v33 = vpop.f32.mrf.mxu1 }
 0xcb9   : > { %v7723_v37 = vadd.f32 %v7719_v33, %v7641_v29 }
 0xcba   : > { %v14609_v34 = vpop.f32.mrf.mxu1 }
 0xcbc   : > { %v7801_v35 = vpop.f32.mrf.mxu0 }
 0xcbd   : > { %v7805_v40 = vadd.f32 %v7801_v35, %v7723_v37  ;;  %v17153_v35 = vld [vmem:[%s18181_s18 + $0x24] sm:$0xf] }
 0xcbe   : > { %v14616_v38 = vpop.f32.mrf.mxu0 }
 0xcc0   : > { %v7883_v39 = vpop.f32.mrf.mxu1 }
 0xcc1   : > { %v7887_v44 = vadd.f32 %v7883_v39, %v7805_v40 }
 0xcc2   : > { %v14623_v41 = vpop.f32.mrf.mxu1 }
 0xcc3   : > { %v17168_v41 = vld [vmem:[%s18181_s18 + $0x28] sm:$0xf] }
 0xcc4   : > { %v7965_v43 = vpop.f32.mrf.mxu0 }
 0xcc5   : > { %v7969_v46 = vadd.f32 %v7965_v43, %v7887_v44 }
 0xcc6   : > { %v14630_v42 = vpop.f32.mrf.mxu0 }
 0xcc8   : > { %v8047_v45 = vpop.f32.mrf.mxu1 }
 0xcc9   : > { %v8051_v48 = vadd.f32 %v8047_v45, %v7969_v46  ;;  %v17185_v46 = vld [vmem:[%s18181_s18 + $0x2c] sm:$0xf] }
 0xcca   : > { %v14637_v60 = vpop.f32.mrf.mxu1 }
 0xccc   : > { %v8129_v47 = vpop.f32.mrf.mxu0 }
 0xccd   : > { %v8133_v50 = vadd.f32 %v8129_v47, %v8051_v48 }
 0xcce   : > { %v14644_v49 = vpop.f32.mrf.mxu0 }
 0xcd0   : > { %v8211_v51 = vpop.f32.mrf.mxu1 }
 0xcd1   : > { %v8215_v53 = vadd.f32 %v8211_v51, %v8133_v50  ;;  %v17204_v50 = vld [vmem:[%s18181_s18 + $0x30] sm:$0xf] }
 0xcd2   : > { %v14651_v54 = vpop.f32.mrf.mxu1 }
 0xcd3   : > { %v8222_v56 = vadd.f32 %v8220_v55, %v8215_v53 }
 0xcd5   : > { %vm8223_vm6 = vcmp.ge.f32.partialorder %v8222_v56, 0.0  ;;  %v8224_v57 = vmul.f32 0.01, %v8222_v56 }
 0xcd7   : > { %v8225_v58 = vsel %vm8223_vm6, %v8222_v56, %v8224_v57  ;;  %vm9375_vm6 = vcmask 875520   ;;  %v17221_v56 = vld [vmem:[%s18181_s18 + $0x34] sm:$0xf] }
 0xcd8   : > { %13548 = vmatmul.mubr.msk.f32.vlgmr.msra.gmra.mxu0 %vm8259_vm9, %v8225_v58  ;;  %14675 = vmatmul.mubr.msk.f32.vlgmr.msra.gmra.mxu1 %vm8259_vm9, %v8225_v58  ;;  %vm9536_vm9 = vcmask 867328  }
 0xcd9   : > { %14679 = vmatprep.mubr.msk.f32.mxu1 %vm15024_vm14, %v15023_v20  ;;  %8505 = vmatprep.mubr.f32.mxu0 %v15023_v20 }
 0xd98   : > { %v16963_v59 = vpop.f32.mrf.mxu0  ;;  %v8410_v61 = vpop.f32.mrf.mxu1 }
 0xd99   : > { %8417 = vst.msk [vmem:[#allocation8 + $0x10] sm:$0xff] %vm8416_vm10, %v8410_v61  ;;  %vm9857_vm10 = vcmask 728064  }
 0xd9a   : > { %v16965_v25 = vpop.f32.mrf.mxu0  ;;  %v14676_v62 = vpop.f32.mrf.mxu1 }
 0xda0   : > { %v8420_v63 = vld [vmem:[#allocation8 + $0x10] sm:$0xff] }
 0xda1   : > { %8732 = vrot.lane.b32.xlu1 %v8420_v63, %s18152_s29  ;;  %8431 = vrot.lane.b32.xlu0 %v8420_v63, %s18153_s8 }
 0xda5   : > { %9053 = vrot.lane.b32.xlu1 %v8420_v63, %s18154_s5  ;;  %8892 = vrot.lane.b32.xlu0 %v8420_v63, %s18169_s9 }
 0xda9   : > { %9373 = vrot.lane.b32.xlu1 %v8420_v63, %s18171_s17  ;;  %9213 = vrot.lane.b32.xlu0 %v8420_v63, %s18150_s2 }
 0xdad   : > { %8427 = vrot.lane.b32.xlu1 %v16963_v59, %s18153_s8  ;;  %9534 = vrot.lane.b32.xlu0 %v8420_v63, %s18173_s3 }
 0xdb1   : > { %9695 = vrot.lane.b32.xlu1 %v8420_v63, %s18156_s28  ;;  %9855 = vrot.lane.b32.xlu0 %v8420_v63, %s15046_s11 }
 0xdb5   : > { %8728 = vrot.lane.b32.xlu1 %v16963_v59, %s18152_s29  ;;  %8888 = vrot.lane.b32.xlu0 %v16963_v59, %s18169_s9 }
 0xdb9   : > { %10016 = vrot.lane.b32.xlu1 %v8420_v63, %s15047_s13  ;;  %8429 = vrot.lane.b32.xlu0 %v16965_v25, %s18153_s8 }
 0xdbd   : > { %9049 = vrot.lane.b32.xlu1 %v16963_v59, %s18154_s5  ;;  %10177 = vrot.lane.b32.xlu0 %v8420_v63, %s15048_s0 }
 0xdc1   : > { %10338 = vrot.lane.b32.xlu1 %v8420_v63, %s15049_s10  ;;  %8730 = vrot.lane.b32.xlu0 %v16965_v25, %s18152_s29 }
 0xdc5   : > { %8890 = vrot.lane.b32.xlu1 %v16965_v25, %s18169_s9  ;;  %9209 = vrot.lane.b32.xlu0 %v16963_v59, %s18150_s2  ;;  %s15052_s9 = smov 68  }
 0xdc9   : > { %9369 = vrot.lane.b32.xlu1 %v16963_v59, %s18171_s17  ;;  %9051 = vrot.lane.b32.xlu0 %v16965_v25, %s18154_s5 }
 0xdcd   : > { %9211 = vrot.lane.b32.xlu1 %v16965_v25, %s18150_s2  ;;  %10499 = vrot.lane.b32.xlu0 %v8420_v63, %s15050_s27 }
 0xdd1   : > { %10660 = vrot.lane.b32.xlu1 %v8420_v63, %s15051_s4  ;;  %9371 = vrot.lane.b32.xlu0 %v16965_v25, %s18171_s17  ;;  %s18182_s17 = sld [smem:[#allocation26_spill]] }
 0xdd5   : > { %9532 = vrot.lane.b32.xlu1 %v16965_v25, %s18173_s3  ;;  %9530 = vrot.lane.b32.xlu0 %v16963_v59, %s18173_s3  ;;  %s13271_s3 = sshll.u32 %s18191_s30, 1 }
 0xdd6   : > { %s805_s12 = scalar_lea.vmem %s18063_s25, %s13271_s3 }
 0xdd9   : > { %9691 = vrot.lane.b32.xlu1 %v16963_v59, %s18156_s28  ;;  %9693 = vrot.lane.b32.xlu0 %v16965_v25, %s18156_s28 }
 0xddd   : > { %9853 = vrot.lane.b32.xlu1 %v16965_v25, %s15046_s11  ;;  %10821 = vrot.lane.b32.xlu0 %v8420_v63, %s15052_s9 }
 0xde1   : > { %10014 = vrot.lane.b32.xlu1 %v16965_v25, %s15047_s13  ;;  %9851 = vrot.lane.b32.xlu0 %v16963_v59, %s15046_s11 }
 0xde5   : > { %10175 = vrot.lane.b32.xlu1 %v16965_v25, %s15048_s0  ;;  %10012 = vrot.lane.b32.xlu0 %v16963_v59, %s15047_s13 }
 0xde9   : > { %10336 = vrot.lane.b32.xlu1 %v16965_v25, %s15049_s10  ;;  %10173 = vrot.lane.b32.xlu0 %v16963_v59, %s15048_s0 }
 0xded   : > { %10497 = vrot.lane.b32.xlu1 %v16965_v25, %s15050_s27  ;;  %10334 = vrot.lane.b32.xlu0 %v16963_v59, %s15049_s10 }
 0xdf1   : > { %10658 = vrot.lane.b32.xlu1 %v16965_v25, %s15051_s4  ;;  %10495 = vrot.lane.b32.xlu0 %v16963_v59, %s15050_s27 }
 0xdf5   : > { %10819 = vrot.lane.b32.xlu1 %v16965_v25, %s15052_s9  ;;  %10656 = vrot.lane.b32.xlu0 %v16963_v59, %s15051_s4 }
 0xdf9   : > { %10979 = vperm.xlu1 %14900, %v10976_v1   ;;  %10817 = vrot.lane.b32.xlu0 %v16963_v59, %s15052_s9 }
 0xe13   : > { %v17030_v4 = vpop.permute.xlu1 %8732  ;;  %v8432_v5 = vpop.permute.xlu0 %8431 }
 0xe14   : > { %14678 = vmatpush3.msra.mxu1 %v8432_v5 }
 0xe15   : > { %14680 = vmatmul.mubr.msk.f32.vlgmr.msra.gmra.mxu1 %vm3197_vm13, %v13551_v3  ;;  %14682 = vmatprep.subr.mxu1 %v15023_v20 }
 0xe16   : > { %14683 = vmatpush3.msra.mxu1 %v8420_v63  ;;  %14684 = vmatprep.mubr.msk.f32.mxu1 %vm15024_vm14, %v15023_v20 }
 0xe17   : > { %v17039_v8 = vpop.permute.xlu1 %9053  ;;  %v17041_v9 = vpop.permute.xlu0 %8892  ;;  %14687 = vmatprep.subr.mxu1 %v15023_v20 }
 0xe19   : > { %14685 = vmatmul.mubr.msk.f32.vlgmr.msra.gmra.mxu1 %vm3197_vm13, %v8421_v6 }
 0xe1a   : > { %14688 = vmatpush3.msra.mxu1 %v17030_v4  ;;  %14689 = vmatprep.mubr.msk.f32.mxu1 %vm15024_vm14, %v15023_v20 }
 0xe1b   : > { %v17053_v11 = vpop.permute.xlu1 %9373  ;;  %v17055_v0 = vpop.permute.xlu0 %9213  ;;  %14692 = vmatprep.subr.mxu1 %v15023_v20 }
 0xe1d   : > { %14690 = vmatmul.mubr.msk.f32.vlgmr.msra.gmra.mxu1 %vm3197_vm13, %v17051_v10 }
 0xe1e   : > { %14693 = vmatpush3.msra.mxu1 %v17041_v9  ;;  %14694 = vmatprep.mubr.msk.f32.mxu1 %vm15024_vm14, %v15023_v20 }
 0xe1f   : > { %v8428_v7 = vpop.permute.xlu1 %8427  ;;  %v17068_v12 = vpop.permute.xlu0 %9534  ;;  %14697 = vmatprep.subr.mxu1 %v15023_v20 }
 0xe21   : > { %14695 = vmatmul.mubr.msk.f32.vlgmr.msra.gmra.mxu1 %vm3197_vm13, %v17066_v36 }
 0xe22   : > { %14698 = vmatpush3.msra.mxu1 %v17039_v8  ;;  %14699 = vmatprep.mubr.msk.f32.mxu1 %vm15024_vm14, %v15023_v20 }
 0xe23   : > { %v17081_v15 = vpop.permute.xlu1 %9695  ;;  %v17083_v16 = vpop.permute.xlu0 %9855  ;;  %14702 = vmatprep.subr.mxu1 %v15023_v20 }
 0xe25   : > { %14700 = vmatmul.mubr.msk.f32.vlgmr.msra.gmra.mxu1 %vm3197_vm13, %v17079_v14 }
 0xe26   : > { %14703 = vmatpush3.msra.mxu1 %v17055_v0  ;;  %14704 = vmatprep.mubr.msk.f32.mxu1 %vm15024_vm14, %v15023_v20 }
 0xe27   : > { %v8729_v18 = vpop.permute.xlu1 %8728  ;;  %v8889_v19 = vpop.permute.xlu0 %8888  ;;  %14707 = vmatprep.subr.mxu1 %v15023_v20 }
 0xe29   : > { %14705 = vmatmul.mubr.msk.f32.vlgmr.msra.gmra.mxu1 %vm3197_vm13, %v17094_v17 }
 0xe2a   : > { %14708 = vmatpush3.msra.mxu1 %v17053_v11  ;;  %14709 = vmatprep.mubr.msk.f32.mxu1 %vm15024_vm14, %v15023_v20 }
 0xe2b   : > { %v17107_v22 = vpop.permute.xlu1 %10016  ;;  %v8430_v24 = vpop.permute.xlu0 %8429  ;;  %14712 = vmatprep.subr.mxu1 %v15023_v20 }
 0xe2c   : > { %v8433_v27 = vsel %vm857_vm2, %v8428_v7, %v8430_v24  ;;  %v8434_v23 = vsel %vm857_vm2, %v8430_v24, %v8432_v5 }
 0xe2d   : > { %8471 = vmatprep.subr.mxu0 %v8434_v23  ;;  %14710 = vmatmul.mubr.msk.f32.vlgmr.msra.gmra.mxu1 %vm3197_vm13, %v17105_v21 }
 0xe2e   : > { %14713 = vmatpush3.msra.mxu1 %v17068_v12  ;;  %8472 = vmatpush1.msra.mxu0 %v8433_v27 }
 0xe2f   : > { %v9050_v26 = vpop.permute.xlu1 %9049  ;;  %13552 = vmatmul.mubr.msk.f32.vlgmr.msra.gmra.mxu0 %vm3197_vm13, %v13551_v3  ;;  %8615 = vmatprep.subr.mxu0 %v16965_v25  ;;  %v17122_v30 = vpop.permute.xlu0 %10177  ;;  %v17236_v25 = vld [vmem:[%s18181_s18 + $0x38] sm:$0xf] }
 0xe30   : > { %8616 = vmatpush1.msra.mxu0 %v16963_v59  ;;  %14714 = vmatprep.mubr.msk.f32.mxu1 %vm15024_vm14, %v15023_v20 }
 0xe31   : > { %14717 = vmatprep.subr.mxu1 %v15023_v20  ;;  %14715 = vmatmul.mubr.msk.f32.vlgmr.msra.gmra.mxu1 %vm3197_vm13, %v17118_v28 }
 0xe32   : > { %14718 = vmatpush3.msra.mxu1 %v17081_v15  ;;  %8649 = vmatprep.mubr.f32.mxu0 %v15023_v20 }
 0xe33   : > { %v17137_v32 = vpop.permute.xlu1 %10338  ;;  %13554 = vmatmul.mubr.msk.f32.vlgmr.msra.gmra.mxu0 %vm3197_vm13, %v8421_v6  ;;  %v8731_v33 = vpop.permute.xlu0 %8730  ;;  %14719 = vmatprep.mubr.msk.f32.mxu1 %vm15024_vm14, %v15023_v20 }
 0xe34   : > { %v8734_v29 = vsel %vm885_vm5, %v8729_v18, %v8731_v33  ;;  %14722 = vmatprep.subr.mxu1 %v15023_v20  ;;  %v8735_v34 = vsel %vm885_vm5, %v8731_v33, %v17030_v4  ;;  %8806 = vmatprep.mubr.f32.mxu0 %v15023_v20  ;;  %v17254_v4 = vld [vmem:[%s18181_s18 + $0x3c] sm:$0xf] }
 0xe35   : > { %8772 = vmatprep.subr.mxu0 %v8735_v34  ;;  %14720 = vmatmul.mubr.msk.f32.vlgmr.msra.gmra.mxu1 %vm3197_vm13, %v17135_v31 }
 0xe36   : > { %14723 = vmatpush3.msra.mxu1 %v17083_v16  ;;  %8773 = vmatpush1.msra.mxu0 %v8734_v29 }
 0xe37   : > { %v8891_v37 = vpop.permute.xlu1 %8890  ;;  %13557 = vmatmul.mubr.msk.f32.vlgmr.msra.gmra.mxu0 %vm3197_vm13, %v17051_v10  ;;  %v9210_v38 = vpop.permute.xlu0 %9209  ;;  %14724 = vmatprep.mubr.msk.f32.mxu1 %vm15024_vm14, %v15023_v20 }
 0xe38   : > { %v8895_v39 = vsel %vm8894_vm12, %v8889_v19, %v8891_v37  ;;  %14727 = vmatprep.subr.mxu1 %v15023_v20  ;;  %v8896_v40 = vsel %vm8894_vm12, %v8891_v37, %v17041_v9  ;;  %8967 = vmatprep.mubr.f32.mxu0 %v15023_v20  ;;  %vm10018_vm12 = vcmask 719872   ;;  %v11039_v37 = vld [vmem:[%s18061_s23 + $0x168] sm:$0xff] }
 0xe39   : > { %8933 = vmatprep.subr.mxu0 %v8896_v40  ;;  %14725 = vmatmul.mubr.msk.f32.vlgmr.msra.gmra.mxu1 %vm3197_vm13, %v17153_v35  ;;  %v11034_v40 = vld [vmem:[%s18061_s23 + $0x140] sm:$0xff] }
 0xe3a   : > { %14728 = vmatpush3.msra.mxu1 %v17107_v22  ;;  %8934 = vmatpush1.msra.mxu0 %v8895_v39  ;;  %v11036_v39 = vld [vmem:[%s18061_s23 + $0x150] sm:$0xff] }
 0xe3b   : > { %v9370_v43 = vpop.permute.xlu1 %9369  ;;  %13560 = vmatmul.mubr.msk.f32.vlgmr.msra.gmra.mxu0 %vm3197_vm13, %v17066_v36  ;;  %v9052_v44 = vpop.permute.xlu0 %9051  ;;  %14729 = vmatprep.mubr.msk.f32.mxu1 %vm15024_vm14, %v15023_v20 }
 0xe3c   : > { %v9055_v42 = vsel %vm941_vm7, %v9050_v26, %v9052_v44  ;;  %14732 = vmatprep.subr.mxu1 %v15023_v20  ;;  %v9056_v45 = vsel %vm941_vm7, %v9052_v44, %v17039_v8  ;;  %9127 = vmatprep.mubr.f32.mxu0 %v15023_v20  ;;  %v11030_v44 = vld [vmem:[%s18061_s23 + $0x120] sm:$0xff] }
 0xe3d   : > { %9093 = vmatprep.subr.mxu0 %v9056_v45  ;;  %14730 = vmatmul.mubr.msk.f32.vlgmr.msra.gmra.mxu1 %vm3197_vm13, %v17168_v41  ;;  %v11027_v45 = vld [vmem:[%s18061_s23 + $0x108] sm:$0xff] }
 0xe3e   : > { %14733 = vmatpush3.msra.mxu1 %v17122_v30  ;;  %9094 = vmatpush1.msra.mxu0 %v9055_v42  ;;  %v11028_v42 = vld [vmem:[%s18061_s23 + $0x110] sm:$0xff] }
 0xe3f   : > { %v9212_v60 = vpop.permute.xlu1 %9211  ;;  %13563 = vmatmul.mubr.msk.f32.vlgmr.msra.gmra.mxu0 %vm3197_vm13, %v17079_v14  ;;  %v17189_v47 = vpop.permute.xlu0 %10499  ;;  %14734 = vmatprep.mubr.msk.f32.mxu1 %vm15024_vm14, %v15023_v20 }
 0xe40   : > { %v9215_v48 = vsel %vm969_vm8, %v9210_v38, %v9212_v60  ;;  %14737 = vmatprep.subr.mxu1 %v15023_v20  ;;  %v9216_v49 = vsel %vm969_vm8, %v9212_v60, %v17055_v0  ;;  %9287 = vmatprep.mubr.f32.mxu0 %v15023_v20  ;;  %v11037_v38 = vld [vmem:[%s18061_s23 + $0x158] sm:$0xff]  ;;  %v11024_v60 = vld [vmem:[%s18061_s23 + $0xf0] sm:$0xff] }
 0xe41   : > { %9253 = vmatprep.subr.mxu0 %v9216_v49  ;;  %14735 = vmatmul.mubr.msk.f32.vlgmr.msra.gmra.mxu1 %vm3197_vm13, %v17185_v46  ;;  %v11019_v49 = vld [vmem:[%s18061_s23 + $0xc8] sm:$0xff] }
 0xe42   : > { %14738 = vmatpush3.msra.mxu1 %v17137_v32  ;;  %9254 = vmatpush1.msra.mxu0 %v9215_v48  ;;  %v11021_v48 = vld [vmem:[%s18061_s23 + $0xd8] sm:$0xff] }
 0xe43   : > { %v17206_v51 = vpop.permute.xlu1 %10660  ;;  %13566 = vmatmul.mubr.msk.f32.vlgmr.msra.gmra.mxu0 %vm3197_vm13, %v17094_v17  ;;  %v9372_v53 = vpop.permute.xlu0 %9371  ;;  %14739 = vmatprep.mubr.msk.f32.mxu1 %vm15024_vm14, %v15023_v20 }
 0xe44   : > { %v9376_v55 = vsel %vm9375_vm6, %v9370_v43, %v9372_v53  ;;  %14742 = vmatprep.subr.mxu1 %v15023_v20  ;;  %v9377_v54 = vsel %vm9375_vm6, %v9372_v53, %v17053_v11  ;;  %9448 = vmatprep.mubr.f32.mxu0 %v15023_v20  ;;  %vm10179_vm6 = vcmask 711680   ;;  %v11031_v43 = vld [vmem:[%s18061_s23 + $0x128] sm:$0xff] }
 0xe45   : > { %9414 = vmatprep.subr.mxu0 %v9377_v54  ;;  %14740 = vmatmul.mubr.msk.f32.vlgmr.msra.gmra.mxu1 %vm3197_vm13, %v17204_v50  ;;  %v11015_v53 = vld [vmem:[%s18061_s23 + $0xa8] sm:$0xff]  ;;  %v11012_v54 = vld [vmem:[%s18061_s23 + $0x90] sm:$0xff] }
 0xe46   : > { %14743 = vmatpush3.msra.mxu1 %v17189_v47  ;;  %9415 = vmatpush1.msra.mxu0 %v9376_v55  ;;  %v11013_v55 = vld [vmem:[%s18061_s23 + $0x98] sm:$0xff] }
 0xe47   : > { %v9533_v57 = vpop.permute.xlu1 %9532  ;;  %13569 = vmatmul.mubr.msk.f32.vlgmr.msra.gmra.mxu0 %vm3197_vm13, %v17105_v21  ;;  %v9531_v58 = vpop.permute.xlu0 %9530  ;;  %14744 = vmatprep.mubr.msk.f32.mxu1 %vm15024_vm14, %v15023_v20 }
 0xe48   : > { %v9537_v59 = vsel %vm9536_vm9, %v9531_v58, %v9533_v57  ;;  %14747 = vmatprep.subr.mxu1 %v15023_v20  ;;  %v9538_v61 = vsel %vm9536_vm9, %v9533_v57, %v17068_v12  ;;  %9609 = vmatprep.mubr.f32.mxu0 %v15023_v20  ;;  %vm10340_vm9 = vcmask 580608   ;;  %v11010_v57 = vld [vmem:[%s18061_s23 + $0x80] sm:$0xff]  ;;  %v11105_v58 = vld [vmem:[%s18061_s23 + $0x378] sm:$0x1f] }
 0xe49   : > { %9575 = vmatprep.subr.mxu0 %v9538_v61  ;;  %14745 = vmatmul.mubr.msk.f32.vlgmr.msra.gmra.mxu1 %vm3197_vm13, %v17221_v56  ;;  %v11103_v61 = vld [vmem:[%s18061_s23 + $0x368] sm:$0xff] }
 0xe4a   : > { %14748 = vmatpush3.msra.mxu1 %v17206_v51  ;;  %9576 = vmatpush1.msra.mxu0 %v9537_v59  ;;  %v11009_v59 = vld [vmem:[%s18061_s23 + $0x78] sm:$0xff] }
 0xe4b   : > { %v9692_v62 = vpop.permute.xlu1 %9691  ;;  %13572 = vmatmul.mubr.msk.f32.vlgmr.msra.gmra.mxu0 %vm3197_vm13, %v17118_v28  ;;  %v9694_v63 = vpop.permute.xlu0 %9693  ;;  %14749 = vmatprep.mubr.msk.f32.mxu1 %vm15024_vm14, %v15023_v20 }
 0xe4c   : > { %v9697_v1 = vsel %vm1053_vm11, %v9692_v62, %v9694_v63  ;;  %v9698_v3 = vsel %vm1053_vm11, %v9694_v63, %v17081_v15  ;;  %9769 = vmatprep.mubr.f32.mxu0 %v15023_v20  ;;  %14752 = vmatprep.subr.mxu1 %v15023_v20  ;;  %v11102_v62 = vld [vmem:[%s18061_s23 + $0x360] sm:$0xff] }
 0xe4d   : > { %9735 = vmatprep.subr.mxu0 %v9698_v3  ;;  %14750 = vmatmul.mubr.msk.f32.vlgmr.msra.gmra.mxu1 %vm3197_vm13, %v17236_v25  ;;  %v11006_v63 = vld [vmem:[%s18061_s23 + $0x60] sm:$0xff]  ;;  %v11004_v3 = vld [vmem:[%s18061_s23 + $0x50] sm:$0xff] }
 0xe4e   : > { %9736 = vmatpush1.msra.mxu0 %v9697_v1  ;;  %14754 = vmatprep.mubr.msk.f32.mxu1 %vm15024_vm14, %v15023_v20  ;;  %v11100_v1 = vld [vmem:[%s18061_s23 + $0x350] sm:$0xff] }
 0xe4f   : > { %v9854_v5 = vpop.permute.xlu1 %9853  ;;  %13575 = vmatmul.mubr.msk.f32.vlgmr.msra.gmra.mxu0 %vm3197_vm13, %v17135_v31  ;;  %v10822_v6 = vpop.permute.xlu0 %10821 }
 0xe50   : > { %14753 = vmatpush3.msra.mxu1 %v10822_v6  ;;  %v9859_v8 = vsel %vm9857_vm10, %v9854_v5, %v17083_v16  ;;  %9930 = vmatprep.mubr.f32.mxu0 %v15023_v20 }
 0xe51   : > { %9896 = vmatprep.subr.mxu0 %v9859_v8  ;;  %14755 = vmatmul.mubr.msk.f32.vlgmr.msra.gmra.mxu1 %vm3197_vm13, %v17254_v4  ;;  %v11001_v8 = vld [vmem:[%s18061_s23 + $0x38] sm:$0xff] }
 0xe52   : > { %11256 = vmatprep.mubr.f32.mxu1 %v15023_v20 }
 0xe53   : > { %v10015_v9 = vpop.permute.xlu1 %10014  ;;  %v9852_v10 = vpop.permute.xlu0 %9851 }
 0xe54   : > { %v9858_v11 = vsel %vm9857_vm10, %v9852_v10, %v9854_v5  ;;  %v10020_v0 = vsel %vm10018_vm12, %v10015_v9, %v17107_v22  ;;  %vm10501_vm10 = vcmask 572416   ;;  %v11003_v5 = vld [vmem:[%s18061_s23 + $0x48] sm:$0xff]  ;;  %v11000_v10 = vld [vmem:[%s18061_s23 + $0x30] sm:$0xff] }
 0xe55   : > { %9897 = vmatpush1.msra.mxu0 %v9858_v11  ;;  %v11094_v11 = vld [vmem:[%s18061_s23 + $0x320] sm:$0xff] }
 0xe56   : > { %13578 = vmatmul.mubr.msk.f32.vlgmr.msra.gmra.mxu0 %vm3197_vm13, %v17153_v35  ;;  %10057 = vmatprep.subr.mxu0 %v10020_v0  ;;  %v11040_v35 = vld [vmem:[%s18061_s23 + $0x170] sm:$0xff]  ;;  %v10998_v0 = vld [vmem:[%s18061_s23 + $0x20] sm:$0xff] }
 0xe57   : > { %v10176_v36 = vpop.permute.xlu1 %10175  ;;  %v10013_v7 = vpop.permute.xlu0 %10012  ;;  %10091 = vmatprep.mubr.f32.mxu0 %v15023_v20 }
 0xe58   : > { %v10019_v12 = vsel %vm10018_vm12, %v10013_v7, %v10015_v9  ;;  %v10181_v14 = vsel %vm10179_vm6, %v10176_v36, %v17122_v30  ;;  %vm10662_vm12 = vcmask 564224   ;;  %v11096_v9 = vld [vmem:[%s18061_s23 + $0x330] sm:$0xff]  ;;  %v10997_v7 = vld [vmem:[%s18061_s23 + $0x18] sm:$0xff] }
 0xe59   : > { %10058 = vmatpush1.msra.mxu0 %v10019_v12  ;;  %v11091_v12 = vld [vmem:[%s18061_s23 + $0x308] sm:$0xff] }
 0xe5a   : > { %13581 = vmatmul.mubr.msk.f32.vlgmr.msra.gmra.mxu0 %vm3197_vm13, %v17168_v41  ;;  %10218 = vmatprep.subr.mxu0 %v10181_v14  ;;  %v11033_v41 = vld [vmem:[%s18061_s23 + $0x138] sm:$0xff]  ;;  %v10995_v14 = vld [vmem:[%s18061_s23 + $0x8] sm:$0xff] }
 0xe5b   : > { %v10337_v15 = vpop.permute.xlu1 %10336  ;;  %v10174_v16 = vpop.permute.xlu0 %10173  ;;  %10252 = vmatprep.mubr.f32.mxu0 %v15023_v20 }
 0xe5c   : > { %v10180_v17 = vsel %vm10179_vm6, %v10174_v16, %v10176_v36  ;;  %v10342_v18 = vsel %vm10340_vm9, %v10337_v15, %v17137_v32  ;;  %vm10823_vm6 = vcmask 556032   ;;  %v11093_v36 = vld [vmem:[%s18061_s23 + $0x318] sm:$0xff]  ;;  %v10994_v16 = vld [vmem:[%s18061_s23] sm:$0xff] }
 0xe5d   : > { %10219 = vmatpush1.msra.mxu0 %v10180_v17  ;;  %v11089_v17 = vld [vmem:[%s18061_s23 + $0x2f8] sm:$0xff] }
 0xe5e   : > { %13584 = vmatmul.mubr.msk.f32.vlgmr.msra.gmra.mxu0 %vm3197_vm13, %v17185_v46  ;;  %10379 = vmatprep.subr.mxu0 %v10342_v18  ;;  %v11025_v46 = vld [vmem:[%s18061_s23 + $0xf8] sm:$0xff]  ;;  %v11088_v18 = vld [vmem:[%s18061_s23 + $0x2f0] sm:$0xff] }
 0xe5f   : > { %v10498_v19 = vpop.permute.xlu1 %10497  ;;  %v10335_v21 = vpop.permute.xlu0 %10334  ;;  %10413 = vmatprep.mubr.f32.mxu0 %v15023_v20 }
 0xe60   : > { %v10341_v22 = vsel %vm10340_vm9, %v10335_v21, %v10337_v15  ;;  %v10503_v24 = vsel %vm10501_vm10, %v10498_v19, %v17189_v47  ;;  %v11022_v47 = vld [vmem:[%s18061_s23 + $0xe0] sm:$0xff]  ;;  %v11085_v21 = vld [vmem:[%s18061_s23 + $0x2d8] sm:$0xff]  ;;  %vm11108_vm9 = vcmask 367616  }
 0xe61   : > { %10380 = vmatpush1.msra.mxu0 %v10341_v22  ;;  %v11090_v15 = vld [vmem:[%s18061_s23 + $0x300] sm:$0xff]  ;;  %v11084_v22 = vld [vmem:[%s18061_s23 + $0x2d0] sm:$0xff] }
 0xe62   : > { %13587 = vmatmul.mubr.msk.f32.vlgmr.msra.gmra.mxu0 %vm3197_vm13, %v17204_v50  ;;  %10540 = vmatprep.subr.mxu0 %v10503_v24  ;;  %v11018_v50 = vld [vmem:[%s18061_s23 + $0xc0] sm:$0xff] }
 0xe63   : > { %v10659_v27 = vpop.permute.xlu1 %10658  ;;  %v10496_v23 = vpop.permute.xlu0 %10495  ;;  %10574 = vmatprep.mubr.f32.mxu0 %v15023_v20  ;;  %v11082_v24 = vld [vmem:[%s18061_s23 + $0x2c0] sm:$0xff] }
 0xe64   : > { %v10502_v28 = vsel %vm10501_vm10, %v10496_v23, %v10498_v19  ;;  %v10664_v26 = vsel %vm10662_vm12, %v10659_v27, %v17206_v51  ;;  %v11016_v51 = vld [vmem:[%s18061_s23 + $0xb0] sm:$0xff]  ;;  %v11087_v19 = vld [vmem:[%s18061_s23 + $0x2e8] sm:$0xff] }
 0xe65   : > { %10541 = vmatpush1.msra.mxu0 %v10502_v28  ;;  %v11079_v23 = vld [vmem:[%s18061_s23 + $0x2a8] sm:$0xff]  ;;  %v11078_v28 = vld [vmem:[%s18061_s23 + $0x2a0] sm:$0xff] }
 0xe66   : > { %13590 = vmatmul.mubr.msk.f32.vlgmr.msra.gmra.mxu0 %vm3197_vm13, %v17221_v56  ;;  %10701 = vmatprep.subr.mxu0 %v10664_v26  ;;  %v11106_v56 = vld [vmem:[%s18061_s23 + $0x380] sm:$0x1f]  ;;  %v11076_v26 = vld [vmem:[%s18061_s23 + $0x290] sm:$0xff] }
 0xe67   : > { %v10820_v30 = vpop.permute.xlu1 %10819  ;;  %v10657_v31 = vpop.permute.xlu0 %10656  ;;  %10735 = vmatprep.mubr.f32.mxu0 %v15023_v20  ;;  %13598 = vmatprep.subr.msk.mxu1 %vm8263_vm4, %v11106_v56 }
 0xe68   : > { %v10663_v32 = vsel %vm10662_vm12, %v10657_v31, %v10659_v27  ;;  %v10825_v33 = vsel %vm10823_vm6, %v10820_v30, %v10822_v6  ;;  %13599 = vmatpush1.msk.msra.mxu1 %vm8263_vm4, %v11105_v58  ;;  %v11097_v6 = vld [vmem:[%s18061_s23 + $0x338] sm:$0xff] }
 0xe69   : > { %10702 = vmatpush1.msra.mxu0 %v10663_v32  ;;  %11214 = vmatprep.subr.mxu1 %v11103_v61  ;;  %v11081_v27 = vld [vmem:[%s18061_s23 + $0x2b8] sm:$0xff]  ;;  %v11072_v32 = vld [vmem:[%s18061_s23 + $0x270] sm:$0xff] }
 0xe6a   : > { %13593 = vmatmul.mubr.msk.f32.vlgmr.msra.gmra.mxu0 %vm3197_vm13, %v17236_v25  ;;  %10862 = vmatprep.subr.mxu0 %v10825_v33  ;;  %v11007_v25 = vld [vmem:[%s18061_s23 + $0x68] sm:$0xff]  ;;  %v11073_v31 = vld [vmem:[%s18061_s23 + $0x278] sm:$0xff]  ;;  %v11070_v33 = vld [vmem:[%s18061_s23 + $0x260] sm:$0xff] }
 0xe6b   : > { %v10818_v29 = vpop.permute.xlu0 %10817  ;;  %10896 = vmatprep.mubr.f32.mxu0 %v15023_v20  ;;  %11215 = vmatpush1.msra.mxu1 %v11102_v62 }
 0xe6c   : > { %v10824_v34 = vsel %vm10823_vm6, %v10818_v29, %v10820_v30  ;;  %11216 = vmatprep.subr.mxu1 %v11100_v1  ;;  %v11075_v30 = vld [vmem:[%s18061_s23 + $0x288] sm:$0xff]  ;;  %v11069_v29 = vld [vmem:[%s18061_s23 + $0x258] sm:$0xff] }
 0xe6d   : > { %10863 = vmatpush1.msra.mxu0 %v10824_v34  ;;  %v11067_v34 = vld [vmem:[%s18061_s23 + $0x248] sm:$0xff] }
 0xe6e   : > { %13596 = vmatmul.mubr.msk.f32.vlgmr.msra.gmra.mxu0 %vm3197_vm13, %v17254_v4  ;;  %11121 = vmatprep.subr.mxu0 %v11040_v35  ;;  %v11099_v4 = vld [vmem:[%s18061_s23 + $0x348] sm:$0xff]  ;;  %v11066_v35 = vld [vmem:[%s18061_s23 + $0x240] sm:$0xff] }
 0xe6f   : > { %11122 = vmatpush1.msra.mxu0 %v11039_v37  ;;  %11217 = vmatpush1.msra.mxu1 %v11099_v4  ;;  %v11064_v37 = vld [vmem:[%s18061_s23 + $0x230] sm:$0xff] }
 0xe70   : > { %11123 = vmatprep.subr.mxu0 %v11037_v38  ;;  %11218 = vmatprep.subr.mxu1 %v11097_v6  ;;  %v11063_v38 = vld [vmem:[%s18061_s23 + $0x228] sm:$0xff] }
 0xe71   : > { %11124 = vmatpush1.msra.mxu0 %v11036_v39  ;;  %11219 = vmatpush1.msra.mxu1 %v11096_v9  ;;  %v11061_v39 = vld [vmem:[%s18061_s23 + $0x218] sm:$0xff] }
 0xe72   : > { %11125 = vmatprep.subr.mxu0 %v11034_v40  ;;  %11220 = vmatprep.subr.mxu1 %v11094_v11  ;;  %v11060_v40 = vld [vmem:[%s18061_s23 + $0x210] sm:$0xff] }
 0xe73   : > { %11126 = vmatpush1.msra.mxu0 %v11033_v41  ;;  %11221 = vmatpush1.msra.mxu1 %v11093_v36  ;;  %v11058_v41 = vld [vmem:[%s18061_s23 + $0x200] sm:$0xff] }
 0xe74   : > { %11127 = vmatprep.subr.mxu0 %v11031_v43  ;;  %11222 = vmatprep.subr.mxu1 %v11091_v12  ;;  %v11057_v43 = vld [vmem:[%s18061_s23 + $0x1f8] sm:$0xff] }
 0xe75   : > { %11128 = vmatpush1.msra.mxu0 %v11030_v44  ;;  %11223 = vmatpush1.msra.mxu1 %v11090_v15  ;;  %v11055_v44 = vld [vmem:[%s18061_s23 + $0x1e8] sm:$0xff] }
 0xe76   : > { %11129 = vmatprep.subr.mxu0 %v11028_v42  ;;  %14056 = vmatprep.subr.mxu1 %v11089_v17  ;;  %v11054_v42 = vld [vmem:[%s18061_s23 + $0x1e0] sm:$0xff] }
 0xe77   : > { %11130 = vmatpush1.msra.mxu0 %v11027_v45  ;;  %v11052_v45 = vld [vmem:[%s18061_s23 + $0x1d0] sm:$0xff] }
 0xe78   : > { %11131 = vmatprep.subr.mxu0 %v11025_v46  ;;  %v11051_v46 = vld [vmem:[%s18061_s23 + $0x1c8] sm:$0xff] }
 0xe79   : > { %11132 = vmatpush1.msra.mxu0 %v11024_v60  ;;  %v11049_v60 = vld [vmem:[%s18061_s23 + $0x1b8] sm:$0xff] }
 0xe7a   : > { %11133 = vmatprep.subr.mxu0 %v11022_v47  ;;  %v11048_v47 = vld [vmem:[%s18061_s23 + $0x1b0] sm:$0xff] }
 0xe7b   : > { %11134 = vmatpush1.msra.mxu0 %v11021_v48  ;;  %v11046_v48 = vld [vmem:[%s18061_s23 + $0x1a0] sm:$0xff] }
 0xe7c   : > { %11135 = vmatprep.subr.mxu0 %v11019_v49  ;;  %v11045_v49 = vld [vmem:[%s18061_s23 + $0x198] sm:$0xff] }
 0xe7d   : > { %11136 = vmatpush1.msra.mxu0 %v11018_v50  ;;  %v11043_v50 = vld [vmem:[%s18061_s23 + $0x188] sm:$0xff] }
 0xe7e   : > { %11137 = vmatprep.subr.mxu0 %v11016_v51  ;;  %v11042_v51 = vld [vmem:[%s18061_s23 + $0x180] sm:$0xff] }
 0xe7f   : > { %11138 = vmatpush1.msra.mxu0 %v11015_v53 }
 0xe80   : > { %11139 = vmatprep.subr.mxu0 %v11013_v55 }
 0xe81   : > { %11140 = vmatpush1.msra.mxu0 %v11012_v54 }
 0xe82   : > { %11141 = vmatprep.subr.mxu0 %v11010_v57 }
 0xe83   : > { %11142 = vmatpush1.msra.mxu0 %v11009_v59 }
 0xe84   : > { %11143 = vmatprep.subr.mxu0 %v11007_v25 }
 0xe85   : > { %11144 = vmatpush1.msra.mxu0 %v11006_v63 }
 0xe86   : > { %11145 = vmatprep.subr.mxu0 %v11004_v3 }
 0xe87   : > { %11146 = vmatpush1.msra.mxu0 %v11003_v5 }
 0xe88   : > { %11147 = vmatprep.subr.mxu0 %v11001_v8 }
 0xe89   : > { %11148 = vmatpush1.msra.mxu0 %v11000_v10 }
 0xe8a   : > { %11149 = vmatprep.subr.mxu0 %v10998_v0 }
 0xe8b   : > { %11150 = vmatpush1.msra.mxu0 %v10997_v7 }
 0xe8c   : > { %11151 = vmatprep.subr.mxu0 %v10995_v14 }
 0xe8d   : > { %11152 = vmatpush1.msra.mxu0 %v10994_v16 }
 0xe8e   : > { %11153 = vmatprep.subr.mxu0 %v11088_v18 }
 0xe8f   : > { %11154 = vmatpush2.msra.mxu0 %v11087_v19 }
 0xe90   : > { %11155 = vmatprep.subr.mxu0 %v11085_v21 }
 0xe91   : > { %11156 = vmatpush2.msra.mxu0 %v11084_v22 }
 0xe92   : > { %11157 = vmatprep.subr.mxu0 %v11082_v24 }
 0xe93   : > { %11158 = vmatpush2.msra.mxu0 %v11081_v27 }
 0xe94   : > { %11159 = vmatprep.subr.mxu0 %v11079_v23 }
 0xe95   : > { %11160 = vmatpush2.msra.mxu0 %v11078_v28 }
 0xe96   : > { %11161 = vmatprep.subr.mxu0 %v11076_v26 }
 0xe97   : > { %11162 = vmatpush2.msra.mxu0 %v11075_v30 }
 0xe98   : > { %11163 = vmatprep.subr.mxu0 %v11073_v31 }
 0xe99   : > { %11164 = vmatpush2.msra.mxu0 %v11072_v32 }
 0xe9a   : > { %11165 = vmatprep.subr.mxu0 %v11070_v33 }
 0xe9b   : > { %11166 = vmatpush2.msra.mxu0 %v11069_v29 }
 0xe9c   : > { %11167 = vmatprep.subr.mxu0 %v11067_v34 }
 0xe9d   : > { %11168 = vmatpush2.msra.mxu0 %v11066_v35 }
 0xe9e   : > { %11169 = vmatprep.subr.mxu0 %v11064_v37 }
 0xe9f   : > { %11170 = vmatpush2.msra.mxu0 %v11063_v38 }
 0xea0   : > { %11171 = vmatprep.subr.mxu0 %v11061_v39 }
 0xea1   : > { %11172 = vmatpush2.msra.mxu0 %v11060_v40 }
 0xea2   : > { %11173 = vmatprep.subr.mxu0 %v11058_v41 }
 0xea3   : > { %11174 = vmatpush2.msra.mxu0 %v11057_v43 }
 0xea4   : > { %11175 = vmatprep.subr.mxu0 %v11055_v44 }
 0xea5   : > { %11176 = vmatpush2.msra.mxu0 %v11054_v42 }
 0xea6   : > { %11177 = vmatprep.subr.mxu0 %v11052_v45 }
 0xea7   : > { %11178 = vmatpush2.msra.mxu0 %v11051_v46 }
 0xea8   : > { %11179 = vmatprep.subr.mxu0 %v11049_v60 }
 0xea9   : > { %11180 = vmatpush2.msra.mxu0 %v11048_v47 }
 0xeaa   : > { %11181 = vmatprep.subr.mxu0 %v11046_v48 }
 0xeab   : > { %11182 = vmatpush2.msra.mxu0 %v11045_v49 }
 0xeac   : > { %11183 = vmatprep.subr.mxu0 %v11043_v50 }
 0xead   : > { %11184 = vmatpush2.msra.mxu0 %v11042_v51 }
 0xed5   : > { %v8578_v53 = vpop.f32.mrf.mxu1 }
 0xed7   : > { %v14681_v55 = vpop.f32.mrf.mxu1 }
 0xed9   : > { %v8722_v54 = vpop.f32.mrf.mxu1 }
 0xeda   : > { %v8723_v36 = vadd.f32 %v8722_v54, %v8578_v53 }
 0xedb   : > { %v14686_v56 = vpop.f32.mrf.mxu1 }
 0xedc   : > { %v17523_v56 = vpop.permute.xlu1 %10979 }
 0xedd   : > { %v8879_v57 = vpop.f32.mrf.mxu1 }
 0xede   : > { %v8885_v14 = vadd.f32 %v8879_v57, %v8723_v36 }
 0xedf   : > { %v14691_v58 = vpop.f32.mrf.mxu1 }
 0xee1   : > { %v9040_v59 = vpop.f32.mrf.mxu1 }
 0xee2   : > { %v9046_v17 = vadd.f32 %v9040_v59, %v8885_v14 }
 0xee3   : > { %v14696_v61 = vpop.f32.mrf.mxu1 }
 0xee5   : > { %v9200_v25 = vpop.f32.mrf.mxu1 }
 0xee6   : > { %v9206_v21 = vadd.f32 %v9200_v25, %v9046_v17  ;;  %v11080_v17 = vld [vmem:[%s18061_s23 + $0x2b0] sm:$0xff] }
 0xee7   : > { %v14701_v62 = vpop.f32.mrf.mxu1 }
 0xee9   : > { %v9360_v63 = vpop.f32.mrf.mxu1 }
 0xeea   : > { %v9366_v27 = vadd.f32 %v9360_v63, %v9206_v21  ;;  %v11032_v21 = vld [vmem:[%s18061_s23 + $0x130] sm:$0xff] }
 0xeeb   : > { %v14706_v1 = vpop.f32.mrf.mxu1 }
 0xeed   : > { %v9521_v3 = vpop.f32.mrf.mxu1 }
 0xeee   : > { %v9527_v26 = vadd.f32 %v9521_v3, %v9366_v27 }
 0xeef   : > { %v8507_v4 = vpop.f32.mrf.mxu0  ;;  %v14711_v5 = vpop.f32.mrf.mxu1 }
 0xef1   : > { %v8509_v6 = vpop.f32.mrf.mxu0  ;;  %v9682_v8 = vpop.f32.mrf.mxu1 }
 0xef2   : > { %v9688_v32 = vadd.f32 %v9682_v8, %v9527_v26  ;;  %v11041_v8 = vld [vmem:[%s18061_s23 + $0x178] sm:$0xff] }
 0xef3   : > { %v8651_v9 = vpop.f32.mrf.mxu0  ;;  %v14716_v10 = vpop.f32.mrf.mxu1 }
 0xef4   : > { %v8652_v57 = vadd.f32 %v8651_v9, %v8507_v4  ;;  %v11086_v4 = vld [vmem:[%s18061_s23 + $0x2e0] sm:$0xff] }
 0xef5   : > { %v8653_v11 = vpop.f32.mrf.mxu0  ;;  %v9842_v0 = vpop.f32.mrf.mxu1 }
 0xef6   : > { %v9848_v34 = vadd.f32 %v9842_v0, %v9688_v32  ;;  %v8654_v25 = vadd.f32 %v8653_v11, %v8509_v6  ;;  %v11038_v11 = vld [vmem:[%s18061_s23 + $0x160] sm:$0xff] }
 0xef7   : > { %v8808_v7 = vpop.f32.mrf.mxu0  ;;  %v14721_v12 = vpop.f32.mrf.mxu1 }
 0xef8   : > { %v8883_v62 = vadd.f32 %v8808_v7, %v8652_v57  ;;  %v11083_v7 = vld [vmem:[%s18061_s23 + $0x2c8] sm:$0xff] }
 0xef9   : > { %v8810_v15 = vpop.f32.mrf.mxu0  ;;  %v10003_v16 = vpop.f32.mrf.mxu1 }
 0xefa   : > { %v10009_v38 = vadd.f32 %v10003_v16, %v9848_v34  ;;  %v8884_v3 = vadd.f32 %v8810_v15, %v8654_v25  ;;  %v11035_v15 = vld [vmem:[%s18061_s23 + $0x148] sm:$0xff]  ;;  %v11056_v25 = vld [vmem:[%s18061_s23 + $0x1f0] sm:$0xff] }
 0xefb   : > { %v8969_v18 = vpop.f32.mrf.mxu0  ;;  %v14726_v19 = vpop.f32.mrf.mxu1  ;;  %v11071_v34 = vld [vmem:[%s18061_s23 + $0x268] sm:$0xff] }
 0xefc   : > { %v9044_v5 = vadd.f32 %v8969_v18, %v8883_v62 }
 0xefd   : > { %v8971_v22 = vpop.f32.mrf.mxu0  ;;  %v10164_v24 = vpop.f32.mrf.mxu1 }
 0xefe   : > { %v10170_v41 = vadd.f32 %v10164_v24, %v10009_v38  ;;  %v9045_v9 = vadd.f32 %v8971_v22, %v8884_v3  ;;  %v11077_v24 = vld [vmem:[%s18061_s23 + $0x298] sm:$0xff]  ;;  %v11023_v38 = vld [vmem:[%s18061_s23 + $0xe8] sm:$0xff] }
 0xeff   : > { %v9129_v23 = vpop.f32.mrf.mxu0  ;;  %v14731_v28 = vpop.f32.mrf.mxu1 }
 0xf00   : > { %v9204_v6 = vadd.f32 %v9129_v23, %v9044_v5  ;;  %v11029_v28 = vld [vmem:[%s18061_s23 + $0x118] sm:$0xff] }
 0xf01   : > { %v9131_v30 = vpop.f32.mrf.mxu0  ;;  %v10325_v31 = vpop.f32.mrf.mxu1  ;;  %v11053_v5 = vld [vmem:[%s18061_s23 + $0x1d8] sm:$0xff] }
 0xf02   : > { %v10331_v42 = vadd.f32 %v10325_v31, %v10170_v41  ;;  %v9205_v12 = vadd.f32 %v9131_v30, %v9045_v9  ;;  %v11074_v30 = vld [vmem:[%s18061_s23 + $0x280] sm:$0xff] }
 0xf03   : > { %v9289_v33 = vpop.f32.mrf.mxu0  ;;  %v14736_v29 = vpop.f32.mrf.mxu1 }
 0xf04   : > { %v9364_v14 = vadd.f32 %v9289_v33, %v9204_v6  ;;  %v11026_v33 = vld [vmem:[%s18061_s23 + $0x100] sm:$0xff] }
 0xf05   : > { %v9291_v35 = vpop.f32.mrf.mxu0  ;;  %v10486_v37 = vpop.f32.mrf.mxu1  ;;  %v11050_v6 = vld [vmem:[%s18061_s23 + $0x1c0] sm:$0xff] }
 0xf06   : > { %v10492_v60 = vadd.f32 %v10486_v37, %v10331_v42  ;;  %v9365_v18 = vadd.f32 %v9291_v35, %v9205_v12  ;;  %v11047_v12 = vld [vmem:[%s18061_s23 + $0x1a8] sm:$0xff] }
 0xf07   : > { %v9450_v39 = vpop.f32.mrf.mxu0  ;;  %v14741_v40 = vpop.f32.mrf.mxu1 }
 0xf08   : > { %v9525_v19 = vadd.f32 %v9450_v39, %v9364_v14  ;;  %v11068_v40 = vld [vmem:[%s18061_s23 + $0x250] sm:$0xff] }
 0xf09   : > { %v9452_v43 = vpop.f32.mrf.mxu0  ;;  %v10647_v44 = vpop.f32.mrf.mxu1 }
 0xf0a   : > { %v10653_v49 = vadd.f32 %v10647_v44, %v10492_v60  ;;  %v9526_v27 = vadd.f32 %v9452_v43, %v9365_v18  ;;  %v11020_v44 = vld [vmem:[%s18061_s23 + $0xd0] sm:$0xff] }
 0xf0b   : > { %v9611_v45 = vpop.f32.mrf.mxu0  ;;  %v14746_v46 = vpop.f32.mrf.mxu1  ;;  %v10996_v18 = vld [vmem:[%s18061_s23 + $0x10] sm:$0xff] }
 0xf0c   : > { %v9686_v23 = vadd.f32 %v9611_v45, %v9525_v19  ;;  %v11065_v45 = vld [vmem:[%s18061_s23 + $0x238] sm:$0xff] }
 0xf0d   : > { %v9613_v47 = vpop.f32.mrf.mxu0  ;;  %v10808_v48 = vpop.f32.mrf.mxu1 }
 0xf0e   : > { %v10814_v51 = vadd.f32 %v10808_v48, %v10653_v49  ;;  %v9687_v31 = vadd.f32 %v9613_v47, %v9526_v27  ;;  %v11017_v47 = vld [vmem:[%s18061_s23 + $0xb8] sm:$0xff]  ;;  %v11062_v49 = vld [vmem:[%s18061_s23 + $0x220] sm:$0xff] }
 0xf0f   : > { %v14751_v50 = vpop.f32.mrf.mxu1  ;;  %v9771_v53 = vpop.f32.mrf.mxu0  ;;  %v11101_v27 = vld [vmem:[%s18061_s23 + $0x358] sm:$0xff] }
 0xf10   : > { %v9846_v32 = vadd.f32 %v9771_v53, %v9686_v23  ;;  %v11014_v53 = vld [vmem:[%s18061_s23 + $0xa0] sm:$0xff] }
 0xf11   : > { %v10969_v55 = vpop.f32.mrf.mxu1  ;;  %v9773_v59 = vpop.f32.mrf.mxu0  ;;  %v11098_v23 = vld [vmem:[%s18061_s23 + $0x340] sm:$0xff] }
 0xf12   : > { %v10975_v54 = vadd.f32 %v10969_v55, %v10814_v51  ;;  %v9847_v35 = vadd.f32 %v9773_v59, %v9687_v31  ;;  %v11011_v59 = vld [vmem:[%s18061_s23 + $0x88] sm:$0xff] }
 0xf13   : > { %v14756_v58 = vpop.f32.mrf.mxu1 }
 0xf14   : > { %v10984_v61 = vadd.f32 %v17523_v56, %v10975_v54  ;;  %v11059_v54 = vld [vmem:[%s18061_s23 + $0x208] sm:$0xff] }
 0xf16   : > { %vm10987_vm13 = vcmp.ge.f32.partialorder %v10984_v61, 0.0  ;;  %v10990_v63 = vmul.f32 0.01, %v10984_v61  ;;  %v9932_v1 = vpop.f32.mrf.mxu0 }
 0xf17   : > { %v10007_v37 = vadd.f32 %v9932_v1, %v9846_v32  ;;  %v11008_v1 = vld [vmem:[%s18061_s23 + $0x70] sm:$0xff] }
 0xf18   : > { %v17529_v10 = vsel %vm10987_vm13, %v10984_v61, %v10990_v63  ;;  %v9934_v0 = vpop.f32.mrf.mxu0 }
 0xf19   : > { %13600 = vmatmul.mubr.msk.f32.vlgmr.msra.gmra.mxu1 %vm11108_vm9, %v17529_v10  ;;  %v10008_v41 = vadd.f32 %v9934_v0, %v9847_v35 }
 0xf1a   : > { %14057 = vmatpush3.msra.mxu1 %v11041_v8  ;;  %v10093_v36 = vpop.f32.mrf.mxu0 }
 0xf1b   : > { %14058 = vmatprep.subr.mxu1 %v11086_v4  ;;  %v10168_v43 = vadd.f32 %v10093_v36, %v10007_v37  ;;  %v11005_v4 = vld [vmem:[%s18061_s23 + $0x58] sm:$0xff] }
 0xf1c   : > { %14059 = vmatpush3.msra.mxu1 %v11038_v11  ;;  %v10095_v16 = vpop.f32.mrf.mxu0 }
 0xf1d   : > { %14060 = vmatprep.subr.mxu1 %v11083_v7  ;;  %v10169_v46 = vadd.f32 %v10095_v16, %v10008_v41  ;;  %v11002_v7 = vld [vmem:[%s18061_s23 + $0x40] sm:$0xff]  ;;  %v11044_v16 = vld [vmem:[%s18061_s23 + $0x190] sm:$0xff] }
 0xf1e   : > { %14061 = vmatpush3.msra.mxu1 %v11035_v15  ;;  %v10254_v22 = vpop.f32.mrf.mxu0  ;;  %v10999_v15 = vld [vmem:[%s18061_s23 + $0x28] sm:$0xff] }
 0xf1f   : > { %14062 = vmatprep.subr.mxu1 %v11080_v17  ;;  %v10329_v60 = vadd.f32 %v10254_v22, %v10168_v43 }
 0xf20   : > { %14063 = vmatpush3.msra.mxu1 %v11032_v21  ;;  %v10256_v26 = vpop.f32.mrf.mxu0  ;;  %v11107_v21 = vld [vmem:[%s18061_s23 + $0x388] sm:$0x1f] }
 0xf21   : > { %14064 = vmatprep.subr.mxu1 %v11077_v24  ;;  %v10330_v50 = vadd.f32 %v10256_v26, %v10169_v46  ;;  %v11104_v24 = vld [vmem:[%s18061_s23 + $0x370] sm:$0xff] }
 0xf22   : > { %14065 = vmatpush3.msra.mxu1 %v11029_v28  ;;  %v10415_v29 = vpop.f32.mrf.mxu0  ;;  %v11095_v28 = vld [vmem:[%s18061_s23 + $0x328] sm:$0xff]  ;;  %v11092_v26 = vld [vmem:[%s18061_s23 + $0x310] sm:$0xff] }
 0xf23   : > { %14066 = vmatprep.subr.mxu1 %v11074_v30  ;;  %v10490_v51 = vadd.f32 %v10415_v29, %v10329_v60 }
 0xf24   : > { %14067 = vmatpush3.msra.mxu1 %v11026_v33  ;;  %v10417_v39 = vpop.f32.mrf.mxu0 }
 0xf25   : > { %14068 = vmatprep.subr.mxu1 %v11071_v34  ;;  %v10491_v57 = vadd.f32 %v10417_v39, %v10330_v50 }
 0xf26   : > { %14069 = vmatpush3.msra.mxu1 %v11023_v38  ;;  %v10576_v42 = vpop.f32.mrf.mxu0 }
 0xf27   : > { %14070 = vmatprep.subr.mxu1 %v11068_v40  ;;  %v10651_v58 = vadd.f32 %v10576_v42, %v10490_v51  ;;  %v12901_v51 = vld [vmem:[#allocation10] sm:$0x1] }
 0xf28   : > { %14071 = vmatpush3.msra.mxu1 %v11020_v44  ;;  %v10578_v48 = vpop.f32.mrf.mxu0  ;;  %v17665_v44 = vld [vmem:[%s18182_s17] sm:$0x1] }
 0xf29   : > { %14072 = vmatprep.subr.mxu1 %v11065_v45  ;;  %v10652_v62 = vadd.f32 %v10578_v48, %v10491_v57 }
 0xf2a   : > { %14073 = vmatpush3.msra.mxu1 %v11017_v47  ;;  %v10737_v55 = vpop.f32.mrf.mxu0 }
 0xf2b   : > { %14074 = vmatprep.subr.mxu1 %v11062_v49  ;;  %v10812_v63 = vadd.f32 %v10737_v55, %v10651_v58 }
 0xf2c   : > { %14075 = vmatpush3.msra.mxu1 %v11014_v53  ;;  %v10739_v61 = vpop.f32.mrf.mxu0 }
 0xf2d   : > { %14076 = vmatprep.subr.mxu1 %v11059_v54  ;;  %v10813_v8 = vadd.f32 %v10739_v61, %v10652_v62 }
 0xf2e   : > { %14077 = vmatpush3.msra.mxu1 %v11011_v59  ;;  %v10898_v3 = vpop.f32.mrf.mxu0 }
 0xf2f   : > { %v10973_v0 = vadd.f32 %v10898_v3, %v10812_v63  ;;  %14078 = vmatprep.subr.mxu1 %v11056_v25  ;;  %v13603_v63 = vld [vmem:[%s18182_s17 + $0x1] sm:$0x1] }
 0xf30   : > { %14079 = vmatpush3.msra.mxu1 %v11008_v1  ;;  %v10900_v9 = vpop.f32.mrf.mxu0 }
 0xf31   : > { %v10982_v11 = vadd.f32 %v17523_v56, %v10973_v0  ;;  %v10974_v36 = vadd.f32 %v10900_v9, %v10813_v8  ;;  %14080 = vmatprep.subr.mxu1 %v11053_v5  ;;  %v13614_v0 = vld [vmem:[%s18182_s17 + $0x2] sm:$0x1] }
 0xf32   : > { %14081 = vmatpush3.msra.mxu1 %v11005_v4 }
 0xf33   : > { %v10983_v14 = vadd.f32 %v17523_v56, %v10974_v36  ;;  %14082 = vmatprep.subr.mxu1 %v11050_v6  ;;  %v10988_v17 = vmul.f32 0.01, %v10982_v11  ;;  %vm10985_vm12 = vcmp.ge.f32.partialorder %v10982_v11, 0.0 }
 0xf34   : > { %14083 = vmatpush3.msra.mxu1 %v11002_v7 }
 0xf35   : > { %14084 = vmatprep.subr.mxu1 %v11047_v12  ;;  %vm10986_vm10 = vcmp.ge.f32.partialorder %v10983_v14, 0.0  ;;  %v10989_v19 = vmul.f32 0.01, %v10983_v14  ;;  %v10991_v22 = vsel %vm10985_vm12, %v10982_v11, %v10988_v17  ;;  %v13620_v12 = vld [vmem:[%s18182_s17 + $0x3] sm:$0x1] }
 0xf36   : > { %14085 = vmatpush3.msra.mxu1 %v10999_v15 }
 0xf37   : > { %14086 = vmatprep.subr.mxu1 %v11044_v16  ;;  %v10992_v56 = vsel %vm10986_vm10, %v10983_v14, %v10989_v19 }
 0xf38   : > { %14087 = vmatpush3.msra.mxu1 %v10996_v18  ;;  %11185 = vmatprep.mubr.f32.mxu0 %v10992_v56  ;;  %v13626_v18 = vld [vmem:[%s18182_s17 + $0x4] sm:$0x1] }
 0xf39   : > { %11327 = vmatprep.mubr.f32.mxu1 %v10992_v56  ;;  %14757 = vmatprep.subr.mxu1 %v15023_v20 }
 0xf3a   : > { %11186 = vmatmul.mubr.f32.vlgmr.msra.gmra.mxu0 %v10991_v22  ;;  %11328 = vmatmul.mubr.f32.vlgmr.msra.gmra.mxu1 %v10991_v22 }
 0xf3b   : > { %14758 = vmatpush3.msk.msra.mxu1 %vm8263_vm4, %v11107_v21  ;;  %14769 = vmatprep.mubr.msk.f32.mxu1 %vm15024_vm14, %v15023_v20 }
 0xf3c   : > { %14759 = vmatprep.subr.mxu1 %v15023_v20  ;;  %11648 = vmatprep.mubr.f32.mxu0 %v15023_v20 }
 0xf3d   : > { %14760 = vmatpush3.msra.mxu1 %v11104_v24  ;;  %v13632_v24 = vld [vmem:[%s18182_s17 + $0x5] sm:$0x1] }
 0xf3e   : > { %14761 = vmatprep.subr.mxu1 %v15023_v20 }
 0xf3f   : > { %14762 = vmatpush3.msra.mxu1 %v11101_v27 }
 0xf40   : > { %14763 = vmatprep.subr.mxu1 %v15023_v20 }
 0xf41   : > { %14764 = vmatpush3.msra.mxu1 %v11098_v23 }
 0xf42   : > { %14765 = vmatprep.subr.mxu1 %v15023_v20 }
 0xf43   : > { %14766 = vmatpush3.msra.mxu1 %v11095_v28 }
 0xf44   : > { %14767 = vmatprep.subr.mxu1 %v15023_v20 }
 0xf45   : > { %14768 = vmatpush3.msra.mxu1 %v11092_v26 }
 0xf46   : > { %14770 = vmatmul.mubr.msk.f32.vlgmr.msra.gmra.mxu1 %vm11108_vm9, %v17529_v10 }
 0xf47   : > { %11498 = vmatprep.mubr.f32.mxu1 %v15023_v20 }
 0xfd9   : > { %v11258_v30 = vpop.f32.mrf.mxu1 }
 0xfdb   : > { %v11260_v32 = vpop.f32.mrf.mxu1 }
 0xffa   : > { %v11187_v31 = vpop.f32.mrf.mxu0  ;;  %v14088_v35 = vpop.f32.mrf.mxu1 }
 0xffb   : > { %v11259_v29 = vadd.f32 %v11258_v30, %v11187_v31  ;;  %v13638_v30 = vld [vmem:[%s18182_s17 + $0x6] sm:$0x1] }
 0xffc   : > { %v11189_v33 = vpop.f32.mrf.mxu0  ;;  %v14089_v39 = vpop.f32.mrf.mxu1 }
 0xffd   : > { %v11261_v34 = vadd.f32 %v11260_v32, %v11189_v33  ;;  %v14090_v10 = vadd.f32 %v14089_v39, %v14088_v35 }
 0xfff   : > { %v11405_v37 = vcombine.low %v11259_v29, %v11261_v34  ;;  %v14914_v38 = vcombine.low %v11261_v34, %v11261_v34  ;;  %v13644_v29 = vld [vmem:[%s18182_s17 + $0x7] sm:$0x1] }
0x1001   : > { %11732 = vrot.lane.b32.xlu1 %v11405_v37, %s18152_s29  ;;  %11417 = vrot.lane.b32.xlu0 %v11405_v37, %s18153_s8 }
0x1002   : > { %13609 = vmatprep.subr.msk.mxu0 %vm1511_vm0, %v14914_v38 }
0x1003   : > { %13610 = vmatpush1.msk.msra.mxu0 %vm1511_vm0, %v11405_v37 }
0x1004   : > { %13611 = vmatmul.mubr.msk.f32.vlgmr.msra.gmra.mxu0 %vm1507_vm3, %v17665_v44 }
0x1005   : > { %11734 = vrot.lane.b32.xlu1 %v14914_v38, %s18152_s29  ;;  %11900 = vrot.lane.b32.xlu0 %v11405_v37, %s18149_s7 }
0x1006   : > { %v11399_v40 = vpop.f32.mrf.mxu1  ;;  %11813 = vmatprep.mubr.f32.mxu0 %v15023_v20 }
0x1007   : > { %v11400_v41 = vadd.f32 %v14090_v10, %v11399_v40  ;;  %v13650_v10 = vld [vmem:[%s18182_s17 + $0x8] sm:$0x1] }
0x1008   : > { %v14771_v43 = vpop.f32.mrf.mxu1 }
0x1009   : > { %11408 = vst.msk [vmem:[#allocation9 + $0x8] sm:$0xf] %vm1489_vm15, %v11400_v41  ;;  %11419 = vrot.lane.b32.xlu0 %v14914_v38, %s18153_s8  ;;  %v12963_v41 = vld [vmem:[%s18062_s24 + $0xf8] sm:$0xff]  ;;  %v12962_v43 = vld [vmem:[%s18062_s24 + $0xf0] sm:$0xff] }
0x100d   : > { %11902 = vrot.lane.b32.xlu0 %v14914_v38, %s18149_s7 }
0x1010   : > { %v11410_v42 = vld [vmem:[#allocation9 + $0x8] sm:$0xf] }
0x1011   : > { %11421 = vrot.lane.b32.xlu1 %v11410_v42, %s18153_s8  ;;  %12238 = vrot.lane.b32.xlu0 %v14914_v38, %s18150_s2  ;;  %v11726_v45 = vld [vmem:[#allocation9 + $0x8] sm:$0xf] }
0x1012   : > { %v11894_v46 = vld [vmem:[#allocation9 + $0x8] sm:$0xf] }
0x1013   : > { %v12062_v60 = vld [vmem:[#allocation9 + $0x8] sm:$0xf] }
0x1014   : > { %v12230_v47 = vld [vmem:[#allocation9 + $0x8] sm:$0xf] }
0x1015   : > { %12070 = vrot.lane.b32.xlu1 %v14914_v38, %s18154_s5  ;;  %11736 = vrot.lane.b32.xlu0 %v11726_v45, %s18152_s29  ;;  %v12398_v48 = vld [vmem:[#allocation9 + $0x8] sm:$0xf] }
0x1016   : > { %v12566_v49 = vld [vmem:[#allocation9 + $0x8] sm:$0xf] }
0x1017   : > { %v12734_v50 = vld [vmem:[#allocation9 + $0x8] sm:$0xf] }
0x1018   : > { %v12958_v45 = vld [vmem:[%s18062_s24 + $0xd0] sm:$0xff] }
0x1019   : > { %12068 = vrot.lane.b32.xlu1 %v11405_v37, %s18154_s5  ;;  %12236 = vrot.lane.b32.xlu0 %v11405_v37, %s18150_s2 }
0x101d   : > { %11904 = vrot.lane.b32.xlu1 %v11894_v46, %s18149_s7  ;;  %12072 = vrot.lane.b32.xlu0 %v12062_v60, %s18154_s5  ;;  %v12957_v46 = vld [vmem:[%s18062_s24 + $0xc8] sm:$0xff]  ;;  %v12956_v60 = vld [vmem:[%s18062_s24 + $0xc0] sm:$0xff] }
0x1021   : > { %12406 = vrot.lane.b32.xlu1 %v14914_v38, %s18151_s16  ;;  %12574 = vrot.lane.b32.xlu0 %v14914_v38, %s18155_s26 }
0x1025   : > { %12240 = vrot.lane.b32.xlu1 %v12230_v47, %s18150_s2  ;;  %12408 = vrot.lane.b32.xlu0 %v12398_v48, %s18151_s16  ;;  %v12955_v47 = vld [vmem:[%s18062_s24 + $0xb8] sm:$0xff]  ;;  %v12954_v48 = vld [vmem:[%s18062_s24 + $0xb0] sm:$0xff] }
0x1029   : > { %12404 = vrot.lane.b32.xlu1 %v11405_v37, %s18151_s16  ;;  %12572 = vrot.lane.b32.xlu0 %v11405_v37, %s18155_s26 }
0x102d   : > { %12576 = vrot.lane.b32.xlu1 %v12566_v49, %s18155_s26  ;;  %12744 = vrot.lane.b32.xlu0 %v12734_v50, %s18156_s28  ;;  %v12953_v49 = vld [vmem:[%s18062_s24 + $0xa8] sm:$0xff]  ;;  %v12952_v50 = vld [vmem:[%s18062_s24 + $0xa0] sm:$0xff] }
0x1031   : > { %12742 = vrot.lane.b32.xlu1 %v14914_v38, %s18156_s28  ;;  %12904 = vperm.xlu0 %14899, %v12901_v51   ;;  %v12951_v51 = vld [vmem:[%s18062_s24 + $0x98] sm:$0xff] }
0x1035   : > { %12740 = vrot.lane.b32.xlu1 %v11405_v37, %s18156_s28 }
0x1073   : > { %v11418_v53 = vpop.permute.xlu0 %11417  ;;  %v11733_v54 = vpop.permute.xlu1 %11732 }
0x1077   : > { %v11901_v55 = vpop.permute.xlu0 %11900  ;;  %v11735_v58 = vpop.permute.xlu1 %11734 }
0x1078   : > { %v11738_v4 = vsel %vm885_vm5, %v11733_v54, %v11735_v58  ;;  %v12948_v54 = vld [vmem:[%s18062_s24 + $0x80] sm:$0xff] }
0x107b   : > { %v11420_v57 = vpop.permute.xlu0 %11419 }
0x107c   : > { %v11423_v1 = vsel %vm857_vm2, %v11418_v53, %v11420_v57  ;;  %v12950_v53 = vld [vmem:[%s18062_s24 + $0x90] sm:$0xff] }
0x107f   : > { %v11903_v59 = vpop.permute.xlu0 %11902 }
0x1083   : > { %v11422_v61 = vpop.permute.xlu1 %11421  ;;  %v12239_v25 = vpop.permute.xlu0 %12238 }
0x1084   : > { %v11424_v62 = vsel %vm857_vm2, %v11420_v57, %v11422_v61  ;;  %vm18183_vm2 = vcmask 900096   ;;  %v12947_v57 = vld [vmem:[%s18062_s24 + $0x78] sm:$0xff] }
0x1085   : > { %13604 = vmatprep.subr.msk.mxu1 %vm1511_vm0, %v11424_v62  ;;  %v12942_v62 = vld [vmem:[%s18062_s24 + $0x50] sm:$0xff] }
0x1086   : > { %13605 = vmatpush1.msk.msra.mxu1 %vm1511_vm0, %v11423_v1  ;;  %v12940_v1 = vld [vmem:[%s18062_s24 + $0x40] sm:$0xff] }
0x1087   : > { %v12071_v3 = vpop.permute.xlu1 %12070  ;;  %13606 = vmatmul.mubr.msk.f32.vlgmr.msra.gmra.mxu1 %vm1507_vm3, %v13603_v63  ;;  %14772 = vmatprep.subr.mxu1 %v15023_v20  ;;  %v11737_v5 = vpop.permute.xlu0 %11736 }
0x1088   : > { %14773 = vmatpush3.msk.msra.mxu1 %vm1511_vm0, %v11422_v61  ;;  %14774 = vmatprep.mubr.msk.f32.mxu1 %vm15024_vm14, %v15023_v20  ;;  %v11739_v8 = vsel %vm885_vm5, %v11735_v58, %v11737_v5  ;;  %vm18184_vm5 = vmmov %vm18183_vm2  ;;  %v12946_v58 = vld [vmem:[%s18062_s24 + $0x70] sm:$0xff]  ;;  %v12944_v61 = vld [vmem:[%s18062_s24 + $0x60] sm:$0xff] }
0x1089   : > { %14777 = vmatprep.subr.mxu1 %v15023_v20  ;;  %13615 = vmatprep.subr.msk.mxu0 %vm1511_vm0, %v11739_v8  ;;  %v11906_v14 = vsel %vm18184_vm5, %v11901_v55, %v11903_v59  ;;  %v12949_v55 = vld [vmem:[%s18062_s24 + $0x88] sm:$0xff] }
0x108a   : > { %13616 = vmatpush1.msk.msra.mxu0 %vm1511_vm0, %v11738_v4  ;;  %v12937_v8 = vld [vmem:[%s18062_s24 + $0x28] sm:$0xff]  ;;  %v12935_v4 = vld [vmem:[%s18062_s24 + $0x18] sm:$0xff] }
0x108b   : > { %v12069_v9 = vpop.permute.xlu1 %12068  ;;  %14775 = vmatmul.mubr.msk.f32.vlgmr.msra.gmra.mxu1 %vm1507_vm3, %v13603_v63  ;;  %v12237_v6 = vpop.permute.xlu0 %12236  ;;  %13617 = vmatmul.mubr.msk.f32.vlgmr.msra.gmra.mxu0 %vm1507_vm3, %v13614_v0  ;;  %v12941_v63 = vld [vmem:[%s18062_s24 + $0x48] sm:$0xff] }
0x108c   : > { %14778 = vmatpush3.msk.msra.mxu1 %vm1511_vm0, %v11410_v42  ;;  %14779 = vmatprep.mubr.msk.f32.mxu1 %vm15024_vm14, %v15023_v20  ;;  %v12074_v19 = vsel %vm941_vm7, %v12069_v9, %v12071_v3  ;;  %v12242_v27 = vsel %vm969_vm8, %v12237_v6, %v12239_v25  ;;  %v12960_v42 = vld [vmem:[%s18062_s24 + $0xe0] sm:$0xff]  ;;  %v12934_v9 = vld [vmem:[%s18062_s24 + $0x10] sm:$0xff]  ;;  %v12933_v6 = vld [vmem:[%s18062_s24 + $0x8] sm:$0xff] }
0x108d   : > { %14782 = vmatprep.subr.mxu1 %v15023_v20  ;;  %11981 = vmatprep.mubr.f32.mxu0 %v15023_v20 }
0x108f   : > { %v11905_v11 = vpop.permute.xlu1 %11904  ;;  %14780 = vmatmul.mubr.msk.f32.vlgmr.msra.gmra.mxu1 %vm1507_vm3, %v17665_v44  ;;  %v12073_v36 = vpop.permute.xlu0 %12072  ;;  %v12961_v44 = vld [vmem:[%s18062_s24 + $0xe8] sm:$0xff] }
0x1090   : > { %v11907_v7 = vsel %vm18183_vm2, %v11903_v59, %v11905_v11  ;;  %14783 = vmatpush3.msk.msra.mxu1 %vm1511_vm0, %v11737_v5  ;;  %14784 = vmatprep.mubr.msk.f32.mxu1 %vm15024_vm14, %v15023_v20  ;;  %v12075_v15 = vsel %vm941_vm7, %v12071_v3, %v12073_v36  ;;  %vm18185_vm7 = vcmask 752640   ;;  %v12945_v59 = vld [vmem:[%s18062_s24 + $0x68] sm:$0xff]  ;;  %v12939_v3 = vld [vmem:[%s18062_s24 + $0x38] sm:$0xff]  ;;  %v12938_v5 = vld [vmem:[%s18062_s24 + $0x30] sm:$0xff] }
0x1091   : > { %14787 = vmatprep.subr.mxu1 %v15023_v20  ;;  %13621 = vmatprep.subr.msk.mxu0 %vm1511_vm0, %v11907_v7  ;;  %vm18186_vm15 = vmmov %vm18185_vm7  ;;  %v12994_v7 = vld [vmem:[%s18062_s24 + $0x1f0] sm:$0xff] }
0x1092   : > { %13622 = vmatpush1.msk.msra.mxu0 %vm1511_vm0, %v11906_v14  ;;  %v12992_v14 = vld [vmem:[%s18062_s24 + $0x1e0] sm:$0xff] }
0x1093   : > { %v12407_v16 = vpop.permute.xlu1 %12406  ;;  %14785 = vmatmul.mubr.msk.f32.vlgmr.msra.gmra.mxu1 %vm1507_vm3, %v13614_v0  ;;  %13623 = vmatmul.mubr.msk.f32.vlgmr.msra.gmra.mxu0 %vm1507_vm3, %v13620_v12  ;;  %v12575_v17 = vpop.permute.xlu0 %12574  ;;  %v12936_v0 = vld [vmem:[%s18062_s24 + $0x20] sm:$0xff] }
0x1094   : > { %14788 = vmatpush3.msk.msra.mxu1 %vm1511_vm0, %v11905_v11  ;;  %14789 = vmatprep.mubr.msk.f32.mxu1 %vm15024_vm14, %v15023_v20  ;;  %v12932_v11 = vld [vmem:[%s18062_s24] sm:$0xff] }
0x1095   : > { %14792 = vmatprep.subr.mxu1 %v15023_v20  ;;  %13627 = vmatprep.subr.msk.mxu0 %vm1511_vm0, %v12075_v15  ;;  %v12991_v15 = vld [vmem:[%s18062_s24 + $0x1d8] sm:$0xff] }
0x1096   : > { %13628 = vmatpush1.msk.msra.mxu0 %vm1511_vm0, %v12074_v19  ;;  %12149 = vmatprep.mubr.f32.mxu0 %v15023_v20  ;;  %v12987_v19 = vld [vmem:[%s18062_s24 + $0x1b8] sm:$0xff] }
0x1097   : > { %v12241_v56 = vpop.permute.xlu1 %12240  ;;  %14790 = vmatmul.mubr.msk.f32.vlgmr.msra.gmra.mxu1 %vm1507_vm3, %v13620_v12  ;;  %13629 = vmatmul.mubr.msk.f32.vlgmr.msra.gmra.mxu0 %vm1507_vm3, %v13626_v18  ;;  %v12409_v21 = vpop.permute.xlu0 %12408  ;;  %v12993_v12 = vld [vmem:[%s18062_s24 + $0x1e8] sm:$0xff] }
0x1098   : > { %v12243_v22 = vsel %vm969_vm8, %v12239_v25, %v12241_v56  ;;  %14793 = vmatpush3.msk.msra.mxu1 %vm1511_vm0, %v12073_v36  ;;  %14794 = vmatprep.mubr.msk.f32.mxu1 %vm15024_vm14, %v15023_v20  ;;  %v12411_v23 = vsel %vm18185_vm7, %v12407_v16, %v12409_v21  ;;  %vm18187_vm8 = vcmask 744448   ;;  %v12943_v25 = vld [vmem:[%s18062_s24 + $0x58] sm:$0xff] }
0x1099   : > { %14797 = vmatprep.subr.mxu1 %v15023_v20  ;;  %13633 = vmatprep.subr.msk.mxu0 %vm1511_vm0, %v12243_v22  ;;  %vm18188_vm4 = vmmov %vm18187_vm8  ;;  %v12995_v36 = vld [vmem:[%s18062_s24 + $0x1f8] sm:$0xff]  ;;  %v12984_v22 = vld [vmem:[%s18062_s24 + $0x1a0] sm:$0xff] }
0x109a   : > { %13634 = vmatpush1.msk.msra.mxu0 %vm1511_vm0, %v12242_v27  ;;  %12317 = vmatprep.mubr.f32.mxu0 %v15023_v20  ;;  %v12982_v27 = vld [vmem:[%s18062_s24 + $0x190] sm:$0xff] }
0x109b   : > { %v12405_v28 = vpop.permute.xlu1 %12404  ;;  %14795 = vmatmul.mubr.msk.f32.vlgmr.msra.gmra.mxu1 %vm1507_vm3, %v13626_v18  ;;  %13635 = vmatmul.mubr.msk.f32.vlgmr.msra.gmra.mxu0 %vm1507_vm3, %v13632_v24  ;;  %v12573_v31 = vpop.permute.xlu0 %12572  ;;  %v12988_v18 = vld [vmem:[%s18062_s24 + $0x1c0] sm:$0xff] }
0x109c   : > { %v12410_v26 = vsel %vm18186_vm15, %v12405_v28, %v12407_v16  ;;  %14798 = vmatpush3.msk.msra.mxu1 %vm1511_vm0, %v12241_v56  ;;  %14799 = vmatprep.mubr.msk.f32.mxu1 %vm15024_vm14, %v15023_v20  ;;  %v12578_v34 = vsel %vm18188_vm4, %v12573_v31, %v12575_v17  ;;  %v12990_v16 = vld [vmem:[%s18062_s24 + $0x1d0] sm:$0xff]  ;;  %v12980_v28 = vld [vmem:[%s18062_s24 + $0x180] sm:$0xff]  ;;  %v12977_v31 = vld [vmem:[%s18062_s24 + $0x168] sm:$0xff] }
0x109d   : > { %14802 = vmatprep.subr.mxu1 %v15023_v20  ;;  %13639 = vmatprep.subr.msk.mxu0 %vm1511_vm0, %v12411_v23  ;;  %v12986_v56 = vld [vmem:[%s18062_s24 + $0x1b0] sm:$0xff]  ;;  %v12981_v23 = vld [vmem:[%s18062_s24 + $0x188] sm:$0xff] }
0x109e   : > { %13640 = vmatpush1.msk.msra.mxu0 %vm1511_vm0, %v12410_v26  ;;  %12485 = vmatprep.mubr.f32.mxu0 %v15023_v20  ;;  %v12979_v26 = vld [vmem:[%s18062_s24 + $0x178] sm:$0xff] }
0x109f   : > { %v12577_v32 = vpop.permute.xlu1 %12576  ;;  %14800 = vmatmul.mubr.msk.f32.vlgmr.msra.gmra.mxu1 %vm1507_vm3, %v13632_v24  ;;  %13641 = vmatmul.mubr.msk.f32.vlgmr.msra.gmra.mxu0 %vm1507_vm3, %v13638_v30  ;;  %v12745_v37 = vpop.permute.xlu0 %12744  ;;  %v12983_v24 = vld [vmem:[%s18062_s24 + $0x198] sm:$0xff] }
0x10a0   : > { %v12579_v33 = vsel %vm18187_vm8, %v12575_v17, %v12577_v32  ;;  %14803 = vmatpush3.msk.msra.mxu1 %vm1511_vm0, %v12409_v21  ;;  %14804 = vmatprep.mubr.msk.f32.mxu1 %vm15024_vm14, %v15023_v20  ;;  %v12989_v17 = vld [vmem:[%s18062_s24 + $0x1c8] sm:$0xff] }
0x10a1   : > { %14807 = vmatprep.subr.mxu1 %v15023_v20  ;;  %13645 = vmatprep.subr.msk.mxu0 %vm1511_vm0, %v12579_v33  ;;  %v12985_v21 = vld [vmem:[%s18062_s24 + $0x1a8] sm:$0xff]  ;;  %v12975_v33 = vld [vmem:[%s18062_s24 + $0x158] sm:$0xff] }
0x10a2   : > { %13646 = vmatpush1.msk.msra.mxu0 %vm1511_vm0, %v12578_v34  ;;  %12653 = vmatprep.mubr.f32.mxu0 %v15023_v20  ;;  %v13002_v34 = vld [vmem:[%s18062_s24 + $0x230] sm:$0x3f] }
0x10a3   : > { %v12743_v35 = vpop.permute.xlu1 %12742  ;;  %14805 = vmatmul.mubr.msk.f32.vlgmr.msra.gmra.mxu1 %vm1507_vm3, %v13638_v30  ;;  %13647 = vmatmul.mubr.msk.f32.vlgmr.msra.gmra.mxu0 %vm1507_vm3, %v13644_v29  ;;  %v12978_v30 = vld [vmem:[%s18062_s24 + $0x170] sm:$0xff] }
0x10a4   : > { %14808 = vmatpush3.msk.msra.mxu1 %vm1511_vm0, %v12577_v32  ;;  %14809 = vmatprep.mubr.msk.f32.mxu1 %vm15024_vm14, %v15023_v20  ;;  %v12747_v38 = vsel %vm1053_vm11, %v12743_v35, %v12745_v37  ;;  %v12976_v32 = vld [vmem:[%s18062_s24 + $0x160] sm:$0xff] }
0x10a5   : > { %14812 = vmatprep.subr.mxu1 %v15023_v20  ;;  %13651 = vmatprep.subr.msk.mxu0 %vm1511_vm0, %v12747_v38  ;;  %v12973_v38 = vld [vmem:[%s18062_s24 + $0x148] sm:$0xff] }
0x10a6   : > { %12821 = vmatprep.mubr.f32.mxu0 %v15023_v20 }
0x10a7   : > { %v12741_v39 = vpop.permute.xlu1 %12740  ;;  %14810 = vmatmul.mubr.msk.f32.vlgmr.msra.gmra.mxu1 %vm1507_vm3, %v13644_v29  ;;  %v13003_v29 = vld [vmem:[%s18062_s24 + $0x238] sm:$0x3f] }
0x10a8   : > { %v12746_v40 = vsel %vm1053_vm11, %v12741_v39, %v12743_v35  ;;  %14813 = vmatpush3.msk.msra.mxu1 %vm1511_vm0, %v12745_v37  ;;  %14814 = vmatprep.mubr.msk.f32.mxu1 %vm15024_vm14, %v15023_v20  ;;  %v12974_v35 = vld [vmem:[%s18062_s24 + $0x150] sm:$0xff]  ;;  %v13001_v37 = vld [vmem:[%s18062_s24 + $0x228] sm:$0xff]  ;;  %v13000_v39 = vld [vmem:[%s18062_s24 + $0x220] sm:$0xff]  ;;  %vm13173_vm11 = vcmp.lt.s32.totalorder %v807_v2, 256 }
0x10a9   : > { %13652 = vmatpush1.msk.msra.mxu0 %vm1511_vm0, %v12746_v40  ;;  %13659 = vmatprep.subr.msk.mxu1 %vm1192_vm1, %v13003_v29  ;;  %v12972_v40 = vld [vmem:[%s18062_s24 + $0x140] sm:$0xff] }
0x10aa   : > { %13653 = vmatmul.mubr.msk.f32.vlgmr.msra.gmra.mxu0 %vm1507_vm3, %v13650_v10  ;;  %13013 = vmatprep.subr.mxu0 %v12963_v41  ;;  %v12998_v41 = vld [vmem:[%s18062_s24 + $0x210] sm:$0xff] }
0x10ab   : > { %14815 = vmatmul.mubr.msk.f32.vlgmr.msra.gmra.mxu1 %vm1507_vm3, %v13650_v10  ;;  %13014 = vmatpush1.msra.mxu0 %v12962_v43  ;;  %v12999_v10 = vld [vmem:[%s18062_s24 + $0x218] sm:$0xff] }
0x10ac   : > { %13148 = vmatprep.mubr.f32.mxu1 %v15023_v20  ;;  %13015 = vmatprep.subr.mxu0 %v12961_v44  ;;  %v12959_v20 = vld [vmem:[%s18062_s24 + $0xd8] sm:$0xff]  ;;  %v12997_v44 = vld [vmem:[%s18062_s24 + $0x208] sm:$0xff] }
0x10ad   : > { %13016 = vmatpush1.msra.mxu0 %v12960_v42  ;;  %13660 = vmatpush1.msk.msra.mxu1 %vm1192_vm1, %v13002_v34  ;;  %v12971_v43 = vld [vmem:[%s18062_s24 + $0x138] sm:$0xff]  ;;  %v12970_v42 = vld [vmem:[%s18062_s24 + $0x130] sm:$0xff]  ;;  %vm18189_vm1 = vcmask 244736  }
0x10ae   : > { %13017 = vmatprep.subr.mxu0 %v12959_v20  ;;  %13110 = vmatprep.subr.mxu1 %v13001_v37  ;;  %v12996_v20 = vld [vmem:[%s18062_s24 + $0x200] sm:$0xff] }
0x10af   : > { %13018 = vmatpush1.msra.mxu0 %v12958_v45  ;;  %13111 = vmatpush1.msra.mxu1 %v13000_v39  ;;  %v12969_v45 = vld [vmem:[%s18062_s24 + $0x128] sm:$0xff] }
0x10b0   : > { %13019 = vmatprep.subr.mxu0 %v12957_v46  ;;  %13112 = vmatprep.subr.mxu1 %v12999_v10  ;;  %v12968_v46 = vld [vmem:[%s18062_s24 + $0x120] sm:$0xff] }
0x10b1   : > { %13020 = vmatpush1.msra.mxu0 %v12956_v60  ;;  %13113 = vmatpush1.msra.mxu1 %v12998_v41  ;;  %v12967_v60 = vld [vmem:[%s18062_s24 + $0x118] sm:$0xff] }
0x10b2   : > { %13021 = vmatprep.subr.mxu0 %v12955_v47  ;;  %13114 = vmatprep.subr.mxu1 %v12997_v44  ;;  %v12966_v47 = vld [vmem:[%s18062_s24 + $0x110] sm:$0xff] }
0x10b3   : > { %13022 = vmatpush1.msra.mxu0 %v12954_v48  ;;  %13115 = vmatpush1.msra.mxu1 %v12996_v20  ;;  %v12965_v48 = vld [vmem:[%s18062_s24 + $0x108] sm:$0xff] }
0x10b4   : > { %13023 = vmatprep.subr.mxu0 %v12953_v49  ;;  %v12964_v49 = vld [vmem:[%s18062_s24 + $0x100] sm:$0xff] }
0x10b5   : > { %13024 = vmatpush1.msra.mxu0 %v12952_v50 }
0x10b6   : > { %13025 = vmatprep.subr.mxu0 %v12951_v51 }
0x10b7   : > { %13026 = vmatpush1.msra.mxu0 %v12950_v53 }
0x10b8   : > { %13027 = vmatprep.subr.mxu0 %v12949_v55 }
0x10b9   : > { %13028 = vmatpush1.msra.mxu0 %v12948_v54 }
0x10ba   : > { %13029 = vmatprep.subr.mxu0 %v12947_v57 }
0x10bb   : > { %13030 = vmatpush1.msra.mxu0 %v12946_v58 }
0x10bc   : > { %13031 = vmatprep.subr.mxu0 %v12945_v59 }
0x10bd   : > { %13032 = vmatpush1.msra.mxu0 %v12944_v61 }
0x10be   : > { %13033 = vmatprep.subr.mxu0 %v12943_v25 }
0x10bf   : > { %13034 = vmatpush1.msra.mxu0 %v12942_v62 }
0x10c0   : > { %13035 = vmatprep.subr.mxu0 %v12941_v63 }
0x10c1   : > { %13036 = vmatpush1.msra.mxu0 %v12940_v1 }
0x10c2   : > { %13037 = vmatprep.subr.mxu0 %v12939_v3 }
0x10c3   : > { %13038 = vmatpush1.msra.mxu0 %v12938_v5 }
0x10c4   : > { %13039 = vmatprep.subr.mxu0 %v12937_v8  ;;  %v11650_v50 = vpop.f32.mrf.mxu0 }
0x10c5   : > { %13040 = vmatpush1.msra.mxu0 %v12936_v0 }
0x10c6   : > { %13041 = vmatprep.subr.mxu0 %v12935_v4  ;;  %v11652_v55 = vpop.f32.mrf.mxu0 }
0x10c7   : > { %13042 = vmatpush1.msra.mxu0 %v12934_v9 }
0x10c8   : > { %13043 = vmatprep.subr.mxu0 %v12933_v6 }
0x10c9   : > { %13044 = vmatpush1.msra.mxu0 %v12932_v11 }
0x10ca   : > { %13045 = vmatprep.subr.mxu0 %v12995_v36 }
0x10cb   : > { %13046 = vmatpush2.msra.mxu0 %v12994_v7 }
0x10cc   : > { %13047 = vmatprep.subr.mxu0 %v12993_v12 }
0x10cd   : > { %13048 = vmatpush2.msra.mxu0 %v12992_v14 }
0x10ce   : > { %13049 = vmatprep.subr.mxu0 %v12991_v15 }
0x10cf   : > { %13050 = vmatpush2.msra.mxu0 %v12990_v16 }
0x10d0   : > { %13051 = vmatprep.subr.mxu0 %v12989_v17 }
0x10d1   : > { %13052 = vmatpush2.msra.mxu0 %v12988_v18 }
0x10d2   : > { %13053 = vmatprep.subr.mxu0 %v12987_v19 }
0x10d3   : > { %13054 = vmatpush2.msra.mxu0 %v12986_v56 }
0x10d4   : > { %13055 = vmatprep.subr.mxu0 %v12985_v21 }
0x10d5   : > { %13056 = vmatpush2.msra.mxu0 %v12984_v22 }
0x10d6   : > { %13057 = vmatprep.subr.mxu0 %v12983_v24 }
0x10d7   : > { %13058 = vmatpush2.msra.mxu0 %v12982_v27 }
0x10d8   : > { %13059 = vmatprep.subr.mxu0 %v12981_v23 }
0x10d9   : > { %13060 = vmatpush2.msra.mxu0 %v12980_v28 }
0x10da   : > { %13061 = vmatprep.subr.mxu0 %v12979_v26 }
0x10db   : > { %13062 = vmatpush2.msra.mxu0 %v12978_v30 }
0x10dc   : > { %13063 = vmatprep.subr.mxu0 %v12977_v31 }
0x10dd   : > { %13064 = vmatpush2.msra.mxu0 %v12976_v32 }
0x10de   : > { %13065 = vmatprep.subr.mxu0 %v12975_v33 }
0x10df   : > { %13066 = vmatpush2.msra.mxu0 %v12974_v35 }
0x10e0   : > { %13067 = vmatprep.subr.mxu0 %v12973_v38  ;;  %v12905_v38 = vpop.permute.xlu0 %12904 }
0x10e1   : > { %13068 = vmatpush2.msra.mxu0 %v12972_v40  ;;  %v12910_v20 = vrot.slane %v12905_v38, %v822_v52 }
0x10e2   : > { %13069 = vmatprep.subr.mxu0 %v12971_v43 }
0x10e3   : > { %13070 = vmatpush2.msra.mxu0 %v12970_v42 }
0x10e4   : > { %13071 = vmatprep.subr.mxu0 %v12969_v45 }
0x10e5   : > { %13072 = vmatpush2.msra.mxu0 %v12968_v46 }
0x10e6   : > { %13073 = vmatprep.subr.mxu0 %v12967_v60 }
0x10e7   : > { %13074 = vmatpush2.msra.mxu0 %v12966_v47 }
0x10e8   : > { %13075 = vmatprep.subr.mxu0 %v12965_v48 }
0x10e9   : > { %13076 = vmatpush2.msra.mxu0 %v12964_v49 }
0x1147   : > { %v11500_v51 = vpop.f32.mrf.mxu1 }
0x1148   : > { %v11651_v9 = vadd.f32 %v11650_v50, %v11500_v51 }
0x1149   : > { %v11502_v53 = vpop.f32.mrf.mxu1 }
0x114a   : > { %v11653_v14 = vadd.f32 %v11652_v55, %v11502_v53 }
0x114b   : > { %v11571_v54 = vpop.f32.mrf.mxu1  ;;  %v11815_v58 = vpop.f32.mrf.mxu0 }
0x114c   : > { %v11890_v15 = vadd.f32 %v11815_v58, %v11651_v9 }
0x114d   : > { %v14776_v57 = vpop.f32.mrf.mxu1  ;;  %v11817_v25 = vpop.f32.mrf.mxu0 }
0x114e   : > { %v11891_v19 = vadd.f32 %v11817_v25, %v11653_v14 }
0x114f   : > { %v11721_v59 = vpop.f32.mrf.mxu1 }
0x1150   : > { %v11722_v12 = vadd.f32 %v11721_v59, %v11571_v54 }
0x1151   : > { %v14781_v61 = vpop.f32.mrf.mxu1 }
0x1153   : > { %v11886_v62 = vpop.f32.mrf.mxu1  ;;  %v11983_v63 = vpop.f32.mrf.mxu0 }
0x1154   : > { %v11892_v18 = vadd.f32 %v11886_v62, %v11722_v12  ;;  %v12058_v56 = vadd.f32 %v11983_v63, %v11890_v15 }
0x1155   : > { %v14786_v1 = vpop.f32.mrf.mxu1  ;;  %v11985_v3 = vpop.f32.mrf.mxu0 }
0x1156   : > { %v12059_v27 = vadd.f32 %v11985_v3, %v11891_v19 }
0x1157   : > { %v12054_v5 = vpop.f32.mrf.mxu1  ;;  %v12151_v8 = vpop.f32.mrf.mxu0 }
0x1158   : > { %v12060_v24 = vadd.f32 %v12054_v5, %v11892_v18  ;;  %v12226_v23 = vadd.f32 %v12151_v8, %v12058_v56  ;;  %v15053_v8 = vmov 1966171168  }
0x1159   : > { %v14791_v0 = vpop.f32.mrf.mxu1  ;;  %v12153_v4 = vpop.f32.mrf.mxu0 }
0x115a   : > { %v12227_v31 = vadd.f32 %v12153_v4, %v12059_v27  ;;  %v13159_v0 = vunpack.c.l.s4 %v15053_v8 }
0x115b   : > { %v12222_v6 = vpop.f32.mrf.mxu1  ;;  %v12319_v11 = vpop.f32.mrf.mxu0 }
0x115c   : > { %v12228_v26 = vadd.f32 %v12222_v6, %v12060_v24  ;;  %v12394_v32 = vadd.f32 %v12319_v11, %v12226_v23  ;;  %v13160_v9 = vunpack.c.0.s8 %v13159_v0 }
0x115d   : > { %v14796_v36 = vpop.f32.mrf.mxu1  ;;  %v12321_v7 = vpop.f32.mrf.mxu0 }
0x115e   : > { %v12395_v34 = vadd.f32 %v12321_v7, %v12227_v31  ;;  %v13163_v14 = vsub.s32 %v13160_v9, %v15290_v13 }
0x115f   : > { %v12390_v16 = vpop.f32.mrf.mxu1  ;;  %v12487_v17 = vpop.f32.mrf.mxu0 }
0x1160   : > { %v12396_v29 = vadd.f32 %v12390_v16, %v12228_v26  ;;  %v12562_v35 = vadd.f32 %v12487_v17, %v12394_v32 }
0x1161   : > { %v14801_v21 = vpop.f32.mrf.mxu1  ;;  %v12489_v22 = vpop.f32.mrf.mxu0 }
0x1162   : > { %v12563_v40 = vadd.f32 %v12489_v22, %v12395_v34 }
0x1163   : > { %v12558_v28 = vpop.f32.mrf.mxu1  ;;  %v12655_v30 = vpop.f32.mrf.mxu0 }
0x1164   : > { %v12564_v39 = vadd.f32 %v12558_v28, %v12396_v29  ;;  %v12730_v41 = vadd.f32 %v12655_v30, %v12562_v35 }
0x1165   : > { %v14806_v33 = vpop.f32.mrf.mxu1  ;;  %v12657_v10 = vpop.f32.mrf.mxu0 }
0x1166   : > { %v12731_v45 = vadd.f32 %v12657_v10, %v12563_v40 }
0x1167   : > { %v12726_v37 = vpop.f32.mrf.mxu1 }
0x1168   : > { %v12732_v44 = vadd.f32 %v12726_v37, %v12564_v39 }
0x1169   : > { %v14811_v43 = vpop.f32.mrf.mxu1 }
0x116a   : > { %v12823_v42 = vpop.f32.mrf.mxu0 }
0x116b   : > { %v12898_v46 = vadd.f32 %v12823_v42, %v12730_v41  ;;  %v12894_v60 = vpop.f32.mrf.mxu1 }
0x116c   : > { %v12900_v47 = vadd.f32 %v12894_v60, %v12732_v44  ;;  %v12825_v48 = vpop.f32.mrf.mxu0 }
0x116d   : > { %v12911_v49 = vadd.f32 %v12910_v20, %v12898_v46  ;;  %v12899_v50 = vadd.f32 %v12825_v48, %v12731_v45  ;;  %v14816_v51 = vpop.f32.mrf.mxu1 }
0x116e   : > { %v12913_v53 = vadd.f32 %v12910_v20, %v12900_v47 }
0x116f   : > { %v13656_v55 = vmul.f32 -1.442695, %v12911_v49  ;;  %v12912_v54 = vadd.f32 %v12910_v20, %v12899_v50 }
0x1170   : > { %v13658_v57 = vmul.f32 -1.442695, %v12913_v53 }
0x1171   : > { %14901 = vpow2.f32 %v13656_v55  ;;  %v13657_v58 = vmul.f32 -1.442695, %v12912_v54 }
0x1172   : > { %14903 = vpow2.f32 %v13658_v57 }
0x1173   : > { %14905 = vpow2.f32 %v13657_v58 }
0x117e   : > { %v14902_v59 = vpop.eup %14901 }
0x117f   : > { %v14904_v61 = vpop.eup %14903  ;;  %v12923_v52 = vadd.f32 1.0, %v14902_v59 }
0x1180   : > { %v14906_v25 = vpop.eup %14905  ;;  %v12925_v62 = vadd.f32 1.0, %v14904_v61 }
0x1181   : > { %v12924_v63 = vadd.f32 1.0, %v14906_v25 }
0x1182   : > { %14907 = vrcp.f32 %v12925_v62 }
0x1183   : > { %14909 = vrcp.f32 %v12924_v63 }
0x1184   : > { %14911 = vrcp.f32 %v12923_v52 }
0x118f   : > { %v14908_v1 = vpop.eup %14907 }
0x1190   : > { %v14910_v3 = vpop.eup %14909  ;;  %13661 = vmatmul.mubr.msk.f32.vlgmr.msra.gmra.mxu1 %vm18189_vm1, %v14908_v1 }
0x1191   : > { %v14912_v5 = vpop.eup %14911  ;;  %13077 = vmatprep.mubr.f32.mxu0 %v14910_v3 }
0x1192   : > { %13078 = vmatmul.mubr.f32.vlgmr.msra.gmra.mxu0 %v14912_v5 }
0x1250   : > { %v13150_v4 = vpop.f32.mrf.mxu1 }
0x1252   : > { %v13079_v6 = vpop.f32.mrf.mxu0  ;;  %v13152_v11 = vpop.f32.mrf.mxu1 }
0x1253   : > { %v13151_v7 = vadd.f32 %v13150_v4, %v13079_v6 }
0x1254   : > { %v13081_v36 = vpop.f32.mrf.mxu0 }
0x1255   : > { %v13153_v12 = vadd.f32 %v13152_v11, %v13081_v36 }
0x1257   : > { %v13157_v15 = vcombine.low %v13151_v7, %v13153_v12 }
0x1259   : > { %v13164_v16 = vrot.slane %v13157_v15, %v13163_v14 }
0x125b   : > { %v13171_v17 = vrot.slane %v13164_v16, %v13163_v14 }
0x125d   : > { %13175 = vst.msk [vmem:[%s805_s12] sm:$0x3] %vm13173_vm11, %v13171_v17 }
0x125e PF: > { %s39_s6 = sadd.s32 1, %s15007_s6  }
0x125f   : > { %p36_p2 = scmp.ge.s32.totalorder %s39_s6, 4  }
0x1261   :  { %38 = sbr.rel (!%p36_p2) target bundleno = 22 (0x16), region = 248 }
0x1266   :  { %13195 = vsyncpa [#allocation12], 1 }
0x1267   :  { %13197 = vsyncpa [#allocation12 + $0x1], 1 }
0x1268   :  { %13198 = vsyncpa [#allocation14], 1 }

</bundles_post_ra>
